<compile_context>
chip_gen: v7x
topology: tpu7x:2x2x1
jax: 0.10.0
libtpu: 0.0.40
codegen_flags: <defaults>
</compile_context>

<pallas_src>
import jax
import jax.numpy as jnp
from jax import lax
from jax.experimental import pallas as pl
from jax.experimental.pallas import tpu as pltpu

EPS = 1e-5


def fused_bn_relu_conv(x_nchw, params, *, c1_chunks=3):
    N, C1, H, W = x_nchw.shape
    if N != 1:
        # TODO(synk): generalize the channel-first fused path to batch > 1
        # (needs an NCHW -> (C, N*Hp*Wp) transpose; the source module uses N=1).
        raise NotImplementedError("kernel is specialized for batch = 1")

    C2 = params["w1"].shape[0]            # 192
    C3 = params["w2"].shape[0]            # 48
    Hp, Wp = H + 2, W + 2                 # zero-padded spatial grid (16 x 16)
    PP = Hp * Wp                          # padded position axis (256 = 2 lane tiles)
    P = H * W                             # number of valid pixels (196)

    assert Wp & (Wp - 1) == 0, "padded width must be a power of two (iota mask)"
    wp_bits = Wp.bit_length() - 1
    assert C1 % c1_chunks == 0
    TC1 = C1 // c1_chunks                 # 384
    assert TC1 % 128 == 0 and C2 % 8 == 0 and C3 % 8 == 0

    # ---- host/XLA-side layout plumbing (cheap, one-time) ---------------------
    # NCHW (N=1) -> zero-padded channel-first (C1, 16*16).
    x_pad = jnp.pad(x_nchw.reshape(C1, H, W).astype(jnp.float32),
                    ((0, 0), (1, 1), (1, 1))).reshape(C1, PP)
    gb1 = jnp.stack([params["gamma1"], params["beta1"]], axis=1).astype(jnp.float32)  # (C1, 2)
    gb2 = jnp.stack([params["gamma2"], params["beta2"]], axis=1).astype(jnp.float32)  # (C2, 2)
    w1 = params["w1"].reshape(C2, C1).astype(jnp.float32)                             # 1x1 conv
    # OIHW -> (co, kh, kw, ci) -> (48, 9*192); column block t = kh*3 + kw.
    w2col = jnp.transpose(params["w2"], (0, 2, 3, 1)).reshape(C3, 9 * C2).astype(jnp.float32)

    # Flattened padded-grid offset of tap (kh, kw); roll wrap only hits the pad ring.
    shifts = tuple((kh - 1) * Wp + (kw - 1) for kh in range(3) for kw in range(3))
    inv_p = 1.0 / P

    def kernel(x_ref, gb1_ref, w1_ref, gb2_ref, w2_ref, o_ref, y1_ref, col_ref):
        i = pl.program_id(0)
        nsteps = pl.num_programs(0)

        # Interior-pixel mask (1 on the real 14x14 image, 0 on the zero-pad ring).
        pos = lax.broadcasted_iota(jnp.int32, (1, PP), 1)
        hh = jnp.right_shift(pos, wp_bits)
        ww = jnp.bitwise_and(pos, Wp - 1)
        valid = (hh >= 1) & (hh <= H) & (ww >= 1) & (ww <= W)
        mask = jnp.where(valid, 1.0, 0.0).astype(jnp.float32)       # (1, PP)

        # ---- stage 1: BN1 (per-channel batch stats) + ReLU on this C1 chunk ----
        xv = x_ref[...]                                             # (TC1, PP)
        mu1 = jnp.sum(xv, axis=1, keepdims=True) * inv_p            # pads are zero
        ex1 = jnp.sum(xv * xv, axis=1, keepdims=True) * inv_p
        var1 = ex1 - mu1 * mu1                                      # biased variance
        sc1 = gb1_ref[:, 0:1] * lax.rsqrt(var1 + EPS)
        sh1 = gb1_ref[:, 1:2] - mu1 * sc1
        a1 = jnp.maximum(xv * sc1 + sh1, 0.0) * mask                # re-zero pad ring

        # ---- 1x1 conv partial product, accumulated across C1 chunks ------------
        part = jnp.dot(w1_ref[...], a1, preferred_element_type=jnp.float32)  # (C2, PP)

        @pl.when(i == 0)
        def _():
            y1_ref[...] = part

        @pl.when(i > 0)
        def _():
            y1_ref[...] = y1_ref[...] + part

        # ---- last chunk: BN2 + ReLU + 3x3 conv as a single im2col matmul -------
        @pl.when(i == nsteps - 1)
        def _():
            y1 = y1_ref[...]                                        # (C2, PP), pads = 0
            mu2 = jnp.sum(y1, axis=1, keepdims=True) * inv_p
            ex2 = jnp.sum(y1 * y1, axis=1, keepdims=True) * inv_p
            var2 = ex2 - mu2 * mu2
            sc2 = gb2_ref[:, 0:1] * lax.rsqrt(var2 + EPS)
            sh2 = gb2_ref[:, 1:2] - mu2 * sc2
            a2 = jnp.maximum(y1 * sc2 + sh2, 0.0) * mask            # (C2, PP), pads = 0

            # im2col: 9 lane-rotated copies of a2 (XLU); circular wrap only lands
            # on pad-ring output positions, which the wrapper slices away.
            for t, s in enumerate(shifts):
                slab = a2 if s == 0 else pltpu.roll(a2, shift=(-s) % PP, axis=1)
                col_ref[t * C2:(t + 1) * C2, :] = slab

            # One (48, 1728) @ (1728, 256) MXU matmul, lane-dense output store.
            o_ref[...] = jnp.dot(w2_ref[...], col_ref[...],
                                 preferred_element_type=jnp.float32)

    out_pad = pl.pallas_call(
        kernel,
        out_shape=jax.ShapeDtypeStruct((C3, PP), jnp.float32),
        grid=(c1_chunks,),
        in_specs=[
            pl.BlockSpec((TC1, PP), lambda i: (i, 0)),      # x chunk (pipelined)
            pl.BlockSpec((TC1, 2), lambda i: (i, 0)),       # gamma1/beta1 chunk
            pl.BlockSpec((C2, TC1), lambda i: (0, i)),      # w1 chunk (pipelined)
            pl.BlockSpec((C2, 2), lambda i: (0, 0)),        # gamma2/beta2
            pl.BlockSpec((C3, 9 * C2), lambda i: (0, 0)),   # w2 im2col weights
        ],
        out_specs=pl.BlockSpec((C3, PP), lambda i: (0, 0)),
        scratch_shapes=[
            pltpu.VMEM((C2, PP), jnp.float32),              # y1 accumulator
            pltpu.VMEM((9 * C2, PP), jnp.float32),          # im2col buffer
        ],
        compiler_params=pltpu.CompilerParams(
            dimension_semantics=("arbitrary",),
            vmem_limit_bytes=32 * 1024 * 1024,
        ),
    )(x_pad, gb1, w1, gb2, w2col)

    # Drop the pad ring and restore NCHW.
    out = out_pad.reshape(C3, Hp, Wp)[:, 1:1 + H, 1:1 + W]
    return out.reshape(N, C3, H, W)


def forward(x_nchw, p):
    return fused_bn_relu_conv(x_nchw, p)


# ---------------------------------------------------------------------------
# Pure-JAX reference (training-mode BN, biased variance) for correctness.
# ---------------------------------------------------------------------------
def ref_forward(x, p):
    def bn_train(z, g, b):
        m = z.mean(axis=(0, 2, 3), keepdims=True)
        v = z.var(axis=(0, 2, 3), keepdims=True)
        return (z - m) / jnp.sqrt(v + EPS) * g[None, :, None, None] \
            + b[None, :, None, None]

    y = jnp.maximum(bn_train(x, p["gamma1"], p["beta1"]), 0.0)
    y = lax.conv_general_dilated(y, p["w1"], (1, 1), "VALID",
                                 dimension_numbers=("NCHW", "OIHW", "NCHW"))
    y = jnp.maximum(bn_train(y, p["gamma2"], p["beta2"]), 0.0)
    y = lax.conv_general_dilated(y, p["w2"], (1, 1), ((1, 1), (1, 1)),
                                 dimension_numbers=("NCHW", "OIHW", "NCHW"))
    return y


if __name__ == "__main__":
    key = jax.random.PRNGKey(0)
    kx, k1, k2, k3, k4, k5, k6 = jax.random.split(key, 7)

    N, C1, H, W = 1, 1152, 14, 14
    C2, C3 = 192, 48

    x = jax.random.normal(kx, (N, C1, H, W), dtype=jnp.float32)

    params = {
        "gamma1": jax.random.uniform(k1, (C1,), jnp.float32, 0.5, 1.5),
        "beta1":  jax.random.normal(k2, (C1,), jnp.float32) * 0.1,
        "w1":     jax.random.normal(k3, (C2, C1, 1, 1), jnp.float32) * 0.02,
        "gamma2": jax.random.uniform(k4, (C2,), jnp.float32, 0.5, 1.5),
        "beta2":  jax.random.normal(k5, (C2,), jnp.float32) * 0.1,
        "w2":     jax.random.normal(k6, (C3, C2, 3, 3), jnp.float32) * 0.05,
    }

    out = jax.block_until_ready(jax.jit(forward)(x, params))
    ref = jax.block_until_ready(jax.jit(ref_forward)(x, params))

    assert out.shape == (N, C3, H, W), out.shape
    assert jnp.allclose(out, ref, rtol=1e-3, atol=1e-3), \
        float(jnp.max(jnp.abs(out - ref)))

    print("KERNEL_OK")
</pallas_src>

<mosaic_0001>
module attributes {stable_mosaic.version = 11 : i64} {
  func.func @kernel(%arg0: i32, %arg1: memref<384x256xf32, #tpu.memory_space<vmem>>, %arg2: memref<384x2xf32, #tpu.memory_space<vmem>>, %arg3: memref<192x384xf32, #tpu.memory_space<vmem>>, %arg4: memref<192x2xf32, #tpu.memory_space<vmem>>, %arg5: memref<48x1728xf32, #tpu.memory_space<vmem>>, %arg6: memref<48x256xf32, #tpu.memory_space<vmem>>, %arg7: memref<192x256xf32, #tpu.memory_space<vmem>>, %arg8: memref<1728x256xf32, #tpu.memory_space<vmem>>) attributes {dimension_semantics = [#tpu.dimension_semantics<arbitrary>], iteration_bounds = array<i64: 3>, scalar_prefetch = 0 : i64, scratch_operands = 2 : i64, tpu.core_type = #tpu.core_type<tc>, window_params = [{transform_indices = @transform_0, window_bounds = array<i64: 384, 256>}, {transform_indices = @transform_1, window_bounds = array<i64: 384, 2>}, {transform_indices = @transform_2, window_bounds = array<i64: 192, 384>}, {pipeline_mode = #tpu.pipeline_mode<synchronous>, transform_indices = @transform_3, window_bounds = array<i64: 192, 2>}, {pipeline_mode = #tpu.pipeline_mode<synchronous>, transform_indices = @transform_4, window_bounds = array<i64: 48, 1728>}, {pipeline_mode = #tpu.pipeline_mode<synchronous>, transform_indices = @transform_5, window_bounds = array<i64: 48, 256>}]} {
    %0 = tpu.iota {dimensions = array<i32: 1>} : vector<1x256xi32>
    %c4_i32 = arith.constant 4 : i32
    %1 = vector.broadcast %c4_i32 : i32 to vector<1x256xi32>
    %2 = arith.shrsi %0, %1 : vector<1x256xi32>
    %c15_i32 = arith.constant 15 : i32
    %3 = vector.broadcast %c15_i32 : i32 to vector<1x256xi32>
    %4 = arith.andi %0, %3 : vector<1x256xi32>
    %c1_i32 = arith.constant 1 : i32
    %5 = vector.broadcast %c1_i32 : i32 to vector<1x256xi32>
    %6 = arith.cmpi sge, %2, %5 : vector<1x256xi32>
    %c14_i32 = arith.constant 14 : i32
    %7 = vector.broadcast %c14_i32 : i32 to vector<1x256xi32>
    %8 = arith.cmpi sle, %2, %7 : vector<1x256xi32>
    %9 = arith.andi %6, %8 : vector<1x256xi1>
    %c1_i32_0 = arith.constant 1 : i32
    %10 = vector.broadcast %c1_i32_0 : i32 to vector<1x256xi32>
    %11 = arith.cmpi sge, %4, %10 : vector<1x256xi32>
    %12 = arith.andi %9, %11 : vector<1x256xi1>
    %c14_i32_1 = arith.constant 14 : i32
    %13 = vector.broadcast %c14_i32_1 : i32 to vector<1x256xi32>
    %14 = arith.cmpi sle, %4, %13 : vector<1x256xi32>
    %15 = arith.andi %12, %14 : vector<1x256xi1>
    %cst = arith.constant 1.000000e+00 : f32
    %cst_2 = arith.constant 0.000000e+00 : f32
    %16 = vector.broadcast %cst : f32 to vector<1x256xf32>
    %17 = vector.broadcast %cst_2 : f32 to vector<1x256xf32>
    %18 = arith.select %15, %16, %17 : vector<1x256xi1>, vector<1x256xf32>
    %c0 = arith.constant 0 : index
    %c0_3 = arith.constant 0 : index
    %19 = vector.load %arg1[%c0, %c0_3] : memref<384x256xf32, #tpu.memory_space<vmem>>, vector<384x256xf32>
    %cst_4 = arith.constant dense<0.000000e+00> : vector<384xf32>
    %20 = vector.multi_reduction <add>, %19, %cst_4 [1] : vector<384x256xf32> to vector<384xf32>
    %21 = vector.shape_cast %20 : vector<384xf32> to vector<384x1xf32>
    %cst_5 = arith.constant 0.00510204071 : f32
    %22 = vector.broadcast %cst_5 : f32 to vector<384x1xf32>
    %23 = arith.mulf %21, %22 : vector<384x1xf32>
    %24 = arith.mulf %19, %19 : vector<384x256xf32>
    %cst_6 = arith.constant dense<0.000000e+00> : vector<384xf32>
    %25 = vector.multi_reduction <add>, %24, %cst_6 [1] : vector<384x256xf32> to vector<384xf32>
    %26 = vector.shape_cast %25 : vector<384xf32> to vector<384x1xf32>
    %cst_7 = arith.constant 0.00510204071 : f32
    %27 = vector.broadcast %cst_7 : f32 to vector<384x1xf32>
    %28 = arith.mulf %26, %27 : vector<384x1xf32>
    %29 = arith.mulf %23, %23 : vector<384x1xf32>
    %30 = arith.subf %28, %29 : vector<384x1xf32>
    %c0_8 = arith.constant 0 : index
    %c0_9 = arith.constant 0 : index
    %31 = vector.load %arg2[%c0_8, %c0_9] : memref<384x2xf32, #tpu.memory_space<vmem>>, vector<384x1xf32>
    %cst_10 = arith.constant 9.99999974E-6 : f32
    %32 = vector.broadcast %cst_10 : f32 to vector<384x1xf32>
    %33 = arith.addf %30, %32 : vector<384x1xf32>
    %34 = math.rsqrt %33 : vector<384x1xf32>
    %35 = arith.mulf %31, %34 : vector<384x1xf32>
    %c0_11 = arith.constant 0 : index
    %c1 = arith.constant 1 : index
    %36 = vector.load %arg2[%c0_11, %c1] : memref<384x2xf32, #tpu.memory_space<vmem>>, vector<384x1xf32>
    %37 = arith.mulf %23, %35 : vector<384x1xf32>
    %38 = arith.subf %36, %37 : vector<384x1xf32>
    %39 = vector.broadcast %35 : vector<384x1xf32> to vector<384x256xf32>
    %40 = arith.mulf %19, %39 : vector<384x256xf32>
    %41 = vector.broadcast %38 : vector<384x1xf32> to vector<384x256xf32>
    %42 = arith.addf %40, %41 : vector<384x256xf32>
    %cst_12 = arith.constant 0.000000e+00 : f32
    %43 = vector.broadcast %cst_12 : f32 to vector<384x256xf32>
    %44 = arith.maximumf %42, %43 : vector<384x256xf32>
    %45 = vector.broadcast %18 : vector<1x256xf32> to vector<384x256xf32>
    %46 = arith.mulf %44, %45 : vector<384x256xf32>
    %c0_13 = arith.constant 0 : index
    %c0_14 = arith.constant 0 : index
    %47 = vector.load %arg3[%c0_13, %c0_14] : memref<192x384xf32, #tpu.memory_space<vmem>>, vector<192x384xf32>
    %cst_15 = arith.constant dense<0.000000e+00> : vector<192x256xf32>
    %48 = tpu.matmul %47, %46, %cst_15 {dimension_numbers = #tpu.dot_dimension_numbers<[1], [0], [0], [1], [0, 0, 1, 1], [], []>} : vector<192x384xf32>, vector<384x256xf32>, vector<192x256xf32> -> vector<192x256xf32>
    %c0_i32 = arith.constant 0 : i32
    %49 = arith.cmpi eq, %arg0, %c0_i32 : i32
    %50 = arith.extui %49 : i1 to i32
    %c0_i32_16 = arith.constant 0 : i32
    %51 = arith.cmpi ne, %50, %c0_i32_16 : i32
    scf.if %51 {
      %c0_20 = arith.constant 0 : index
      %c0_21 = arith.constant 0 : index
      %58 = vector.load %arg7[%c0_20, %c0_21] : memref<192x256xf32, #tpu.memory_space<vmem>>, vector<192x256xf32>
      tpu.vector_store %arg7[%c0_20, %c0_21], %48 {strides = array<i32>} : memref<192x256xf32, #tpu.memory_space<vmem>>, vector<192x256xf32>,
    } else {
    }
    %c0_i32_17 = arith.constant 0 : i32
    %52 = arith.cmpi sgt, %arg0, %c0_i32_17 : i32
    %53 = arith.extui %52 : i1 to i32
    %c0_i32_18 = arith.constant 0 : i32
    %54 = arith.cmpi ne, %53, %c0_i32_18 : i32
    scf.if %54 {
      %c0_20 = arith.constant 0 : index
      %c0_21 = arith.constant 0 : index
      %58 = vector.load %arg7[%c0_20, %c0_21] : memref<192x256xf32, #tpu.memory_space<vmem>>, vector<192x256xf32>
      %59 = arith.addf %58, %48 : vector<192x256xf32>
      %c0_22 = arith.constant 0 : index
      %c0_23 = arith.constant 0 : index
      %60 = vector.load %arg7[%c0_22, %c0_23] : memref<192x256xf32, #tpu.memory_space<vmem>>, vector<192x256xf32>
      tpu.vector_store %arg7[%c0_22, %c0_23], %59 {strides = array<i32>} : memref<192x256xf32, #tpu.memory_space<vmem>>, vector<192x256xf32>,
    } else {
    }
    %c2_i32 = arith.constant 2 : i32
    %55 = arith.cmpi eq, %arg0, %c2_i32 : i32
    %56 = arith.extui %55 : i1 to i32
    %c0_i32_19 = arith.constant 0 : i32
    %57 = arith.cmpi ne, %56, %c0_i32_19 : i32
    scf.if %57 {
      %c0_20 = arith.constant 0 : index
      %c0_21 = arith.constant 0 : index
      %58 = vector.load %arg7[%c0_20, %c0_21] : memref<192x256xf32, #tpu.memory_space<vmem>>, vector<192x256xf32>
      %cst_22 = arith.constant dense<0.000000e+00> : vector<192xf32>
      %59 = vector.multi_reduction <add>, %58, %cst_22 [1] : vector<192x256xf32> to vector<192xf32>
      %60 = vector.shape_cast %59 : vector<192xf32> to vector<192x1xf32>
      %cst_23 = arith.constant 0.00510204071 : f32
      %61 = vector.broadcast %cst_23 : f32 to vector<192x1xf32>
      %62 = arith.mulf %60, %61 : vector<192x1xf32>
      %63 = arith.mulf %58, %58 : vector<192x256xf32>
      %cst_24 = arith.constant dense<0.000000e+00> : vector<192xf32>
      %64 = vector.multi_reduction <add>, %63, %cst_24 [1] : vector<192x256xf32> to vector<192xf32>
      %65 = vector.shape_cast %64 : vector<192xf32> to vector<192x1xf32>
      %cst_25 = arith.constant 0.00510204071 : f32
      %66 = vector.broadcast %cst_25 : f32 to vector<192x1xf32>
      %67 = arith.mulf %65, %66 : vector<192x1xf32>
      %68 = arith.mulf %62, %62 : vector<192x1xf32>
      %69 = arith.subf %67, %68 : vector<192x1xf32>
      %c0_26 = arith.constant 0 : index
      %c0_27 = arith.constant 0 : index
      %70 = vector.load %arg4[%c0_26, %c0_27] : memref<192x2xf32, #tpu.memory_space<vmem>>, vector<192x1xf32>
      %cst_28 = arith.constant 9.99999974E-6 : f32
      %71 = vector.broadcast %cst_28 : f32 to vector<192x1xf32>
      %72 = arith.addf %69, %71 : vector<192x1xf32>
      %73 = math.rsqrt %72 : vector<192x1xf32>
      %74 = arith.mulf %70, %73 : vector<192x1xf32>
      %c0_29 = arith.constant 0 : index
      %c1_30 = arith.constant 1 : index
      %75 = vector.load %arg4[%c0_29, %c1_30] : memref<192x2xf32, #tpu.memory_space<vmem>>, vector<192x1xf32>
      %76 = arith.mulf %62, %74 : vector<192x1xf32>
      %77 = arith.subf %75, %76 : vector<192x1xf32>
      %78 = vector.broadcast %74 : vector<192x1xf32> to vector<192x256xf32>
      %79 = arith.mulf %58, %78 : vector<192x256xf32>
      %80 = vector.broadcast %77 : vector<192x1xf32> to vector<192x256xf32>
      %81 = arith.addf %79, %80 : vector<192x256xf32>
      %cst_31 = arith.constant 0.000000e+00 : f32
      %82 = vector.broadcast %cst_31 : f32 to vector<192x256xf32>
      %83 = arith.maximumf %81, %82 : vector<192x256xf32>
      %84 = vector.broadcast %18 : vector<1x256xf32> to vector<192x256xf32>
      %85 = arith.mulf %83, %84 : vector<192x256xf32>
      %c17_i32 = arith.constant 17 : i32
      %86 = tpu.dynamic_rotate %85 by %c17_i32 dim 1 : vector<192x256xf32>, i32 -> vector<192x256xf32>
      %c0_32 = arith.constant 0 : index
      %c0_33 = arith.constant 0 : index
      %87 = vector.load %arg8[%c0_32, %c0_33] : memref<1728x256xf32, #tpu.memory_space<vmem>>, vector<192x256xf32>
      tpu.vector_store %arg8[%c0_32, %c0_33], %86 {strides = array<i32>} : memref<1728x256xf32, #tpu.memory_space<vmem>>, vector<192x256xf32>,
      %c16_i32 = arith.constant 16 : i32
      %88 = tpu.dynamic_rotate %85 by %c16_i32 dim 1 : vector<192x256xf32>, i32 -> vector<192x256xf32>
      %c192 = arith.constant 192 : index
      %c0_34 = arith.constant 0 : index
      %89 = vector.load %arg8[%c192, %c0_34] : memref<1728x256xf32, #tpu.memory_space<vmem>>, vector<192x256xf32>
      tpu.vector_store %arg8[%c192, %c0_34], %88 {strides = array<i32>} : memref<1728x256xf32, #tpu.memory_space<vmem>>, vector<192x256xf32>,
      %c15_i32_35 = arith.constant 15 : i32
      %90 = tpu.dynamic_rotate %85 by %c15_i32_35 dim 1 : vector<192x256xf32>, i32 -> vector<192x256xf32>
      %c384 = arith.constant 384 : index
      %c0_36 = arith.constant 0 : index
      %91 = vector.load %arg8[%c384, %c0_36] : memref<1728x256xf32, #tpu.memory_space<vmem>>, vector<192x256xf32>
      tpu.vector_store %arg8[%c384, %c0_36], %90 {strides = array<i32>} : memref<1728x256xf32, #tpu.memory_space<vmem>>, vector<192x256xf32>,
      %c1_i32_37 = arith.constant 1 : i32
      %92 = tpu.dynamic_rotate %85 by %c1_i32_37 dim 1 : vector<192x256xf32>, i32 -> vector<192x256xf32>
      %c576 = arith.constant 576 : index
      %c0_38 = arith.constant 0 : index
      %93 = vector.load %arg8[%c576, %c0_38] : memref<1728x256xf32, #tpu.memory_space<vmem>>, vector<192x256xf32>
      tpu.vector_store %arg8[%c576, %c0_38], %92 {strides = array<i32>} : memref<1728x256xf32, #tpu.memory_space<vmem>>, vector<192x256xf32>,
      %c768 = arith.constant 768 : index
      %c0_39 = arith.constant 0 : index
      %94 = vector.load %arg8[%c768, %c0_39] : memref<1728x256xf32, #tpu.memory_space<vmem>>, vector<192x256xf32>
      tpu.vector_store %arg8[%c768, %c0_39], %85 {strides = array<i32>} : memref<1728x256xf32, #tpu.memory_space<vmem>>, vector<192x256xf32>,
      %c255_i32 = arith.constant 255 : i32
      %95 = tpu.dynamic_rotate %85 by %c255_i32 dim 1 : vector<192x256xf32>, i32 -> vector<192x256xf32>
      %c960 = arith.constant 960 : index
      %c0_40 = arith.constant 0 : index
      %96 = vector.load %arg8[%c960, %c0_40] : memref<1728x256xf32, #tpu.memory_space<vmem>>, vector<192x256xf32>
      tpu.vector_store %arg8[%c960, %c0_40], %95 {strides = array<i32>} : memref<1728x256xf32, #tpu.memory_space<vmem>>, vector<192x256xf32>,
      %c241_i32 = arith.constant 241 : i32
      %97 = tpu.dynamic_rotate %85 by %c241_i32 dim 1 : vector<192x256xf32>, i32 -> vector<192x256xf32>
      %c1152 = arith.constant 1152 : index
      %c0_41 = arith.constant 0 : index
      %98 = vector.load %arg8[%c1152, %c0_41] : memref<1728x256xf32, #tpu.memory_space<vmem>>, vector<192x256xf32>
      tpu.vector_store %arg8[%c1152, %c0_41], %97 {strides = array<i32>} : memref<1728x256xf32, #tpu.memory_space<vmem>>, vector<192x256xf32>,
      %c240_i32 = arith.constant 240 : i32
      %99 = tpu.dynamic_rotate %85 by %c240_i32 dim 1 : vector<192x256xf32>, i32 -> vector<192x256xf32>
      %c1344 = arith.constant 1344 : index
      %c0_42 = arith.constant 0 : index
      %100 = vector.load %arg8[%c1344, %c0_42] : memref<1728x256xf32, #tpu.memory_space<vmem>>, vector<192x256xf32>
      tpu.vector_store %arg8[%c1344, %c0_42], %99 {strides = array<i32>} : memref<1728x256xf32, #tpu.memory_space<vmem>>, vector<192x256xf32>,
      %c239_i32 = arith.constant 239 : i32
      %101 = tpu.dynamic_rotate %85 by %c239_i32 dim 1 : vector<192x256xf32>, i32 -> vector<192x256xf32>
      %c1536 = arith.constant 1536 : index
      %c0_43 = arith.constant 0 : index
      %102 = vector.load %arg8[%c1536, %c0_43] : memref<1728x256xf32, #tpu.memory_space<vmem>>, vector<192x256xf32>
      tpu.vector_store %arg8[%c1536, %c0_43], %101 {strides = array<i32>} : memref<1728x256xf32, #tpu.memory_space<vmem>>, vector<192x256xf32>,
      %c0_44 = arith.constant 0 : index
      %c0_45 = arith.constant 0 : index
      %103 = vector.load %arg5[%c0_44, %c0_45] : memref<48x1728xf32, #tpu.memory_space<vmem>>, vector<48x1728xf32>
      %c0_46 = arith.constant 0 : index
      %c0_47 = arith.constant 0 : index
      %104 = vector.load %arg8[%c0_46, %c0_47] : memref<1728x256xf32, #tpu.memory_space<vmem>>, vector<1728x256xf32>
      %cst_48 = arith.constant dense<0.000000e+00> : vector<48x256xf32>
      %105 = tpu.matmul %103, %104, %cst_48 {dimension_numbers = #tpu.dot_dimension_numbers<[1], [0], [0], [1], [0, 0, 1, 1], [], []>} : vector<48x1728xf32>, vector<1728x256xf32>, vector<48x256xf32> -> vector<48x256xf32>
      %c0_49 = arith.constant 0 : index
      %c0_50 = arith.constant 0 : index
      %106 = vector.load %arg6[%c0_49, %c0_50] : memref<48x256xf32, #tpu.memory_space<vmem>>, vector<48x256xf32>
      tpu.vector_store %arg6[%c0_49, %c0_50], %105 {strides = array<i32>} : memref<48x256xf32, #tpu.memory_space<vmem>>, vector<48x256xf32>,
    } else {
    }
    return
  }
  func.func @transform_0(%arg0: i32) -> (i32, i32) {
    %c0_i32 = arith.constant 0 : i32
    %c0_i32_0 = arith.constant 0 : i32
    return %arg0, %c0_i32 : i32, i32
  }
  func.func @transform_1(%arg0: i32) -> (i32, i32) {
    %c0_i32 = arith.constant 0 : i32
    %c0_i32_0 = arith.constant 0 : i32
    return %arg0, %c0_i32 : i32, i32
  }
  func.func @transform_2(%arg0: i32) -> (i32, i32) {
    %c0_i32 = arith.constant 0 : i32
    %c0_i32_0 = arith.constant 0 : i32
    return %c0_i32, %arg0 : i32, i32
  }
  func.func @transform_3(%arg0: i32) -> (i32, i32) {
    %c0_i32 = arith.constant 0 : i32
    %c0_i32_0 = arith.constant 0 : i32
    %c0_i32_1 = arith.constant 0 : i32
    return %c0_i32, %c0_i32_0 : i32, i32
  }
  func.func @transform_4(%arg0: i32) -> (i32, i32) {
    %c0_i32 = arith.constant 0 : i32
    %c0_i32_0 = arith.constant 0 : i32
    %c0_i32_1 = arith.constant 0 : i32
    return %c0_i32, %c0_i32_0 : i32, i32
  }
  func.func @transform_5(%arg0: i32) -> (i32, i32) {
    %c0_i32 = arith.constant 0 : i32
    %c0_i32_0 = arith.constant 0 : i32
    %c0_i32_1 = arith.constant 0 : i32
    return %c0_i32, %c0_i32_0 : i32, i32
  }
}

</mosaic_0001>

<bundles_post_ra>
// kernel: forward.1
= control target key start
LH: loop header
LB: loop body
LE: loop exit
PB: predicated region body
PF: predicated region fallthrough
CT: control target
= control target key end

     0   :  { %s9165_s18 = smov 0   ;;  %s9167_s19 = smov 0   ;;  %s14223_s0 = inlined_call_operand.vmem [shape: f32[1152,256], index: 0, kind: input, shape index: {}]   ;;  %s14224_s1 = inlined_call_operand.vmem [shape: f32[1152,2], index: 1, kind: input, shape index: {}]   ;;  %s14225_s2 = inlined_call_operand.vmem [shape: f32[192,1152], index: 2, kind: input, shape index: {}]   ;;  %s14226_s3 = inlined_call_operand.vmem [shape: f32[192,2], index: 3, kind: input, shape index: {}]   ;;  %s14227_s4 = inlined_call_operand.vmem [shape: f32[48,1728], index: 4, kind: input, shape index: {}]   ;;  %s14228_s5 = inlined_call_operand.vmem [shape: f32[48,256], index: 5, kind: output, shape index: {}]  }
   0x1   :  { %s9169_s20 = smov 0  }
   0x2 LB: > { %s9181_s21 = sadd.s32 4294967295, %s9119_s20   ;;  %s9184_s22 = sadd.s32 1, %s9119_s20   ;;  %s9119_s20 = sphi %s9169_s20, %s14505_s20   ;;  %s9115_s19 = sphi %s9167_s19, %s14504_s19   ;;  %s9111_s18 = sphi %s9165_s18, %s14503_s18  }
   0x3   : > { %s71_s23 = ssub.s32 %s9119_s20, %s9184_s22  ;;  %s74_s24 = sadd.s32 1, %s9115_s19 }
   0x4   : > { %p72_p0 = scmp.eq.s32.totalorder %s71_s23, 0  ;;  %p81_p1 = scmp.ne.s32.totalorder %s9115_s19, %s9111_s18 }
   0x5   : > { %p82_p2 = scmp.eq.s32.totalorder %s9119_s20, 0  ;;  %p7067_p4 = scmp.ge.s32.totalorder %s9119_s20, 3 }
   0x6   : > { %s9193_s25 = scalar_select %p72_p0, %s9115_s19, %s74_s24  }
   0x7   : > { %p83_p3 = por %p82_p2, %p81_p1  ;;  %176 = sbr.rel (%p7067_p4) target bundleno = 55 (0x37), region = 24 }
   0xe   : > { %198 = sbr.rel (!%p83_p3) target bundleno = 55 (0x37), region = 36  ;;  %s200_s26 = sand.u32 (%p83_p3), 1, %s9115_s19  }
   0xf   : > { %s7084_s27 = smul.u32 (%p83_p3), 24, %s9119_s20 }
  0x10   : > { %s7758_s28 = smul.u32 (%p83_p3), 576, %s200_s26 }
  0x11   : > { %s9201_s6 = scalar_lea.vmem (%p83_p3), %s14225_s2, %s7084_s27 }
  0x12   : > { %v218_v0 = vld [vmem:[%s9201_s6] sm:$0xff] (%p83_p3)  ;;  %v220_v1 = vld [vmem:[%s9201_s6 + $0x8] sm:$0xff] (%p83_p3)  ;;  %v222_v2 = vld [vmem:[%s9201_s6 + $0x10] sm:$0xff] (%p83_p3)  ;;  %s9206_s7 = scalar_lea.vmem (%p83_p3), [#allocation4], %s7758_s28 }
  0x13   : > { %219 = vst [vmem:[%s9206_s7] sm:$0xff] (%p83_p3), %v218_v0  ;;  %221 = vst [vmem:[%s9206_s7 + $0x8] sm:$0xff] (%p83_p3), %v220_v1  ;;  %v224_v3 = vld [vmem:[%s9201_s6 + $0x48] sm:$0xff] (%p83_p3)  ;;  %v226_v4 = vld [vmem:[%s9201_s6 + $0x50] sm:$0xff] (%p83_p3) }
  0x14   : > { %223 = vst [vmem:[%s9206_s7 + $0x10] sm:$0xff] (%p83_p3), %v222_v2  ;;  %v228_v5 = vld [vmem:[%s9201_s6 + $0x58] sm:$0xff] (%p83_p3)  ;;  %225 = vst [vmem:[%s9206_s7 + $0x18] sm:$0xff] (%p83_p3), %v224_v3  ;;  %v230_v6 = vld [vmem:[%s9201_s6 + $0x90] sm:$0xff] (%p83_p3) }
  0x15   : > { %227 = vst [vmem:[%s9206_s7 + $0x20] sm:$0xff] %v226_v4  ;;  %229 = vst [vmem:[%s9206_s7 + $0x28] sm:$0xff] %v228_v5  ;;  %v232_v7 = vld [vmem:[%s9201_s6 + $0x98] sm:$0xff]  ;;  %v234_v8 = vld [vmem:[%s9201_s6 + $0xa0] sm:$0xff] }
  0x16   : > { %231 = vst [vmem:[%s9206_s7 + $0x30] sm:$0xff] %v230_v6  ;;  %233 = vst [vmem:[%s9206_s7 + $0x38] sm:$0xff] %v232_v7  ;;  %v236_v9 = vld [vmem:[%s9201_s6 + $0xd8] sm:$0xff]  ;;  %v238_v10 = vld [vmem:[%s9201_s6 + $0xe0] sm:$0xff] }
  0x17   : > { %235 = vst [vmem:[%s9206_s7 + $0x40] sm:$0xff] %v234_v8  ;;  %v240_v11 = vld [vmem:[%s9201_s6 + $0xe8] sm:$0xff]  ;;  %237 = vst [vmem:[%s9206_s7 + $0x48] sm:$0xff] %v236_v9  ;;  %v242_v12 = vld [vmem:[%s9201_s6 + $0x120] sm:$0xff] }
  0x18   : > { %239 = vst [vmem:[%s9206_s7 + $0x50] sm:$0xff] %v238_v10  ;;  %241 = vst [vmem:[%s9206_s7 + $0x58] sm:$0xff] %v240_v11  ;;  %v244_v13 = vld [vmem:[%s9201_s6 + $0x128] sm:$0xff]  ;;  %v246_v14 = vld [vmem:[%s9201_s6 + $0x130] sm:$0xff] }
  0x19   : > { %243 = vst [vmem:[%s9206_s7 + $0x60] sm:$0xff] %v242_v12  ;;  %245 = vst [vmem:[%s9206_s7 + $0x68] sm:$0xff] %v244_v13  ;;  %v248_v15 = vld [vmem:[%s9201_s6 + $0x168] sm:$0xff]  ;;  %v250_v16 = vld [vmem:[%s9201_s6 + $0x170] sm:$0xff] }
  0x1a   : > { %247 = vst [vmem:[%s9206_s7 + $0x70] sm:$0xff] %v246_v14  ;;  %v252_v17 = vld [vmem:[%s9201_s6 + $0x178] sm:$0xff]  ;;  %249 = vst [vmem:[%s9206_s7 + $0x78] sm:$0xff] %v248_v15  ;;  %v254_v18 = vld [vmem:[%s9201_s6 + $0x1b0] sm:$0xff] }
  0x1b   : > { %251 = vst [vmem:[%s9206_s7 + $0x80] sm:$0xff] %v250_v16  ;;  %253 = vst [vmem:[%s9206_s7 + $0x88] sm:$0xff] %v252_v17  ;;  %v256_v19 = vld [vmem:[%s9201_s6 + $0x1b8] sm:$0xff]  ;;  %v258_v20 = vld [vmem:[%s9201_s6 + $0x1c0] sm:$0xff] }
  0x1c   : > { %255 = vst [vmem:[%s9206_s7 + $0x90] sm:$0xff] %v254_v18  ;;  %257 = vst [vmem:[%s9206_s7 + $0x98] sm:$0xff] %v256_v19  ;;  %v260_v21 = vld [vmem:[%s9201_s6 + $0x1f8] sm:$0xff]  ;;  %v262_v22 = vld [vmem:[%s9201_s6 + $0x200] sm:$0xff] }
  0x1d   : > { %259 = vst [vmem:[%s9206_s7 + $0xa0] sm:$0xff] %v258_v20  ;;  %v264_v23 = vld [vmem:[%s9201_s6 + $0x208] sm:$0xff]  ;;  %261 = vst [vmem:[%s9206_s7 + $0xa8] sm:$0xff] %v260_v21  ;;  %v266_v24 = vld [vmem:[%s9201_s6 + $0x240] sm:$0xff] }
  0x1e   : > { %263 = vst [vmem:[%s9206_s7 + $0xb0] sm:$0xff] %v262_v22  ;;  %265 = vst [vmem:[%s9206_s7 + $0xb8] sm:$0xff] %v264_v23  ;;  %v268_v25 = vld [vmem:[%s9201_s6 + $0x248] sm:$0xff]  ;;  %v270_v26 = vld [vmem:[%s9201_s6 + $0x250] sm:$0xff] }
  0x1f   : > { %267 = vst [vmem:[%s9206_s7 + $0xc0] sm:$0xff] %v266_v24  ;;  %269 = vst [vmem:[%s9206_s7 + $0xc8] sm:$0xff] %v268_v25  ;;  %v272_v27 = vld [vmem:[%s9201_s6 + $0x288] sm:$0xff]  ;;  %v274_v28 = vld [vmem:[%s9201_s6 + $0x290] sm:$0xff] }
  0x20   : > { %271 = vst [vmem:[%s9206_s7 + $0xd0] sm:$0xff] %v270_v26  ;;  %v276_v29 = vld [vmem:[%s9201_s6 + $0x298] sm:$0xff]  ;;  %273 = vst [vmem:[%s9206_s7 + $0xd8] sm:$0xff] %v272_v27  ;;  %v278_v30 = vld [vmem:[%s9201_s6 + $0x2d0] sm:$0xff] }
  0x21   : > { %275 = vst [vmem:[%s9206_s7 + $0xe0] sm:$0xff] %v274_v28  ;;  %277 = vst [vmem:[%s9206_s7 + $0xe8] sm:$0xff] %v276_v29  ;;  %v280_v31 = vld [vmem:[%s9201_s6 + $0x2d8] sm:$0xff]  ;;  %v282_v32 = vld [vmem:[%s9201_s6 + $0x2e0] sm:$0xff] }
  0x22   : > { %279 = vst [vmem:[%s9206_s7 + $0xf0] sm:$0xff] %v278_v30  ;;  %281 = vst [vmem:[%s9206_s7 + $0xf8] sm:$0xff] %v280_v31  ;;  %v284_v33 = vld [vmem:[%s9201_s6 + $0x318] sm:$0xff]  ;;  %v286_v34 = vld [vmem:[%s9201_s6 + $0x320] sm:$0xff] }
  0x23   : > { %283 = vst [vmem:[%s9206_s7 + $0x100] sm:$0xff] %v282_v32  ;;  %v288_v35 = vld [vmem:[%s9201_s6 + $0x328] sm:$0xff]  ;;  %285 = vst [vmem:[%s9206_s7 + $0x108] sm:$0xff] %v284_v33  ;;  %v290_v36 = vld [vmem:[%s9201_s6 + $0x360] sm:$0xff] }
  0x24   : > { %287 = vst [vmem:[%s9206_s7 + $0x110] sm:$0xff] %v286_v34  ;;  %289 = vst [vmem:[%s9206_s7 + $0x118] sm:$0xff] %v288_v35  ;;  %v292_v37 = vld [vmem:[%s9201_s6 + $0x368] sm:$0xff]  ;;  %v294_v38 = vld [vmem:[%s9201_s6 + $0x370] sm:$0xff] }
  0x25   : > { %291 = vst [vmem:[%s9206_s7 + $0x120] sm:$0xff] %v290_v36  ;;  %293 = vst [vmem:[%s9206_s7 + $0x128] sm:$0xff] %v292_v37  ;;  %v296_v39 = vld [vmem:[%s9201_s6 + $0x3a8] sm:$0xff]  ;;  %v298_v40 = vld [vmem:[%s9201_s6 + $0x3b0] sm:$0xff] }
  0x26   : > { %295 = vst [vmem:[%s9206_s7 + $0x130] sm:$0xff] %v294_v38  ;;  %v300_v41 = vld [vmem:[%s9201_s6 + $0x3b8] sm:$0xff]  ;;  %297 = vst [vmem:[%s9206_s7 + $0x138] sm:$0xff] %v296_v39  ;;  %v302_v42 = vld [vmem:[%s9201_s6 + $0x3f0] sm:$0xff] }
  0x27   : > { %299 = vst [vmem:[%s9206_s7 + $0x140] sm:$0xff] %v298_v40  ;;  %301 = vst [vmem:[%s9206_s7 + $0x148] sm:$0xff] %v300_v41  ;;  %v304_v43 = vld [vmem:[%s9201_s6 + $0x3f8] sm:$0xff]  ;;  %v306_v44 = vld [vmem:[%s9201_s6 + $0x400] sm:$0xff] }
  0x28   : > { %303 = vst [vmem:[%s9206_s7 + $0x150] sm:$0xff] %v302_v42  ;;  %305 = vst [vmem:[%s9206_s7 + $0x158] sm:$0xff] %v304_v43  ;;  %v308_v45 = vld [vmem:[%s9201_s6 + $0x438] sm:$0xff]  ;;  %v310_v46 = vld [vmem:[%s9201_s6 + $0x440] sm:$0xff] }
  0x29   : > { %307 = vst [vmem:[%s9206_s7 + $0x160] sm:$0xff] %v306_v44  ;;  %v312_v47 = vld [vmem:[%s9201_s6 + $0x448] sm:$0xff]  ;;  %309 = vst [vmem:[%s9206_s7 + $0x168] sm:$0xff] %v308_v45  ;;  %v314_v48 = vld [vmem:[%s9201_s6 + $0x480] sm:$0xff] }
  0x2a   : > { %311 = vst [vmem:[%s9206_s7 + $0x170] sm:$0xff] %v310_v46  ;;  %313 = vst [vmem:[%s9206_s7 + $0x178] sm:$0xff] %v312_v47  ;;  %v316_v49 = vld [vmem:[%s9201_s6 + $0x488] sm:$0xff]  ;;  %v318_v50 = vld [vmem:[%s9201_s6 + $0x490] sm:$0xff] }
  0x2b   : > { %315 = vst [vmem:[%s9206_s7 + $0x180] sm:$0xff] %v314_v48  ;;  %317 = vst [vmem:[%s9206_s7 + $0x188] sm:$0xff] %v316_v49  ;;  %v320_v51 = vld [vmem:[%s9201_s6 + $0x4c8] sm:$0xff]  ;;  %v322_v52 = vld [vmem:[%s9201_s6 + $0x4d0] sm:$0xff] }
  0x2c   : > { %319 = vst [vmem:[%s9206_s7 + $0x190] sm:$0xff] %v318_v50  ;;  %v324_v53 = vld [vmem:[%s9201_s6 + $0x4d8] sm:$0xff]  ;;  %321 = vst [vmem:[%s9206_s7 + $0x198] sm:$0xff] %v320_v51  ;;  %v326_v54 = vld [vmem:[%s9201_s6 + $0x510] sm:$0xff] }
  0x2d   : > { %323 = vst [vmem:[%s9206_s7 + $0x1a0] sm:$0xff] %v322_v52  ;;  %325 = vst [vmem:[%s9206_s7 + $0x1a8] sm:$0xff] %v324_v53  ;;  %v328_v55 = vld [vmem:[%s9201_s6 + $0x518] sm:$0xff]  ;;  %v330_v56 = vld [vmem:[%s9201_s6 + $0x520] sm:$0xff] }
  0x2e   : > { %327 = vst [vmem:[%s9206_s7 + $0x1b0] sm:$0xff] %v326_v54  ;;  %329 = vst [vmem:[%s9206_s7 + $0x1b8] sm:$0xff] %v328_v55  ;;  %v332_v57 = vld [vmem:[%s9201_s6 + $0x558] sm:$0xff]  ;;  %v334_v58 = vld [vmem:[%s9201_s6 + $0x560] sm:$0xff] }
  0x2f   : > { %331 = vst [vmem:[%s9206_s7 + $0x1c0] sm:$0xff] %v330_v56  ;;  %v336_v59 = vld [vmem:[%s9201_s6 + $0x568] sm:$0xff]  ;;  %333 = vst [vmem:[%s9206_s7 + $0x1c8] sm:$0xff] %v332_v57  ;;  %v338_v60 = vld [vmem:[%s9201_s6 + $0x5a0] sm:$0xff] }
  0x30   : > { %335 = vst [vmem:[%s9206_s7 + $0x1d0] sm:$0xff] %v334_v58  ;;  %337 = vst [vmem:[%s9206_s7 + $0x1d8] sm:$0xff] %v336_v59  ;;  %v340_v61 = vld [vmem:[%s9201_s6 + $0x5a8] sm:$0xff]  ;;  %v342_v62 = vld [vmem:[%s9201_s6 + $0x5b0] sm:$0xff] }
  0x31   : > { %339 = vst [vmem:[%s9206_s7 + $0x1e0] sm:$0xff] %v338_v60  ;;  %341 = vst [vmem:[%s9206_s7 + $0x1e8] sm:$0xff] %v340_v61  ;;  %v344_v63 = vld [vmem:[%s9201_s6 + $0x5e8] sm:$0xff]  ;;  %v346_v0 = vld [vmem:[%s9201_s6 + $0x5f0] sm:$0xff] }
  0x32   : > { %343 = vst [vmem:[%s9206_s7 + $0x1f0] sm:$0xff] %v342_v62  ;;  %v348_v1 = vld [vmem:[%s9201_s6 + $0x5f8] sm:$0xff]  ;;  %345 = vst [vmem:[%s9206_s7 + $0x1f8] sm:$0xff] %v344_v63  ;;  %v350_v2 = vld [vmem:[%s9201_s6 + $0x630] sm:$0xff] }
  0x33   : > { %347 = vst [vmem:[%s9206_s7 + $0x200] sm:$0xff] %v346_v0  ;;  %349 = vst [vmem:[%s9206_s7 + $0x208] sm:$0xff] %v348_v1  ;;  %v352_v3 = vld [vmem:[%s9201_s6 + $0x638] sm:$0xff]  ;;  %v354_v4 = vld [vmem:[%s9201_s6 + $0x640] sm:$0xff] }
  0x34   : > { %351 = vst [vmem:[%s9206_s7 + $0x210] sm:$0xff] %v350_v2  ;;  %353 = vst [vmem:[%s9206_s7 + $0x218] sm:$0xff] %v352_v3  ;;  %v356_v5 = vld [vmem:[%s9201_s6 + $0x678] sm:$0xff]  ;;  %v358_v6 = vld [vmem:[%s9201_s6 + $0x680] sm:$0xff] }
  0x35   : > { %355 = vst [vmem:[%s9206_s7 + $0x220] sm:$0xff] %v354_v4  ;;  %v360_v7 = vld [vmem:[%s9201_s6 + $0x688] sm:$0xff]  ;;  %357 = vst [vmem:[%s9206_s7 + $0x228] sm:$0xff] %v356_v5 }
  0x36   : > { %359 = vst [vmem:[%s9206_s7 + $0x230] sm:$0xff] %v358_v6  ;;  %361 = vst [vmem:[%s9206_s7 + $0x238] sm:$0xff] %v360_v7 }
  0x37 PF: > { %p7069_p5 = scmp.ge.s32.totalorder %s9119_s20, 1  ;;  %p366_p6 = scmp.lt.s32.totalorder %s9119_s20, 4 }
  0x39   : > { %p367_p7 = pnand %p7069_p5, %p366_p6 }
  0x3b   : > { %370 = sbr.rel (%p367_p7) target bundleno = 2428 (0x97c), region = 59 }
  0x42   : > { %s406_s8 = smul.u32 48, %s9181_s21  ;;  %s9122_s17 = smov 1  }
  0x43   : > { %s373_s20 = sand.u32 1, %s9111_s18   ;;  %p7073_p9 = scmp.ne.s32.totalorder %s9181_s21, 0 }
  0x44   : > { %p407_p8 = scmp.lt.s32.totalorder %s406_s8, 143  ;;  %s7759_s23 = smul.u32 576, %s373_s20 }
  0x46   : > { %s14507_s8 = smov (!%p407_p8, %s406_s8), 143  ;;  %s11153_s24 = scalar_lea.vmem [#allocation4], %s7759_s23 }
  0x47   : > { %s7085_s9 = sshll.u32 %s14507_s8, 4  ;;  %s7072_s13 = sshll.u32 %s14507_s8, 3 }
  0x48   : > { %s9358_s12 = scalar_lea.vmem %s14223_s0, %s7085_s9  ;;  %s10012_s16 = scalar_lea.vmem %s14224_s1, %s7072_s13 }
  0x49   : > { %v9361_v8 = vld [vmem:[%s9358_s12 + $0x20] sm:$0xff]  ;;  %v9364_v9 = vld [vmem:[%s9358_s12 + $0x28] sm:$0xff]  ;;  %v9375_v13 = vld [vmem:[%s9358_s12 + $0x30] sm:$0xff] }
  0x4a   : > { %v9367_v10 = vld [vmem:[%s9358_s12] sm:$0xff]  ;;  %v545_v11 = vadd.f32 %v9364_v9, %v9361_v8  ;;  %v9372_v12 = vld [vmem:[%s9358_s12 + $0x8] sm:$0xff]  ;;  %v9378_v14 = vld [vmem:[%s9358_s12 + $0x38] sm:$0xff] }
  0x4b   : > { %v539_v15 = vadd.f32 %v9372_v12, %v9367_v10  ;;  %v9383_v16 = vld [vmem:[%s9358_s12 + $0x10] sm:$0xff]  ;;  %v9386_v17 = vld [vmem:[%s9358_s12 + $0x18] sm:$0xff]  ;;  %v548_v18 = vadd.f32 %v9378_v14, %v9375_v13  ;;  %v9399_v22 = vld [vmem:[%s9358_s12 + $0x40] sm:$0xff] }
  0x4c   : > { %546 = vadd.xlane.f32.xlu1 %v545_v11  ;;  %v542_v19 = vadd.f32 %v9386_v17, %v9383_v16  ;;  %v9393_v20 = vld [vmem:[%s9358_s12 + $0x50] sm:$0xff]  ;;  %v9396_v21 = vld [vmem:[%s9358_s12 + $0x58] sm:$0xff]  ;;  %v9402_v23 = vld [vmem:[%s9358_s12 + $0x48] sm:$0xff] }
  0x4d   : > { %540 = vadd.xlane.f32.xlu0 %v539_v15  ;;  %v554_v24 = vadd.f32 %v9396_v21, %v9393_v20  ;;  %v551_v25 = vadd.f32 %v9402_v23, %v9399_v22  ;;  %v9409_v26 = vld [vmem:[%s9358_s12 + $0x70] sm:$0xff]  ;;  %v9412_v27 = vld [vmem:[%s9358_s12 + $0x78] sm:$0xff]  ;;  %v9415_v28 = vld [vmem:[%s9358_s12 + $0x60] sm:$0xff] }
  0x4e   : > { %v9418_v29 = vld [vmem:[%s9358_s12 + $0x68] sm:$0xff]  ;;  %v560_v30 = vadd.f32 %v9412_v27, %v9409_v26  ;;  %v9425_v32 = vld [vmem:[%s9358_s12 + $0x90] sm:$0xff]  ;;  %v9428_v33 = vld [vmem:[%s9358_s12 + $0x98] sm:$0xff] }
  0x4f   : > { %v557_v31 = vadd.f32 %v9418_v29, %v9415_v28  ;;  %v9431_v34 = vld [vmem:[%s9358_s12 + $0x80] sm:$0xff]  ;;  %v9434_v35 = vld [vmem:[%s9358_s12 + $0x88] sm:$0xff]  ;;  %v566_v36 = vadd.f32 %v9428_v33, %v9425_v32  ;;  %v9441_v38 = vld [vmem:[%s9358_s12 + $0xb0] sm:$0xff] }
  0x50   : > { %549 = vadd.xlane.f32.xlu1 %v548_v18  ;;  %v563_v37 = vadd.f32 %v9434_v35, %v9431_v34  ;;  %v9444_v39 = vld [vmem:[%s9358_s12 + $0xb8] sm:$0xff]  ;;  %v9447_v40 = vld [vmem:[%s9358_s12 + $0xa0] sm:$0xff]  ;;  %v9450_v41 = vld [vmem:[%s9358_s12 + $0xa8] sm:$0xff] }
  0x51   : > { %543 = vadd.xlane.f32.xlu0 %v542_v19  ;;  %v572_v42 = vadd.f32 %v9444_v39, %v9441_v38  ;;  %v569_v43 = vadd.f32 %v9450_v41, %v9447_v40  ;;  %v9457_v44 = vld [vmem:[%s9358_s12 + $0xd0] sm:$0xff]  ;;  %v9460_v45 = vld [vmem:[%s9358_s12 + $0xd8] sm:$0xff]  ;;  %v9463_v46 = vld [vmem:[%s9358_s12 + $0xc0] sm:$0xff] }
  0x52   : > { %v9466_v47 = vld [vmem:[%s9358_s12 + $0xc8] sm:$0xff]  ;;  %v578_v48 = vadd.f32 %v9460_v45, %v9457_v44  ;;  %v9473_v50 = vld [vmem:[%s9358_s12 + $0xf0] sm:$0xff]  ;;  %v9476_v51 = vld [vmem:[%s9358_s12 + $0xf8] sm:$0xff] }
  0x53   : > { %v575_v49 = vadd.f32 %v9466_v47, %v9463_v46  ;;  %v9479_v52 = vld [vmem:[%s9358_s12 + $0xe0] sm:$0xff]  ;;  %v9482_v53 = vld [vmem:[%s9358_s12 + $0xe8] sm:$0xff]  ;;  %v584_v54 = vadd.f32 %v9476_v51, %v9473_v50  ;;  %v9489_v56 = vld [vmem:[%s9358_s12 + $0x110] sm:$0xff] }
  0x54   : > { %555 = vadd.xlane.f32.xlu1 %v554_v24  ;;  %v581_v55 = vadd.f32 %v9482_v53, %v9479_v52  ;;  %v9492_v57 = vld [vmem:[%s9358_s12 + $0x118] sm:$0xff]  ;;  %v9495_v58 = vld [vmem:[%s9358_s12 + $0x100] sm:$0xff]  ;;  %v9498_v59 = vld [vmem:[%s9358_s12 + $0x108] sm:$0xff] }
  0x55   : > { %552 = vadd.xlane.f32.xlu0 %v551_v25  ;;  %v590_v60 = vadd.f32 %v9492_v57, %v9489_v56  ;;  %v587_v61 = vadd.f32 %v9498_v59, %v9495_v58  ;;  %v9505_v62 = vld [vmem:[%s9358_s12 + $0x130] sm:$0xff]  ;;  %v9508_v63 = vld [vmem:[%s9358_s12 + $0x138] sm:$0xff]  ;;  %v9511_v0 = vld [vmem:[%s9358_s12 + $0x120] sm:$0xff] }
  0x56   : > { %v9514_v1 = vld [vmem:[%s9358_s12 + $0x128] sm:$0xff]  ;;  %v596_v2 = vadd.f32 %v9508_v63, %v9505_v62  ;;  %v9521_v4 = vld [vmem:[%s9358_s12 + $0x150] sm:$0xff]  ;;  %v9524_v5 = vld [vmem:[%s9358_s12 + $0x158] sm:$0xff] }
  0x57   : > { %v593_v3 = vadd.f32 %v9514_v1, %v9511_v0  ;;  %14321 = vst [vmem:[#allocation5_spill] sm:$0xff] %v9521_v4  ;;  %14322 = vst [vmem:[#allocation6_spill] sm:$0xff] %v9524_v5  ;;  %v9527_v6 = vld [vmem:[%s9358_s12 + $0x140] sm:$0xff]  ;;  %v9530_v7 = vld [vmem:[%s9358_s12 + $0x148] sm:$0xff]  ;;  %v602_v11 = vadd.f32 %v9524_v5, %v9521_v4 }
  0x58   : > { %561 = vadd.xlane.f32.xlu1 %v560_v30  ;;  %v599_v15 = vadd.f32 %v9530_v7, %v9527_v6  ;;  %v9537_v18 = vld [vmem:[%s9358_s12 + $0x170] sm:$0xff]  ;;  %v9540_v19 = vld [vmem:[%s9358_s12 + $0x178] sm:$0xff]  ;;  %v9543_v24 = vld [vmem:[%s9358_s12 + $0x160] sm:$0xff] }
  0x59   : > { %558 = vadd.xlane.f32.xlu0 %v557_v31  ;;  %14323 = vst [vmem:[#allocation7_spill] sm:$0xff] %v9537_v18  ;;  %14324 = vst [vmem:[#allocation8_spill] sm:$0xff] %v9540_v19  ;;  %v9546_v25 = vld [vmem:[%s9358_s12 + $0x168] sm:$0xff]  ;;  %v608_v30 = vadd.f32 %v9540_v19, %v9537_v18  ;;  %v9665_v19 = vld [vmem:[%s9358_s12 + $0x270] sm:$0xff] }
  0x5a   : > { %14325 = vst [vmem:[#allocation9_spill] sm:$0xff] %v9543_v24  ;;  %14326 = vst [vmem:[#allocation10_spill] sm:$0xff] %v9546_v25  ;;  %v605_v31 = vadd.f32 %v9546_v25, %v9543_v24  ;;  %v9668_v18 = vld [vmem:[%s9358_s12 + $0x278] sm:$0xff]  ;;  %v9671_v25 = vld [vmem:[%s9358_s12 + $0x260] sm:$0xff] }
  0x5b   : > { %14346 = vst [vmem:[#allocation30_spill] sm:$0xff] %v9665_v19  ;;  %14347 = vst [vmem:[#allocation31_spill] sm:$0xff] %v9668_v18  ;;  %v9674_v24 = vld [vmem:[%s9358_s12 + $0x268] sm:$0xff]  ;;  %v9687_v5 = vld [vmem:[%s9358_s12 + $0x280] sm:$0xff] }
  0x5c   : > { %567 = vadd.xlane.f32.xlu1 %v566_v36  ;;  %v9553_v36 = vld [vmem:[%s9358_s12 + $0x190] sm:$0xff]  ;;  %14348 = vst [vmem:[#allocation32_spill] sm:$0xff] %v9671_v25  ;;  %14349 = vst [vmem:[#allocation33_spill] sm:$0xff] %v9674_v24  ;;  %v9690_v4 = vld [vmem:[%s9358_s12 + $0x288] sm:$0xff] }
  0x5d   : > { %564 = vadd.xlane.f32.xlu0 %v563_v37  ;;  %14327 = vst [vmem:[#allocation11_spill] sm:$0xff] %v9553_v36  ;;  %v9556_v37 = vld [vmem:[%s9358_s12 + $0x198] sm:$0xff] }
  0x5e   : > { %14328 = vst [vmem:[#allocation12_spill] sm:$0xff] %v9556_v37 }
  0x60   : > { %573 = vadd.xlane.f32.xlu1 %v572_v42  ;;  %v9559_v42 = vld [vmem:[%s9358_s12 + $0x180] sm:$0xff] }
  0x61   : > { %570 = vadd.xlane.f32.xlu0 %v569_v43  ;;  %14329 = vst [vmem:[#allocation13_spill] sm:$0xff] %v9559_v42  ;;  %v9562_v43 = vld [vmem:[%s9358_s12 + $0x188] sm:$0xff] }
  0x62   : > { %14330 = vst [vmem:[#allocation14_spill] sm:$0xff] %v9562_v43 }
  0x64   : > { %579 = vadd.xlane.f32.xlu1 %v578_v48  ;;  %v614_v48 = vadd.f32 %v9556_v37, %v9553_v36  ;;  %v9649_v37 = vld [vmem:[%s9358_s12 + $0x250] sm:$0xff]  ;;  %v9652_v36 = vld [vmem:[%s9358_s12 + $0x258] sm:$0xff] }
  0x65   : > { %576 = vadd.xlane.f32.xlu0 %v575_v49  ;;  %v611_v49 = vadd.f32 %v9562_v43, %v9559_v42  ;;  %14343 = vst [vmem:[#allocation27_spill] sm:$0xff] %v9649_v37  ;;  %14344 = vst [vmem:[#allocation28_spill] sm:$0xff] %v9652_v36  ;;  %v9655_v43 = vld [vmem:[%s9358_s12 + $0x240] sm:$0xff]  ;;  %v9658_v42 = vld [vmem:[%s9358_s12 + $0x248] sm:$0xff] }
  0x66   : > { %14345 = vst [vmem:[#allocation29_spill] sm:$0xff] %v9658_v42 }
  0x68   : > { %585 = vadd.xlane.f32.xlu1 %v584_v54  ;;  %v9569_v54 = vld [vmem:[%s9358_s12 + $0x1b0] sm:$0xff] }
  0x69   : > { %582 = vadd.xlane.f32.xlu0 %v581_v55  ;;  %14331 = vst [vmem:[#allocation15_spill] sm:$0xff] %v9569_v54  ;;  %v9572_v55 = vld [vmem:[%s9358_s12 + $0x1b8] sm:$0xff] }
  0x6a   : > { %14332 = vst [vmem:[#allocation16_spill] sm:$0xff] %v9572_v55 }
  0x6c   : > { %591 = vadd.xlane.f32.xlu1 %v590_v60  ;;  %v9575_v60 = vld [vmem:[%s9358_s12 + $0x1a0] sm:$0xff] }
  0x6d   : > { %588 = vadd.xlane.f32.xlu0 %v587_v61  ;;  %14333 = vst [vmem:[#allocation17_spill] sm:$0xff] %v9575_v60  ;;  %v9578_v61 = vld [vmem:[%s9358_s12 + $0x1a8] sm:$0xff] }
  0x6e   : > { %14334 = vst [vmem:[#allocation18_spill] sm:$0xff] %v9578_v61 }
  0x70   : > { %597 = vadd.xlane.f32.xlu1 %v596_v2  ;;  %v620_v2 = vadd.f32 %v9572_v55, %v9569_v54  ;;  %v9607_v55 = vld [vmem:[%s9358_s12 + $0x1e0] sm:$0xff]  ;;  %v9610_v54 = vld [vmem:[%s9358_s12 + $0x1e8] sm:$0xff] }
  0x71   : > { %594 = vadd.xlane.f32.xlu0 %v593_v3  ;;  %v617_v3 = vadd.f32 %v9578_v61, %v9575_v60  ;;  %v9601_v61 = vld [vmem:[%s9358_s12 + $0x1f0] sm:$0xff]  ;;  %v9604_v60 = vld [vmem:[%s9358_s12 + $0x1f8] sm:$0xff]  ;;  %14341 = vst [vmem:[#allocation25_spill] sm:$0xff] %v9607_v55  ;;  %14342 = vst [vmem:[#allocation26_spill] sm:$0xff] %v9610_v54 }
  0x72   : > { %14339 = vst [vmem:[#allocation23_spill] sm:$0xff] %v9601_v61  ;;  %14340 = vst [vmem:[#allocation24_spill] sm:$0xff] %v9604_v60 }
  0x74   : > { %603 = vadd.xlane.f32.xlu1 %v602_v11  ;;  %v9585_v11 = vld [vmem:[%s9358_s12 + $0x1d0] sm:$0xff] }
  0x75   : > { %600 = vadd.xlane.f32.xlu0 %v599_v15  ;;  %14335 = vst [vmem:[#allocation19_spill] sm:$0xff] %v9585_v11  ;;  %v9588_v15 = vld [vmem:[%s9358_s12 + $0x1d8] sm:$0xff] }
  0x76   : > { %14336 = vst [vmem:[#allocation20_spill] sm:$0xff] %v9588_v15 }
  0x78   : > { %609 = vadd.xlane.f32.xlu1 %v608_v30  ;;  %v9591_v30 = vld [vmem:[%s9358_s12 + $0x1c0] sm:$0xff] }
  0x79   : > { %606 = vadd.xlane.f32.xlu0 %v605_v31  ;;  %14337 = vst [vmem:[#allocation21_spill] sm:$0xff] %v9591_v30  ;;  %v9594_v31 = vld [vmem:[%s9358_s12 + $0x1c8] sm:$0xff] }
  0x7a   : > { %14338 = vst [vmem:[#allocation22_spill] sm:$0xff] %v9594_v31 }
  0x7c   : > { %615 = vadd.xlane.f32.xlu1 %v614_v48  ;;  %v626_v48 = vadd.f32 %v9588_v15, %v9585_v11  ;;  %v9623_v15 = vld [vmem:[%s9358_s12 + $0x200] sm:$0xff]  ;;  %v9626_v11 = vld [vmem:[%s9358_s12 + $0x208] sm:$0xff] }
  0x7d   : > { %612 = vadd.xlane.f32.xlu0 %v611_v49  ;;  %v623_v49 = vadd.f32 %v9594_v31, %v9591_v30  ;;  %v9617_v31 = vld [vmem:[%s9358_s12 + $0x210] sm:$0xff]  ;;  %v9620_v30 = vld [vmem:[%s9358_s12 + $0x218] sm:$0xff] }
  0x80   : > { %621 = vadd.xlane.f32.xlu1 %v620_v2  ;;  %v632_v2 = vadd.f32 %v9604_v60, %v9601_v61  ;;  %v9639_v60 = vld [vmem:[%s9358_s12 + $0x220] sm:$0xff]  ;;  %v9642_v61 = vld [vmem:[%s9358_s12 + $0x228] sm:$0xff] }
  0x81   : > { %618 = vadd.xlane.f32.xlu0 %v617_v3  ;;  %v629_v3 = vadd.f32 %v9610_v54, %v9607_v55  ;;  %v9633_v54 = vld [vmem:[%s9358_s12 + $0x230] sm:$0xff]  ;;  %v9636_v55 = vld [vmem:[%s9358_s12 + $0x238] sm:$0xff] }
  0x84   : > { %627 = vadd.xlane.f32.xlu1 %v626_v48  ;;  %v638_v48 = vadd.f32 %v9620_v30, %v9617_v31 }
  0x85   : > { %624 = vadd.xlane.f32.xlu0 %v623_v49  ;;  %v635_v49 = vadd.f32 %v9626_v11, %v9623_v15 }
  0x88   : > { %633 = vadd.xlane.f32.xlu1 %v632_v2  ;;  %v644_v2 = vadd.f32 %v9636_v55, %v9633_v54 }
  0x89   : > { %630 = vadd.xlane.f32.xlu0 %v629_v3  ;;  %v641_v3 = vadd.f32 %v9642_v61, %v9639_v60 }
  0x8c   : > { %639 = vadd.xlane.f32.xlu1 %v638_v48  ;;  %v650_v48 = vadd.f32 %v9652_v36, %v9649_v37  ;;  %v9681_v36 = vld [vmem:[%s9358_s12 + $0x290] sm:$0xff]  ;;  %v9684_v37 = vld [vmem:[%s9358_s12 + $0x298] sm:$0xff] }
  0x8d   : > { %636 = vadd.xlane.f32.xlu0 %v635_v49  ;;  %v647_v49 = vadd.f32 %v9658_v42, %v9655_v43  ;;  %14350 = vst [vmem:[#allocation34_spill] sm:$0xff] %v9681_v36  ;;  %14351 = vst [vmem:[#allocation35_spill] sm:$0xff] %v9684_v37  ;;  %v662_v42 = vadd.f32 %v9684_v37, %v9681_v36  ;;  %v736_v37 = vmul.f32 %v9364_v9, %v9364_v9 }
  0x90   : > { %645 = vadd.xlane.f32.xlu1 %v644_v2  ;;  %v656_v2 = vadd.f32 %v9668_v18, %v9665_v19  ;;  %v659_v18 = vadd.f32 %v9690_v4, %v9687_v5  ;;  %v9701_v19 = vld [vmem:[%s9358_s12 + $0x2a0] sm:$0xff] }
  0x91   : > { %642 = vadd.xlane.f32.xlu0 %v641_v3  ;;  %v653_v3 = vadd.f32 %v9674_v24, %v9671_v25  ;;  %v9704_v24 = vld [vmem:[%s9358_s12 + $0x2a8] sm:$0xff] }
  0x94   : > { %651 = vadd.xlane.f32.xlu1 %v650_v48  ;;  %v731_v48 = vmul.f32 %v9367_v10, %v9367_v10  ;;  %v665_v10 = vadd.f32 %v9704_v24, %v9701_v19 }
  0x95   : > { %648 = vadd.xlane.f32.xlu0 %v647_v49  ;;  %v732_v49 = vmul.f32 %v9372_v12, %v9372_v12  ;;  %v733_v12 = vmul.f32 %v9383_v16, %v9383_v16 }
  0x97   : > { %v827_v25 = vadd.f32 %v732_v49, %v731_v48  ;;  %v738_v48 = vmul.f32 %v9378_v14, %v9378_v14  ;;  %v747_v14 = vmul.f32 %v9431_v34, %v9431_v34  ;;  %v746_v49 = vmul.f32 %v9412_v27, %v9412_v27 }
  0x98   : > { %657 = vadd.xlane.f32.xlu1 %v656_v2  ;;  %v735_v2 = vmul.f32 %v9361_v8, %v9361_v8  ;;  %v740_v8 = vmul.f32 %v9402_v23, %v9402_v23  ;;  %v741_v23 = vmul.f32 %v9393_v20, %v9393_v20  ;;  %v755_v27 = vmul.f32 %v9463_v46, %v9463_v46 }
  0x99   : > { %654 = vadd.xlane.f32.xlu0 %v653_v3  ;;  %v734_v3 = vmul.f32 %v9386_v17, %v9386_v17  ;;  %v743_v17 = vmul.f32 %v9415_v28, %v9415_v28 }
  0x9a   : > { %v833_v36 = vadd.f32 %v736_v37, %v735_v2  ;;  %v742_v37 = vmul.f32 %v9396_v21, %v9396_v21  ;;  %v751_v21 = vmul.f32 %v9447_v40, %v9447_v40  ;;  %v752_v2 = vmul.f32 %v9450_v41, %v9450_v41 }
  0x9b   : > { %v830_v9 = vadd.f32 %v734_v3, %v733_v12  ;;  %v756_v12 = vmul.f32 %v9466_v47, %v9466_v47  ;;  %v753_v41 = vmul.f32 %v9441_v38, %v9441_v38  ;;  %v754_v3 = vmul.f32 %v9444_v39, %v9444_v39 }
  0x9c   : > { %663 = vadd.xlane.f32.xlu1 %v662_v42  ;;  %v739_v42 = vmul.f32 %v9399_v22, %v9399_v22  ;;  %v842_v28 = vadd.f32 %v742_v37, %v741_v23  ;;  %v757_v47 = vmul.f32 %v9457_v44, %v9457_v44  ;;  %v763_v39 = vmul.f32 %v9495_v58, %v9495_v58 }
  0x9d   : > { %660 = vadd.xlane.f32.xlu0 %v659_v18  ;;  %v737_v18 = vmul.f32 %v9375_v13, %v9375_v13  ;;  %v860_v46 = vadd.f32 %v754_v3, %v753_v41  ;;  %v770_v23 = vmul.f32 %v9508_v63, %v9508_v63  ;;  %v772_v37 = vmul.f32 %v9530_v7, %v9530_v7  ;;  %v14360_v41 = vld [vmem:[#allocation33_spill] sm:$0xff] }
  0x9e   : > { %v839_v16 = vadd.f32 %v740_v8, %v739_v42  ;;  %v760_v42 = vmul.f32 %v9482_v53, %v9482_v53  ;;  %v758_v8 = vmul.f32 %v9460_v45, %v9460_v45  ;;  %v761_v53 = vmul.f32 %v9473_v50, %v9473_v50 }
  0x9f   : > { %v836_v22 = vadd.f32 %v738_v48, %v737_v18  ;;  %v762_v18 = vmul.f32 %v9476_v51, %v9476_v51  ;;  %v795_v45 = vmul.f32 %v9623_v15, %v9623_v15  ;;  %v796_v48 = vmul.f32 %v9626_v11, %v9626_v11 }
  0xa0   : > { %828 = vadd.xlane.f32.xlu1 %v827_v25  ;;  %v744_v25 = vmul.f32 %v9418_v29, %v9418_v29  ;;  %v745_v29 = vmul.f32 %v9409_v26, %v9409_v26  ;;  %v857_v26 = vadd.f32 %v752_v2, %v751_v21  ;;  %v767_v51 = vmul.f32 %v9511_v0, %v9511_v0  ;;  %v14356_v21 = vld [vmem:[#allocation10_spill] sm:$0xff] }
  0xa1   : > { %666 = vadd.xlane.f32.xlu0 %v665_v10  ;;  %v750_v10 = vmul.f32 %v9428_v33, %v9428_v33  ;;  %v759_v33 = vmul.f32 %v9479_v52, %v9479_v52  ;;  %v866_v52 = vadd.f32 %v758_v8, %v757_v47  ;;  %v872_v58 = vadd.f32 %v762_v18, %v761_v53 }
  0xa2   : > { %v845_v13 = vadd.f32 %v744_v25, %v743_v17  ;;  %v848_v34 = vadd.f32 %v746_v49, %v745_v29  ;;  %v923_v50 = vadd.f32 %v796_v48, %v795_v45  ;;  %v768_v17 = vmul.f32 %v9514_v1, %v9514_v1  ;;  %v14354_v29 = vld [vmem:[#allocation6_spill] sm:$0xff]  ;;  %v14366_v48 = vld [vmem:[#allocation31_spill] sm:$0xff] }
  0xa3   : > { %v869_v38 = vadd.f32 %v760_v42, %v759_v33  ;;  %v797_v11 = vmul.f32 %v9617_v31, %v9617_v31  ;;  %v798_v25 = vmul.f32 %v9620_v30, %v9620_v30  ;;  %v769_v1 = vmul.f32 %v9505_v62, %v9505_v62  ;;  %v14361_v33 = vld [vmem:[#allocation7_spill] sm:$0xff] }
  0xa4   : > { %834 = vadd.xlane.f32.xlu1 %v833_v36  ;;  %v748_v36 = vmul.f32 %v9434_v35, %v9434_v35  ;;  %v749_v35 = vmul.f32 %v9425_v32, %v9425_v32  ;;  %v863_v32 = vadd.f32 %v756_v12, %v755_v27  ;;  %v771_v30 = vmul.f32 %v9527_v6, %v9527_v6  ;;  %v14359_v12 = vld [vmem:[#allocation32_spill] sm:$0xff] }
  0xa5   : > { %831 = vadd.xlane.f32.xlu0 %v830_v9  ;;  %v764_v9 = vmul.f32 %v9498_v59, %v9498_v59  ;;  %v765_v59 = vmul.f32 %v9489_v56, %v9489_v56  ;;  %v881_v56 = vadd.f32 %v768_v17, %v767_v51  ;;  %v926_v0 = vadd.f32 %v798_v25, %v797_v11  ;;  %v14367_v11 = vld [vmem:[#allocation11_spill] sm:$0xff] }
  0xa6   : > { %v851_v20 = vadd.f32 %v748_v36, %v747_v14  ;;  %v854_v40 = vadd.f32 %v750_v10, %v749_v35  ;;  %v887_v62 = vadd.f32 %v772_v37, %v771_v30  ;;  %v803_v63 = vmul.f32 %v9655_v43, %v9655_v43  ;;  %v14352_v14 = vld [vmem:[#allocation29_spill] sm:$0xff]  ;;  %v14358_v10 = vld [vmem:[#allocation28_spill] sm:$0xff]  ;;  %v14370_v37 = vld [vmem:[#allocation35_spill] sm:$0xff] }
  0xa7   : > { %v875_v44 = vadd.f32 %v764_v9, %v763_v39  ;;  %v804_v36 = vmul.f32 %v14352_v14, %v14352_v14  ;;  %v774_v49 = vmul.f32 %v14354_v29, %v14354_v29  ;;  %v776_v2 = vmul.f32 %v14356_v21, %v14356_v21  ;;  %v14364_v9 = vld [vmem:[#allocation14_spill] sm:$0xff]  ;;  %v14372_v14 = vld [vmem:[#allocation16_spill] sm:$0xff] }
  0xa8   : > { %840 = vadd.xlane.f32.xlu1 %v839_v16  ;;  %v766_v16 = vmul.f32 %v9492_v57, %v9492_v57  ;;  %v799_v57 = vmul.f32 %v9639_v60, %v9639_v60  ;;  %v884_v60 = vadd.f32 %v770_v23, %v769_v1  ;;  %v808_v3 = vmul.f32 %v14360_v41, %v14360_v41  ;;  %v529_v23 = vld [vmem:[%s9358_s12 + $0x2b0] sm:$0xff] }
  0xa9   : > { %837 = vadd.xlane.f32.xlu0 %v836_v22  ;;  %v800_v22 = vmul.f32 %v9642_v61, %v9642_v61  ;;  %v801_v61 = vmul.f32 %v9633_v54, %v9633_v54  ;;  %v935_v54 = vadd.f32 %v804_v36, %v803_v63  ;;  %v777_v42 = vmul.f32 %v14361_v33, %v14361_v33  ;;  %v533_v41 = vld [vmem:[%s9358_s12 + $0x2d0] sm:$0xff]  ;;  %v531_v33 = vld [vmem:[%s9358_s12 + $0x2c0] sm:$0xff] }
  0xaa   : > { %v878_v15 = vadd.f32 %v766_v16, %v765_v59  ;;  %v812_v51 = vmul.f32 %v9690_v4, %v9690_v4  ;;  %v781_v25 = vmul.f32 %v14367_v11, %v14367_v11  ;;  %v530_v4 = vld [vmem:[%s9358_s12 + $0x2b8] sm:$0xff]  ;;  %v786_v36 = vmul.f32 %v14372_v14, %v14372_v14 }
  0xab   : > { %v929_v31 = vadd.f32 %v800_v22, %v799_v57  ;;  %v817_v21 = vmul.f32 %v529_v23, %v529_v23 }
  0xac   : > { %846 = vadd.xlane.f32.xlu1 %v845_v13  ;;  %v802_v13 = vmul.f32 %v9636_v55, %v9636_v55 }
  0xad   : > { %843 = vadd.xlane.f32.xlu0 %v842_v28  ;;  %v14353_v28 = vld [vmem:[#allocation5_spill] sm:$0xff] }
  0xae   : > { %v932_v6 = vadd.f32 %v802_v13, %v801_v61  ;;  %v773_v7 = vmul.f32 %v14353_v28, %v14353_v28  ;;  %v668_v13 = vadd.f32 %v530_v4, %v529_v23  ;;  %v538_v23 = vld [vmem:[%s9358_s12 + $0x2f8] sm:$0xff] }
  0xb0   : > { %852 = vadd.xlane.f32.xlu1 %v851_v20  ;;  %v14355_v20 = vld [vmem:[#allocation9_spill] sm:$0xff]  ;;  %v890_v43 = vadd.f32 %v774_v49, %v773_v7  ;;  %v14374_v49 = vld [vmem:[#allocation18_spill] sm:$0xff] }
  0xb1   : > { %849 = vadd.xlane.f32.xlu0 %v848_v34  ;;  %v775_v55 = vmul.f32 %v14355_v20, %v14355_v20  ;;  %v14357_v34 = vld [vmem:[#allocation27_spill] sm:$0xff]  ;;  %v14373_v7 = vld [vmem:[#allocation17_spill] sm:$0xff] }
  0xb2   : > { %v805_v35 = vmul.f32 %v14357_v34, %v14357_v34  ;;  %v783_v29 = vmul.f32 %v14373_v7, %v14373_v7 }
  0xb3   : > { %v893_v27 = vadd.f32 %v776_v2, %v775_v55  ;;  %v818_v2 = vmul.f32 %v530_v4, %v530_v4 }
  0xb4   : > { %858 = vadd.xlane.f32.xlu1 %v857_v26  ;;  %v806_v26 = vmul.f32 %v14358_v10, %v14358_v10  ;;  %v816_v10 = vmul.f32 %v9704_v24, %v9704_v24  ;;  %v14376_v24 = vld [vmem:[#allocation20_spill] sm:$0xff] }
  0xb5   : > { %855 = vadd.xlane.f32.xlu0 %v854_v40  ;;  %v807_v40 = vmul.f32 %v14359_v12, %v14359_v12 }
  0xb7   : > { %v941_v8 = vadd.f32 %v808_v3, %v807_v40  ;;  %v534_v3 = vld [vmem:[%s9358_s12 + $0x2d8] sm:$0xff] }
  0xb8   : > { %864 = vadd.xlane.f32.xlu1 %v863_v32  ;;  %v938_v32 = vadd.f32 %v806_v26, %v805_v35  ;;  %v815_v35 = vmul.f32 %v9701_v19, %v9701_v19  ;;  %v14375_v19 = vld [vmem:[#allocation19_spill] sm:$0xff] }
  0xb9   : > { %861 = vadd.xlane.f32.xlu0 %v860_v46  ;;  %v14362_v46 = vld [vmem:[#allocation8_spill] sm:$0xff] }
  0xba   : > { %v778_v47 = vmul.f32 %v14362_v46, %v14362_v46  ;;  %v953_v40 = vadd.f32 %v816_v10, %v815_v35  ;;  %v674_v46 = vadd.f32 %v534_v3, %v533_v41 }
  0xbc   : > { %870 = vadd.xlane.f32.xlu1 %v869_v38  ;;  %v14363_v38 = vld [vmem:[#allocation13_spill] sm:$0xff]  ;;  %v896_v18 = vadd.f32 %v778_v47, %v777_v42  ;;  %v532_v42 = vld [vmem:[%s9358_s12 + $0x2c8] sm:$0xff]  ;;  %v789_v47 = vmul.f32 %v14375_v19, %v14375_v19 }
  0xbd   : > { %867 = vadd.xlane.f32.xlu0 %v866_v52  ;;  %v779_v39 = vmul.f32 %v14363_v38, %v14363_v38  ;;  %v780_v52 = vmul.f32 %v14364_v9, %v14364_v9  ;;  %v14377_v9 = vld [vmem:[#allocation21_spill] sm:$0xff]  ;;  %v820_v11 = vmul.f32 %v532_v42, %v532_v42 }
  0xbf   : > { %v899_v16 = vadd.f32 %v780_v52, %v779_v39  ;;  %v671_v39 = vadd.f32 %v532_v42, %v531_v33  ;;  %v787_v52 = vmul.f32 %v14377_v9, %v14377_v9 }
  0xc0   : > { %876 = vadd.xlane.f32.xlu1 %v875_v44  ;;  %v14365_v44 = vld [vmem:[#allocation30_spill] sm:$0xff] }
  0xc1   : > { %873 = vadd.xlane.f32.xlu0 %v872_v58  ;;  %v809_v45 = vmul.f32 %v14365_v44, %v14365_v44  ;;  %v810_v58 = vmul.f32 %v14366_v48, %v14366_v48 }
  0xc4   : > { %924 = vadd.xlane.f32.xlu1 %v923_v50  ;;  %v811_v50 = vmul.f32 %v9687_v5, %v9687_v5 }
  0xc5   : > { %879 = vadd.xlane.f32.xlu0 %v878_v15  ;;  %v944_v15 = vadd.f32 %v810_v58, %v809_v45  ;;  %v821_v58 = vmul.f32 %v533_v41, %v533_v41 }
  0xc8   : > { %882 = vadd.xlane.f32.xlu1 %v881_v56  ;;  %v14368_v56 = vld [vmem:[#allocation12_spill] sm:$0xff] }
  0xc9   : > { %927 = vadd.xlane.f32.xlu0 %v926_v0  ;;  %v782_v57 = vmul.f32 %v14368_v56, %v14368_v56  ;;  %v947_v0 = vadd.f32 %v812_v51, %v811_v50 }
  0xcb   : > { %v902_v5 = vadd.f32 %v782_v57, %v781_v25 }
  0xcc   : > { %930 = vadd.xlane.f32.xlu1 %v929_v31  ;;  %v14369_v31 = vld [vmem:[#allocation34_spill] sm:$0xff] }
  0xcd   : > { %885 = vadd.xlane.f32.xlu0 %v884_v60  ;;  %v813_v30 = vmul.f32 %v14369_v31, %v14369_v31  ;;  %v814_v60 = vmul.f32 %v14370_v37, %v14370_v37  ;;  %v535_v31 = vld [vmem:[%s9358_s12 + $0x2e0] sm:$0xff] }
  0xce   : > { %v823_v10 = vmul.f32 %v535_v31, %v535_v31 }
  0xcf   : > { %v950_v28 = vadd.f32 %v814_v60, %v813_v30  ;;  %v536_v30 = vld [vmem:[%s9358_s12 + $0x2e8] sm:$0xff]  ;;  %v14379_v60 = vld [vmem:[#allocation23_spill] sm:$0xff] }
  0xd0   : > { %888 = vadd.xlane.f32.xlu1 %v887_v62  ;;  %v14371_v62 = vld [vmem:[#allocation15_spill] sm:$0xff] }
  0xd1   : > { %933 = vadd.xlane.f32.xlu0 %v932_v6  ;;  %v785_v63 = vmul.f32 %v14371_v62, %v14371_v62  ;;  %v14380_v62 = vld [vmem:[#allocation24_spill] sm:$0xff] }
  0xd3   : > { %v908_v55 = vadd.f32 %v786_v36, %v785_v63  ;;  %v794_v63 = vmul.f32 %v14380_v62, %v14380_v62  ;;  %v677_v36 = vadd.f32 %v536_v30, %v535_v31 }
  0xd4   : > { %936 = vadd.xlane.f32.xlu1 %v935_v54  ;;  %v784_v54 = vmul.f32 %v14374_v49, %v14374_v49 }
  0xd5   : > { %891 = vadd.xlane.f32.xlu0 %v890_v43 }
  0xd6   : > { %v905_v34 = vadd.f32 %v784_v54, %v783_v29  ;;  %v14382_v29 = vld [vmem:[#allocation26_spill] sm:$0xff] }
  0xd7   : > { %v792_v49 = vmul.f32 %v14382_v29, %v14382_v29 }
  0xd8   : > { %894 = vadd.xlane.f32.xlu1 %v893_v27  ;;  %v956_v27 = vadd.f32 %v818_v2, %v817_v21  ;;  %v826_v2 = vmul.f32 %v538_v23, %v538_v23 }
  0xd9   : > { %939 = vadd.xlane.f32.xlu0 %v938_v32  ;;  %v9832_v53 = vpop.xlane.xlu1 %546 }
  0xda   : > { %v9838_v59 = vpop.xlane.xlu0 %540 }
  0xdc   : > { %942 = vadd.xlane.f32.xlu1 %v941_v8  ;;  %v790_v8 = vmul.f32 %v14376_v24, %v14376_v24 }
  0xdd   : > { %897 = vadd.xlane.f32.xlu0 %v896_v18  ;;  %v9844_v17 = vpop.xlane.xlu1 %549  ;;  %v14378_v18 = vld [vmem:[#allocation22_spill] sm:$0xff] }
  0xde   : > { %v9850_v22 = vpop.xlane.xlu0 %543  ;;  %v788_v44 = vmul.f32 %v14378_v18, %v14378_v18  ;;  %v914_v48 = vadd.f32 %v790_v8, %v789_v47 }
  0xdf   : > { %v9983_v62 = vmul.f32 0.0051020407, %v9850_v22 }
  0xe0   : > { %900 = vadd.xlane.f32.xlu1 %v899_v16  ;;  %v822_v16 = vmul.f32 %v534_v3, %v534_v3  ;;  %v911_v51 = vadd.f32 %v788_v44, %v787_v52 }
  0xe1   : > { %945 = vadd.xlane.f32.xlu0 %v944_v15  ;;  %v9852_v1 = vpop.xlane.xlu1 %555  ;;  %v819_v15 = vmul.f32 %v531_v33, %v531_v33 }
  0xe2   : > { %v9860_v61 = vpop.xlane.xlu0 %552  ;;  %v962_v56 = vadd.f32 %v822_v16, %v821_v58 }
  0xe4   : > { %948 = vadd.xlane.f32.xlu1 %v947_v0  ;;  %v959_v0 = vadd.f32 %v820_v11, %v819_v15 }
  0xe5   : > { %903 = vadd.xlane.f32.xlu0 %v902_v5  ;;  %v9866_v6 = vpop.xlane.xlu1 %561  ;;  %v537_v5 = vld [vmem:[%s9358_s12 + $0x2f0] sm:$0xff] }
  0xe6   : > { %v9872_v20 = vpop.xlane.xlu0 %558  ;;  %v680_v37 = vadd.f32 %v538_v23, %v537_v5  ;;  %v825_v21 = vmul.f32 %v537_v5, %v537_v5  ;;  %v9971_v5 = vmul.f32 0.0051020407, %v9838_v59 }
  0xe8   : > { %669 = vadd.xlane.f32.xlu1 %v668_v13  ;;  %v793_v13 = vmul.f32 %v14379_v60, %v14379_v60  ;;  %v968_v41 = vadd.f32 %v826_v2, %v825_v21 }
  0xe9   : > { %951 = vadd.xlane.f32.xlu0 %v950_v28  ;;  %v9874_v43 = vpop.xlane.xlu1 %567  ;;  %v14381_v28 = vld [vmem:[#allocation25_spill] sm:$0xff] }
  0xea   : > { %v9880_v26 = vpop.xlane.xlu0 %564  ;;  %v791_v7 = vmul.f32 %v14381_v28, %v14381_v28  ;;  %v9988_v28 = vmul.f32 0.0051020407, %v9860_v61  ;;  %v9999_v61 = vmul.f32 0.0051020407, %v9872_v20 }
  0xec   : > { %909 = vadd.xlane.f32.xlu1 %v908_v55  ;;  %v920_v55 = vadd.f32 %v794_v63, %v793_v13  ;;  %v917_v35 = vadd.f32 %v792_v49, %v791_v7  ;;  %v9991_v49 = vmul.f32 0.0051020407, %v9844_v17 }
  0xed   : > { %906 = vadd.xlane.f32.xlu0 %v905_v34  ;;  %v9882_v12 = vpop.xlane.xlu1 %573 }
  0xee   : > { %v9886_v32 = vpop.xlane.xlu0 %570  ;;  %v1022_v17 = vmul.f32 %v9991_v49, %v9991_v49 }
  0xf0   : > { %957 = vadd.xlane.f32.xlu1 %v956_v27  ;;  %v824_v27 = vmul.f32 %v536_v30, %v536_v30  ;;  %v9976_v30 = vmul.f32 0.0051020407, %v9832_v53 }
  0xf1   : > { %954 = vadd.xlane.f32.xlu0 %v953_v40  ;;  %v9894_v38 = vpop.xlane.xlu1 %579 }
  0xf2   : > { %v9900_v45 = vpop.xlane.xlu0 %576  ;;  %v965_v33 = vadd.f32 %v824_v27, %v823_v10  ;;  %v1021_v59 = vmul.f32 %v9976_v30, %v9976_v30  ;;  %v1023_v10 = vmul.f32 %v9988_v28, %v9988_v28 }
  0xf4   : > { %675 = vadd.xlane.f32.xlu1 %v674_v46 }
  0xf5   : > { %672 = vadd.xlane.f32.xlu0 %v671_v39  ;;  %v9902_v50 = vpop.xlane.xlu1 %585 }
  0xf6   : > { %v9904_v25 = vpop.xlane.xlu0 %582 }
  0xf8   : > { %915 = vadd.xlane.f32.xlu1 %v914_v48 }
  0xf9   : > { %912 = vadd.xlane.f32.xlu0 %v911_v51  ;;  %v9906_v57 = vpop.xlane.xlu1 %591  ;;  %v14260_v51 = vmov 0  }
  0xfa   : > { %v9910_v4 = vpop.xlane.xlu0 %588  ;;  %7799 = vset.pattern.permute.xlu1 %v14260_v51  ;;  %7798 = vset.pattern.permute.xlu0 %v14260_v51 }
  0xfc   : > { %963 = vadd.xlane.f32.xlu1 %v962_v56 }
  0xfd   : > { %960 = vadd.xlane.f32.xlu0 %v959_v0  ;;  %v9918_v14 = vpop.xlane.xlu1 %597 }
  0xfe   : > { %v9924_v54 = vpop.xlane.xlu0 %594 }
 0x100   : > { %681 = vadd.xlane.f32.xlu1 %v680_v37  ;;  %v1019_v37 = vmul.f32 %v9971_v5, %v9971_v5 }
 0x101   : > { %678 = vadd.xlane.f32.xlu0 %v677_v36  ;;  %v9926_v34 = vpop.xlane.xlu1 %603 }
 0x102   : > { %v9928_v40 = vpop.xlane.xlu0 %600 }
 0x104   : > { %921 = vadd.xlane.f32.xlu1 %v920_v55  ;;  %v1020_v55 = vmul.f32 %v9983_v62, %v9983_v62 }
 0x105   : > { %918 = vadd.xlane.f32.xlu0 %v917_v35  ;;  %v9930_v3 = vpop.xlane.xlu1 %609 }
 0x106   : > { %v9932_v42 = vpop.xlane.xlu0 %606 }
 0x108   : > { %969 = vadd.xlane.f32.xlu1 %v968_v41 }
 0x109   : > { %966 = vadd.xlane.f32.xlu0 %v965_v33  ;;  %v9934_v46 = vpop.xlane.xlu1 %615 }
 0x10a   : > { %v9936_v19 = vpop.xlane.xlu0 %612 }
 0x10d   : > { %v9938_v47 = vpop.xlane.xlu1 %621 }
 0x10e   : > { %v9940_v24 = vpop.xlane.xlu0 %618 }
 0x111   : > { %v9942_v8 = vpop.xlane.xlu1 %627 }
 0x112   : > { %v9944_v39 = vpop.xlane.xlu0 %624 }
 0x115   : > { %v9946_v9 = vpop.xlane.xlu1 %633 }
 0x116   : > { %v9948_v52 = vpop.xlane.xlu0 %630 }
 0x119   : > { %v9950_v18 = vpop.xlane.xlu1 %639 }
 0x11a   : > { %v9952_v44 = vpop.xlane.xlu0 %636 }
 0x11d   : > { %v9954_v48 = vpop.xlane.xlu1 %645 }
 0x11e   : > { %v9956_v58 = vpop.xlane.xlu0 %642 }
 0x121   : > { %v9958_v16 = vpop.xlane.xlu1 %651 }
 0x122   : > { %v9962_v15 = vpop.xlane.xlu0 %648 }
 0x125   : > { %v9964_v11 = vpop.xlane.xlu1 %657 }
 0x126   : > { %v9966_v56 = vpop.xlane.xlu0 %654 }
 0x129   : > { %v9968_v0 = vpop.xlane.xlu1 %663 }
 0x12a   : > { %v9973_v23 = vpop.xlane.xlu0 %660 }
 0x12d   : > { %v829_v31 = vpop.xlane.xlu1 %828 }
 0x12e   : > { %v971_v60 = vmul.f32 0.0051020407, %v829_v31  ;;  %v9980_v13 = vpop.xlane.xlu0 %666  ;;  %v10004_v31 = vmul.f32 0.0051020407, %v9852_v1  ;;  %v1025_v1 = vmul.f32 %v9999_v61, %v9999_v61 }
 0x130   : > { %v1067_v63 = vsub.f32 %v971_v60, %v1019_v37 }
 0x131   : > { %v835_v36 = vpop.xlane.xlu1 %834 }
 0x132   : > { %v1163_v53 = vadd.f32 1e-05, %v1067_v63  ;;  %v973_v7 = vmul.f32 0.0051020407, %v835_v36  ;;  %v832_v29 = vpop.xlane.xlu0 %831  ;;  %v10007_v36 = vmul.f32 0.0051020407, %v9866_v6  ;;  %v1024_v6 = vmul.f32 %v10004_v31, %v10004_v31 }
 0x133   : > { %v972_v21 = vmul.f32 0.0051020407, %v832_v29 }
 0x134   : > { %7832 = vrsqrt.f32 %v1163_v53  ;;  %v1069_v22 = vsub.f32 %v973_v7, %v1021_v59  ;;  %v10017_v53 = vmul.f32 0.0051020407, %v9880_v26 }
 0x135   : > { %v1068_v2 = vsub.f32 %v972_v21, %v1020_v55  ;;  %v841_v35 = vpop.xlane.xlu1 %840 }
 0x136   : > { %v1165_v27 = vadd.f32 1e-05, %v1069_v22  ;;  %v975_v41 = vmul.f32 0.0051020407, %v841_v35  ;;  %v838_v33 = vpop.xlane.xlu0 %837  ;;  %v1115_v35 = vld [vmem:[%s10012_s16] sm:$0xff]  ;;  %v1027_v26 = vmul.f32 %v10017_v53, %v10017_v53 }
 0x137   : > { %v1164_v37 = vadd.f32 1e-05, %v1068_v2  ;;  %v974_v60 = vmul.f32 0.0051020407, %v838_v33 }
 0x138   : > { %7834 = vrsqrt.f32 %v1165_v27  ;;  %v1071_v63 = vsub.f32 %v975_v41, %v1023_v10  ;;  %v1026_v10 = vmul.f32 %v10007_v36, %v10007_v36 }
 0x139   : > { %7836 = vrsqrt.f32 %v1164_v37  ;;  %v1070_v59 = vsub.f32 %v974_v60, %v1022_v17  ;;  %v847_v20 = vpop.xlane.xlu1 %846  ;;  %v10027_v17 = vmul.f32 0.0051020407, %v9886_v32 }
 0x13a   : > { %v1167_v7 = vadd.f32 1e-05, %v1071_v63  ;;  %v977_v29 = vmul.f32 0.0051020407, %v847_v20  ;;  %v844_v55 = vpop.xlane.xlu0 %843 }
 0x13b   : > { %v1166_v21 = vadd.f32 1e-05, %v1070_v59  ;;  %v976_v22 = vmul.f32 0.0051020407, %v844_v55  ;;  %v10030_v59 = vmul.f32 0.0051020407, %v9874_v43  ;;  %v1029_v43 = vmul.f32 %v10027_v17, %v10027_v17 }
 0x13c   : > { %7838 = vrsqrt.f32 %v1167_v7  ;;  %v1073_v2 = vsub.f32 %v977_v29, %v1025_v1  ;;  %v10035_v55 = vmul.f32 0.0051020407, %v9900_v45 }
 0x13d   : > { %7840 = vrsqrt.f32 %v1166_v21  ;;  %v1072_v27 = vsub.f32 %v976_v22, %v1024_v6  ;;  %v853_v41 = vpop.xlane.xlu1 %852  ;;  %v1116_v22 = vld [vmem:[%s10012_s16 + $0x8] sm:$0xff]  ;;  %v1028_v45 = vmul.f32 %v10030_v59, %v10030_v59 }
 0x13e   : > { %v7833_v33 = vpop.eup %7832  ;;  %v1169_v37 = vadd.f32 1e-05, %v1073_v2  ;;  %v979_v60 = vmul.f32 0.0051020407, %v853_v41  ;;  %v850_v63 = vpop.xlane.xlu0 %849 }
 0x13f   : > { %v1168_v20 = vadd.f32 1e-05, %v1072_v27  ;;  %v978_v1 = vmul.f32 0.0051020407, %v850_v63  ;;  %v10032_v7 = vmul.f32 %v7833_v33, %v1115_v35  ;;  %v1117_v33 = vld [vmem:[%s10012_s16 + $0x10] sm:$0xff] }
 0x140   : > { %7842 = vrsqrt.f32 %v1169_v37  ;;  %v1075_v29 = vsub.f32 %v979_v60, %v1027_v26 }
 0x141   : > { %14383 = vst [vmem:[#allocation29_spill] sm:$0xff] %v10032_v7  ;;  %7844 = vrsqrt.f32 %v1168_v20  ;;  %v1074_v6 = vsub.f32 %v978_v1, %v1026_v10  ;;  %v859_v32 = vpop.xlane.xlu1 %858  ;;  %v1307_v21 = vmul.f32 %v10032_v7, %v9971_v5  ;;  %v10046_v10 = vmul.f32 0.0051020407, %v9882_v12  ;;  %v1119_v1 = vld [vmem:[%s10012_s16 + $0x20] sm:$0xff] }
 0x142   : > { %v7835_v2 = vpop.eup %7834  ;;  %v1171_v27 = vadd.f32 1e-05, %v1075_v29  ;;  %v981_v35 = vmul.f32 0.0051020407, %v859_v32  ;;  %v856_v41 = vpop.xlane.xlu0 %855  ;;  %v10050_v5 = vmul.f32 0.0051020407, %v9894_v38  ;;  %v1031_v29 = vmul.f32 %v10035_v55, %v10035_v55 }
 0x143   : > { %v7837_v26 = vpop.eup %7836  ;;  %v1170_v37 = vadd.f32 1e-05, %v1074_v6  ;;  %v980_v60 = vmul.f32 0.0051020407, %v856_v41  ;;  %1403 = vrot.lane.b32.xlu0 %v1307_v21, %s9122_s17  ;;  %v10058_v12 = vmul.f32 0.0051020407, %v9904_v25 }
 0x144   : > { %7846 = vrsqrt.f32 %v1171_v27  ;;  %v1077_v63 = vsub.f32 %v981_v35, %v1029_v43  ;;  %v10052_v20 = vmul.f32 %v7837_v26, %v1116_v22  ;;  %v10062_v43 = vmul.f32 %v7835_v2, %v1117_v33  ;;  %v1121_v2 = vld [vmem:[%s10012_s16 + $0x30] sm:$0xff] }
 0x145   : > { %7848 = vrsqrt.f32 %v1170_v37  ;;  %v1076_v6 = vsub.f32 %v980_v60, %v1028_v45  ;;  %v865_v32 = vpop.xlane.xlu1 %864  ;;  %v1030_v35 = vmul.f32 %v10046_v10, %v10046_v10  ;;  %v10069_v45 = vld [vmem:[%s10012_s16 + $0x18] sm:$0xff]  ;;  %v1032_v37 = vmul.f32 %v10050_v5, %v10050_v5 }
 0x146   : > { %v7839_v41 = vpop.eup %7838  ;;  %v1173_v21 = vadd.f32 1e-05, %v1077_v63  ;;  %v983_v38 = vmul.f32 0.0051020407, %v865_v32  ;;  %v862_v51 = vpop.xlane.xlu0 %861  ;;  %v1308_v22 = vmul.f32 %v10052_v20, %v9983_v62  ;;  %14384 = vst [vmem:[#allocation5_spill] sm:$0xff] %v10069_v45  ;;  %v1033_v33 = vmul.f32 %v10058_v12, %v10058_v12 }
 0x147   : > { %v7841_v27 = vpop.eup %7840  ;;  %v1172_v26 = vadd.f32 1e-05, %v1076_v6  ;;  %v982_v25 = vmul.f32 0.0051020407, %v862_v51  ;;  %v10066_v7 = vmul.f32 %v7839_v41, %v1119_v1  ;;  %v10074_v60 = vmul.f32 0.0051020407, %v9910_v4 }
 0x148   : > { %7850 = vrsqrt.f32 %v1173_v21  ;;  %v1079_v62 = vsub.f32 %v983_v38, %v1031_v29  ;;  %1405 = vrot.lane.b32.xlu1 %v1308_v22, %s9122_s17  ;;  %v1309_v29 = vmul.f32 %v10062_v43, %v9976_v30  ;;  %v10085_v21 = vmul.f32 %v7841_v27, %v10069_v45  ;;  %v1120_v38 = vld [vmem:[%s10012_s16 + $0x28] sm:$0xff] }
 0x149   : > { %7852 = vrsqrt.f32 %v1172_v26  ;;  %v1078_v51 = vsub.f32 %v982_v25, %v1030_v35  ;;  %v871_v63 = vpop.xlane.xlu1 %870  ;;  %v1311_v1 = vmul.f32 %v10066_v7, %v9988_v28  ;;  %v10089_v26 = vmul.f32 0.0051020407, %v9902_v50 }
 0x14a   : > { %v7843_v6 = vpop.eup %7842  ;;  %v1175_v32 = vadd.f32 1e-05, %v1079_v62  ;;  %v985_v41 = vmul.f32 0.0051020407, %v871_v63  ;;  %v868_v4 = vpop.xlane.xlu0 %867  ;;  %v10095_v62 = vmul.f32 0.0051020407, %v9906_v57  ;;  %v1035_v30 = vmul.f32 %v10074_v60, %v10074_v60 }
 0x14b   : > { %v7845_v22 = vpop.eup %7844  ;;  %v1174_v35 = vadd.f32 1e-05, %v1078_v51  ;;  %v984_v25 = vmul.f32 0.0051020407, %v868_v4  ;;  %1411 = vrot.lane.b32.xlu0 %v1311_v1, %s9122_s17  ;;  %v10092_v28 = vmul.f32 %v7843_v6, %v1121_v2  ;;  %v1123_v63 = vld [vmem:[%s10012_s16 + $0x40] sm:$0xff] }
 0x14c   : > { %7854 = vrsqrt.f32 %v1175_v32  ;;  %v1081_v27 = vsub.f32 %v985_v41, %v1033_v33  ;;  %1407 = vrot.lane.b32.xlu1 %v1309_v29, %s9122_s17  ;;  %v10102_v50 = vmul.f32 0.0051020407, %v9952_v44  ;;  %v1310_v33 = vmul.f32 %v10085_v21, %v9991_v49 }
 0x14d   : > { %7856 = vrsqrt.f32 %v1174_v35  ;;  %v1080_v51 = vsub.f32 %v984_v25, %v1032_v37  ;;  %v877_v1 = vpop.xlane.xlu1 %876  ;;  %v1313_v2 = vmul.f32 %v10092_v28, %v9999_v61  ;;  %v10108_v32 = vmul.f32 %v7845_v22, %v1120_v38  ;;  %v10116_v61 = vld [vmem:[%s10012_s16 + $0x38] sm:$0xff]  ;;  %v1125_v38 = vld [vmem:[%s10012_s16 + $0x50] sm:$0xff] }
 0x14e   : > { %v7847_v57 = vpop.eup %7846  ;;  %v1177_v6 = vadd.f32 1e-05, %v1081_v27  ;;  %v987_v4 = vmul.f32 0.0051020407, %v877_v1  ;;  %v874_v45 = vpop.xlane.xlu0 %873  ;;  %v1034_v44 = vmul.f32 %v10089_v26, %v10089_v26  ;;  %v1036_v25 = vmul.f32 %v10095_v62, %v10095_v62 }
 0x14f   : > { %v7849_v41 = vpop.eup %7848  ;;  %v1176_v29 = vadd.f32 1e-05, %v1080_v51  ;;  %v986_v37 = vmul.f32 0.0051020407, %v874_v45  ;;  %1415 = vrot.lane.b32.xlu0 %v1313_v2, %s9122_s17  ;;  %v10113_v35 = vmul.f32 %v7847_v57, %v1123_v63  ;;  %v10121_v27 = vmul.f32 0.0051020407, %v9924_v54 }
 0x150   : > { %7858 = vrsqrt.f32 %v1177_v6  ;;  %v1083_v49 = vsub.f32 %v987_v4, %v1035_v30  ;;  %1409 = vrot.lane.b32.xlu1 %v1310_v33, %s9122_s17  ;;  %v1051_v45 = vmul.f32 %v10102_v50, %v10102_v50  ;;  %v1312_v30 = vmul.f32 %v10108_v32, %v10004_v31  ;;  %v1124_v4 = vld [vmem:[%s10012_s16 + $0x48] sm:$0xff] }
 0x151   : > { %7860 = vrsqrt.f32 %v1176_v29  ;;  %v1082_v22 = vsub.f32 %v986_v37, %v1034_v44  ;;  %v925_v63 = vpop.xlane.xlu1 %924  ;;  %v1315_v51 = vmul.f32 %v10113_v35, %v10017_v53  ;;  %v10132_v6 = vmul.f32 %v7849_v41, %v10116_v61 }
 0x152   : > { %v7851_v1 = vpop.eup %7850  ;;  %v1179_v2 = vadd.f32 1e-05, %v1083_v49  ;;  %v1003_v57 = vmul.f32 0.0051020407, %v925_v63  ;;  %v880_v54 = vpop.xlane.xlu0 %879  ;;  %v10136_v29 = vmul.f32 0.0051020407, %v9950_v18  ;;  %v1037_v31 = vmul.f32 %v10121_v27, %v10121_v27 }
 0x153   : > { %v7853_v33 = vpop.eup %7852  ;;  %v1178_v44 = vadd.f32 1e-05, %v1082_v22  ;;  %v988_v37 = vmul.f32 0.0051020407, %v880_v54  ;;  %1419 = vrot.lane.b32.xlu0 %v1315_v51, %s9122_s17  ;;  %v10139_v53 = vmul.f32 %v7851_v1, %v1125_v38  ;;  %v10142_v49 = vmul.f32 0.0051020407, %v9918_v14 }
 0x154   : > { %7862 = vrsqrt.f32 %v1179_v2  ;;  %v1099_v41 = vsub.f32 %v1003_v57, %v1051_v45  ;;  %1413 = vrot.lane.b32.xlu1 %v1312_v30, %s9122_s17  ;;  %v10148_v63 = vld [vmem:[%s10012_s16 + $0x60] sm:$0xff]  ;;  %v10151_v18 = vmul.f32 0.0051020407, %v9956_v58  ;;  %v1314_v45 = vmul.f32 %v10132_v6, %v10007_v36 }
 0x155   : > { %14385 = vst [vmem:[#allocation6_spill] sm:$0xff] %v10139_v53  ;;  %14386 = vst [vmem:[#allocation9_spill] sm:$0xff] %v10148_v63  ;;  %7864 = vrsqrt.f32 %v1178_v44  ;;  %v1084_v22 = vsub.f32 %v988_v37, %v1036_v25  ;;  %v883_v38 = vpop.xlane.xlu1 %882  ;;  %v1317_v14 = vmul.f32 %v10139_v53, %v10027_v17  ;;  %v10157_v57 = vmul.f32 %v7853_v33, %v1124_v4  ;;  %v10166_v37 = vld [vmem:[%s10012_s16 + $0x58] sm:$0xff]  ;;  %v10175_v33 = vld [vmem:[%s10012_s16 + $0x70] sm:$0xff] }
 0x156   : > { %v7855_v51 = vpop.eup %7854  ;;  %v1195_v1 = vadd.f32 1e-05, %v1099_v41  ;;  %v989_v54 = vmul.f32 0.0051020407, %v883_v38  ;;  %v928_v2 = vpop.xlane.xlu0 %927  ;;  %v1052_v58 = vmul.f32 %v10136_v29, %v10136_v29  ;;  %v1038_v41 = vmul.f32 %v10142_v49, %v10142_v49  ;;  %14387 = vst [vmem:[#allocation10_spill] sm:$0xff] %v10175_v33 }
 0x157   : > { %v7857_v30 = vpop.eup %7856  ;;  %v1180_v44 = vadd.f32 1e-05, %v1084_v22  ;;  %v1004_v25 = vmul.f32 0.0051020407, %v928_v2  ;;  %1423 = vrot.lane.b32.xlu0 %v1317_v14, %s9122_s17  ;;  %v10163_v17 = vmul.f32 %v7855_v51, %v10148_v63  ;;  %v10171_v36 = vmul.f32 0.0051020407, %v9928_v40 }
 0x158   : > { %7866 = vrsqrt.f32 %v1195_v1  ;;  %v1085_v4 = vsub.f32 %v989_v54, %v1037_v31  ;;  %1417 = vrot.lane.b32.xlu1 %v1314_v45, %s9122_s17  ;;  %v1053_v22 = vmul.f32 %v10151_v18, %v10151_v18  ;;  %v1316_v31 = vmul.f32 %v10157_v57, %v10030_v59  ;;  %v10187_v54 = vld [vmem:[%s10012_s16 + $0x68] sm:$0xff] }
 0x159   : > { %7868 = vrsqrt.f32 %v1180_v44  ;;  %v1100_v38 = vsub.f32 %v1004_v25, %v1052_v58  ;;  %v931_v14 = vpop.xlane.xlu1 %930  ;;  %v1319_v51 = vmul.f32 %v10163_v17, %v10035_v55  ;;  %v10184_v1 = vmul.f32 %v7857_v30, %v10166_v37  ;;  %14388 = vst [vmem:[#allocation27_spill] sm:$0xff] %v10187_v54 }
 0x15a   : > { %v7859_v2 = vpop.eup %7858  ;;  %v1181_v63 = vadd.f32 1e-05, %v1085_v4  ;;  %v1005_v40 = vmul.f32 0.0051020407, %v931_v14  ;;  %v886_v53 = vpop.xlane.xlu0 %885  ;;  %v10190_v58 = vmul.f32 0.0051020407, %v9954_v48  ;;  %v1039_v59 = vmul.f32 %v10171_v36, %v10171_v36 }
 0x15b   : > { %v7861_v45 = vpop.eup %7860  ;;  %v1196_v44 = vadd.f32 1e-05, %v1100_v38  ;;  %v990_v25 = vmul.f32 0.0051020407, %v886_v53  ;;  %1427 = vrot.lane.b32.xlu0 %v1319_v51, %s9122_s17  ;;  %v10194_v55 = vmul.f32 %v7859_v2, %v10175_v33  ;;  %v10197_v4 = vmul.f32 0.0051020407, %v9926_v34 }
 0x15c   : > { %7870 = vrsqrt.f32 %v1181_v63  ;;  %v1101_v30 = vsub.f32 %v1005_v40, %v1053_v22  ;;  %1421 = vrot.lane.b32.xlu1 %v1316_v31, %s9122_s17  ;;  %v10203_v14 = vld [vmem:[%s10012_s16 + $0x80] sm:$0xff]  ;;  %v10206_v48 = vmul.f32 0.0051020407, %v9962_v15  ;;  %v1318_v22 = vmul.f32 %v10184_v1, %v10046_v10 }
 0x15d   : > { %14389 = vst [vmem:[#allocation28_spill] sm:$0xff] %v10194_v55  ;;  %14390 = vst [vmem:[#allocation32_spill] sm:$0xff] %v10203_v14  ;;  %7872 = vrsqrt.f32 %v1196_v44  ;;  %v1086_v53 = vsub.f32 %v990_v25, %v1038_v41  ;;  %v889_v38 = vpop.xlane.xlu1 %888  ;;  %v1321_v34 = vmul.f32 %v10194_v55, %v10058_v12  ;;  %v10213_v40 = vmul.f32 %v7861_v45, %v10187_v54  ;;  %v10222_v25 = vld [vmem:[%s10012_s16 + $0x78] sm:$0xff] }
 0x15e   : > { %v7863_v51 = vpop.eup %7862  ;;  %v1197_v2 = vadd.f32 1e-05, %v1101_v30  ;;  %v991_v33 = vmul.f32 0.0051020407, %v889_v38  ;;  %v934_v63 = vpop.xlane.xlu0 %933  ;;  %v1054_v31 = vmul.f32 %v10190_v58, %v10190_v58  ;;  %v1040_v30 = vmul.f32 %v10197_v4, %v10197_v4 }
 0x15f   : > { %v7865_v15 = vpop.eup %7864  ;;  %v1182_v41 = vadd.f32 1e-05, %v1086_v53  ;;  %v1006_v44 = vmul.f32 0.0051020407, %v934_v63  ;;  %1431 = vrot.lane.b32.xlu0 %v1321_v34, %s9122_s17  ;;  %v10219_v12 = vmul.f32 %v7863_v51, %v10203_v14  ;;  %v10227_v10 = vmul.f32 0.0051020407, %v9932_v42 }
 0x160   : > { %7874 = vrsqrt.f32 %v1197_v2  ;;  %v1087_v45 = vsub.f32 %v991_v33, %v1039_v59  ;;  %1425 = vrot.lane.b32.xlu1 %v1318_v22, %s9122_s17  ;;  %v10231_v53 = vld [vmem:[%s10012_s16 + $0x100] sm:$0xff]  ;;  %v1055_v38 = vmul.f32 %v10206_v48, %v10206_v48  ;;  %v1320_v33 = vmul.f32 %v10213_v40, %v10050_v5  ;;  %v10243_v2 = vld [vmem:[%s10012_s16 + $0x88] sm:$0xff] }
 0x161   : > { %14391 = vst [vmem:[#allocation33_spill] sm:$0xff] %v10231_v53  ;;  %7876 = vrsqrt.f32 %v1182_v41  ;;  %v1102_v34 = vsub.f32 %v1006_v44, %v1054_v31  ;;  %v937_v51 = vpop.xlane.xlu1 %936  ;;  %v1323_v63 = vmul.f32 %v10219_v12, %v10074_v60  ;;  %v10240_v59 = vmul.f32 %v7865_v15, %v10222_v25  ;;  %14392 = vst [vmem:[#allocation7_spill] sm:$0xff] %v10243_v2 }
 0x162   : > { %v7867_v14 = vpop.eup %7866  ;;  %v1183_v54 = vadd.f32 1e-05, %v1087_v45  ;;  %v1007_v42 = vmul.f32 0.0051020407, %v937_v51  ;;  %v892_v55 = vpop.xlane.xlu0 %891  ;;  %v10246_v31 = vmul.f32 0.0051020407, %v9958_v16  ;;  %v1041_v5 = vmul.f32 %v10227_v10, %v10227_v10 }
 0x163   : > { %v7869_v22 = vpop.eup %7868  ;;  %v1198_v41 = vadd.f32 1e-05, %v1102_v34  ;;  %v992_v44 = vmul.f32 0.0051020407, %v892_v55  ;;  %1435 = vrot.lane.b32.xlu0 %v1323_v63, %s9122_s17  ;;  %v10250_v60 = vmul.f32 %v7867_v14, %v10231_v53  ;;  %v10253_v45 = vmul.f32 0.0051020407, %v9930_v3 }
 0x164   : > { %7878 = vrsqrt.f32 %v1183_v54  ;;  %v1103_v15 = vsub.f32 %v1007_v42, %v1055_v38  ;;  %1429 = vrot.lane.b32.xlu1 %v1320_v33, %s9122_s17  ;;  %v10259_v51 = vld [vmem:[%s10012_s16 + $0x90] sm:$0xff]  ;;  %v10262_v16 = vmul.f32 0.0051020407, %v9966_v56  ;;  %v1322_v38 = vmul.f32 %v10240_v59, %v10089_v26 }
 0x165   : > { %14393 = vst [vmem:[#allocation8_spill] sm:$0xff] %v10250_v60  ;;  %14394 = vst [vmem:[#allocation13_spill] sm:$0xff] %v10259_v51  ;;  %7880 = vrsqrt.f32 %v1198_v41  ;;  %v1088_v55 = vsub.f32 %v992_v44, %v1040_v30  ;;  %v895_v14 = vpop.xlane.xlu1 %894  ;;  %v1339_v3 = vmul.f32 %v10250_v60, %v10102_v50  ;;  %v10269_v42 = vmul.f32 %v7869_v22, %v10243_v2  ;;  %v10278_v44 = vld [vmem:[%s10012_s16 + $0x108] sm:$0xff] }
 0x166   : > { %v7871_v34 = vpop.eup %7870  ;;  %v1199_v63 = vadd.f32 1e-05, %v1103_v15  ;;  %v993_v53 = vmul.f32 0.0051020407, %v895_v14  ;;  %v940_v54 = vpop.xlane.xlu0 %939  ;;  %v1056_v33 = vmul.f32 %v10246_v31, %v10246_v31  ;;  %14395 = vst [vmem:[#allocation14_spill] sm:$0xff] %v10278_v44  ;;  %v1042_v15 = vmul.f32 %v10253_v45, %v10253_v45 }
 0x167   : > { %v7873_v56 = vpop.eup %7872  ;;  %v1184_v30 = vadd.f32 1e-05, %v1088_v55  ;;  %v1008_v41 = vmul.f32 0.0051020407, %v940_v54  ;;  %1467 = vrot.lane.b32.xlu0 %v1339_v3, %s9122_s17  ;;  %v10275_v50 = vmul.f32 %v7871_v34, %v10259_v51  ;;  %v10283_v26 = vmul.f32 0.0051020407, %v9936_v19 }
 0x168   : > { %7882 = vrsqrt.f32 %v1199_v63  ;;  %v1089_v22 = vsub.f32 %v993_v53, %v1041_v5  ;;  %1433 = vrot.lane.b32.xlu1 %v1322_v38, %s9122_s17  ;;  %v10287_v55 = vld [vmem:[%s10012_s16 + $0x110] sm:$0xff]  ;;  %v1057_v14 = vmul.f32 %v10262_v16, %v10262_v16  ;;  %v1324_v53 = vmul.f32 %v10269_v42, %v10095_v62  ;;  %v10299_v63 = vld [vmem:[%s10012_s16 + $0x98] sm:$0xff] }
 0x169   : > { %14396 = vst [vmem:[#allocation30_spill] sm:$0xff] %v10287_v55  ;;  %7884 = vrsqrt.f32 %v1184_v30  ;;  %v1104_v3 = vsub.f32 %v1008_v41, %v1056_v33  ;;  %v943_v34 = vpop.xlane.xlu1 %942  ;;  %v1325_v54 = vmul.f32 %v10275_v50, %v10121_v27  ;;  %v10296_v5 = vmul.f32 %v7873_v56, %v10278_v44 }
 0x16a   : > { %v7875_v51 = vpop.eup %7874  ;;  %v1185_v2 = vadd.f32 1e-05, %v1089_v22  ;;  %v1009_v19 = vmul.f32 0.0051020407, %v943_v34  ;;  %v898_v60 = vpop.xlane.xlu0 %897  ;;  %v10302_v33 = vmul.f32 0.0051020407, %v9964_v11  ;;  %v1043_v62 = vmul.f32 %v10283_v26, %v10283_v26 }
 0x16b   : > { %v7877_v38 = vpop.eup %7876  ;;  %v1200_v30 = vadd.f32 1e-05, %v1104_v3  ;;  %v994_v41 = vmul.f32 0.0051020407, %v898_v60  ;;  %1439 = vrot.lane.b32.xlu0 %v1325_v54, %s9122_s17  ;;  %v10306_v27 = vmul.f32 %v7875_v51, %v10287_v55  ;;  %v10309_v22 = vmul.f32 0.0051020407, %v9934_v46 }
 0x16c   : > { %7886 = vrsqrt.f32 %v1185_v2  ;;  %v1105_v56 = vsub.f32 %v1009_v19, %v1057_v14  ;;  %1437 = vrot.lane.b32.xlu1 %v1324_v53, %s9122_s17  ;;  %v10315_v34 = vld [vmem:[%s10012_s16 + $0xa0] sm:$0xff]  ;;  %v10318_v11 = vmul.f32 0.0051020407, %v9973_v23  ;;  %v1340_v14 = vmul.f32 %v10296_v5, %v10136_v29 }
 0x16d   : > { %14397 = vst [vmem:[#allocation31_spill] sm:$0xff] %v10306_v27  ;;  %14398 = vst [vmem:[#allocation11_spill] sm:$0xff] %v10315_v34  ;;  %7888 = vrsqrt.f32 %v1200_v30  ;;  %v1090_v60 = vsub.f32 %v994_v41, %v1042_v15  ;;  %v901_v51 = vpop.xlane.xlu1 %900  ;;  %v1341_v46 = vmul.f32 %v10306_v27, %v10151_v18  ;;  %v10325_v19 = vmul.f32 %v7877_v38, %v10299_v63  ;;  %v10334_v41 = vld [vmem:[%s10012_s16 + $0x118] sm:$0xff]  ;;  %v10340_v38 = vld [vmem:[%s10012_s16 + $0x120] sm:$0xff] }
 0x16e   : > { %v7879_v3 = vpop.eup %7878  ;;  %v1201_v54 = vadd.f32 1e-05, %v1105_v56  ;;  %v995_v55 = vmul.f32 0.0051020407, %v901_v51  ;;  %v946_v2 = vpop.xlane.xlu0 %945  ;;  %v1058_v53 = vmul.f32 %v10302_v33, %v10302_v33  ;;  %14399 = vst [vmem:[#allocation12_spill] sm:$0xff] %v10334_v41  ;;  %v1044_v56 = vmul.f32 %v10309_v22, %v10309_v22  ;;  %14400 = vst [vmem:[#allocation34_spill] sm:$0xff] %v10340_v38 }
 0x16f   : > { %v7881_v23 = vpop.eup %7880  ;;  %v1186_v15 = vadd.f32 1e-05, %v1090_v60  ;;  %v1010_v30 = vmul.f32 0.0051020407, %v946_v2  ;;  %1471 = vrot.lane.b32.xlu0 %v1341_v46, %s9122_s17  ;;  %v10331_v18 = vmul.f32 %v7879_v3, %v10315_v34  ;;  %v1059_v60 = vmul.f32 %v10318_v11, %v10318_v11 }
 0x170   : > { %7890 = vrsqrt.f32 %v1201_v54  ;;  %v1091_v29 = vsub.f32 %v995_v55, %v1043_v62  ;;  %1469 = vrot.lane.b32.xlu1 %v1340_v14, %s9122_s17  ;;  %v1326_v55 = vmul.f32 %v10325_v19, %v10142_v49  ;;  %v10349_v62 = vmul.f32 %v7881_v23, %v10334_v41  ;;  %v10352_v54 = vld [vmem:[%s10012_s16 + $0xa8] sm:$0xff]  ;;  %v10363_v49 = vld [vmem:[%s10012_s16 + $0xb0] sm:$0xff]  ;;  %v10494_v41 = vld [vmem:[%s10012_s16 + $0xd8] sm:$0xff] }
 0x171   : > { %7892 = vrsqrt.f32 %v1186_v15  ;;  %v1106_v51 = vsub.f32 %v1010_v30, %v1058_v53  ;;  %v949_v46 = vpop.xlane.xlu1 %948  ;;  %v1327_v3 = vmul.f32 %v10331_v18, %v10171_v36  ;;  %v10355_v53 = vmul.f32 0.0051020407, %v9968_v0  ;;  %14402 = vst [vmem:[#allocation15_spill] sm:$0xff] %v10363_v49 }
 0x172   : > { %v7883_v2 = vpop.eup %7882  ;;  %v1187_v34 = vadd.f32 1e-05, %v1091_v29  ;;  %v1011_v27 = vmul.f32 0.0051020407, %v949_v46  ;;  %v904_v44 = vpop.xlane.xlu0 %903  ;;  %v10366_v23 = vmul.f32 0.0051020407, %v9938_v47 }
 0x173   : > { %v7885_v14 = vpop.eup %7884  ;;  %v1202_v15 = vadd.f32 1e-05, %v1106_v51  ;;  %v996_v30 = vmul.f32 0.0051020407, %v904_v44  ;;  %1443 = vrot.lane.b32.xlu0 %v1327_v3, %s9122_s17  ;;  %v10359_v36 = vmul.f32 %v7883_v2, %v10340_v38  ;;  %v10371_v3 = vmul.f32 0.0051020407, %v9940_v24 }
 0x174   : > { %7894 = vrsqrt.f32 %v1187_v34  ;;  %v1107_v29 = vsub.f32 %v1011_v27, %v1059_v60  ;;  %1441 = vrot.lane.b32.xlu1 %v1326_v55, %s9122_s17  ;;  %v1342_v60 = vmul.f32 %v10349_v62, %v10190_v58  ;;  %v10376_v47 = vmul.f32 %v7885_v14, %v10352_v54  ;;  %v10385_v24 = vld [vmem:[%s10012_s16 + $0x128] sm:$0xff]  ;;  %v10391_v58 = vld [vmem:[%s10012_s16 + $0x130] sm:$0xff]  ;;  %v10405_v38 = vld [vmem:[%s10012_s16 + $0xb8] sm:$0xff] }
 0x175   : > { %14401 = vst [vmem:[#allocation35_spill] sm:$0xff] %v10359_v36  ;;  %7896 = vrsqrt.f32 %v1202_v15  ;;  %v1092_v0 = vsub.f32 %v996_v30, %v1044_v56  ;;  %v670_v46 = vpop.xlane.xlu1 %669  ;;  %v1343_v44 = vmul.f32 %v10359_v36, %v10206_v48  ;;  %v1060_v56 = vmul.f32 %v10355_v53, %v10355_v53  ;;  %14404 = vst [vmem:[#allocation17_spill] sm:$0xff] %v10385_v24 }
 0x176   : > { %v7887_v51 = vpop.eup %7886  ;;  %v1203_v27 = vadd.f32 1e-05, %v1107_v29  ;;  %v952_v34 = vpop.xlane.xlu0 %951  ;;  %14403 = vst [vmem:[#allocation16_spill] sm:$0xff] %v10376_v47  ;;  %v10387_v30 = vmul.f32 0.0051020407, %v670_v46  ;;  %14405 = vst [vmem:[#allocation18_spill] sm:$0xff] %v10391_v58  ;;  %v1046_v14 = vmul.f32 %v10366_v23, %v10366_v23 }
 0x177   : > { %v7889_v2 = vpop.eup %7888  ;;  %v1188_v55 = vadd.f32 1e-05, %v1092_v0  ;;  %v1012_v15 = vmul.f32 0.0051020407, %v952_v34  ;;  %1475 = vrot.lane.b32.xlu0 %v1343_v44, %s9122_s17  ;;  %v10382_v48 = vmul.f32 %v7887_v51, %v10363_v49 }
 0x178   : > { %7898 = vrsqrt.f32 %v1203_v27  ;;  %1473 = vrot.lane.b32.xlu1 %v1342_v60, %s9122_s17  ;;  %v1045_v27 = vmul.f32 %v10371_v3, %v10371_v3  ;;  %v1328_v60 = vmul.f32 %v10376_v47, %v10197_v4  ;;  %v10402_v49 = vmul.f32 %v7889_v2, %v10385_v24  ;;  %v10418_v2 = vld [vmem:[%s10012_s16 + $0xc0] sm:$0xff] }
 0x179   : > { %7900 = vrsqrt.f32 %v1188_v55  ;;  %v1108_v29 = vsub.f32 %v1012_v15, %v1060_v56  ;;  %v910_v0 = vpop.xlane.xlu1 %909  ;;  %v1329_v44 = vmul.f32 %v10382_v48, %v10227_v10  ;;  %v10408_v55 = vmul.f32 0.0051020407, %v9980_v13  ;;  %14407 = vst [vmem:[#allocation20_spill] sm:$0xff] %v10418_v2 }
 0x17a   : > { %v7891_v51 = vpop.eup %7890  ;;  %v998_v46 = vmul.f32 0.0051020407, %v910_v0  ;;  %v907_v34 = vpop.xlane.xlu0 %906  ;;  %v1062_v0 = vmul.f32 %v10387_v30, %v10387_v30  ;;  %v1344_v47 = vmul.f32 %v10402_v49, %v10246_v31  ;;  %v10438_v31 = vld [vmem:[%s10012_s16 + $0x140] sm:$0xff] }
 0x17b   : > { %v7893_v56 = vpop.eup %7892  ;;  %v1204_v10 = vadd.f32 1e-05, %v1108_v29  ;;  %v997_v15 = vmul.f32 0.0051020407, %v907_v34  ;;  %1447 = vrot.lane.b32.xlu0 %v1329_v44, %s9122_s17  ;;  %v10412_v36 = vmul.f32 %v7891_v51, %v10391_v58  ;;  %14410 = vst [vmem:[#allocation23_spill] sm:$0xff] %v10438_v31 }
 0x17c   : > { %v1094_v4 = vsub.f32 %v998_v46, %v1046_v14  ;;  %1445 = vrot.lane.b32.xlu1 %v1328_v60, %s9122_s17  ;;  %v10425_v14 = vmul.f32 %v7893_v56, %v10405_v38  ;;  %v1061_v60 = vmul.f32 %v10408_v55, %v10408_v55 }
 0x17d   : > { %14406 = vst [vmem:[#allocation19_spill] sm:$0xff] %v10412_v36  ;;  %7902 = vrsqrt.f32 %v1204_v10  ;;  %v1093_v24 = vsub.f32 %v997_v15, %v1045_v27  ;;  %v958_v13 = vpop.xlane.xlu1 %957  ;;  %v1345_v29 = vmul.f32 %v10412_v36, %v10262_v16  ;;  %v10434_v15 = vld [vmem:[%s10012_s16 + $0x138] sm:$0xff] }
 0x17e   : > { %v7895_v34 = vpop.eup %7894  ;;  %v1190_v44 = vadd.f32 1e-05, %v1094_v4  ;;  %v1014_v51 = vmul.f32 0.0051020407, %v958_v13  ;;  %v955_v58 = vpop.xlane.xlu0 %954  ;;  %14408 = vst [vmem:[#allocation21_spill] sm:$0xff] %v10425_v14  ;;  %14409 = vst [vmem:[#allocation22_spill] sm:$0xff] %v10434_v15 }
 0x17f   : > { %v7897_v46 = vpop.eup %7896  ;;  %v1189_v27 = vadd.f32 1e-05, %v1093_v24  ;;  %v1013_v10 = vmul.f32 0.0051020407, %v955_v58  ;;  %1479 = vrot.lane.b32.xlu0 %v1345_v29, %s9122_s17  ;;  %v10431_v16 = vmul.f32 %v7895_v34, %v10418_v2  ;;  %v10443_v29 = vmul.f32 0.0051020407, %v9942_v8 }
 0x180   : > { %7904 = vrsqrt.f32 %v1190_v44  ;;  %v1110_v4 = vsub.f32 %v1014_v51, %v1062_v0  ;;  %1477 = vrot.lane.b32.xlu1 %v1344_v47, %s9122_s17  ;;  %v1330_v0 = vmul.f32 %v10425_v14, %v10253_v45  ;;  %v10448_v47 = vmul.f32 %v7897_v46, %v10434_v15  ;;  %v10458_v8 = vld [vmem:[%s10012_s16 + $0xc8] sm:$0xff] }
 0x181   : > { %7906 = vrsqrt.f32 %v1189_v27  ;;  %v1109_v56 = vsub.f32 %v1013_v10, %v1061_v60  ;;  %v676_v13 = vpop.xlane.xlu1 %675  ;;  %v1331_v24 = vmul.f32 %v10431_v16, %v10283_v26  ;;  %v10451_v51 = vmul.f32 0.0051020407, %v9944_v39 }
 0x182   : > { %v7899_v58 = vpop.eup %7898  ;;  %v1206_v34 = vadd.f32 1e-05, %v1110_v4  ;;  %v673_v2 = vpop.xlane.xlu0 %672  ;;  %v10460_v27 = vmul.f32 0.0051020407, %v676_v13  ;;  %v1048_v10 = vmul.f32 %v10443_v29, %v10443_v29 }
 0x183   : > { %v7901_v44 = vpop.eup %7900  ;;  %v1205_v60 = vadd.f32 1e-05, %v1109_v56  ;;  %1451 = vrot.lane.b32.xlu0 %v1331_v24, %s9122_s17  ;;  %v10455_v26 = vmul.f32 %v7899_v58, %v10438_v31  ;;  %v10463_v45 = vmul.f32 0.0051020407, %v673_v2  ;;  %v1346_v24 = vmul.f32 %v10448_v47, %v10302_v33  ;;  %v10486_v31 = vld [vmem:[%s10012_s16 + $0xd0] sm:$0xff] }
 0x184   : > { %7908 = vrsqrt.f32 %v1206_v34  ;;  %1449 = vrot.lane.b32.xlu1 %v1330_v0, %s9122_s17  ;;  %v10472_v13 = vmul.f32 %v7901_v44, %v10458_v8  ;;  %v1047_v2 = vmul.f32 %v10451_v51, %v10451_v51  ;;  %v1064_v0 = vmul.f32 %v10460_v27, %v10460_v27  ;;  %14413 = vst [vmem:[#allocation26_spill] sm:$0xff] %v10486_v31 }
 0x185   : > { %14411 = vst [vmem:[#allocation24_spill] sm:$0xff] %v10455_v26  ;;  %7910 = vrsqrt.f32 %v1205_v60  ;;  %v916_v46 = vpop.xlane.xlu1 %915  ;;  %v1347_v39 = vmul.f32 %v10455_v26, %v10318_v11  ;;  %v10478_v11 = vld [vmem:[%s10012_s16 + $0x148] sm:$0xff]  ;;  %v1063_v33 = vmul.f32 %v10463_v45, %v10463_v45 }
 0x186   : > { %v1000_v4 = vmul.f32 0.0051020407, %v916_v46  ;;  %v913_v56 = vpop.xlane.xlu0 %912  ;;  %14412 = vst [vmem:[#allocation25_spill] sm:$0xff] %v10478_v11  ;;  %v1332_v36 = vmul.f32 %v10472_v13, %v10309_v22 }
 0x187   : > { %v7903_v58 = vpop.eup %7902  ;;  %v999_v34 = vmul.f32 0.0051020407, %v913_v56  ;;  %1483 = vrot.lane.b32.xlu0 %v1347_v39, %s9122_s17 }
 0x188   : > { %v1096_v60 = vsub.f32 %v1000_v4, %v1048_v10  ;;  %1481 = vrot.lane.b32.xlu1 %v1346_v24, %s9122_s17  ;;  %v10491_v14 = vmul.f32 %v7903_v58, %v10478_v11 }
 0x189   : > { %v1095_v44 = vsub.f32 %v999_v34, %v1047_v2  ;;  %v964_v46 = vpop.xlane.xlu1 %963 }
 0x18a   : > { %v7905_v26 = vpop.eup %7904  ;;  %v1192_v56 = vadd.f32 1e-05, %v1096_v60  ;;  %v1016_v15 = vmul.f32 0.0051020407, %v964_v46  ;;  %v961_v39 = vpop.xlane.xlu0 %960  ;;  %v10501_v60 = vmul.f32 0.0051020407, %v9946_v9 }
 0x18b   : > { %v7907_v10 = vpop.eup %7906  ;;  %v1191_v4 = vadd.f32 1e-05, %v1095_v44  ;;  %v1015_v24 = vmul.f32 0.0051020407, %v961_v39  ;;  %v10504_v46 = vld [vmem:[%s10012_s16 + $0x150] sm:$0xff] }
 0x18c   : > { %7912 = vrsqrt.f32 %v1192_v56  ;;  %v1112_v2 = vsub.f32 %v1016_v15, %v1064_v0  ;;  %1453 = vrot.lane.b32.xlu1 %v1332_v36, %s9122_s17  ;;  %v10498_v34 = vmul.f32 %v7907_v10, %v10486_v31  ;;  %14414 = vst [vmem:[#allocation36_spill] sm:$0xff] %v10504_v46  ;;  %v1348_v15 = vmul.f32 %v10491_v14, %v10355_v53  ;;  %v10517_v10 = vld [vmem:[%s10012_s16 + $0x158] sm:$0xff] }
 0x18d   : > { %7914 = vrsqrt.f32 %v1191_v4  ;;  %v1111_v22 = vsub.f32 %v1015_v24, %v1063_v33  ;;  %v682_v58 = vpop.xlane.xlu1 %681  ;;  %v10511_v0 = vmul.f32 %v7905_v26, %v10494_v41  ;;  %v10514_v9 = vmul.f32 0.0051020407, %v9948_v52  ;;  %14416 = vst [vmem:[#allocation38_spill] sm:$0xff] %v10517_v10 }
 0x18e   : > { %v7909_v44 = vpop.eup %7908  ;;  %v1208_v39 = vadd.f32 1e-05, %v1112_v2  ;;  %v679_v11 = vpop.xlane.xlu0 %678  ;;  %v1333_v36 = vmul.f32 %v10498_v34, %v10371_v3  ;;  %v10519_v4 = vmul.f32 0.0051020407, %v682_v58  ;;  %v1050_v3 = vmul.f32 %v10501_v60, %v10501_v60 }
 0x18f   : > { %14415 = vst [vmem:[#allocation37_spill] sm:$0xff] %v10511_v0  ;;  %v7911_v56 = vpop.eup %7910  ;;  %v1207_v33 = vadd.f32 1e-05, %v1111_v22  ;;  %v10528_v52 = vmul.f32 0.0051020407, %v679_v11  ;;  %v1334_v22 = vmul.f32 %v10511_v0, %v10366_v23 }
 0x190   : > { %7916 = vrsqrt.f32 %v1208_v39  ;;  %1485 = vrot.lane.b32.xlu1 %v1348_v15, %s9122_s17  ;;  %1455 = vrot.lane.b32.xlu0 %v1333_v36, %s9122_s17  ;;  %v10524_v53 = vmul.f32 %v7911_v56, %v10504_v46  ;;  %v10535_v39 = vmul.f32 %v7909_v44, %v10517_v10  ;;  %v1049_v15 = vmul.f32 %v10514_v9, %v10514_v9 }
 0x191   : > { %7918 = vrsqrt.f32 %v1207_v33  ;;  %v922_v26 = vpop.xlane.xlu1 %921  ;;  %v1066_v11 = vmul.f32 %v10519_v4, %v10519_v4  ;;  %v10544_v33 = vld [vmem:[%s10012_s16 + $0xe8] sm:$0xff]  ;;  %v1065_v23 = vmul.f32 %v10528_v52, %v10528_v52 }
 0x192   : > { %14417 = vst [vmem:[#allocation39_spill] sm:$0xff] %v10524_v53  ;;  %v1002_v24 = vmul.f32 0.0051020407, %v922_v26  ;;  %v919_v2 = vpop.xlane.xlu0 %918  ;;  %v1349_v58 = vmul.f32 %v10524_v53, %v10408_v55  ;;  %v10549_v26 = vld [vmem:[%s10012_s16 + $0xe0] sm:$0xff] }
 0x193   : > { %v1001_v36 = vmul.f32 0.0051020407, %v919_v2 }
 0x194   : > { %v1098_v56 = vsub.f32 %v1002_v24, %v1050_v3  ;;  %1457 = vrot.lane.b32.xlu1 %v1334_v22, %s9122_s17  ;;  %1487 = vrot.lane.b32.xlu0 %v1349_v58, %s9122_s17  ;;  %v1350_v3 = vmul.f32 %v10535_v39, %v10387_v30  ;;  %v10564_v30 = vld [vmem:[%s10012_s16 + $0x160] sm:$0xff] }
 0x195   : > { %v1097_v55 = vsub.f32 %v1001_v36, %v1049_v15  ;;  %v970_v44 = vpop.xlane.xlu1 %969 }
 0x196   : > { %v7913_v53 = vpop.eup %7912  ;;  %v1194_v2 = vadd.f32 1e-05, %v1098_v56  ;;  %v1018_v0 = vmul.f32 0.0051020407, %v970_v44  ;;  %v967_v10 = vpop.xlane.xlu0 %966  ;;  %v1160_v56 = vld [vmem:[%s10012_s16 + $0x168] sm:$0xff] }
 0x197   : > { %v7915_v24 = vpop.eup %7914  ;;  %v1193_v22 = vadd.f32 1e-05, %v1097_v55  ;;  %v1017_v58 = vmul.f32 0.0051020407, %v967_v10  ;;  %v10554_v46 = vmul.f32 %v7913_v53, %v10544_v33 }
 0x198   : > { %7920 = vrsqrt.f32 %v1194_v2  ;;  %v1114_v15 = vsub.f32 %v1018_v0, %v1066_v11  ;;  %1489 = vrot.lane.b32.xlu1 %v1350_v3, %s9122_s17  ;;  %v10558_v36 = vmul.f32 %v7915_v24, %v10549_v26  ;;  %v10582_v3 = vld [vmem:[%s10012_s16 + $0xf8] sm:$0xff] }
 0x199   : > { %7922 = vrsqrt.f32 %v1193_v22  ;;  %v1113_v44 = vsub.f32 %v1017_v58, %v1065_v23  ;;  %v1336_v31 = vmul.f32 %v10554_v46, %v10443_v29 }
 0x19a   : > { %v7917_v10 = vpop.eup %7916  ;;  %v1210_v53 = vadd.f32 1e-05, %v1114_v15  ;;  %v1335_v0 = vmul.f32 %v10558_v36, %v10451_v51  ;;  %v14418_v15 = vld [vmem:[#allocation29_spill] sm:$0xff] }
 0x19b   : > { %v7919_v11 = vpop.eup %7918  ;;  %v1209_v55 = vadd.f32 1e-05, %v1113_v44  ;;  %v10568_v2 = vmul.f32 %v7917_v10, %v1160_v56  ;;  %v1162_v56 = vld [vmem:[%s10012_s16 + $0x178] sm:$0xff]  ;;  %v1161_v44 = vld [vmem:[%s10012_s16 + $0x170] sm:$0xff] }
 0x19c   : > { %7924 = vrsqrt.f32 %v1210_v53  ;;  %1461 = vrot.lane.b32.xlu1 %v1336_v31, %s9122_s17  ;;  %1459 = vrot.lane.b32.xlu0 %v1335_v0, %s9122_s17  ;;  %v10573_v29 = vmul.f32 %v7919_v11, %v10564_v30  ;;  %v1145_v31 = vld [vmem:[%s10012_s16 + $0xf0] sm:$0xff] }
 0x19d   : > { %7926 = vrsqrt.f32 %v1209_v55  ;;  %v1352_v23 = vmul.f32 %v10568_v2, %v10460_v27 }
 0x19e   : > { %v1351_v51 = vmul.f32 %v10573_v29, %v10463_v45 }
 0x1a0   : > { %1493 = vrot.lane.b32.xlu1 %v1352_v23, %s9122_s17  ;;  %1491 = vrot.lane.b32.xlu0 %v1351_v51, %s9122_s17  ;;  %v14302_v23 = vmov 1   ;;  %v7928_v51 = vld [vmem:[%s10012_s16] sm:$0xff] }
 0x1a2   : > { %v7921_v24 = vpop.eup %7920 }
 0x1a3   : > { %v7923_v22 = vpop.eup %7922  ;;  %v10586_v58 = vmul.f32 %v7921_v24, %v10582_v3  ;;  %v14419_v24 = vmov 0  }
 0x1a4   : > { %1602 = vperm.xlu1 %7799, %v10052_v20   ;;  %1597 = vperm.xlu0 %7798, %v14418_v15   ;;  %v10590_v27 = vmul.f32 %v7923_v22, %v1145_v31  ;;  %v14300_v22 = vmov 0.0   ;;  %v14420_v15 = vld [vmem:[#allocation5_spill] sm:$0xff] }
 0x1a5   : > { %v1338_v45 = vmul.f32 %v10586_v58, %v10501_v60  ;;  %2804 = vmatprep.mubr.f32.mxu0 %v14300_v22 }
 0x1a6   : > { %v7925_v10 = vpop.eup %7924  ;;  %v1337_v53 = vmul.f32 %v10590_v27, %v10514_v9 }
 0x1a7   : > { %v7927_v0 = vpop.eup %7926  ;;  %v10598_v11 = vmul.f32 %v7925_v10, %v1162_v56 }
 0x1a8   : > { %1465 = vrot.lane.b32.xlu0 %v1338_v45, %s9122_s17  ;;  %1463 = vrot.lane.b32.xlu1 %v1337_v53, %s9122_s17  ;;  %v10602_v20 = vmul.f32 %v7927_v0, %v1161_v44 }
 0x1a9   : > { %v1354_v55 = vmul.f32 %v10598_v11, %v10519_v4  ;;  %7800 = vset.pattern.permute.xlu1 %v14302_v23 }
 0x1aa   : > { %v1353_v60 = vmul.f32 %v10602_v20, %v10528_v52 }
 0x1ac   : > { %1497 = vrot.lane.b32.xlu0 %v1354_v55, %s9122_s17  ;;  %1495 = vrot.lane.b32.xlu1 %v1353_v60, %s9122_s17 }
 0x1b0   : > { %1617 = vperm.xlu0 %7798, %v10066_v7  }
 0x1b4   : > { %1637 = vperm.xlu0 %7798, %v10113_v35  }
 0x1b5   : > { %v1404_v9 = vpop.permute.xlu0 %1403 }
 0x1b6   : > { %v1547_v31 = vsub.f32 %v7928_v51, %v1404_v9 }
 0x1b8   : > { %1657 = vperm.xlu0 %7798, %v10163_v17   ;;  %1933 = vperm.xlu1 %7800, %v1547_v31  }
 0x1ba   : > { %v10615_v4 = vpop.permute.xlu1 %1405 }
 0x1bc   : > { %1677 = vperm.xlu0 %7798, %v10219_v12   ;;  %7801 = vset.pattern.permute.xlu1 %v14419_v24 }
 0x1bd   : > { %1607 = vperm.xlu1 %7801, %v10062_v43   ;;  %v1412_v52 = vpop.permute.xlu0 %1411 }
 0x1be   : > { %v10621_v7 = vpop.permute.xlu1 %1407 }
 0x1c0   : > { %1762 = vperm.xlu0 %7798, %v10296_v5  }
 0x1c1   : > { %1612 = vperm.xlu1 %7801, %v10085_v21   ;;  %v10625_v35 = vpop.permute.xlu0 %1415 }
 0x1c2   : > { %v1410_v17 = vpop.permute.xlu1 %1409 }
 0x1c3   : > { %v1550_v12 = vsub.f32 %v14420_v15, %v1410_v17 }
 0x1c4   : > { %1687 = vperm.xlu0 %7798, %v10275_v50   ;;  %v7929_v50 = vld [vmem:[%s10012_s16 + $0x20] sm:$0xff] }
 0x1c5   : > { %7802 = vset.pattern.permute.xlu1 %v14302_v23  ;;  %v1420_v43 = vpop.permute.xlu0 %1419  ;;  %v1551_v44 = vsub.f32 %v7929_v50, %v1412_v52 }
 0x1c6   : > { %v10630_v56 = vpop.permute.xlu1 %1413  ;;  %1948 = vperm.xlu1 %7802, %v1550_v12  }
 0x1c8   : > { %1772 = vperm.xlu0 %7798, %v10349_v62  }
 0x1c9   : > { %v10633_v45 = vpop.permute.xlu0 %1423 }
 0x1ca   : > { %v1418_v5 = vpop.permute.xlu1 %1417  ;;  %7803 = vset.pattern.permute.xlu1 %v14419_v24 }
 0x1cb   : > { %1622 = vperm.xlu1 %7803, %v10108_v32   ;;  %v1554_v55 = vsub.f32 %v10116_v61, %v1418_v5  ;;  %v7930_v61 = vld [vmem:[%s10012_s16 + $0x40] sm:$0xff] }
 0x1cc   : > { %1697 = vperm.xlu0 %7798, %v10331_v18  }
 0x1cd   : > { %v10638_v21 = vpop.permute.xlu0 %1427 }
 0x1ce   : > { %v10641_v10 = vpop.permute.xlu1 %1421 }
 0x1cf   : > { %7804 = vset.pattern.permute.xlu1 %v14302_v23 }
 0x1d0   : > { %1782 = vperm.xlu0 %7798, %v10402_v49   ;;  %1953 = vperm.xlu1 %7804, %v1551_v44   ;;  %v7935_v44 = vld [vmem:[%s10012_s16 + $0x48] sm:$0xff] }
 0x1d1   : > { %v10645_v62 = vpop.permute.xlu0 %1431 }
 0x1d2   : > { %v1426_v53 = vpop.permute.xlu1 %1425 }
 0x1d4   : > { %1707 = vperm.xlu0 %7798, %v10382_v48   ;;  %7805 = vset.pattern.permute.xlu1 %v14419_v24 }
 0x1d5   : > { %1627 = vperm.xlu1 %7805, %v10092_v28   ;;  %v10650_v32 = vpop.permute.xlu0 %1435 }
 0x1d6   : > { %v10652_v18 = vpop.permute.xlu1 %1429 }
 0x1d8   : > { %1792 = vperm.xlu0 %7798, %v10448_v47  }
 0x1d9   : > { %1632 = vperm.xlu1 %7805, %v10132_v6   ;;  %v10658_v0 = vpop.permute.xlu0 %1467  ;;  %v1555_v6 = vsub.f32 %v7930_v61, %v1420_v43 }
 0x1da   : > { %v10656_v49 = vpop.permute.xlu1 %1433 }
 0x1db   : > { %v1562_v61 = vsub.f32 %v10222_v25, %v10656_v49  ;;  %v14425_v25 = vld [vmem:[#allocation10_spill] sm:$0xff] }
 0x1dc   : > { %1717 = vperm.xlu0 %7798, %v10431_v16   ;;  %v1561_v49 = vsub.f32 %v14425_v25, %v10645_v62  ;;  %v14429_v62 = vld [vmem:[#allocation33_spill] sm:$0xff] }
 0x1dd   : > { %7806 = vset.pattern.permute.xlu1 %v14302_v23  ;;  %v10666_v48 = vpop.permute.xlu0 %1439 }
 0x1de   : > { %v10663_v28 = vpop.permute.xlu1 %1437  ;;  %1968 = vperm.xlu1 %7806, %v1554_v55  }
 0x1e0   : > { %1802 = vperm.xlu0 %7798, %v10491_v14  }
 0x1e1   : > { %v10676_v60 = vpop.permute.xlu0 %1471 }
 0x1e2   : > { %v10668_v47 = vpop.permute.xlu1 %1469  ;;  %7807 = vset.pattern.permute.xlu1 %v14419_v24 }
 0x1e3   : > { %1642 = vperm.xlu1 %7807, %v10157_v57  }
 0x1e4   : > { %1727 = vperm.xlu0 %7798, %v10498_v34   ;;  %v14421_v34 = vld [vmem:[#allocation6_spill] sm:$0xff] }
 0x1e5   : > { %v10684_v57 = vpop.permute.xlu0 %1443 }
 0x1e6   : > { %v10674_v16 = vpop.permute.xlu1 %1441 }
 0x1e7   : > { %7808 = vset.pattern.permute.xlu1 %v14302_v23 }
 0x1e8   : > { %1812 = vperm.xlu0 %7798, %v10535_v39   ;;  %1973 = vperm.xlu1 %7808, %v1555_v6   ;;  %v7936_v6 = vld [vmem:[%s10012_s16 + $0x50] sm:$0xff] }
 0x1e9   : > { %v10691_v51 = vpop.permute.xlu0 %1475 }
 0x1ea   : > { %v10680_v14 = vpop.permute.xlu1 %1473 }
 0x1ec   : > { %1737 = vperm.xlu0 %7798, %v10558_v36   ;;  %7809 = vset.pattern.permute.xlu1 %v14419_v24  ;;  %v1558_v36 = vsub.f32 %v10166_v37, %v1426_v53  ;;  %v14422_v37 = vld [vmem:[#allocation9_spill] sm:$0xff]  ;;  %v1556_v53 = vsub.f32 %v7935_v44, %v10641_v10  ;;  %v14424_v10 = vld [vmem:[#allocation27_spill] sm:$0xff] }
 0x1ed   : > { %1647 = vperm.xlu1 %7809, %v14421_v34   ;;  %v10699_v31 = vpop.permute.xlu0 %1447 }
 0x1ee   : > { %v10687_v9 = vpop.permute.xlu1 %1445 }
 0x1f0   : > { %1822 = vperm.xlu0 %7798, %v10568_v2  }
 0x1f1   : > { %1652 = vperm.xlu1 %7809, %v10184_v1   ;;  %v7931_v1 = vld [vmem:[%s10012_s16 + $0x8] sm:$0xff]  ;;  %v10712_v15 = vpop.permute.xlu0 %1479 }
 0x1f2   : > { %v10693_v39 = vpop.permute.xlu1 %1477  ;;  %v1548_v52 = vsub.f32 %v7931_v1, %v10615_v4 }
 0x1f4   : > { %1747 = vperm.xlu0 %7798, %v10590_v27   ;;  %v1559_v27 = vsub.f32 %v14422_v37, %v10638_v21  ;;  %v7934_v21 = vld [vmem:[%s10012_s16 + $0x30] sm:$0xff] }
 0x1f5   : > { %7810 = vset.pattern.permute.xlu1 %v14302_v23  ;;  %v10720_v43 = vpop.permute.xlu0 %1451  ;;  %v1553_v50 = vsub.f32 %v7934_v21, %v10625_v35  ;;  %v1557_v35 = vsub.f32 %v7936_v6, %v10633_v45  ;;  %v14426_v45 = vld [vmem:[#allocation8_spill] sm:$0xff] }
 0x1f6   : > { %1988 = vperm.xlu1 %7810, %v1558_v36   ;;  %v10701_v2 = vpop.permute.xlu1 %1449  ;;  %v1560_v36 = vsub.f32 %v14424_v10, %v10652_v18  ;;  %v14428_v18 = vld [vmem:[#allocation7_spill] sm:$0xff] }
 0x1f8   : > { %1832 = vperm.xlu0 %7798, %v10598_v11   ;;  %v7932_v11 = vld [vmem:[%s10012_s16 + $0x10] sm:$0xff] }
 0x1f9   : > { %v1549_v17 = vsub.f32 %v7932_v11, %v10621_v7  ;;  %v14423_v7 = vld [vmem:[#allocation28_spill] sm:$0xff]  ;;  %v10728_v55 = vpop.permute.xlu0 %1483 }
 0x1fa   : > { %7811 = vset.pattern.permute.xlu1 %v14419_v24  ;;  %v10714_v12 = vpop.permute.xlu1 %1481 }
 0x1fb   : > { %1662 = vperm.xlu1 %7811, %v10213_v40   ;;  %v7933_v40 = vld [vmem:[%s10012_s16 + $0x28] sm:$0xff] }
 0x1fc   : > { %7830 = vset.pattern.permute.xlu0 %v14302_v23  ;;  %v1552_v4 = vsub.f32 %v7933_v40, %v10630_v56  ;;  %v1579_v40 = vsub.f32 %v14429_v62, %v10658_v0  ;;  %v1570_v0 = vsub.f32 %v10405_v38, %v10701_v2  ;;  %v14433_v2 = vld [vmem:[#allocation13_spill] sm:$0xff]  ;;  %v14439_v62 = vld [vmem:[#allocation34_spill] sm:$0xff] }
 0x1fd   : > { %1938 = vperm.xlu0 %7830, %v1548_v52   ;;  %v1565_v6 = vsub.f32 %v14433_v2, %v10666_v48  ;;  %v14446_v2 = vld [vmem:[#allocation19_spill] sm:$0xff] }
 0x1fe   : > { %v1454_v5 = vpop.permute.xlu1 %1453 }
 0x1ff   : > { %7812 = vset.pattern.permute.xlu1 %v14302_v23 }
 0x200   : > { %1993 = vperm.xlu1 %7812, %v1559_v27   ;;  %v14427_v27 = vld [vmem:[#allocation32_spill] sm:$0xff] }
 0x201   : > { %1943 = vperm.xlu0 %7830, %v1549_v17   ;;  %v1563_v11 = vsub.f32 %v14427_v27, %v10650_v32  ;;  %v1564_v17 = vsub.f32 %v14428_v18, %v10663_v28  ;;  %v14430_v32 = vld [vmem:[#allocation14_spill] sm:$0xff]  ;;  %v1568_v28 = vsub.f32 %v10352_v54, %v10687_v9 }
 0x202   : > { %v10730_v56 = vpop.permute.xlu1 %1485  ;;  %v10737_v34 = vpop.permute.xlu0 %1455  ;;  %v1580_v21 = vsub.f32 %v14430_v32, %v10668_v47  ;;  %v1572_v47 = vsub.f32 %v10458_v8, %v1454_v5 }
 0x204   : > { %7813 = vset.pattern.permute.xlu1 %v14419_v24 }
 0x205   : > { %1958 = vperm.xlu0 %7830, %v1552_v4   ;;  %1667 = vperm.xlu1 %7813, %v14423_v7   ;;  %v1566_v4 = vsub.f32 %v10299_v63, %v10674_v16 }
 0x206   : > { %v10743_v1 = vpop.permute.xlu0 %1487 }
 0x209   : > { %1963 = vperm.xlu0 %7830, %v1553_v50   ;;  %1672 = vperm.xlu1 %7813, %v10240_v59   ;;  %v1458_v59 = vpop.permute.xlu1 %1457 }
 0x20d   : > { %1978 = vperm.xlu0 %7830, %v1556_v53   ;;  %7814 = vset.pattern.permute.xlu1 %v14302_v23  ;;  %v10747_v52 = vpop.permute.xlu1 %1489  ;;  %v14432_v53 = vld [vmem:[#allocation31_spill] sm:$0xff] }
 0x20e   : > { %2008 = vperm.xlu1 %7814, %v1562_v61   ;;  %v10750_v37 = vpop.permute.xlu0 %1459  ;;  %v1574_v61 = vsub.f32 %v10494_v41, %v1458_v59 }
 0x211   : > { %1983 = vperm.xlu0 %7830, %v1557_v35   ;;  %v14434_v35 = vld [vmem:[#allocation30_spill] sm:$0xff] }
 0x212   : > { %7815 = vset.pattern.permute.xlu1 %v14419_v24  ;;  %v10761_v7 = vpop.permute.xlu0 %1491  ;;  %v1581_v10 = vsub.f32 %v14434_v35, %v10676_v60 }
 0x213   : > { %1682 = vperm.xlu1 %7815, %v10269_v42   ;;  %v1462_v42 = vpop.permute.xlu1 %1461 }
 0x215   : > { %1998 = vperm.xlu0 %7830, %v1560_v36   ;;  %v14435_v36 = vld [vmem:[#allocation12_spill] sm:$0xff] }
 0x216   : > { %v1582_v25 = vsub.f32 %v14435_v36, %v10680_v14  ;;  %v14438_v14 = vld [vmem:[#allocation11_spill] sm:$0xff] }
 0x217   : > { %1757 = vperm.xlu1 %7815, %v14426_v45   ;;  %v10767_v50 = vpop.permute.xlu1 %1493  ;;  %v14436_v45 = vld [vmem:[#allocation16_spill] sm:$0xff] }
 0x219   : > { %2003 = vperm.xlu0 %7830, %v1561_v49  }
 0x21b   : > { %7816 = vset.pattern.permute.xlu1 %v14302_v23 }
 0x21c   : > { %2013 = vperm.xlu1 %7816, %v1563_v11   ;;  %v14437_v11 = vld [vmem:[#allocation35_spill] sm:$0xff] }
 0x21d   : > { %2018 = vperm.xlu0 %7830, %v1564_v17   ;;  %v1567_v17 = vsub.f32 %v14438_v14, %v10684_v57 }
 0x220   : > { %2093 = vperm.xlu1 %7816, %v1579_v40   ;;  %v1583_v40 = vsub.f32 %v14439_v62, %v10691_v51  ;;  %v14444_v51 = vld [vmem:[#allocation21_spill] sm:$0xff] }
 0x221   : > { %2028 = vperm.xlu0 %7830, %v1566_v4  }
 0x223   : > { %v10769_v44 = vpop.permute.xlu0 %1597  ;;  %v10773_v63 = vpop.permute.xlu1 %1602 }
 0x224   : > { %2098 = vperm.xlu1 %7816, %v1580_v21   ;;  %v14441_v21 = vld [vmem:[#allocation17_spill] sm:$0xff] }
 0x225   : > { %2038 = vperm.xlu0 %7830, %v1568_v28   ;;  %v1584_v28 = vsub.f32 %v14441_v21, %v10693_v39 }
 0x227   : > { %v1466_v16 = vpop.permute.xlu0 %1465  ;;  %v10780_v9 = vpop.permute.xlu1 %1463 }
 0x228   : > { %7817 = vset.pattern.permute.xlu1 %v14419_v24  ;;  %v1578_v41 = vsub.f32 %v10582_v3, %v1466_v16 }
 0x229   : > { %2048 = vperm.xlu0 %7830, %v1570_v0   ;;  %1692 = vperm.xlu1 %7817, %v10325_v19   ;;  %v1576_v19 = vsub.f32 %v10544_v33, %v1462_v42 }
 0x22b   : > { %v10778_v54 = vpop.permute.xlu0 %1497  ;;  %v10790_v8 = vpop.permute.xlu1 %1495 }
 0x22c   : > { %14431 = vst [vmem:[#allocation29_spill] sm:$0xff] %v10778_v54 }
 0x22d   : > { %2058 = vperm.xlu0 %7830, %v1572_v47   ;;  %1767 = vperm.xlu1 %7817, %v14432_v53  }
 0x22f   : > { %v10784_v38 = vpop.permute.xlu0 %1617 }
 0x231   : > { %2068 = vperm.xlu0 %7830, %v1574_v61   ;;  %7818 = vset.pattern.permute.xlu1 %v14302_v23 }
 0x232   : > { %2023 = vperm.xlu1 %7818, %v1565_v6   ;;  %v420_v6 = vlaneseq }
 0x233   : > { %v10792_v5 = vpop.permute.xlu0 %1637 }
 0x234   : > { %v10855_v36 = vand.u32 127, %v420_v6 }
 0x235   : > { %2078 = vperm.xlu0 %7830, %v1576_v19   ;;  %v14448_v19 = vld [vmem:[#allocation15_spill] sm:$0xff] }
 0x236   : > { %2103 = vperm.xlu1 %7818, %v1581_v10   ;;  %v1569_v35 = vsub.f32 %v14448_v19, %v10699_v31  ;;  %14450 = vst [vmem:[#allocation8_spill] sm:$0xff] %v10855_v36  ;;  %v14453_v31 = vld [vmem:[#allocation22_spill] sm:$0xff] }
 0x237   : > { %v10797_v59 = vpop.permute.xlu0 %1657  ;;  %v10799_v48 = vpop.permute.xlu1 %1933  ;;  %v1586_v62 = vsub.f32 %v14453_v31, %v10714_v12  ;;  %v7937_v12 = vld [vmem:[%s9358_s12 + $0x8] sm:$0xff] }
 0x239   : > { %2088 = vperm.xlu0 %7830, %v1578_v41  }
 0x23a   : > { %2108 = vperm.xlu1 %7818, %v1582_v25   ;;  %v14451_v25 = vld [vmem:[#allocation18_spill] sm:$0xff] }
 0x23b   : > { %v10803_v33 = vpop.permute.xlu0 %1677 }
 0x23c   : > { %v10805_v49 = vpop.permute.xlu1 %1607 }
 0x23e   : > { %7819 = vset.pattern.permute.xlu1 %v14419_v24 }
 0x23f   : > { %v10808_v60 = vpop.permute.xlu0 %1762  ;;  %1702 = vperm.xlu1 %7819, %v14436_v45   ;;  %v1585_v45 = vsub.f32 %v14451_v25, %v10712_v15  ;;  %v425_v15 = vand.u32 15, %v10855_v36 }
 0x240   : > { %v10811_v3 = vpop.permute.xlu1 %1612 }
 0x241   : > { %vm433_vm5 = vcmp.ge.s32.totalorder %v425_v15, 1  ;;  %vm10897_vm9 = vcmp.le.s32.totalorder %v425_v15, 14 }
 0x243   : > { %v10813_v27 = vpop.permute.xlu0 %1687  ;;  %1777 = vperm.xlu1 %7819, %v14437_v11  }
 0x245   : > { %v10816_v18 = vpop.permute.xlu1 %1948 }
 0x247   : > { %v10820_v42 = vpop.permute.xlu0 %1772  ;;  %7820 = vset.pattern.permute.xlu1 %v14302_v23 }
 0x248   : > { %2033 = vperm.xlu1 %7820, %v1567_v17   ;;  %v422_v17 = vadd.s32 128, %v10855_v36 }
 0x24a   : > { %v10825_v4 = vpop.permute.xlu1 %1622 }
 0x24b   : > { %v10827_v32 = vpop.permute.xlu0 %1697 }
 0x24c   : > { %14440 = vst [vmem:[#allocation5_spill] sm:$0xff] %v10827_v32  ;;  %2113 = vperm.xlu1 %7820, %v1583_v40   ;;  %v423_v40 = vshra.s32 %v10855_v36, 4  ;;  %v7941_v36 = vld [vmem:[%s9358_s12 + $0x40] sm:$0xff] }
 0x24e   : > { %vm10872_vm0 = vcmp.ge.s32.totalorder %v423_v40, 1  ;;  %vm429_vm1 = vcmp.le.s32.totalorder %v423_v40, 14 }
 0x24f   : > { %v10831_v0 = vpop.permute.xlu0 %1782  ;;  %v10833_v16 = vpop.permute.xlu1 %1953  ;;  %vm431_vm4 = vmand %vm10872_vm0, %vm429_vm1 }
 0x250   : > { %14442 = vst [vmem:[#allocation6_spill] sm:$0xff] %v10831_v0  ;;  %2118 = vperm.xlu1 %7820, %v1584_v28   ;;  %v424_v28 = vshra.s32 %v422_v17, 4  ;;  %vm10893_vm8 = vmand %vm431_vm4, %vm433_vm5  ;;  %v7951_v0 = vld [vmem:[%s9358_s12 + $0x20] sm:$0xff] }
 0x251   : > { %vm439_vm12 = vmand %vm10893_vm8, %vm10897_vm9 }
 0x252   : > { %vm10877_vm2 = vcmp.ge.s32.totalorder %v424_v28, 1  ;;  %vm430_vm3 = vcmp.le.s32.totalorder %v424_v28, 14  ;;  %v14470_v28 = vld [vmem:[#allocation20_spill] sm:$0xff] }
 0x253   : > { %v10835_v57 = vpop.permute.xlu0 %1707  ;;  %vm432_vm6 = vmand %vm10877_vm2, %vm430_vm3  ;;  %v1571_v6 = vsub.f32 %v14470_v28, %v10720_v43 }
 0x254   : > { %14443 = vst [vmem:[#allocation9_spill] sm:$0xff] %v10835_v57  ;;  %v10837_v47 = vpop.permute.xlu1 %1627  ;;  %7821 = vset.pattern.permute.xlu1 %v14419_v24 }
 0x255   : > { %1712 = vperm.xlu1 %7821, %v14444_v51  }
 0x257   : > { %v10841_v53 = vpop.permute.xlu0 %1792 }
 0x258   : > { %14445 = vst [vmem:[#allocation28_spill] sm:$0xff] %v10841_v53  ;;  %v10843_v61 = vpop.permute.xlu1 %1632 }
 0x259   : > { %1787 = vperm.xlu1 %7821, %v14446_v2   ;;  %v426_v2 = vand.u32 15, %v422_v17  ;;  %v14472_v17 = vld [vmem:[#allocation23_spill] sm:$0xff] }
 0x25a   : > { %v1587_v28 = vsub.f32 %v14472_v17, %v10728_v55  ;;  %v14478_v55 = vld [vmem:[#allocation36_spill] sm:$0xff]  ;;  %v1843_v17 = vmul.f32 %v7941_v36, %v10784_v38 }
 0x25b   : > { %v10846_v39 = vpop.permute.xlu0 %1717  ;;  %vm434_vm7 = vcmp.ge.s32.totalorder %v426_v2, 1  ;;  %vm10907_vm11 = vcmp.le.s32.totalorder %v426_v2, 14  ;;  %v7938_v2 = vld [vmem:[%s9358_s12] sm:$0xff] }
 0x25c   : > { %14447 = vst [vmem:[#allocation27_spill] sm:$0xff] %v10846_v39  ;;  %vm10903_vm10 = vmand %vm432_vm6, %vm434_vm7  ;;  %v1835_v22 = vmul.f32 %v7938_v2, %v10769_v44  ;;  %v14474_v2 = vmov 0.0   ;;  %v7945_v39 = vld [vmem:[%s9358_s12 + $0x80] sm:$0xff] }
 0x25d   : > { %v10850_v10 = vpop.permute.xlu1 %1968  ;;  %7822 = vset.pattern.permute.xlu1 %v14302_v23  ;;  %vm440_vm13 = vmand %vm10903_vm10, %vm10907_vm11  ;;  %v10937_v40 = vsel %vm439_vm12, 1.0, %v14474_v2  ;;  %v10969_v36 = vmul.f32 %v7945_v39, %v10792_v5 }
 0x25e   : > { %2043 = vperm.xlu1 %7822, %v1569_v35  }
 0x25f   : > { %v10853_v41 = vpop.permute.xlu0 %1802 }
 0x260   : > { %14449 = vst [vmem:[#allocation10_spill] sm:$0xff] %v10853_v41  ;;  %v7944_v41 = vld [vmem:[%s9358_s12 + $0x18] sm:$0xff] }
 0x262   : > { %v10859_v11 = vpop.permute.xlu1 %1642  ;;  %2123 = vperm.xlu1 %7822, %v1585_v45   ;;  %v14461_v45 = vld [vmem:[#allocation24_spill] sm:$0xff] }
 0x263   : > { %v10861_v14 = vpop.permute.xlu0 %1727 }
 0x264   : > { %14452 = vst [vmem:[#allocation32_spill] sm:$0xff] %v10861_v14 }
 0x266   : > { %2128 = vperm.xlu1 %7822, %v1586_v62   ;;  %v10940_v62 = vsel %vm440_vm13, 1.0, %v14474_v2 }
 0x267   : > { %v10867_v21 = vpop.permute.xlu0 %1812  ;;  %v10869_v51 = vpop.permute.xlu1 %1973  ;;  %14475 = vst [vmem:[#allocation13_spill] sm:$0xff] %v10940_v62 }
 0x268   : > { %14454 = vst [vmem:[#allocation7_spill] sm:$0xff] %v10867_v21 }
 0x26a   : > { %7823 = vset.pattern.permute.xlu1 %v14419_v24 }
 0x26b   : > { %v10881_v19 = vpop.permute.xlu0 %1737  ;;  %1722 = vperm.xlu1 %7823, %v10472_v13  }
 0x26c   : > { %14459 = vst [vmem:[#allocation33_spill] sm:$0xff] %v10881_v19  ;;  %v10884_v35 = vpop.permute.xlu1 %1647  ;;  %v7942_v19 = vld [vmem:[%s9358_s12 + $0x48] sm:$0xff] }
 0x26f   : > { %v10890_v25 = vpop.permute.xlu0 %1822  ;;  %1797 = vperm.xlu1 %7823, %v14461_v45   ;;  %v1836_v45 = vmul.f32 %v7937_v12, %v10769_v44  ;;  %v2171_v12 = vadd.f32 %v10799_v48, %v1835_v22  ;;  %v14479_v22 = vld [vmem:[#allocation38_spill] sm:$0xff] }
 0x270   : > { %14460 = vst [vmem:[#allocation14_spill] sm:$0xff] %v10890_v25  ;;  %v10901_v31 = vpop.permute.xlu1 %1652 }
 0x271   : > { %v2172_v43 = vadd.f32 %v10799_v48, %v1836_v45  ;;  %v14477_v45 = vld [vmem:[#allocation26_spill] sm:$0xff]  ;;  %v1844_v48 = vmul.f32 %v7942_v19, %v10784_v38  ;;  %v2267_v21 = vmax.f32 %v2171_v12, 0.0  ;;  %v7947_v19 = vld [vmem:[%s9358_s12 + $0xc0] sm:$0xff] }
 0x273   : > { %v10919_v15 = vpop.permute.xlu0 %1747  ;;  %7824 = vset.pattern.permute.xlu1 %v14302_v23  ;;  %v14473_v23 = vld [vmem:[#allocation25_spill] sm:$0xff]  ;;  %v2268_v25 = vmax.f32 %v2172_v43, 0.0  ;;  %v7946_v43 = vld [vmem:[%s9358_s12 + $0x88] sm:$0xff] }
 0x274   : > { %14471 = vst [vmem:[#allocation31_spill] sm:$0xff] %v10919_v15  ;;  %2053 = vperm.xlu1 %7824, %v1571_v6   ;;  %v1588_v44 = vsub.f32 %v14473_v23, %v10730_v56  ;;  %v7939_v23 = vld [vmem:[%s9358_s12 + $0x38] sm:$0xff]  ;;  %v10973_v38 = vmul.f32 %v7946_v43, %v10792_v5  ;;  %v7949_v5 = vld [vmem:[%s9358_s12 + $0xc8] sm:$0xff] }
 0x275   : > { %v10929_v13 = vpop.permute.xlu1 %1988  ;;  %v1842_v56 = vmul.f32 %v7939_v23, %v10811_v3  ;;  %v7943_v23 = vld [vmem:[%s9358_s12 + $0x30] sm:$0xff]  ;;  %v10986_v43 = vmul.f32 %v7949_v5, %v10797_v59  ;;  %v2364_v57 = vmul.f32 %v2268_v25, %v10940_v62 }
 0x277   : > { %v10942_v6 = vpop.permute.xlu0 %1832  ;;  %v2178_v14 = vadd.f32 %v10816_v18, %v1842_v56  ;;  %v2179_v56 = vadd.f32 %v10833_v16, %v1843_v17 }
 0x278   : > { %14476 = vst [vmem:[#allocation30_spill] sm:$0xff] %v10942_v6  ;;  %2133 = vperm.xlu1 %7824, %v1587_v28   ;;  %v7940_v6 = vld [vmem:[%s9358_s12 + $0x10] sm:$0xff]  ;;  %v1841_v28 = vmul.f32 %v7943_v23, %v10811_v3  ;;  %v10977_v3 = vmul.f32 %v7947_v19, %v10797_v59 }
 0x279   : > { %v1837_v15 = vmul.f32 %v7940_v6, %v10773_v63  ;;  %v1838_v6 = vmul.f32 %v7944_v41, %v10773_v63  ;;  %v2180_v63 = vadd.f32 %v10833_v16, %v1844_v48  ;;  %v7948_v41 = vld [vmem:[%s9358_s12 + $0x78] sm:$0xff]  ;;  %v2363_v48 = vmul.f32 %v2267_v21, %v10937_v40 }
 0x27a   : > { %v10963_v2 = vpop.permute.xlu1 %1662  ;;  %v2177_v12 = vadd.f32 %v10816_v18, %v1841_v28  ;;  %v1850_v39 = vmul.f32 %v7948_v41, %v10843_v61  ;;  %v2274_v18 = vmax.f32 %v2178_v14, 0.0  ;;  %v7950_v28 = vld [vmem:[%s9358_s12 + $0x70] sm:$0xff]  ;;  %v1839_v41 = vmul.f32 %v7951_v0, %v10805_v49  ;;  %v14480_v0 = vld [vmem:[#allocation37_spill] sm:$0xff] }
 0x27b   : > { %v1849_v17 = vmul.f32 %v7950_v28, %v10843_v61  ;;  %v2275_v25 = vmax.f32 %v2179_v56, 0.0 }
 0x27c   : > { %v1939_v23 = vpop.permute.xlu0 %1938  ;;  %2138 = vperm.xlu1 %7824, %v1588_v44   ;;  %v2186_v16 = vadd.f32 %v10850_v10, %v1850_v39  ;;  %v7952_v44 = vld [vmem:[%s9358_s12 + $0x28] sm:$0xff]  ;;  %v2273_v14 = vmax.f32 %v2177_v12, 0.0 }
 0x27d   : > { %v2173_v53 = vadd.f32 %v1939_v23, %v1837_v15  ;;  %v2174_v19 = vadd.f32 %v1939_v23, %v1838_v6  ;;  %v1840_v59 = vmul.f32 %v7952_v44, %v10805_v49  ;;  %v2276_v23 = vmax.f32 %v2180_v63, 0.0  ;;  %v7954_v44 = vld [vmem:[%s9358_s12 + $0x58] sm:$0xff] }
 0x27e   : > { %v2185_v61 = vadd.f32 %v10850_v10, %v1849_v17  ;;  %v1846_v12 = vmul.f32 %v7954_v44, %v10825_v4  ;;  %v2282_v56 = vmax.f32 %v2186_v16, 0.0  ;;  %v2370_v10 = vmul.f32 %v2274_v18, %v10940_v62 }
 0x27f   : > { %v2269_v5 = vmax.f32 %v2173_v53, 0.0  ;;  %v2270_v15 = vmax.f32 %v2174_v19, 0.0  ;;  %v10997_v6 = vpop.permute.xlu1 %1993  ;;  %v7953_v53 = vld [vmem:[%s9358_s12 + $0x50] sm:$0xff]  ;;  %v2371_v54 = vmul.f32 %v2275_v25, %v10937_v40 }
 0x280   : > { %v1944_v39 = vpop.permute.xlu0 %1943  ;;  %7825 = vset.pattern.permute.xlu1 %v14419_v24  ;;  %v1845_v19 = vmul.f32 %v7953_v53, %v10825_v4  ;;  %v2372_v53 = vmul.f32 %v2276_v23, %v10940_v62 }
 0x281   : > { %v2175_v21 = vadd.f32 %v1944_v39, %v1839_v41  ;;  %v2176_v28 = vadd.f32 %v1944_v39, %v1840_v59  ;;  %1732 = vperm.xlu1 %7825, %v14480_v0   ;;  %v2366_v32 = vmul.f32 %v2270_v15, %v10940_v62  ;;  %v2365_v49 = vmul.f32 %v2269_v5, %v10937_v40 }
 0x282   : > { %v2281_v39 = vmax.f32 %v2185_v61, 0.0  ;;  %v2369_v5 = vmul.f32 %v2273_v14, %v10937_v40  ;;  %v2378_v14 = vmul.f32 %v2282_v56, %v10940_v62 }
 0x283   : > { %v2271_v63 = vmax.f32 %v2175_v21, 0.0  ;;  %v2272_v17 = vmax.f32 %v2176_v28, 0.0  ;;  %v7086_v41 = vpack.c.bf16 %v2366_v32, %v2364_v57  ;;  %v7088_v59 = vpack.c.bf16 %v2365_v49, %v2363_v48  ;;  %v7955_v32 = vld [vmem:[%s9358_s12 + $0x60] sm:$0xff]  ;;  %v7956_v48 = vld [vmem:[%s9358_s12 + $0x68] sm:$0xff]  ;;  %v14481_v28 = vld [vmem:[#allocation39_spill] sm:$0xff] }
 0x284   : > { %v1959_v0 = vpop.permute.xlu0 %1958  ;;  %v11009_v15 = vpop.permute.xlu1 %1667  ;;  %v1847_v57 = vmul.f32 %v7955_v32, %v10837_v47  ;;  %v1848_v61 = vmul.f32 %v7956_v48, %v10837_v47  ;;  %v2188_v47 = vadd.f32 %v10869_v51, %v10973_v38  ;;  %v2377_v56 = vmul.f32 %v2281_v39, %v10937_v40 }
 0x285   : > { %v2367_v4 = vmul.f32 %v2271_v63, %v10937_v40  ;;  %v2368_v18 = vmul.f32 %v2272_v17, %v10940_v62  ;;  %v2181_v16 = vadd.f32 %v1959_v0, %v1845_v19  ;;  %v2182_v21 = vadd.f32 %v1959_v0, %v1846_v12  ;;  %7087 = vmatprep.subr.bf16.mxu1 %v7086_v41  ;;  %v7957_v19 = vld [vmem:[%s9358_s12 + $0x90] sm:$0xff] }
 0x286   : > { %1807 = vperm.xlu1 %7825, %v14481_v28   ;;  %7089 = vmatpush1.bf16.msra.mxu1 %v7088_v59  ;;  %v1853_v12 = vmul.f32 %v7957_v19, %v10859_v11  ;;  %v2187_v63 = vadd.f32 %v10869_v51, %v10969_v36  ;;  %v14482_v38 = vmov 1   ;;  %v2284_v28 = vmax.f32 %v2188_v47, 0.0 }
 0x287   : > { %v2277_v25 = vmax.f32 %v2181_v16, 0.0  ;;  %v2278_v23 = vmax.f32 %v2182_v21, 0.0  ;;  %v7090_v49 = vpack.c.bf16 %v2370_v10, %v2368_v18  ;;  %v7092_v44 = vpack.c.bf16 %v2369_v5, %v2367_v4  ;;  %v7958_v4 = vld [vmem:[%s9358_s12 + $0x98] sm:$0xff]  ;;  %v7959_v16 = vld [vmem:[%s9358_s12 + $0xb0] sm:$0xff] }
 0x288   : > { %v1964_v17 = vpop.permute.xlu0 %1963  ;;  %v1673_v41 = vpop.permute.xlu1 %1672  ;;  %v1854_v18 = vmul.f32 %v7958_v4, %v10859_v11  ;;  %v1857_v36 = vmul.f32 %v7959_v16, %v10901_v31  ;;  %v7960_v21 = vld [vmem:[%s9358_s12 + $0xb8] sm:$0xff]  ;;  %v2283_v11 = vmax.f32 %v2187_v63, 0.0  ;;  %v2195_v63 = vadd.f32 %v10997_v6, %v10977_v3 }
 0x289   : > { %v2373_v59 = vmul.f32 %v2277_v25, %v10937_v40  ;;  %v2374_v10 = vmul.f32 %v2278_v23, %v10940_v62  ;;  %v2183_v0 = vadd.f32 %v1964_v17, %v1847_v57  ;;  %v2184_v5 = vadd.f32 %v1964_v17, %v1848_v61  ;;  %7091 = vmatprep.subr.bf16.mxu1 %v7090_v49 }
 0x28a   : > { %v1858_v51 = vmul.f32 %v7960_v21, %v10901_v31  ;;  %7826 = vset.pattern.permute.xlu1 %v14482_v38  ;;  %7093 = vmatpush1.bf16.msra.mxu1 %v7092_v44  ;;  %v14483_v57 = vsub.f32 %v14477_v45, %v10737_v34  ;;  %v2193_v25 = vadd.f32 %v10929_v13, %v1857_v36  ;;  %v7961_v34 = vld [vmem:[%s9358_s12 + $0xa0] sm:$0xff]  ;;  %v7963_v21 = vld [vmem:[%s9358_s12 + $0xf0] sm:$0xff] }
 0x28b   : > { %v2279_v39 = vmax.f32 %v2183_v0, 0.0  ;;  %v2280_v32 = vmax.f32 %v2184_v5, 0.0  ;;  %v7094_v48 = vpack.c.bf16 %v2374_v10, %v2372_v53  ;;  %v7096_v61 = vpack.c.bf16 %v2373_v59, %v2371_v54  ;;  %v7962_v53 = vld [vmem:[%s9358_s12 + $0xa8] sm:$0xff] }
 0x28c   : > { %2063 = vperm.xlu1 %7826, %v14483_v57   ;;  %v2194_v23 = vadd.f32 %v10929_v13, %v1858_v51  ;;  %v1979_v31 = vpop.permute.xlu0 %1978  ;;  %v1855_v45 = vmul.f32 %v7961_v34, %v10884_v35  ;;  %v1856_v54 = vmul.f32 %v7962_v53, %v10884_v35  ;;  %v2196_v13 = vadd.f32 %v10997_v6, %v10986_v43  ;;  %v7964_v51 = vld [vmem:[%s9358_s12 + $0xf8] sm:$0xff]  ;;  %v7965_v57 = vld [vmem:[%s9358_s12 + $0xd0] sm:$0xff] }
 0x28d   : > { %v2375_v49 = vmul.f32 %v2279_v39, %v10937_v40  ;;  %v2376_v44 = vmul.f32 %v2280_v32, %v10940_v62  ;;  %v2189_v19 = vadd.f32 %v1979_v31, %v1853_v12  ;;  %v2190_v17 = vadd.f32 %v1979_v31, %v1854_v18  ;;  %7095 = vmatprep.subr.bf16.mxu1 %v7094_v48  ;;  %v2009_v0 = vpop.permute.xlu1 %2008 }
 0x28e   : > { %7097 = vmatpush1.bf16.msra.mxu1 %v7096_v61  ;;  %v14484_v12 = vsub.f32 %v14478_v55, %v10743_v1  ;;  %v2379_v4 = vmul.f32 %v2283_v11, %v10937_v40  ;;  %v2380_v35 = vmul.f32 %v2284_v28, %v10940_v62  ;;  %v2289_v18 = vmax.f32 %v2193_v25, 0.0  ;;  %v7966_v61 = vld [vmem:[%s9358_s12 + $0xd8] sm:$0xff] }
 0x28f   : > { %v2285_v47 = vmax.f32 %v2189_v19, 0.0  ;;  %v2286_v59 = vmax.f32 %v2190_v17, 0.0  ;;  %v7098_v10 = vpack.c.bf16 %v2378_v14, %v2376_v44  ;;  %v7100_v5 = vpack.c.bf16 %v2377_v56, %v2375_v49 }
 0x290   : > { %2143 = vperm.xlu1 %7826, %v14484_v12   ;;  %v2290_v3 = vmax.f32 %v2194_v23, 0.0  ;;  %v1984_v16 = vpop.permute.xlu0 %1983  ;;  %v2291_v55 = vmax.f32 %v2195_v63, 0.0  ;;  %v2292_v14 = vmax.f32 %v2196_v13, 0.0  ;;  %v1865_v56 = vmul.f32 %v7963_v21, %v1673_v41  ;;  %v7967_v63 = vld [vmem:[%s9358_s12 + $0xe0] sm:$0xff]  ;;  %v7971_v21 = vld [vmem:[%s9358_s12 + $0x110] sm:$0xff] }
 0x291   : > { %v2381_v43 = vmul.f32 %v2285_v47, %v10937_v40  ;;  %v2382_v6 = vmul.f32 %v2286_v59, %v10940_v62  ;;  %v2191_v36 = vadd.f32 %v1984_v16, %v1855_v45  ;;  %v2192_v1 = vadd.f32 %v1984_v16, %v1856_v54  ;;  %7099 = vmatprep.subr.bf16.mxu1 %v7098_v10  ;;  %v7968_v47 = vld [vmem:[%s9358_s12 + $0xe8] sm:$0xff] }
 0x292   : > { %v1866_v39 = vmul.f32 %v7964_v51, %v1673_v41  ;;  %7101 = vmatpush1.bf16.msra.mxu1 %v7100_v5  ;;  %v1683_v32 = vpop.permute.xlu1 %1682  ;;  %v1861_v48 = vmul.f32 %v7965_v57, %v10963_v2  ;;  %v1862_v11 = vmul.f32 %v7966_v61, %v10963_v2  ;;  %v14485_v23 = vsub.f32 %v14479_v22, %v10747_v52  ;;  %v7972_v51 = vld [vmem:[%s9358_s12 + $0x118] sm:$0xff] }
 0x293   : > { %v2287_v28 = vmax.f32 %v2191_v36, 0.0  ;;  %v2288_v25 = vmax.f32 %v2192_v1, 0.0  ;;  %v2201_v31 = vadd.f32 %v2009_v0, %v1865_v56  ;;  %v7102_v41 = vpack.c.bf16 %v2382_v6, %v2380_v35  ;;  %v7969_v36 = vld [vmem:[%s9358_s12 + $0x100] sm:$0xff] }
 0x294   : > { %2148 = vperm.xlu1 %7826, %v14485_v23   ;;  %v2202_v49 = vadd.f32 %v2009_v0, %v1866_v39  ;;  %v1999_v44 = vpop.permute.xlu0 %1998  ;;  %v7104_v19 = vpack.c.bf16 %v2381_v43, %v2379_v4  ;;  %v2385_v2 = vmul.f32 %v2289_v18, %v10937_v40  ;;  %v2386_v54 = vmul.f32 %v2290_v3, %v10940_v62 }
 0x295   : > { %v2383_v17 = vmul.f32 %v2287_v28, %v10937_v40  ;;  %v2384_v34 = vmul.f32 %v2288_v25, %v10940_v62  ;;  %v2197_v45 = vadd.f32 %v1999_v44, %v1861_v48  ;;  %v2198_v53 = vadd.f32 %v1999_v44, %v1862_v11  ;;  %7103 = vmatprep.subr.bf16.mxu1 %v7102_v41 }
 0x296   : > { %v2387_v52 = vmul.f32 %v2291_v55, %v10937_v40  ;;  %v2388_v22 = vmul.f32 %v2292_v14, %v10940_v62  ;;  %v1758_v0 = vpop.permute.xlu1 %1757  ;;  %v1863_v13 = vmul.f32 %v7967_v63, %v11009_v15  ;;  %v1864_v59 = vmul.f32 %v7968_v47, %v11009_v15  ;;  %7105 = vmatpush1.bf16.msra.mxu1 %v7104_v19  ;;  %v7970_v55 = vld [vmem:[%s9358_s12 + $0x108] sm:$0xff]  ;;  %v7973_v19 = vld [vmem:[%s9358_s12 + $0x200] sm:$0xff] }
 0x297   : > { %v2293_v12 = vmax.f32 %v2197_v45, 0.0  ;;  %v2294_v10 = vmax.f32 %v2198_v53, 0.0  ;;  %v2297_v5 = vmax.f32 %v2201_v31, 0.0  ;;  %v2298_v4 = vmax.f32 %v2202_v49, 0.0 }
 0x298   : > { %7827 = vset.pattern.permute.xlu1 %v14419_v24  ;;  %v2004_v35 = vpop.permute.xlu0 %2003  ;;  %v7106_v18 = vpack.c.bf16 %v2386_v54, %v2384_v34  ;;  %v7108_v3 = vpack.c.bf16 %v2385_v2, %v2383_v17  ;;  %v1867_v1 = vmul.f32 %v7969_v36, %v10803_v33  ;;  %v1868_v14 = vmul.f32 %v7970_v55, %v10803_v33  ;;  %v7974_v34 = vld [vmem:[%s9358_s12 + $0x208] sm:$0xff] }
 0x299   : > { %1742 = vperm.xlu1 %7827, %v10554_v46   ;;  %v2389_v16 = vmul.f32 %v2293_v12, %v10937_v40  ;;  %v2390_v43 = vmul.f32 %v2294_v10, %v10940_v62  ;;  %v2199_v15 = vadd.f32 %v2004_v35, %v1863_v13  ;;  %v2200_v6 = vadd.f32 %v2004_v35, %v1864_v59 }
 0x29a   : > { %v1869_v56 = vmul.f32 %v7971_v21, %v1683_v32  ;;  %v1870_v39 = vmul.f32 %v7972_v51, %v1683_v32  ;;  %7107 = vmatprep.subr.bf16.mxu1 %v7106_v18  ;;  %v2393_v28 = vmul.f32 %v2297_v5, %v10937_v40  ;;  %v2394_v25 = vmul.f32 %v2298_v4, %v10940_v62  ;;  %v7975_v4 = vld [vmem:[%s9358_s12 + $0x210] sm:$0xff]  ;;  %v7976_v18 = vld [vmem:[%s9358_s12 + $0x218] sm:$0xff]  ;;  %v7977_v21 = vld [vmem:[%s10012_s16 + $0x168] sm:$0xff] }
 0x29b   : > { %v2295_v46 = vmax.f32 %v2199_v15, 0.0  ;;  %v2296_v57 = vmax.f32 %v2200_v6, 0.0  ;;  %7109 = vmatpush1.bf16.msra.mxu1 %v7108_v3  ;;  %v2014_v48 = vpop.permute.xlu1 %2013  ;;  %v7110_v61 = vpack.c.bf16 %v2390_v43, %v2388_v22  ;;  %v7112_v11 = vpack.c.bf16 %v2389_v16, %v2387_v52 }
 0x29c   : > { %v2203_v23 = vadd.f32 %v2014_v48, %v1867_v1  ;;  %v2204_v31 = vadd.f32 %v2014_v48, %v1868_v14  ;;  %v2019_v33 = vpop.permute.xlu0 %2018  ;;  %v1899_v17 = vmul.f32 %v7973_v19, %v1758_v0  ;;  %v1900_v45 = vmul.f32 %v7974_v34, %v1758_v0  ;;  %v7979_v48 = vld [vmem:[%s9358_s12 + $0x138] sm:$0xff] }
 0x29d   : > { %1817 = vperm.xlu1 %7827, %v10573_v29   ;;  %v2391_v32 = vmul.f32 %v2295_v46, %v10937_v40  ;;  %v2392_v49 = vmul.f32 %v2296_v57, %v10940_v62  ;;  %v2205_v44 = vadd.f32 %v2019_v33, %v1869_v56  ;;  %v2206_v41 = vadd.f32 %v2019_v33, %v1870_v39  ;;  %v7978_v46 = vld [vmem:[%s9358_s12 + $0x130] sm:$0xff]  ;;  %v7980_v33 = vld [vmem:[%s9358_s12 + $0x120] sm:$0xff] }
 0x29e   : > { %7111 = vmatprep.subr.bf16.mxu1 %v7110_v61  ;;  %v2299_v53 = vmax.f32 %v2203_v23, 0.0  ;;  %v2300_v2 = vmax.f32 %v2204_v31, 0.0  ;;  %v14486_v5 = vsub.f32 %v10549_v26, %v10750_v37  ;;  %v1901_v35 = vmul.f32 %v7975_v4, %v10808_v60 }
 0x29f   : > { %v2301_v54 = vmax.f32 %v2205_v44, 0.0  ;;  %v2302_v52 = vmax.f32 %v2206_v41, 0.0  ;;  %7113 = vmatpush1.bf16.msra.mxu1 %v7112_v11  ;;  %v2094_v29 = vpop.permute.xlu1 %2093  ;;  %v7114_v22 = vpack.c.bf16 %v2394_v25, %v2392_v49  ;;  %v7116_v63 = vpack.c.bf16 %v2393_v28, %v2391_v32  ;;  %v7981_v49 = vld [vmem:[%s9358_s12 + $0x128] sm:$0xff] }
 0x2a0   : > { %v2395_v13 = vmul.f32 %v2299_v53, %v10937_v40  ;;  %v2396_v47 = vmul.f32 %v2300_v2, %v10940_v62  ;;  %v2235_v59 = vadd.f32 %v2094_v29, %v1899_v17  ;;  %v2236_v12 = vadd.f32 %v2094_v29, %v1900_v45  ;;  %v7982_v53 = vld [vmem:[%s9358_s12 + $0x220] sm:$0xff]  ;;  %v7984_v29 = vld [vmem:[%s10012_s16 + $0xf0] sm:$0xff] }
 0x2a1   : > { %7828 = vset.pattern.permute.xlu1 %v14482_v38  ;;  %v2397_v0 = vmul.f32 %v2301_v54, %v10937_v40  ;;  %v2398_v10 = vmul.f32 %v2302_v52, %v10940_v62  ;;  %7115 = vmatprep.subr.bf16.mxu1 %v7114_v22  ;;  %v1902_v3 = vmul.f32 %v7976_v18, %v10808_v60  ;;  %v7987_v18 = vld [vmem:[%s10012_s16 + $0x170] sm:$0xff] }
 0x2a2   : > { %2073 = vperm.xlu1 %7828, %v14486_v5   ;;  %v1591_v16 = vsub.f32 %v10564_v30, %v10761_v7  ;;  %v2331_v36 = vmax.f32 %v2235_v59, 0.0  ;;  %v2332_v1 = vmax.f32 %v2236_v12, 0.0  ;;  %v1592_v60 = vsub.f32 %v7977_v21, %v10767_v50  ;;  %v2029_v50 = vpop.permute.xlu0 %2028  ;;  %v7986_v5 = vld [vmem:[%s9358_s12 + $0x238] sm:$0xff] }
 0x2a3   : > { %7117 = vmatpush1.bf16.msra.mxu1 %v7116_v63  ;;  %v2099_v43 = vpop.permute.xlu1 %2098  ;;  %v7118_v15 = vpack.c.bf16 %v2398_v10, %v2396_v47  ;;  %v7120_v6 = vpack.c.bf16 %v2397_v0, %v2395_v13  ;;  %v1871_v32 = vmul.f32 %v7980_v33, %v10813_v27  ;;  %v1872_v44 = vmul.f32 %v7981_v49, %v10813_v27  ;;  %v7985_v0 = vld [vmem:[%s9358_s12 + $0x230] sm:$0xff] }
 0x2a4   : > { %v2237_v26 = vadd.f32 %v2099_v43, %v1901_v35  ;;  %v2238_v37 = vadd.f32 %v2099_v43, %v1902_v3  ;;  %v2428_v30 = vmul.f32 %v2332_v1, %v10940_v62  ;;  %v2427_v51 = vmul.f32 %v2331_v36, %v10937_v40 }
 0x2a5   : > { %7119 = vmatprep.subr.bf16.mxu1 %v7118_v15  ;;  %v1577_v22 = vsub.f32 %v7984_v29, %v10780_v9  ;;  %v1905_v10 = vmul.f32 %v7985_v0, %v10820_v42  ;;  %v1906_v9 = vmul.f32 %v7986_v5, %v10820_v42  ;;  %v1593_v3 = vsub.f32 %v7987_v18, %v10790_v8 }
 0x2a6   : > { %2153 = vperm.xlu1 %7828, %v1591_v16   ;;  %v2333_v55 = vmax.f32 %v2237_v26, 0.0  ;;  %v2334_v14 = vmax.f32 %v2238_v37, 0.0  ;;  %v7988_v26 = vld [vmem:[%s10012_s16 + $0x178] sm:$0xff]  ;;  %v14487_v37 = vld [vmem:[#allocation29_spill] sm:$0xff] }
 0x2a7   : > { %7121 = vmatpush1.bf16.msra.mxu1 %v7120_v6  ;;  %v1594_v42 = vsub.f32 %v7988_v26, %v14487_v37  ;;  %v7998_v37 = vld [vmem:[%s9358_s12 + $0x178] sm:$0xff] }
 0x2a8   : > { %v1693_v56 = vpop.permute.xlu1 %1692  ;;  %v2430_v7 = vmul.f32 %v2334_v14, %v10940_v62  ;;  %v2429_v39 = vmul.f32 %v2333_v55, %v10937_v40 }
 0x2a9   : > { %v1873_v57 = vmul.f32 %v7978_v46, %v1693_v56  ;;  %v1874_v61 = vmul.f32 %v7979_v48, %v1693_v56  ;;  %v7989_v56 = vld [vmem:[%s9358_s12 + $0x150] sm:$0xff] }
 0x2aa   : > { %2158 = vperm.xlu1 %7828, %v1592_v60   ;;  %v7150_v11 = vpack.c.bf16 %v2430_v7, %v2428_v30  ;;  %v7152_v28 = vpack.c.bf16 %v2429_v39, %v2427_v51  ;;  %v7990_v7 = vld [vmem:[%s9358_s12 + $0x158] sm:$0xff] }
 0x2ab   : > { %v2209_v23 = vadd.f32 %v2029_v50, %v1873_v57  ;;  %v2210_v31 = vadd.f32 %v2029_v50, %v1874_v61  ;;  %v2039_v57 = vpop.permute.xlu0 %2038  ;;  %v14488_v50 = vld [vmem:[#allocation5_spill] sm:$0xff] }
 0x2ac   : > { %v1768_v25 = vpop.permute.xlu1 %1767  ;;  %7151 = vmatprep.subr.bf16.mxu0 %v7150_v11 }
 0x2ad   : > { %7153 = vmatpush1.bf16.msra.mxu0 %v7152_v28  ;;  %v2305_v41 = vmax.f32 %v2209_v23, 0.0  ;;  %v2306_v19 = vmax.f32 %v2210_v31, 0.0  ;;  %v1903_v2 = vmul.f32 %v7982_v53, %v1768_v25  ;;  %v7991_v28 = vld [vmem:[%s9358_s12 + $0x140] sm:$0xff]  ;;  %v7992_v23 = vld [vmem:[%s9358_s12 + $0x148] sm:$0xff] }
 0x2ae   : > { %7829 = vset.pattern.permute.xlu1 %v14419_v24  ;;  %v7983_v24 = vld [vmem:[%s9358_s12 + $0x228] sm:$0xff]  ;;  %v1876_v31 = vmul.f32 %v7992_v23, %v14488_v50 }
 0x2af   : > { %1752 = vperm.xlu1 %7829, %v10586_v58   ;;  %v1904_v54 = vmul.f32 %v7983_v24, %v1768_v25  ;;  %v2402_v63 = vmul.f32 %v2306_v19, %v10940_v62  ;;  %v2401_v13 = vmul.f32 %v2305_v41, %v10937_v40  ;;  %v1875_v25 = vmul.f32 %v7991_v28, %v14488_v50  ;;  %v2460_v19 = vld [vmem:[%s11153_s24 + $0x8] sm:$0xff]  ;;  %v8001_v50 = vld [vmem:[%s9358_s12 + $0x260] sm:$0xff] }
 0x2b0   : > { %2595 = vmatprep.mubr.f32.mxu1 %v2460_v19  ;;  %v8002_v23 = vld [vmem:[%s9358_s12 + $0x268] sm:$0xff] }
 0x2b1   : > { %v2024_v17 = vpop.permute.xlu1 %2023 }
 0x2b2   : > { %v2207_v34 = vadd.f32 %v2024_v17, %v1871_v32  ;;  %v2208_v45 = vadd.f32 %v2024_v17, %v1872_v44  ;;  %v7993_v17 = vld [vmem:[%s9358_s12 + $0x240] sm:$0xff] }
 0x2b3   : > { %1827 = vperm.xlu1 %7829, %v10602_v20  }
 0x2b4   : > { %v2303_v58 = vmax.f32 %v2207_v34, 0.0  ;;  %v2304_v52 = vmax.f32 %v2208_v45, 0.0  ;;  %v7994_v45 = vld [vmem:[%s9358_s12 + $0x248] sm:$0xff] }
 0x2b5   : > { %v2104_v27 = vpop.permute.xlu1 %2103 }
 0x2b6   : > { %v2399_v47 = vmul.f32 %v2303_v58, %v10937_v40  ;;  %v2400_v20 = vmul.f32 %v2304_v52, %v10940_v62  ;;  %v2239_v59 = vadd.f32 %v2104_v27, %v1903_v2  ;;  %v2240_v12 = vadd.f32 %v2104_v27, %v1904_v54 }
 0x2b7   : > { %7831 = vset.pattern.permute.xlu1 %v14482_v38 }
 0x2b8   : > { %2083 = vperm.xlu1 %7831, %v1577_v22   ;;  %v7122_v4 = vpack.c.bf16 %v2402_v63, %v2400_v20  ;;  %v7124_v35 = vpack.c.bf16 %v2401_v13, %v2399_v47  ;;  %v2335_v43 = vmax.f32 %v2239_v59, 0.0  ;;  %v2336_v15 = vmax.f32 %v2240_v12, 0.0  ;;  %v7995_v13 = vld [vmem:[%s9358_s12 + $0x250] sm:$0xff]  ;;  %v14489_v47 = vld [vmem:[#allocation6_spill] sm:$0xff]  ;;  %v7996_v59 = vld [vmem:[%s9358_s12 + $0x258] sm:$0xff] }
 0x2b9   : > { %v2109_v16 = vpop.permute.xlu1 %2108  ;;  %v1909_v20 = vmul.f32 %v7995_v13, %v14489_v47  ;;  %v1910_v12 = vmul.f32 %v7996_v59, %v14489_v47 }
 0x2ba   : > { %v2241_v6 = vadd.f32 %v2109_v16, %v1905_v10  ;;  %v2242_v38 = vadd.f32 %v2109_v16, %v1906_v9  ;;  %7123 = vmatprep.subr.bf16.mxu1 %v7122_v4  ;;  %v2431_v55 = vmul.f32 %v2335_v43, %v10937_v40  ;;  %v2432_v14 = vmul.f32 %v2336_v15, %v10940_v62 }
 0x2bb   : > { %7125 = vmatpush1.bf16.msra.mxu1 %v7124_v35 }
 0x2bc   : > { %2163 = vperm.xlu1 %7831, %v1593_v3   ;;  %v2337_v36 = vmax.f32 %v2241_v6, 0.0  ;;  %v2338_v1 = vmax.f32 %v2242_v38, 0.0 }
 0x2be   : > { %v2433_v8 = vmul.f32 %v2337_v36, %v10937_v40  ;;  %v2434_v21 = vmul.f32 %v2338_v1, %v10940_v62  ;;  %v1703_v60 = vpop.permute.xlu1 %1702  ;;  %v7997_v1 = vld [vmem:[%s9358_s12 + $0x170] sm:$0xff] }
 0x2bf   : > { %v1877_v30 = vmul.f32 %v7989_v56, %v1703_v60  ;;  %v1878_v51 = vmul.f32 %v7990_v7, %v1703_v60  ;;  %v14490_v7 = vld [vmem:[#allocation9_spill] sm:$0xff] }
 0x2c0   : > { %2168 = vperm.xlu1 %7831, %v1594_v42   ;;  %v7154_v39 = vpack.c.bf16 %v2434_v21, %v2432_v14  ;;  %v7156_v46 = vpack.c.bf16 %v2433_v8, %v2431_v55  ;;  %v2049_v8 = vpop.permute.xlu0 %2048 }
 0x2c1   : > { %v2213_v61 = vadd.f32 %v2039_v57, %v1877_v30  ;;  %v2214_v11 = vadd.f32 %v2039_v57, %v1878_v51  ;;  %v7999_v30 = vld [vmem:[%s9358_s12 + $0x160] sm:$0xff] }
 0x2c2   : > { %v1778_v48 = vpop.permute.xlu1 %1777  ;;  %7155 = vmatprep.subr.bf16.mxu0 %v7154_v39  ;;  %v1879_v51 = vmul.f32 %v7999_v30, %v14490_v7  ;;  %v8000_v39 = vld [vmem:[%s9358_s12 + $0x168] sm:$0xff]  ;;  %v8009_v30 = vld [vmem:[%s9358_s12 + $0x280] sm:$0xff] }
 0x2c3   : > { %7157 = vmatpush1.bf16.msra.mxu0 %v7156_v46  ;;  %v2309_v33 = vmax.f32 %v2213_v61, 0.0  ;;  %v2310_v32 = vmax.f32 %v2214_v11, 0.0  ;;  %v1907_v34 = vmul.f32 %v7993_v17, %v1778_v48  ;;  %v1908_v53 = vmul.f32 %v7994_v45, %v1778_v48 }
 0x2c4   : > { %v1880_v46 = vmul.f32 %v8000_v39, %v14490_v7 }
 0x2c5   : > { %v2406_v58 = vmul.f32 %v2310_v32, %v10940_v62  ;;  %v2405_v52 = vmul.f32 %v2309_v33, %v10937_v40 }
 0x2c7   : > { %v2034_v49 = vpop.permute.xlu1 %2033 }
 0x2c8   : > { %v2211_v44 = vadd.f32 %v2034_v49, %v1875_v25  ;;  %v2212_v41 = vadd.f32 %v2034_v49, %v1876_v31 }
 0x2ca   : > { %v2307_v2 = vmax.f32 %v2211_v44, 0.0  ;;  %v2308_v24 = vmax.f32 %v2212_v41, 0.0 }
 0x2cb   : > { %v2114_v54 = vpop.permute.xlu1 %2113 }
 0x2cc   : > { %v2403_v29 = vmul.f32 %v2307_v2, %v10937_v40  ;;  %v2404_v22 = vmul.f32 %v2308_v24, %v10940_v62  ;;  %v2243_v27 = vadd.f32 %v2114_v54, %v1907_v34  ;;  %v2244_v63 = vadd.f32 %v2114_v54, %v1908_v53  ;;  %v8003_v53 = vld [vmem:[%s9358_s12 + $0x270] sm:$0xff]  ;;  %v14491_v2 = vld [vmem:[#allocation28_spill] sm:$0xff] }
 0x2cd   : > { %v1913_v24 = vmul.f32 %v8003_v53, %v14491_v2  ;;  %v8004_v54 = vld [vmem:[%s9358_s12 + $0x278] sm:$0xff] }
 0x2ce   : > { %v7126_v0 = vpack.c.bf16 %v2406_v58, %v2404_v22  ;;  %v7128_v10 = vpack.c.bf16 %v2405_v52, %v2403_v29  ;;  %v2339_v9 = vmax.f32 %v2243_v27, 0.0  ;;  %v2340_v4 = vmax.f32 %v2244_v63, 0.0 }
 0x2cf   : > { %v2119_v5 = vpop.permute.xlu1 %2118  ;;  %v1914_v58 = vmul.f32 %v8004_v54, %v14491_v2 }
 0x2d0   : > { %v2245_v35 = vadd.f32 %v2119_v5, %v1909_v20  ;;  %v2246_v18 = vadd.f32 %v2119_v5, %v1910_v12  ;;  %7127 = vmatprep.subr.bf16.mxu1 %v7126_v0  ;;  %v2435_v43 = vmul.f32 %v2339_v9, %v10937_v40  ;;  %v2436_v15 = vmul.f32 %v2340_v4, %v10940_v62  ;;  %v8005_v4 = vld [vmem:[%s9358_s12 + $0x190] sm:$0xff] }
 0x2d1   : > { %7129 = vmatpush1.bf16.msra.mxu1 %v7128_v10 }
 0x2d2   : > { %v2341_v3 = vmax.f32 %v2245_v35, 0.0  ;;  %v2342_v16 = vmax.f32 %v2246_v18, 0.0  ;;  %v8006_v18 = vld [vmem:[%s9358_s12 + $0x198] sm:$0xff] }
 0x2d4   : > { %v2437_v6 = vmul.f32 %v2341_v3, %v10937_v40  ;;  %v2438_v38 = vmul.f32 %v2342_v16, %v10940_v62  ;;  %v1713_v36 = vpop.permute.xlu1 %1712 }
 0x2d5   : > { %v1881_v26 = vmul.f32 %v7997_v1, %v1713_v36  ;;  %v1882_v42 = vmul.f32 %v7998_v37, %v1713_v36  ;;  %v8007_v1 = vld [vmem:[%s9358_s12 + $0x180] sm:$0xff] }
 0x2d6   : > { %v7158_v55 = vpack.c.bf16 %v2438_v38, %v2436_v15  ;;  %v7160_v14 = vpack.c.bf16 %v2437_v6, %v2435_v43  ;;  %v2059_v15 = vpop.permute.xlu0 %2058 }
 0x2d7   : > { %v2217_v60 = vadd.f32 %v2049_v8, %v1881_v26  ;;  %v2218_v56 = vadd.f32 %v2049_v8, %v1882_v42  ;;  %v14492_v26 = vld [vmem:[#allocation27_spill] sm:$0xff]  ;;  %v8008_v42 = vld [vmem:[%s9358_s12 + $0x188] sm:$0xff] }
 0x2d8   : > { %v1788_v21 = vpop.permute.xlu1 %1787  ;;  %7159 = vmatprep.subr.bf16.mxu0 %v7158_v55  ;;  %v1883_v37 = vmul.f32 %v8007_v1, %v14492_v26  ;;  %v1884_v55 = vmul.f32 %v8008_v42, %v14492_v26  ;;  %v8017_v1 = vld [vmem:[%s9358_s12 + $0x2a0] sm:$0xff] }
 0x2d9   : > { %7161 = vmatpush1.bf16.msra.mxu0 %v7160_v14  ;;  %v2313_v57 = vmax.f32 %v2217_v60, 0.0  ;;  %v2314_v48 = vmax.f32 %v2218_v56, 0.0  ;;  %v1911_v25 = vmul.f32 %v8001_v50, %v1788_v21  ;;  %v1912_v31 = vmul.f32 %v8002_v23, %v1788_v21 }
 0x2db   : > { %v2410_v44 = vmul.f32 %v2314_v48, %v10940_v62  ;;  %v2409_v41 = vmul.f32 %v2313_v57, %v10937_v40 }
 0x2dd   : > { %v2044_v61 = vpop.permute.xlu1 %2043 }
 0x2de   : > { %v2215_v11 = vadd.f32 %v2044_v61, %v1879_v51  ;;  %v2216_v28 = vadd.f32 %v2044_v61, %v1880_v46  ;;  %v8010_v51 = vld [vmem:[%s9358_s12 + $0x288] sm:$0xff] }
 0x2e0   : > { %v2311_v33 = vmax.f32 %v2215_v11, 0.0  ;;  %v2312_v32 = vmax.f32 %v2216_v28, 0.0 }
 0x2e1   : > { %v2124_v49 = vpop.permute.xlu1 %2123 }
 0x2e2   : > { %v2407_v19 = vmul.f32 %v2311_v33, %v10937_v40  ;;  %v2408_v17 = vmul.f32 %v2312_v32, %v10940_v62  ;;  %v2247_v34 = vadd.f32 %v2124_v49, %v1911_v25  ;;  %v2248_v45 = vadd.f32 %v2124_v49, %v1912_v31  ;;  %v8011_v31 = vld [vmem:[%s9358_s12 + $0x290] sm:$0xff]  ;;  %v14493_v33 = vld [vmem:[#allocation10_spill] sm:$0xff]  ;;  %v8012_v49 = vld [vmem:[%s9358_s12 + $0x298] sm:$0xff] }
 0x2e3   : > { %v1917_v32 = vmul.f32 %v8011_v31, %v14493_v33 }
 0x2e4   : > { %v7130_v52 = vpack.c.bf16 %v2410_v44, %v2408_v17  ;;  %v7132_v29 = vpack.c.bf16 %v2409_v41, %v2407_v19  ;;  %v2343_v27 = vmax.f32 %v2247_v34, 0.0  ;;  %v2344_v63 = vmax.f32 %v2248_v45, 0.0 }
 0x2e5   : > { %v2129_v22 = vpop.permute.xlu1 %2128  ;;  %v1918_v44 = vmul.f32 %v8012_v49, %v14493_v33 }
 0x2e6   : > { %v2249_v13 = vadd.f32 %v2129_v22, %v1913_v24  ;;  %v2250_v47 = vadd.f32 %v2129_v22, %v1914_v58  ;;  %7131 = vmatprep.subr.bf16.mxu1 %v7130_v52  ;;  %v2439_v12 = vmul.f32 %v2343_v27, %v10937_v40  ;;  %v2440_v0 = vmul.f32 %v2344_v63, %v10940_v62  ;;  %v8013_v63 = vld [vmem:[%s9358_s12 + $0x1b0] sm:$0xff] }
 0x2e7   : > { %7133 = vmatpush1.bf16.msra.mxu1 %v7132_v29 }
 0x2e8   : > { %v2345_v20 = vmax.f32 %v2249_v13, 0.0  ;;  %v2346_v59 = vmax.f32 %v2250_v47, 0.0  ;;  %v8014_v47 = vld [vmem:[%s9358_s12 + $0x1b8] sm:$0xff] }
 0x2ea   : > { %v2441_v10 = vmul.f32 %v2345_v20, %v10937_v40  ;;  %v2442_v5 = vmul.f32 %v2346_v59, %v10940_v62  ;;  %v1723_v9 = vpop.permute.xlu1 %1722 }
 0x2eb   : > { %v1885_v35 = vmul.f32 %v8005_v4, %v1723_v9  ;;  %v1886_v3 = vmul.f32 %v8006_v18, %v1723_v9  ;;  %v8015_v4 = vld [vmem:[%s9358_s12 + $0x1a0] sm:$0xff] }
 0x2ec   : > { %v7162_v16 = vpack.c.bf16 %v2442_v5, %v2440_v0  ;;  %v7164_v43 = vpack.c.bf16 %v2441_v10, %v2439_v12  ;;  %v2069_v0 = vpop.permute.xlu0 %2068 }
 0x2ed   : > { %v2221_v38 = vadd.f32 %v2059_v15, %v1885_v35  ;;  %v2222_v36 = vadd.f32 %v2059_v15, %v1886_v3  ;;  %v14494_v35 = vld [vmem:[#allocation32_spill] sm:$0xff]  ;;  %v8016_v3 = vld [vmem:[%s9358_s12 + $0x1a8] sm:$0xff] }
 0x2ee   : > { %v1798_v6 = vpop.permute.xlu1 %1797  ;;  %7163 = vmatprep.subr.bf16.mxu0 %v7162_v16  ;;  %v1887_v18 = vmul.f32 %v8015_v4, %v14494_v35  ;;  %v1888_v16 = vmul.f32 %v8016_v3, %v14494_v35  ;;  %v8025_v4 = vld [vmem:[%s9358_s12 + $0x2c0] sm:$0xff] }
 0x2ef   : > { %7165 = vmatpush1.bf16.msra.mxu0 %v7164_v43  ;;  %v2317_v14 = vmax.f32 %v2221_v38, 0.0  ;;  %v2318_v8 = vmax.f32 %v2222_v36, 0.0  ;;  %v1915_v7 = vmul.f32 %v8009_v30, %v1798_v6  ;;  %v1916_v39 = vmul.f32 %v8010_v51, %v1798_v6 }
 0x2f1   : > { %v2414_v61 = vmul.f32 %v2318_v8, %v10940_v62  ;;  %v2413_v11 = vmul.f32 %v2317_v14, %v10937_v40 }
 0x2f3   : > { %v2054_v21 = vpop.permute.xlu1 %2053 }
 0x2f4   : > { %v2219_v60 = vadd.f32 %v2054_v21, %v1883_v37  ;;  %v2220_v56 = vadd.f32 %v2054_v21, %v1884_v55  ;;  %v8018_v37 = vld [vmem:[%s9358_s12 + $0x2a8] sm:$0xff] }
 0x2f6   : > { %v2315_v46 = vmax.f32 %v2219_v60, 0.0  ;;  %v2316_v57 = vmax.f32 %v2220_v56, 0.0 }
 0x2f7   : > { %v2134_v48 = vpop.permute.xlu1 %2133 }
 0x2f8   : > { %v2411_v28 = vmul.f32 %v2315_v46, %v10937_v40  ;;  %v2412_v50 = vmul.f32 %v2316_v57, %v10940_v62  ;;  %v2251_v25 = vadd.f32 %v2134_v48, %v1915_v7  ;;  %v2252_v23 = vadd.f32 %v2134_v48, %v1916_v39  ;;  %v8019_v39 = vld [vmem:[%s9358_s12 + $0x2b0] sm:$0xff]  ;;  %v8020_v48 = vld [vmem:[%s9358_s12 + $0x2b8] sm:$0xff] }
 0x2f9   : > { %v14495_v46 = vld [vmem:[#allocation7_spill] sm:$0xff] }
 0x2fa   : > { %v7134_v41 = vpack.c.bf16 %v2414_v61, %v2412_v50  ;;  %v7136_v19 = vpack.c.bf16 %v2413_v11, %v2411_v28  ;;  %v2347_v34 = vmax.f32 %v2251_v25, 0.0  ;;  %v2348_v45 = vmax.f32 %v2252_v23, 0.0 }
 0x2fb   : > { %v2139_v17 = vpop.permute.xlu1 %2138  ;;  %v1921_v57 = vmul.f32 %v8019_v39, %v14495_v46  ;;  %v1922_v61 = vmul.f32 %v8020_v48, %v14495_v46 }
 0x2fc   : > { %v2253_v53 = vadd.f32 %v2139_v17, %v1917_v32  ;;  %v2254_v2 = vadd.f32 %v2139_v17, %v1918_v44  ;;  %7135 = vmatprep.subr.bf16.mxu1 %v7134_v41  ;;  %v2443_v58 = vmul.f32 %v2347_v34, %v10937_v40  ;;  %v2444_v52 = vmul.f32 %v2348_v45, %v10940_v62  ;;  %v8021_v45 = vld [vmem:[%s9358_s12 + $0x1d0] sm:$0xff] }
 0x2fd   : > { %7137 = vmatpush1.bf16.msra.mxu1 %v7136_v19 }
 0x2fe   : > { %v2349_v24 = vmax.f32 %v2253_v53, 0.0  ;;  %v2350_v54 = vmax.f32 %v2254_v2, 0.0  ;;  %v8022_v2 = vld [vmem:[%s9358_s12 + $0x1d8] sm:$0xff] }
 0x300   : > { %v2445_v29 = vmul.f32 %v2349_v24, %v10937_v40  ;;  %v2446_v22 = vmul.f32 %v2350_v54, %v10940_v62  ;;  %v1733_v27 = vpop.permute.xlu1 %1732 }
 0x301   : > { %v1889_v13 = vmul.f32 %v8013_v63, %v1733_v27  ;;  %v1890_v20 = vmul.f32 %v8014_v47, %v1733_v27  ;;  %v8023_v63 = vld [vmem:[%s9358_s12 + $0x1c0] sm:$0xff] }
 0x302   : > { %v7166_v59 = vpack.c.bf16 %v2446_v22, %v2444_v52  ;;  %v7168_v12 = vpack.c.bf16 %v2445_v29, %v2443_v58  ;;  %v2079_v52 = vpop.permute.xlu0 %2078 }
 0x303   : > { %v2225_v5 = vadd.f32 %v2069_v0, %v1889_v13  ;;  %v2226_v9 = vadd.f32 %v2069_v0, %v1890_v20  ;;  %v14496_v13 = vld [vmem:[#allocation33_spill] sm:$0xff]  ;;  %v8024_v20 = vld [vmem:[%s9358_s12 + $0x1c8] sm:$0xff] }
 0x304   : > { %7167 = vmatprep.subr.bf16.mxu0 %v7166_v59  ;;  %v1891_v47 = vmul.f32 %v8023_v63, %v14496_v13  ;;  %v1892_v59 = vmul.f32 %v8024_v20, %v14496_v13  ;;  %v8033_v63 = vld [vmem:[%s9358_s12 + $0x2e0] sm:$0xff] }
 0x305   : > { %v1808_v10 = vpop.permute.xlu1 %1807  ;;  %7169 = vmatpush1.bf16.msra.mxu0 %v7168_v12  ;;  %v2321_v43 = vmax.f32 %v2225_v5, 0.0  ;;  %v2322_v15 = vmax.f32 %v2226_v9, 0.0 }
 0x306   : > { %v1919_v26 = vmul.f32 %v8017_v1, %v1808_v10  ;;  %v1920_v42 = vmul.f32 %v8018_v37, %v1808_v10 }
 0x307   : > { %v2418_v21 = vmul.f32 %v2322_v15, %v10940_v62  ;;  %v2417_v60 = vmul.f32 %v2321_v43, %v10937_v40 }
 0x30b   : > { %v2064_v6 = vpop.permute.xlu1 %2063 }
 0x30c   : > { %v2223_v38 = vadd.f32 %v2064_v6, %v1887_v18  ;;  %v2224_v36 = vadd.f32 %v2064_v6, %v1888_v16  ;;  %v8026_v18 = vld [vmem:[%s9358_s12 + $0x2c8] sm:$0xff] }
 0x30e   : > { %v2319_v55 = vmax.f32 %v2223_v38, 0.0  ;;  %v2320_v14 = vmax.f32 %v2224_v36, 0.0 }
 0x30f   : > { %v2144_v8 = vpop.permute.xlu1 %2143 }
 0x310   : > { %v2415_v56 = vmul.f32 %v2319_v55, %v10937_v40  ;;  %v2416_v30 = vmul.f32 %v2320_v14, %v10940_v62  ;;  %v2255_v7 = vadd.f32 %v2144_v8, %v1919_v26  ;;  %v2256_v51 = vadd.f32 %v2144_v8, %v1920_v42  ;;  %v8027_v42 = vld [vmem:[%s9358_s12 + $0x2d0] sm:$0xff]  ;;  %v14497_v55 = vld [vmem:[#allocation14_spill] sm:$0xff]  ;;  %v8028_v8 = vld [vmem:[%s9358_s12 + $0x2d8] sm:$0xff] }
 0x311   : > { %v1925_v14 = vmul.f32 %v8027_v42, %v14497_v55 }
 0x312   : > { %v7138_v11 = vpack.c.bf16 %v2418_v21, %v2416_v30  ;;  %v7140_v28 = vpack.c.bf16 %v2417_v60, %v2415_v56  ;;  %v2351_v25 = vmax.f32 %v2255_v7, 0.0  ;;  %v2352_v23 = vmax.f32 %v2256_v51, 0.0 }
 0x313   : > { %v2149_v50 = vpop.permute.xlu1 %2148  ;;  %v1926_v21 = vmul.f32 %v8028_v8, %v14497_v55 }
 0x314   : > { %v2257_v31 = vadd.f32 %v2149_v50, %v1921_v57  ;;  %v2258_v33 = vadd.f32 %v2149_v50, %v1922_v61  ;;  %7139 = vmatprep.subr.bf16.mxu1 %v7138_v11  ;;  %v2447_v44 = vmul.f32 %v2351_v25, %v10937_v40  ;;  %v2448_v41 = vmul.f32 %v2352_v23, %v10940_v62  ;;  %v8029_v23 = vld [vmem:[%s9358_s12 + $0x1f0] sm:$0xff] }
 0x315   : > { %7141 = vmatpush1.bf16.msra.mxu1 %v7140_v28 }
 0x316   : > { %v2353_v32 = vmax.f32 %v2257_v31, 0.0  ;;  %v2354_v49 = vmax.f32 %v2258_v33, 0.0  ;;  %v8030_v33 = vld [vmem:[%s9358_s12 + $0x1f8] sm:$0xff] }
 0x318   : > { %v2449_v19 = vmul.f32 %v2353_v32, %v10937_v40  ;;  %v2450_v17 = vmul.f32 %v2354_v49, %v10940_v62  ;;  %v1743_v34 = vpop.permute.xlu1 %1742 }
 0x319   : > { %v1893_v53 = vmul.f32 %v8021_v45, %v1743_v34  ;;  %v1894_v24 = vmul.f32 %v8022_v2, %v1743_v34  ;;  %v8031_v45 = vld [vmem:[%s9358_s12 + $0x1e0] sm:$0xff] }
 0x31a   : > { %v7170_v54 = vpack.c.bf16 %v2450_v17, %v2448_v41  ;;  %v7172_v58 = vpack.c.bf16 %v2449_v19, %v2447_v44  ;;  %v2089_v41 = vpop.permute.xlu0 %2088 }
 0x31b   : > { %v2229_v22 = vadd.f32 %v2079_v52, %v1893_v53  ;;  %v2230_v27 = vadd.f32 %v2079_v52, %v1894_v24  ;;  %v14498_v53 = vld [vmem:[#allocation31_spill] sm:$0xff]  ;;  %v8032_v24 = vld [vmem:[%s9358_s12 + $0x1e8] sm:$0xff] }
 0x31c   : > { %v1818_v29 = vpop.permute.xlu1 %1817  ;;  %7171 = vmatprep.subr.bf16.mxu0 %v7170_v54  ;;  %v1895_v2 = vmul.f32 %v8031_v45, %v14498_v53  ;;  %v1896_v54 = vmul.f32 %v8032_v24, %v14498_v53  ;;  %v2481_v45 = vld [vmem:[%s11153_s24 + $0xb0] sm:$0xff]  ;;  %v2476_v53 = vld [vmem:[%s11153_s24 + $0x88] sm:$0xff] }
 0x31d   : > { %7173 = vmatpush1.bf16.msra.mxu0 %v7172_v58  ;;  %v2325_v12 = vmax.f32 %v2229_v22, 0.0  ;;  %v2326_v0 = vmax.f32 %v2230_v27, 0.0  ;;  %v1923_v35 = vmul.f32 %v8025_v4, %v1818_v29  ;;  %v1924_v3 = vmul.f32 %v8026_v18, %v1818_v29  ;;  %v2484_v24 = vld [vmem:[%s11153_s24 + $0xc8] sm:$0xff] }
 0x31f   : > { %v2422_v6 = vmul.f32 %v2326_v0, %v10940_v62  ;;  %v2421_v38 = vmul.f32 %v2325_v12, %v10937_v40 }
 0x321   : > { %v2074_v10 = vpop.permute.xlu1 %2073 }
 0x322   : > { %v2227_v5 = vadd.f32 %v2074_v10, %v1891_v47  ;;  %v2228_v9 = vadd.f32 %v2074_v10, %v1892_v59  ;;  %v8034_v47 = vld [vmem:[%s9358_s12 + $0x2e8] sm:$0xff] }
 0x324   : > { %v2323_v16 = vmax.f32 %v2227_v5, 0.0  ;;  %v2324_v43 = vmax.f32 %v2228_v9, 0.0 }
 0x325   : > { %v2154_v15 = vpop.permute.xlu1 %2153 }
 0x326   : > { %v2419_v36 = vmul.f32 %v2323_v16, %v10937_v40  ;;  %v2420_v1 = vmul.f32 %v2324_v43, %v10940_v62  ;;  %v2259_v26 = vadd.f32 %v2154_v15, %v1923_v35  ;;  %v2260_v37 = vadd.f32 %v2154_v15, %v1924_v3  ;;  %v8035_v3 = vld [vmem:[%s9358_s12 + $0x2f0] sm:$0xff]  ;;  %v14499_v16 = vld [vmem:[#allocation30_spill] sm:$0xff]  ;;  %v8036_v15 = vld [vmem:[%s9358_s12 + $0x2f8] sm:$0xff] }
 0x327   : > { %v1929_v43 = vmul.f32 %v8035_v3, %v14499_v16  ;;  %v2501_v3 = vld [vmem:[%s11153_s24 + $0x150] sm:$0xff] }
 0x328   : > { %v7142_v60 = vpack.c.bf16 %v2422_v6, %v2420_v1  ;;  %v7144_v56 = vpack.c.bf16 %v2421_v38, %v2419_v36  ;;  %v2355_v7 = vmax.f32 %v2259_v26, 0.0  ;;  %v2356_v51 = vmax.f32 %v2260_v37, 0.0 }
 0x329   : > { %v2159_v30 = vpop.permute.xlu1 %2158  ;;  %v1930_v6 = vmul.f32 %v8036_v15, %v14499_v16  ;;  %v2505_v16 = vld [vmem:[%s11153_s24 + $0x170] sm:$0xff]  ;;  %v2504_v15 = vld [vmem:[%s11153_s24 + $0x168] sm:$0xff] }
 0x32a   : > { %v2261_v39 = vadd.f32 %v2159_v30, %v1925_v14  ;;  %v2262_v46 = vadd.f32 %v2159_v30, %v1926_v21  ;;  %7143 = vmatprep.subr.bf16.mxu1 %v7142_v60  ;;  %v2451_v61 = vmul.f32 %v2355_v7, %v10937_v40  ;;  %v2452_v11 = vmul.f32 %v2356_v51, %v10940_v62  ;;  %v2459_v14 = vld [vmem:[%s11153_s24] sm:$0xff] }
 0x32b   : > { %7145 = vmatpush1.bf16.msra.mxu1 %v7144_v56  ;;  %v2463_v60 = vld [vmem:[%s11153_s24 + $0x20] sm:$0xff] }
 0x32c   : > { %v2357_v57 = vmax.f32 %v2261_v39, 0.0  ;;  %v2358_v48 = vmax.f32 %v2262_v46, 0.0  ;;  %v2462_v39 = vld [vmem:[%s11153_s24 + $0x18] sm:$0xff] }
 0x32e   : > { %v2453_v28 = vmul.f32 %v2357_v57, %v10937_v40  ;;  %v2454_v50 = vmul.f32 %v2358_v48, %v10940_v62  ;;  %v1753_v25 = vpop.permute.xlu1 %1752  ;;  %v2466_v48 = vld [vmem:[%s11153_s24 + $0x38] sm:$0xff] }
 0x32f   : > { %v1897_v31 = vmul.f32 %v8029_v23, %v1753_v25  ;;  %v1898_v32 = vmul.f32 %v8030_v33, %v1753_v25  ;;  %v2464_v25 = vld [vmem:[%s11153_s24 + $0x28] sm:$0xff]  ;;  %v2467_v33 = vld [vmem:[%s11153_s24 + $0x40] sm:$0xff] }
 0x330   : > { %v7174_v49 = vpack.c.bf16 %v2454_v50, %v2452_v11  ;;  %v7176_v44 = vpack.c.bf16 %v2453_v28, %v2451_v61  ;;  %v2461_v61 = vld [vmem:[%s11153_s24 + $0x10] sm:$0xff]  ;;  %v14500_v50 = vmov 0.0   ;;  %v2468_v23 = vld [vmem:[%s11153_s24 + $0x48] sm:$0xff] }
 0x331   : > { %v2233_v17 = vadd.f32 %v2089_v41, %v1897_v31  ;;  %v2234_v34 = vadd.f32 %v2089_v41, %v1898_v32  ;;  %v2465_v11 = vld [vmem:[%s11153_s24 + $0x30] sm:$0xff]  ;;  %v2472_v31 = vld [vmem:[%s11153_s24 + $0x68] sm:$0xff]  ;;  %v2471_v32 = vld [vmem:[%s11153_s24 + $0x60] sm:$0xff] }
 0x332   : > { %v1828_v19 = vpop.permute.xlu1 %1827  ;;  %7175 = vmatprep.subr.bf16.mxu0 %v7174_v49  ;;  %v2469_v28 = vld [vmem:[%s11153_s24 + $0x50] sm:$0xff]  ;;  %v2475_v49 = vld [vmem:[%s11153_s24 + $0x80] sm:$0xff]  ;;  %v2474_v41 = vld [vmem:[%s11153_s24 + $0x78] sm:$0xff] }
 0x333   : > { %7177 = vmatpush1.bf16.msra.mxu0 %v7176_v44  ;;  %v2329_v58 = vmax.f32 %v2233_v17, 0.0  ;;  %v2330_v52 = vmax.f32 %v2234_v34, 0.0  ;;  %v1927_v13 = vmul.f32 %v8033_v63, %v1828_v19  ;;  %v1928_v20 = vmul.f32 %v8034_v47, %v1828_v19  ;;  %v2470_v44 = vld [vmem:[%s11153_s24 + $0x58] sm:$0xff]  ;;  %v2473_v17 = vld [vmem:[%s11153_s24 + $0x70] sm:$0xff] }
 0x334   : > { %v2478_v19 = vld [vmem:[%s11153_s24 + $0x98] sm:$0xff]  ;;  %v2477_v34 = vld [vmem:[%s11153_s24 + $0x90] sm:$0xff] }
 0x335   : > { %v2426_v10 = vmul.f32 %v2330_v52, %v10940_v62  ;;  %v2425_v5 = vmul.f32 %v2329_v58, %v10937_v40  ;;  %v2483_v58 = vld [vmem:[%s11153_s24 + $0xc0] sm:$0xff]  ;;  %v2485_v63 = vld [vmem:[%s11153_s24 + $0xd0] sm:$0xff] }
 0x336   : > { %v2487_v52 = vld [vmem:[%s11153_s24 + $0xe0] sm:$0xff]  ;;  %v2493_v47 = vld [vmem:[%s11153_s24 + $0x110] sm:$0xff] }
 0x337   : > { %v2084_v29 = vpop.permute.xlu1 %2083 }
 0x338   : > { %v2231_v22 = vadd.f32 %v2084_v29, %v1895_v2  ;;  %v2232_v27 = vadd.f32 %v2084_v29, %v1896_v54  ;;  %v2480_v2 = vld [vmem:[%s11153_s24 + $0xa8] sm:$0xff]  ;;  %v2479_v54 = vld [vmem:[%s11153_s24 + $0xa0] sm:$0xff]  ;;  %v2482_v29 = vld [vmem:[%s11153_s24 + $0xb8] sm:$0xff] }
 0x33a   : > { %v2327_v59 = vmax.f32 %v2231_v22, 0.0  ;;  %v2328_v12 = vmax.f32 %v2232_v27, 0.0  ;;  %v2486_v22 = vld [vmem:[%s11153_s24 + $0xd8] sm:$0xff] }
 0x33b   : > { %v2164_v0 = vpop.permute.xlu1 %2163  ;;  %v2490_v27 = vld [vmem:[%s11153_s24 + $0xf8] sm:$0xff] }
 0x33c   : > { %v2423_v9 = vmul.f32 %v2327_v59, %v10937_v40  ;;  %v2424_v4 = vmul.f32 %v2328_v12, %v10940_v62  ;;  %v2263_v35 = vadd.f32 %v2164_v0, %v1927_v13  ;;  %v2264_v18 = vadd.f32 %v2164_v0, %v1928_v20  ;;  %v2489_v13 = vld [vmem:[%s11153_s24 + $0xf0] sm:$0xff]  ;;  %v2488_v20 = vld [vmem:[%s11153_s24 + $0xe8] sm:$0xff]  ;;  %v2491_v0 = vld [vmem:[%s11153_s24 + $0x100] sm:$0xff] }
 0x33d   : > { %v2492_v59 = vld [vmem:[%s11153_s24 + $0x108] sm:$0xff] }
 0x33e   : > { %v7146_v38 = vpack.c.bf16 %v2426_v10, %v2424_v4  ;;  %v7148_v36 = vpack.c.bf16 %v2425_v5, %v2423_v9  ;;  %v2359_v26 = vmax.f32 %v2263_v35, 0.0  ;;  %v2360_v37 = vmax.f32 %v2264_v18, 0.0  ;;  %v2496_v12 = vld [vmem:[%s11153_s24 + $0x128] sm:$0xff]  ;;  %v2495_v10 = vld [vmem:[%s11153_s24 + $0x120] sm:$0xff]  ;;  %v2494_v9 = vld [vmem:[%s11153_s24 + $0x118] sm:$0xff] }
 0x33f   : > { %v2169_v1 = vpop.permute.xlu1 %2168  ;;  %v2499_v5 = vld [vmem:[%s11153_s24 + $0x140] sm:$0xff]  ;;  %v2498_v4 = vld [vmem:[%s11153_s24 + $0x138] sm:$0xff]  ;;  %v2497_v18 = vld [vmem:[%s11153_s24 + $0x130] sm:$0xff] }
 0x340   : > { %v2265_v42 = vadd.f32 %v2169_v1, %v1929_v43  ;;  %v2266_v55 = vadd.f32 %v2169_v1, %v1930_v6  ;;  %7147 = vmatprep.subr.bf16.mxu1 %v7146_v38  ;;  %v2455_v56 = vmul.f32 %v2359_v26, %v10937_v40  ;;  %v2456_v30 = vmul.f32 %v2360_v37, %v10940_v62  ;;  %v2502_v35 = vld [vmem:[%s11153_s24 + $0x158] sm:$0xff]  ;;  %v2500_v43 = vld [vmem:[%s11153_s24 + $0x148] sm:$0xff]  ;;  %v2503_v38 = vld [vmem:[%s11153_s24 + $0x160] sm:$0xff] }
 0x341   : > { %7149 = vmatpush1.bf16.msra.mxu1 %v7148_v36  ;;  %v2508_v6 = vld [vmem:[%s11153_s24 + $0x188] sm:$0xff]  ;;  %v2507_v36 = vld [vmem:[%s11153_s24 + $0x180] sm:$0xff]  ;;  %v2506_v26 = vld [vmem:[%s11153_s24 + $0x178] sm:$0xff] }
 0x342   : > { %v2361_v8 = vmax.f32 %v2265_v42, 0.0  ;;  %v2362_v21 = vmax.f32 %v2266_v55, 0.0  ;;  %v2511_v1 = vld [vmem:[%s11153_s24 + $0x1a0] sm:$0xff]  ;;  %v2510_v37 = vld [vmem:[%s11153_s24 + $0x198] sm:$0xff]  ;;  %v2509_v55 = vld [vmem:[%s11153_s24 + $0x190] sm:$0xff] }
 0x343   : > { %v2514_v42 = vld [vmem:[%s11153_s24 + $0x1b8] sm:$0xff] }
 0x344   : > { %v2457_v7 = vmul.f32 %v2361_v8, %v10937_v40  ;;  %v2458_v51 = vmul.f32 %v2362_v21, %v10940_v62  ;;  %2596 = vmatmul.mubr.f32.vlgmr.msra.gmra.mrb[0].mxu1 %v2459_v14  ;;  %v2513_v14 = vld [vmem:[%s11153_s24 + $0x1b0] sm:$0xff]  ;;  %v2512_v21 = vld [vmem:[%s11153_s24 + $0x1a8] sm:$0xff] }
 0x345   : > { %2601 = vmatprep.mubr.f32.mxu1 %v2463_v60  ;;  %v2517_v8 = vld [vmem:[%s11153_s24 + $0x1d0] sm:$0xff]  ;;  %v2516_v60 = vld [vmem:[%s11153_s24 + $0x1c8] sm:$0xff] }
 0x346   : > { %v7178_v46 = vpack.c.bf16 %v2458_v51, %v2456_v30  ;;  %v7180_v57 = vpack.c.bf16 %v2457_v7, %v2455_v56  ;;  %v2520_v56 = vld [vmem:[%s11153_s24 + $0x1e8] sm:$0xff]  ;;  %v2515_v30 = vld [vmem:[%s11153_s24 + $0x1c0] sm:$0xff] }
 0x347   : > { %v2519_v7 = vld [vmem:[%s11153_s24 + $0x1e0] sm:$0xff] }
 0x348   : > { %7179 = vmatprep.subr.bf16.mxu0 %v7178_v46  ;;  %2602 = vmatmul.mubr.f32.gmra.mrb[2].mxu1 %v2462_v39  ;;  %v2523_v51 = vld [vmem:[%s11153_s24 + $0x200] sm:$0xff]  ;;  %v2518_v39 = vld [vmem:[%s11153_s24 + $0x1d8] sm:$0xff] }
 0x349   : > { %7181 = vmatpush1.bf16.msra.mxu0 %v7180_v57  ;;  %2607 = vmatprep.mubr.f32.mxu1 %v2466_v48  ;;  %v2522_v46 = vld [vmem:[%s11153_s24 + $0x1f8] sm:$0xff]  ;;  %v2521_v48 = vld [vmem:[%s11153_s24 + $0x1f0] sm:$0xff] }
 0x34a   : > { %v2526_v57 = vld [vmem:[%s11153_s24 + $0x218] sm:$0xff] }
 0x34c   : > { %2805 = vmatmul.mubr.f32.vlgmr.msra.gmra.mrb[0].mxu0 %v2461_v61  ;;  %2608 = vmatmul.mubr.f32.gmra.mrb[4].mxu1 %v2465_v11  ;;  %v2525_v61 = vld [vmem:[%s11153_s24 + $0x210] sm:$0xff] }
 0x34d   : > { %2810 = vmatprep.mubr.f32.mxu0 %v14500_v50  ;;  %2613 = vmatprep.mubr.f32.mxu1 %v2469_v28  ;;  %v2529_v11 = vld [vmem:[%s11153_s24 + $0x230] sm:$0xff]  ;;  %v2524_v28 = vld [vmem:[%s11153_s24 + $0x208] sm:$0xff] }
 0x350   : > { %2811 = vmatmul.mubr.f32.gmra.mrb[2].mxu0 %v2464_v25  ;;  %2614 = vmatmul.mubr.f32.gmra.mrb[6].mxu1 %v2468_v23  ;;  %v2528_v25 = vld [vmem:[%s11153_s24 + $0x228] sm:$0xff]  ;;  %v2527_v23 = vld [vmem:[%s11153_s24 + $0x220] sm:$0xff] }
 0x351   : > { %2816 = vmatprep.mubr.f32.mxu0 %v14500_v50  ;;  %2619 = vmatprep.mubr.f32.mxu1 %v2472_v31  ;;  %v2530_v31 = vld [vmem:[%s11153_s24 + $0x238] sm:$0xff] }
 0x354   : > { %2817 = vmatmul.mubr.f32.gmra.mrb[4].mxu0 %v2467_v33  ;;  %2620 = vmatmul.mubr.f32.gmra.mrb[8].mxu1 %v2471_v32 }
 0x355   : > { %2822 = vmatprep.mubr.f32.mxu0 %v14500_v50  ;;  %2625 = vmatprep.mubr.f32.mxu1 %v2475_v49 }
 0x358   : > { %2823 = vmatmul.mubr.f32.gmra.mrb[6].mxu0 %v2470_v44  ;;  %2626 = vmatmul.mubr.f32.gmra.mrb[10].mxu1 %v2474_v41 }
 0x359   : > { %2828 = vmatprep.mubr.f32.mxu0 %v14500_v50  ;;  %2631 = vmatprep.mubr.f32.mxu1 %v2478_v19 }
 0x35c   : > { %2829 = vmatmul.mubr.f32.gmra.mrb[8].mxu0 %v2473_v17  ;;  %2632 = vmatmul.mubr.f32.gmra.mrb[12].mxu1 %v2477_v34 }
 0x35d   : > { %2834 = vmatprep.mubr.f32.mxu0 %v14500_v50  ;;  %2637 = vmatprep.mubr.f32.mxu1 %v2481_v45 }
 0x360   : > { %2835 = vmatmul.mubr.f32.gmra.mrb[10].mxu0 %v2476_v53  ;;  %2638 = vmatmul.mubr.f32.gmra.mrb[14].mxu1 %v2480_v2 }
 0x361   : > { %2840 = vmatprep.mubr.f32.mxu0 %v14500_v50  ;;  %2643 = vmatprep.mubr.f32.mxu1 %v2484_v24 }
 0x364   : > { %2841 = vmatmul.mubr.f32.gmra.mrb[12].mxu0 %v2479_v54  ;;  %2644 = vmatmul.mubr.f32.gmra.mrb[16].mxu1 %v2483_v58 }
 0x365   : > { %2846 = vmatprep.mubr.f32.mxu0 %v14500_v50  ;;  %2649 = vmatprep.mubr.f32.mxu1 %v2487_v52 }
 0x368   : > { %2847 = vmatmul.mubr.f32.gmra.mrb[14].mxu0 %v2482_v29  ;;  %2650 = vmatmul.mubr.f32.gmra.mrb[18].mxu1 %v2486_v22 }
 0x369   : > { %2852 = vmatprep.mubr.f32.mxu0 %v14500_v50  ;;  %2655 = vmatprep.mubr.f32.mxu1 %v2490_v27 }
 0x36c   : > { %2853 = vmatmul.mubr.f32.gmra.mrb[16].mxu0 %v2485_v63  ;;  %2656 = vmatmul.mubr.f32.gmra.mrb[20].mxu1 %v2489_v13 }
 0x36d   : > { %2858 = vmatprep.mubr.f32.mxu0 %v14500_v50  ;;  %2661 = vmatprep.mubr.f32.mxu1 %v2493_v47 }
 0x370   : > { %2859 = vmatmul.mubr.f32.gmra.mrb[18].mxu0 %v2488_v20  ;;  %2662 = vmatmul.mubr.f32.gmra.mrb[22].mxu1 %v2492_v59 }
 0x371   : > { %2864 = vmatprep.mubr.f32.mxu0 %v14500_v50  ;;  %2667 = vmatprep.mubr.f32.mxu1 %v2496_v12 }
 0x374   : > { %2865 = vmatmul.mubr.f32.gmra.mrb[20].mxu0 %v2491_v0  ;;  %2668 = vmatmul.mubr.f32.gmra.mrb[24].mxu1 %v2495_v10 }
 0x375   : > { %2870 = vmatprep.mubr.f32.mxu0 %v14500_v50  ;;  %2673 = vmatprep.mubr.f32.mxu1 %v2499_v5 }
 0x378   : > { %2871 = vmatmul.mubr.f32.gmra.mrb[22].mxu0 %v2494_v9  ;;  %2674 = vmatmul.mubr.f32.gmra.mrb[26].mxu1 %v2498_v4 }
 0x379   : > { %2876 = vmatprep.mubr.f32.mxu0 %v14500_v50  ;;  %2679 = vmatprep.mubr.f32.mxu1 %v2502_v35 }
 0x37c   : > { %2877 = vmatmul.mubr.f32.gmra.mrb[24].mxu0 %v2497_v18  ;;  %2680 = vmatmul.mubr.f32.gmra.mrb[28].mxu1 %v2501_v3 }
 0x37d   : > { %2882 = vmatprep.mubr.f32.mxu0 %v14500_v50  ;;  %2685 = vmatprep.mubr.f32.mxu1 %v2505_v16 }
 0x380   : > { %2883 = vmatmul.mubr.f32.gmra.mrb[26].mxu0 %v2500_v43  ;;  %2686 = vmatmul.mubr.f32.gmra.mrb[30].mxu1 %v2504_v15 }
 0x381   : > { %2888 = vmatprep.mubr.f32.mxu0 %v14500_v50  ;;  %2691 = vmatprep.mubr.f32.mxu1 %v2508_v6 }
 0x384   : > { %2889 = vmatmul.mubr.f32.gmra.mrb[28].mxu0 %v2503_v38  ;;  %2692 = vmatmul.mubr.f32.gmra.mrb[32].mxu1 %v2507_v36 }
 0x385   : > { %2894 = vmatprep.mubr.f32.mxu0 %v14500_v50  ;;  %2697 = vmatprep.mubr.f32.mxu1 %v2511_v1 }
 0x388   : > { %2895 = vmatmul.mubr.f32.gmra.mrb[30].mxu0 %v2506_v26  ;;  %2698 = vmatmul.mubr.f32.gmra.mrb[34].mxu1 %v2510_v37 }
 0x389   : > { %2900 = vmatprep.mubr.f32.mxu0 %v14500_v50  ;;  %2703 = vmatprep.mubr.f32.mxu1 %v2514_v42 }
 0x38c   : > { %2901 = vmatmul.mubr.f32.gmra.mrb[32].mxu0 %v2509_v55  ;;  %2704 = vmatmul.mubr.f32.gmra.mrb[36].mxu1 %v2513_v14 }
 0x38d   : > { %2906 = vmatprep.mubr.f32.mxu0 %v14500_v50  ;;  %2709 = vmatprep.mubr.f32.mxu1 %v2517_v8 }
 0x390   : > { %2907 = vmatmul.mubr.f32.gmra.mrb[34].mxu0 %v2512_v21  ;;  %2710 = vmatmul.mubr.f32.gmra.mrb[38].mxu1 %v2516_v60 }
 0x391   : > { %2912 = vmatprep.mubr.f32.mxu0 %v14500_v50  ;;  %2715 = vmatprep.mubr.f32.mxu1 %v2520_v56 }
 0x394   : > { %2913 = vmatmul.mubr.f32.gmra.mrb[36].mxu0 %v2515_v30  ;;  %2716 = vmatmul.mubr.f32.gmra.mrb[40].mxu1 %v2519_v7 }
 0x395   : > { %2918 = vmatprep.mubr.f32.mxu0 %v14500_v50  ;;  %2721 = vmatprep.mubr.f32.mxu1 %v2523_v51 }
 0x398   : > { %2919 = vmatmul.mubr.f32.gmra.mrb[38].mxu0 %v2518_v39  ;;  %2722 = vmatmul.mubr.f32.gmra.mrb[42].mxu1 %v2522_v46 }
 0x399   : > { %2924 = vmatprep.mubr.f32.mxu0 %v14500_v50  ;;  %2727 = vmatprep.mubr.f32.mxu1 %v2526_v57 }
 0x39c   : > { %2925 = vmatmul.mubr.f32.gmra.mrb[40].mxu0 %v2521_v48  ;;  %2728 = vmatmul.mubr.f32.gmra.mrb[44].mxu1 %v2525_v61 }
 0x39d   : > { %2930 = vmatprep.mubr.f32.mxu0 %v14500_v50  ;;  %2733 = vmatprep.mubr.f32.mxu1 %v2529_v11 }
 0x3a0   : > { %2931 = vmatmul.mubr.f32.gmra.mrb[42].mxu0 %v2524_v28  ;;  %2734 = vmatmul.mubr.f32.gmra.mrb[46].mxu1 %v2528_v25 }
 0x3a1   : > { %2936 = vmatprep.mubr.f32.mxu0 %v14500_v50 }
 0x3a4   : > { %2937 = vmatmul.mubr.f32.gmra.mrb[44].mxu0 %v2527_v23 }
 0x3a5   : > { %2942 = vmatprep.mubr.f32.mxu0 %v14500_v50 }
 0x3a8   : > { %2943 = vmatmul.mubr.f32.gmra.mrb[46].mxu0 %v2530_v31 }
 0x417   : > { %v2597_v33 = vpop.f32.mrb[0].mxu1 }
 0x418   : > { %v2599_v32 = vpop.f32.mrb[1].mxu1 }
 0x41b   : > { %v2603_v49 = vpop.f32.mrb[2].mxu1 }
 0x41c   : > { %v2605_v44 = vpop.f32.mrb[3].mxu1 }
 0x41f   : > { %v2806_v41 = vpop.f32.mrb[0].mxu0  ;;  %v2609_v19 = vpop.f32.mrb[4].mxu1 }
 0x420   : > { %v11364_v17 = vadd.f32 %v2806_v41, %v2597_v33  ;;  %v2808_v34 = vpop.f32.mrb[1].mxu0  ;;  %v2611_v45 = vpop.f32.mrb[5].mxu1 }
 0x421   : > { %v11366_v53 = vadd.f32 %v2808_v34, %v2599_v32 }
 0x422   : > { %2953 = vst [vmem:[#allocation2] sm:$0xff] (!%p7073_p9), %v11364_v17 }
 0x423   : > { %v2812_v2 = vpop.f32.mrb[2].mxu0  ;;  %v2615_v24 = vpop.f32.mrb[6].mxu1  ;;  %2954 = vst [vmem:[#allocation2 + $0x8] sm:$0xff] (!%p7073_p9), %v11366_v53 }
 0x424   : > { %v11368_v54 = vadd.f32 %v2812_v2, %v2603_v49  ;;  %v2814_v58 = vpop.f32.mrb[3].mxu0  ;;  %v2617_v50 = vpop.f32.mrb[7].mxu1 }
 0x425   : > { %v11370_v52 = vadd.f32 %v2814_v58, %v2605_v44 }
 0x426   : > { %2955 = vst [vmem:[#allocation2 + $0x10] sm:$0xff] (!%p7073_p9), %v11368_v54 }
 0x427   : > { %v2818_v29 = vpop.f32.mrb[4].mxu0  ;;  %v2621_v22 = vpop.f32.mrb[8].mxu1  ;;  %2956 = vst [vmem:[#allocation2 + $0x18] sm:$0xff] (!%p7073_p9), %v11370_v52 }
 0x428   : > { %v11372_v27 = vadd.f32 %v2818_v29, %v2609_v19  ;;  %v2820_v63 = vpop.f32.mrb[5].mxu0  ;;  %v2623_v13 = vpop.f32.mrb[9].mxu1 }
 0x429   : > { %v11374_v47 = vadd.f32 %v2820_v63, %v2611_v45 }
 0x42a   : > { %2957 = vst [vmem:[#allocation2 + $0x20] sm:$0xff] (!%p7073_p9), %v11372_v27 }
 0x42b   : > { %v2824_v20 = vpop.f32.mrb[6].mxu0  ;;  %v2627_v59 = vpop.f32.mrb[10].mxu1  ;;  %2958 = vst [vmem:[#allocation2 + $0x28] sm:$0xff] (!%p7073_p9), %v11374_v47 }
 0x42c   : > { %v11376_v12 = vadd.f32 %v2824_v20, %v2615_v24  ;;  %v2826_v0 = vpop.f32.mrb[7].mxu0  ;;  %v2629_v10 = vpop.f32.mrb[11].mxu1 }
 0x42d   : > { %v11378_v5 = vadd.f32 %v2826_v0, %v2617_v50 }
 0x42e   : > { %2959 = vst [vmem:[#allocation2 + $0x30] sm:$0xff] (!%p7073_p9), %v11376_v12 }
 0x42f   : > { %v2830_v9 = vpop.f32.mrb[8].mxu0  ;;  %v2633_v4 = vpop.f32.mrb[12].mxu1  ;;  %2960 = vst [vmem:[#allocation2 + $0x38] sm:$0xff] (!%p7073_p9), %v11378_v5 }
 0x430   : > { %v11380_v35 = vadd.f32 %v2830_v9, %v2621_v22  ;;  %v2832_v18 = vpop.f32.mrb[9].mxu0  ;;  %v2635_v3 = vpop.f32.mrb[13].mxu1 }
 0x431   : > { %v11382_v16 = vadd.f32 %v2832_v18, %v2623_v13 }
 0x432   : > { %2961 = vst [vmem:[#allocation2 + $0x40] sm:$0xff] (!%p7073_p9), %v11380_v35 }
 0x433   : > { %v2836_v43 = vpop.f32.mrb[10].mxu0  ;;  %v2639_v15 = vpop.f32.mrb[14].mxu1  ;;  %2962 = vst [vmem:[#allocation2 + $0x48] sm:$0xff] (!%p7073_p9), %v11382_v16 }
 0x434   : > { %v11384_v6 = vadd.f32 %v2836_v43, %v2627_v59  ;;  %v2838_v38 = vpop.f32.mrb[11].mxu0  ;;  %v2641_v36 = vpop.f32.mrb[15].mxu1 }
 0x435   : > { %v11386_v1 = vadd.f32 %v2838_v38, %v2629_v10 }
 0x436   : > { %2963 = vst [vmem:[#allocation2 + $0x50] sm:$0xff] (!%p7073_p9), %v11384_v6 }
 0x437   : > { %v2842_v26 = vpop.f32.mrb[12].mxu0  ;;  %v2645_v37 = vpop.f32.mrb[16].mxu1  ;;  %2964 = vst [vmem:[#allocation2 + $0x58] sm:$0xff] (!%p7073_p9), %v11386_v1 }
 0x438   : > { %v11388_v42 = vadd.f32 %v2842_v26, %v2633_v4  ;;  %v2844_v55 = vpop.f32.mrb[13].mxu0  ;;  %v2647_v14 = vpop.f32.mrb[17].mxu1 }
 0x439   : > { %v11390_v8 = vadd.f32 %v2844_v55, %v2635_v3 }
 0x43a   : > { %2965 = vst [vmem:[#allocation2 + $0x60] sm:$0xff] (!%p7073_p9), %v11388_v42 }
 0x43b   : > { %v2848_v21 = vpop.f32.mrb[14].mxu0  ;;  %v2651_v60 = vpop.f32.mrb[18].mxu1  ;;  %2966 = vst [vmem:[#allocation2 + $0x68] sm:$0xff] (!%p7073_p9), %v11390_v8 }
 0x43c   : > { %v11392_v56 = vadd.f32 %v2848_v21, %v2639_v15  ;;  %v2850_v30 = vpop.f32.mrb[15].mxu0  ;;  %v2653_v7 = vpop.f32.mrb[19].mxu1 }
 0x43d   : > { %v11394_v51 = vadd.f32 %v2850_v30, %v2641_v36 }
 0x43e   : > { %2967 = vst [vmem:[#allocation2 + $0x70] sm:$0xff] (!%p7073_p9), %v11392_v56 }
 0x43f   : > { %v2854_v39 = vpop.f32.mrb[16].mxu0  ;;  %v2657_v46 = vpop.f32.mrb[20].mxu1  ;;  %2968 = vst [vmem:[#allocation2 + $0x78] sm:$0xff] (!%p7073_p9), %v11394_v51 }
 0x440   : > { %v11396_v57 = vadd.f32 %v2854_v39, %v2645_v37  ;;  %v2856_v48 = vpop.f32.mrb[17].mxu0  ;;  %v2659_v61 = vpop.f32.mrb[21].mxu1 }
 0x441   : > { %v11398_v11 = vadd.f32 %v2856_v48, %v2647_v14 }
 0x442   : > { %2969 = vst [vmem:[#allocation2 + $0x80] sm:$0xff] (!%p7073_p9), %v11396_v57 }
 0x443   : > { %v2860_v28 = vpop.f32.mrb[18].mxu0  ;;  %v2663_v25 = vpop.f32.mrb[22].mxu1  ;;  %2970 = vst [vmem:[#allocation2 + $0x88] sm:$0xff] (!%p7073_p9), %v11398_v11 }
 0x444   : > { %v11400_v23 = vadd.f32 %v2860_v28, %v2651_v60  ;;  %v2862_v31 = vpop.f32.mrb[19].mxu0  ;;  %v2665_v33 = vpop.f32.mrb[23].mxu1 }
 0x445   : > { %v11402_v32 = vadd.f32 %v2862_v31, %v2653_v7 }
 0x446   : > { %2971 = vst [vmem:[#allocation2 + $0x90] sm:$0xff] (!%p7073_p9), %v11400_v23 }
 0x447   : > { %v2866_v49 = vpop.f32.mrb[20].mxu0  ;;  %v2669_v44 = vpop.f32.mrb[24].mxu1  ;;  %2972 = vst [vmem:[#allocation2 + $0x98] sm:$0xff] (!%p7073_p9), %v11402_v32 }
 0x448   : > { %v11404_v41 = vadd.f32 %v2866_v49, %v2657_v46  ;;  %v2868_v19 = vpop.f32.mrb[21].mxu0  ;;  %v2671_v34 = vpop.f32.mrb[25].mxu1 }
 0x449   : > { %v11406_v45 = vadd.f32 %v2868_v19, %v2659_v61 }
 0x44a   : > { %2973 = vst [vmem:[#allocation2 + $0xa0] sm:$0xff] (!%p7073_p9), %v11404_v41 }
 0x44b   : > { %v2872_v2 = vpop.f32.mrb[22].mxu0  ;;  %v2675_v24 = vpop.f32.mrb[26].mxu1  ;;  %2974 = vst [vmem:[#allocation2 + $0xa8] sm:$0xff] (!%p7073_p9), %v11406_v45 }
 0x44c   : > { %v11408_v58 = vadd.f32 %v2872_v2, %v2663_v25  ;;  %v2874_v50 = vpop.f32.mrb[23].mxu0  ;;  %v2677_v29 = vpop.f32.mrb[27].mxu1 }
 0x44d   : > { %v11410_v22 = vadd.f32 %v2874_v50, %v2665_v33 }
 0x44e   : > { %2975 = vst [vmem:[#allocation2 + $0xb0] sm:$0xff] (!%p7073_p9), %v11408_v58 }
 0x44f   : > { %v2878_v63 = vpop.f32.mrb[24].mxu0  ;;  %v2681_v13 = vpop.f32.mrb[28].mxu1  ;;  %2976 = vst [vmem:[#allocation2 + $0xb8] sm:$0xff] (!%p7073_p9), %v11410_v22 }
 0x450   : > { %v11412_v20 = vadd.f32 %v2878_v63, %v2669_v44  ;;  %v2880_v59 = vpop.f32.mrb[25].mxu0  ;;  %v2683_v0 = vpop.f32.mrb[29].mxu1 }
 0x451   : > { %v11414_v10 = vadd.f32 %v2880_v59, %v2671_v34 }
 0x452   : > { %2977 = vst [vmem:[#allocation2 + $0xc0] sm:$0xff] (!%p7073_p9), %v11412_v20 }
 0x453   : > { %v2884_v9 = vpop.f32.mrb[26].mxu0  ;;  %v2687_v4 = vpop.f32.mrb[30].mxu1  ;;  %2978 = vst [vmem:[#allocation2 + $0xc8] sm:$0xff] (!%p7073_p9), %v11414_v10 }
 0x454   : > { %v11416_v18 = vadd.f32 %v2884_v9, %v2675_v24  ;;  %v2886_v3 = vpop.f32.mrb[27].mxu0  ;;  %v2689_v43 = vpop.f32.mrb[31].mxu1 }
 0x455   : > { %v11418_v15 = vadd.f32 %v2886_v3, %v2677_v29 }
 0x456   : > { %2979 = vst [vmem:[#allocation2 + $0xd0] sm:$0xff] (!%p7073_p9), %v11416_v18 }
 0x457   : > { %v2890_v38 = vpop.f32.mrb[28].mxu0  ;;  %v2693_v36 = vpop.f32.mrb[32].mxu1  ;;  %2980 = vst [vmem:[#allocation2 + $0xd8] sm:$0xff] (!%p7073_p9), %v11418_v15 }
 0x458   : > { %v11420_v26 = vadd.f32 %v2890_v38, %v2681_v13  ;;  %v2892_v37 = vpop.f32.mrb[29].mxu0  ;;  %v2695_v55 = vpop.f32.mrb[33].mxu1 }
 0x459   : > { %v11422_v14 = vadd.f32 %v2892_v37, %v2683_v0 }
 0x45a   : > { %2981 = vst [vmem:[#allocation2 + $0xe0] sm:$0xff] (!%p7073_p9), %v11420_v26 }
 0x45b   : > { %v2896_v21 = vpop.f32.mrb[30].mxu0  ;;  %v2699_v60 = vpop.f32.mrb[34].mxu1  ;;  %2982 = vst [vmem:[#allocation2 + $0xe8] sm:$0xff] (!%p7073_p9), %v11422_v14 }
 0x45c   : > { %v11424_v30 = vadd.f32 %v2896_v21, %v2687_v4  ;;  %v2898_v7 = vpop.f32.mrb[31].mxu0  ;;  %v2701_v39 = vpop.f32.mrb[35].mxu1 }
 0x45d   : > { %v11426_v46 = vadd.f32 %v2898_v7, %v2689_v43 }
 0x45e   : > { %2983 = vst [vmem:[#allocation2 + $0xf0] sm:$0xff] (!%p7073_p9), %v11424_v30 }
 0x45f   : > { %v2902_v48 = vpop.f32.mrb[32].mxu0  ;;  %v2705_v61 = vpop.f32.mrb[36].mxu1  ;;  %2984 = vst [vmem:[#allocation2 + $0xf8] sm:$0xff] (!%p7073_p9), %v11426_v46 }
 0x460   : > { %v11428_v28 = vadd.f32 %v2902_v48, %v2693_v36  ;;  %v2904_v25 = vpop.f32.mrb[33].mxu0  ;;  %v2707_v31 = vpop.f32.mrb[37].mxu1 }
 0x461   : > { %v11430_v33 = vadd.f32 %v2904_v25, %v2695_v55 }
 0x462   : > { %2985 = vst [vmem:[#allocation2 + $0x100] sm:$0xff] (!%p7073_p9), %v11428_v28 }
 0x463   : > { %v2908_v49 = vpop.f32.mrb[34].mxu0  ;;  %v2711_v44 = vpop.f32.mrb[38].mxu1  ;;  %2986 = vst [vmem:[#allocation2 + $0x108] sm:$0xff] (!%p7073_p9), %v11430_v33 }
 0x464   : > { %v11432_v19 = vadd.f32 %v2908_v49, %v2699_v60  ;;  %v2910_v34 = vpop.f32.mrb[35].mxu0  ;;  %v2713_v2 = vpop.f32.mrb[39].mxu1 }
 0x465   : > { %v11434_v24 = vadd.f32 %v2910_v34, %v2701_v39 }
 0x466   : > { %2987 = vst [vmem:[#allocation2 + $0x110] sm:$0xff] (!%p7073_p9), %v11432_v19 }
 0x467   : > { %v2914_v50 = vpop.f32.mrb[36].mxu0  ;;  %v2717_v29 = vpop.f32.mrb[40].mxu1  ;;  %2988 = vst [vmem:[#allocation2 + $0x118] sm:$0xff] (!%p7073_p9), %v11434_v24 }
 0x468   : > { %v11436_v63 = vadd.f32 %v2914_v50, %v2705_v61  ;;  %v2916_v13 = vpop.f32.mrb[37].mxu0  ;;  %v2719_v59 = vpop.f32.mrb[41].mxu1 }
 0x469   : > { %v11438_v0 = vadd.f32 %v2916_v13, %v2707_v31 }
 0x46a   : > { %2989 = vst [vmem:[#allocation2 + $0x120] sm:$0xff] (!%p7073_p9), %v11436_v63 }
 0x46b   : > { %v2920_v9 = vpop.f32.mrb[38].mxu0  ;;  %v2723_v4 = vpop.f32.mrb[42].mxu1  ;;  %2990 = vst [vmem:[#allocation2 + $0x128] sm:$0xff] (!%p7073_p9), %v11438_v0 }
 0x46c   : > { %v11440_v3 = vadd.f32 %v2920_v9, %v2711_v44  ;;  %v2922_v43 = vpop.f32.mrb[39].mxu0  ;;  %v2725_v38 = vpop.f32.mrb[43].mxu1 }
 0x46d   : > { %v11442_v36 = vadd.f32 %v2922_v43, %v2713_v2 }
 0x46e   : > { %2991 = vst [vmem:[#allocation2 + $0x130] sm:$0xff] (!%p7073_p9), %v11440_v3 }
 0x46f   : > { %v2926_v37 = vpop.f32.mrb[40].mxu0  ;;  %v2729_v55 = vpop.f32.mrb[44].mxu1  ;;  %2992 = vst [vmem:[#allocation2 + $0x138] sm:$0xff] (!%p7073_p9), %v11442_v36 }
 0x470   : > { %v11444_v21 = vadd.f32 %v2926_v37, %v2717_v29  ;;  %v2928_v60 = vpop.f32.mrb[41].mxu0  ;;  %v2731_v7 = vpop.f32.mrb[45].mxu1 }
 0x471   : > { %v11446_v39 = vadd.f32 %v2928_v60, %v2719_v59 }
 0x472   : > { %2993 = vst [vmem:[#allocation2 + $0x140] sm:$0xff] (!%p7073_p9), %v11444_v21 }
 0x473   : > { %v2932_v48 = vpop.f32.mrb[42].mxu0  ;;  %v2735_v61 = vpop.f32.mrb[46].mxu1  ;;  %2994 = vst [vmem:[#allocation2 + $0x148] sm:$0xff] (!%p7073_p9), %v11446_v39 }
 0x474   : > { %v11448_v25 = vadd.f32 %v2932_v48, %v2723_v4  ;;  %v2934_v31 = vpop.f32.mrb[43].mxu0  ;;  %v2737_v49 = vpop.f32.mrb[47].mxu1 }
 0x475   : > { %v11450_v44 = vadd.f32 %v2934_v31, %v2725_v38 }
 0x476   : > { %2995 = vst [vmem:[#allocation2 + $0x150] sm:$0xff] (!%p7073_p9), %v11448_v25 }
 0x477   : > { %v2938_v34 = vpop.f32.mrb[44].mxu0  ;;  %2952 = sbr.rel (%p7073_p9) target bundleno = 1152 (0x480), region = 67  ;;  %2996 = vst [vmem:[#allocation2 + $0x158] sm:$0xff] (!%p7073_p9), %v11450_v44 }
 0x478   : > { %v11452_v50 = vadd.f32 %v2938_v34, %v2729_v55  ;;  %v2940_v2 = vpop.f32.mrb[45].mxu0 }
 0x479   : > { %v11454_v13 = vadd.f32 %v2940_v2, %v2731_v7 }
 0x47a   : > { %2997 = vst [vmem:[#allocation2 + $0x160] sm:$0xff] (!%p7073_p9), %v11452_v50 }
 0x47b   : > { %v2944_v29 = vpop.f32.mrb[46].mxu0  ;;  %2998 = vst [vmem:[#allocation2 + $0x168] sm:$0xff] (!%p7073_p9), %v11454_v13 }
 0x47c   : > { %v11456_v9 = vadd.f32 %v2944_v29, %v2735_v61  ;;  %v2946_v43 = vpop.f32.mrb[47].mxu0 }
 0x47d   : > { %v11458_v59 = vadd.f32 %v2946_v43, %v2737_v49 }
 0x47e   : > { %2999 = vst [vmem:[#allocation2 + $0x170] sm:$0xff] %v11456_v9 }
 0x47f   : > { %3000 = vst [vmem:[#allocation2 + $0x178] sm:$0xff] %v11458_v59 }
 0x480 PF: > { %p7074_p10 = scmp.le.s32.totalorder %s9181_s21, 0 }
 0x481   : > { %v3005_v4 = vld [vmem:[#allocation2] sm:$0xff] (!%p7074_p10)  ;;  %v3006_v38 = vld [vmem:[#allocation2 + $0x8] sm:$0xff] (!%p7074_p10)  ;;  %v3007_v37 = vld [vmem:[#allocation2 + $0x10] sm:$0xff] (!%p7074_p10) }
 0x482   : > { %3004 = sbr.rel (%p7074_p10) target bundleno = 1180 (0x49c), region = 71  ;;  %v3053_v55 = vadd.f32 (!%p7074_p10), %v3005_v4, %v11364_v17  ;;  %v3054_v60 = vadd.f32 (!%p7074_p10), %v3006_v38, %v11366_v53  ;;  %v3055_v7 = vadd.f32 (!%p7074_p10), %v3007_v37, %v11368_v54  ;;  %v3008_v48 = vld [vmem:[#allocation2 + $0x18] sm:$0xff] (!%p7074_p10)  ;;  %v3009_v61 = vld [vmem:[#allocation2 + $0x20] sm:$0xff] (!%p7074_p10)  ;;  %v3010_v31 = vld [vmem:[#allocation2 + $0x28] sm:$0xff] (!%p7074_p10) }
 0x483   : > { %v3056_v49 = vadd.f32 (!%p7074_p10), %v3008_v48, %v11370_v52  ;;  %v3057_v34 = vadd.f32 (!%p7074_p10), %v3009_v61, %v11372_v27  ;;  %v3058_v2 = vadd.f32 (!%p7074_p10), %v3010_v31, %v11374_v47  ;;  %v3011_v29 = vld [vmem:[#allocation2 + $0x30] sm:$0xff] (!%p7074_p10)  ;;  %v3012_v43 = vld [vmem:[#allocation2 + $0x38] sm:$0xff] (!%p7074_p10)  ;;  %v3013_v62 = vld [vmem:[#allocation2 + $0x40] sm:$0xff] (!%p7074_p10) }
 0x484   : > { %3101 = vst [vmem:[#allocation2] sm:$0xff] (!%p7074_p10), %v3053_v55  ;;  %3102 = vst [vmem:[#allocation2 + $0x8] sm:$0xff] (!%p7074_p10), %v3054_v60  ;;  %v3059_v17 = vadd.f32 (!%p7074_p10), %v3011_v29, %v11376_v12  ;;  %v3060_v53 = vadd.f32 (!%p7074_p10), %v3012_v43, %v11378_v5  ;;  %v3061_v54 = vadd.f32 (!%p7074_p10), %v3013_v62, %v11380_v35  ;;  %v3014_v4 = vld [vmem:[#allocation2 + $0x48] sm:$0xff] (!%p7074_p10)  ;;  %v3015_v38 = vld [vmem:[#allocation2 + $0x50] sm:$0xff] (!%p7074_p10) }
 0x485   : > { %3103 = vst [vmem:[#allocation2 + $0x10] sm:$0xff] (!%p7074_p10), %v3055_v7  ;;  %v3016_v37 = vld [vmem:[#allocation2 + $0x58] sm:$0xff] (!%p7074_p10)  ;;  %3104 = vst [vmem:[#allocation2 + $0x18] sm:$0xff] (!%p7074_p10), %v3056_v49  ;;  %v3062_v52 = vadd.f32 (!%p7074_p10), %v3014_v4, %v11382_v16  ;;  %v3063_v27 = vadd.f32 (!%p7074_p10), %v3015_v38, %v11384_v6  ;;  %v3017_v55 = vld [vmem:[#allocation2 + $0x60] sm:$0xff] (!%p7074_p10) }
 0x486   : > { %3105 = vst [vmem:[#allocation2 + $0x20] sm:$0xff] (!%p7074_p10), %v3057_v34  ;;  %3106 = vst [vmem:[#allocation2 + $0x28] sm:$0xff] (!%p7074_p10), %v3058_v2  ;;  %v3064_v47 = vadd.f32 (!%p7074_p10), %v3016_v37, %v11386_v1  ;;  %v3018_v60 = vld [vmem:[#allocation2 + $0x68] sm:$0xff] (!%p7074_p10)  ;;  %v3019_v7 = vld [vmem:[#allocation2 + $0x70] sm:$0xff] (!%p7074_p10)  ;;  %v3065_v62 = vadd.f32 (!%p7074_p10), %v3017_v55, %v11388_v42 }
 0x487   : > { %3107 = vst [vmem:[#allocation2 + $0x30] sm:$0xff] (!%p7074_p10), %v3059_v17  ;;  %3108 = vst [vmem:[#allocation2 + $0x38] sm:$0xff] (!%p7074_p10), %v3060_v53  ;;  %v3066_v12 = vadd.f32 (!%p7074_p10), %v3018_v60, %v11390_v8  ;;  %v3067_v5 = vadd.f32 (!%p7074_p10), %v3019_v7, %v11392_v56  ;;  %v3020_v35 = vld [vmem:[#allocation2 + $0x78] sm:$0xff] (!%p7074_p10)  ;;  %v3021_v48 = vld [vmem:[#allocation2 + $0x80] sm:$0xff] (!%p7074_p10) }
 0x488   : > { %3109 = vst [vmem:[#allocation2 + $0x40] sm:$0xff] (!%p7074_p10), %v3061_v54  ;;  %v3022_v61 = vld [vmem:[#allocation2 + $0x88] sm:$0xff] (!%p7074_p10)  ;;  %3110 = vst [vmem:[#allocation2 + $0x48] sm:$0xff] (!%p7074_p10), %v3062_v52  ;;  %v3068_v16 = vadd.f32 (!%p7074_p10), %v3020_v35, %v11394_v51  ;;  %v3069_v6 = vadd.f32 (!%p7074_p10), %v3021_v48, %v11396_v57  ;;  %v3023_v31 = vld [vmem:[#allocation2 + $0x90] sm:$0xff] (!%p7074_p10) }
 0x489   : > { %3111 = vst [vmem:[#allocation2 + $0x50] sm:$0xff] %v3063_v27  ;;  %3112 = vst [vmem:[#allocation2 + $0x58] sm:$0xff] %v3064_v47  ;;  %v3070_v1 = vadd.f32 %v3022_v61, %v11398_v11  ;;  %v3024_v49 = vld [vmem:[#allocation2 + $0x98] sm:$0xff]  ;;  %v3025_v34 = vld [vmem:[#allocation2 + $0xa0] sm:$0xff]  ;;  %v3071_v42 = vadd.f32 %v3023_v31, %v11400_v23 }
 0x48a   : > { %3113 = vst [vmem:[#allocation2 + $0x60] sm:$0xff] %v3065_v62  ;;  %3114 = vst [vmem:[#allocation2 + $0x68] sm:$0xff] %v3066_v12  ;;  %v3072_v8 = vadd.f32 %v3024_v49, %v11402_v32  ;;  %v3073_v56 = vadd.f32 %v3025_v34, %v11404_v41  ;;  %v3026_v2 = vld [vmem:[#allocation2 + $0xa8] sm:$0xff]  ;;  %v3027_v29 = vld [vmem:[#allocation2 + $0xb0] sm:$0xff] }
 0x48b   : > { %3115 = vst [vmem:[#allocation2 + $0x70] sm:$0xff] %v3067_v5  ;;  %v3028_v43 = vld [vmem:[#allocation2 + $0xb8] sm:$0xff]  ;;  %3116 = vst [vmem:[#allocation2 + $0x78] sm:$0xff] %v3068_v16  ;;  %v3074_v51 = vadd.f32 %v3026_v2, %v11406_v45  ;;  %v3075_v57 = vadd.f32 %v3027_v29, %v11408_v58  ;;  %v3029_v17 = vld [vmem:[#allocation2 + $0xc0] sm:$0xff] }
 0x48c   : > { %3117 = vst [vmem:[#allocation2 + $0x80] sm:$0xff] %v3069_v6  ;;  %3118 = vst [vmem:[#allocation2 + $0x88] sm:$0xff] %v3070_v1  ;;  %v3076_v11 = vadd.f32 %v3028_v43, %v11410_v22  ;;  %v3030_v53 = vld [vmem:[#allocation2 + $0xc8] sm:$0xff]  ;;  %v3031_v54 = vld [vmem:[#allocation2 + $0xd0] sm:$0xff]  ;;  %v3077_v23 = vadd.f32 %v3029_v17, %v11412_v20 }
 0x48d   : > { %3119 = vst [vmem:[#allocation2 + $0x90] sm:$0xff] %v3071_v42  ;;  %3120 = vst [vmem:[#allocation2 + $0x98] sm:$0xff] %v3072_v8  ;;  %v3078_v32 = vadd.f32 %v3030_v53, %v11414_v10  ;;  %v3079_v41 = vadd.f32 %v3031_v54, %v11416_v18  ;;  %v3032_v4 = vld [vmem:[#allocation2 + $0xd8] sm:$0xff]  ;;  %v3033_v38 = vld [vmem:[#allocation2 + $0xe0] sm:$0xff] }
 0x48e   : > { %3121 = vst [vmem:[#allocation2 + $0xa0] sm:$0xff] %v3073_v56  ;;  %v3034_v37 = vld [vmem:[#allocation2 + $0xe8] sm:$0xff]  ;;  %3122 = vst [vmem:[#allocation2 + $0xa8] sm:$0xff] %v3074_v51  ;;  %v3080_v45 = vadd.f32 %v3032_v4, %v11418_v15  ;;  %v3081_v58 = vadd.f32 %v3033_v38, %v11420_v26  ;;  %v3035_v52 = vld [vmem:[#allocation2 + $0xf0] sm:$0xff] }
 0x48f   : > { %3123 = vst [vmem:[#allocation2 + $0xb0] sm:$0xff] %v3075_v57  ;;  %3124 = vst [vmem:[#allocation2 + $0xb8] sm:$0xff] %v3076_v11  ;;  %v3082_v22 = vadd.f32 %v3034_v37, %v11422_v14  ;;  %v3036_v27 = vld [vmem:[#allocation2 + $0xf8] sm:$0xff]  ;;  %v3037_v47 = vld [vmem:[#allocation2 + $0x100] sm:$0xff]  ;;  %v3083_v20 = vadd.f32 %v3035_v52, %v11424_v30 }
 0x490   : > { %3125 = vst [vmem:[#allocation2 + $0xc0] sm:$0xff] %v3077_v23  ;;  %3126 = vst [vmem:[#allocation2 + $0xc8] sm:$0xff] %v3078_v32  ;;  %v3084_v10 = vadd.f32 %v3036_v27, %v11426_v46  ;;  %v3085_v18 = vadd.f32 %v3037_v47, %v11428_v28  ;;  %v3038_v55 = vld [vmem:[#allocation2 + $0x108] sm:$0xff]  ;;  %v3039_v60 = vld [vmem:[#allocation2 + $0x110] sm:$0xff] }
 0x491   : > { %3127 = vst [vmem:[#allocation2 + $0xd0] sm:$0xff] %v3079_v41  ;;  %v3040_v7 = vld [vmem:[#allocation2 + $0x118] sm:$0xff]  ;;  %3128 = vst [vmem:[#allocation2 + $0xd8] sm:$0xff] %v3080_v45  ;;  %v3086_v15 = vadd.f32 %v3038_v55, %v11430_v33  ;;  %v3087_v26 = vadd.f32 %v3039_v60, %v11432_v19  ;;  %v3041_v62 = vld [vmem:[#allocation2 + $0x120] sm:$0xff] }
 0x492   : > { %3129 = vst [vmem:[#allocation2 + $0xe0] sm:$0xff] %v3081_v58  ;;  %3130 = vst [vmem:[#allocation2 + $0xe8] sm:$0xff] %v3082_v22  ;;  %v3088_v14 = vadd.f32 %v3040_v7, %v11434_v24  ;;  %v3042_v12 = vld [vmem:[#allocation2 + $0x128] sm:$0xff]  ;;  %v3043_v5 = vld [vmem:[#allocation2 + $0x130] sm:$0xff]  ;;  %v3089_v30 = vadd.f32 %v3041_v62, %v11436_v63 }
 0x493   : > { %3131 = vst [vmem:[#allocation2 + $0xf0] sm:$0xff] %v3083_v20  ;;  %3132 = vst [vmem:[#allocation2 + $0xf8] sm:$0xff] %v3084_v10  ;;  %v3090_v46 = vadd.f32 %v3042_v12, %v11438_v0  ;;  %v3091_v28 = vadd.f32 %v3043_v5, %v11440_v3  ;;  %v3044_v35 = vld [vmem:[#allocation2 + $0x138] sm:$0xff]  ;;  %v3045_v48 = vld [vmem:[#allocation2 + $0x140] sm:$0xff] }
 0x494   : > { %3133 = vst [vmem:[#allocation2 + $0x100] sm:$0xff] %v3085_v18  ;;  %v3046_v61 = vld [vmem:[#allocation2 + $0x148] sm:$0xff]  ;;  %3134 = vst [vmem:[#allocation2 + $0x108] sm:$0xff] %v3086_v15  ;;  %v3092_v33 = vadd.f32 %v3044_v35, %v11442_v36  ;;  %v3093_v19 = vadd.f32 %v3045_v48, %v11444_v21  ;;  %v3047_v16 = vld [vmem:[#allocation2 + $0x150] sm:$0xff] }
 0x495   : > { %3135 = vst [vmem:[#allocation2 + $0x110] sm:$0xff] %v3087_v26  ;;  %3136 = vst [vmem:[#allocation2 + $0x118] sm:$0xff] %v3088_v14  ;;  %v3094_v24 = vadd.f32 %v3046_v61, %v11446_v39  ;;  %v3048_v6 = vld [vmem:[#allocation2 + $0x158] sm:$0xff]  ;;  %v3049_v1 = vld [vmem:[#allocation2 + $0x160] sm:$0xff]  ;;  %v3095_v63 = vadd.f32 %v3047_v16, %v11448_v25 }
 0x496   : > { %3137 = vst [vmem:[#allocation2 + $0x120] sm:$0xff] %v3089_v30  ;;  %3138 = vst [vmem:[#allocation2 + $0x128] sm:$0xff] %v3090_v46  ;;  %v3096_v0 = vadd.f32 %v3048_v6, %v11450_v44  ;;  %v3097_v3 = vadd.f32 %v3049_v1, %v11452_v50  ;;  %v3050_v31 = vld [vmem:[#allocation2 + $0x168] sm:$0xff]  ;;  %v3051_v49 = vld [vmem:[#allocation2 + $0x170] sm:$0xff] }
 0x497   : > { %3139 = vst [vmem:[#allocation2 + $0x130] sm:$0xff] %v3091_v28  ;;  %v3052_v34 = vld [vmem:[#allocation2 + $0x178] sm:$0xff]  ;;  %3140 = vst [vmem:[#allocation2 + $0x138] sm:$0xff] %v3092_v33  ;;  %v3098_v36 = vadd.f32 %v3050_v31, %v11454_v13  ;;  %v3099_v21 = vadd.f32 %v3051_v49, %v11456_v9 }
 0x498   : > { %3141 = vst [vmem:[#allocation2 + $0x140] sm:$0xff] %v3093_v19  ;;  %3142 = vst [vmem:[#allocation2 + $0x148] sm:$0xff] %v3094_v24  ;;  %v3100_v39 = vadd.f32 %v3052_v34, %v11458_v59 }
 0x499   : > { %3143 = vst [vmem:[#allocation2 + $0x150] sm:$0xff] %v3095_v63  ;;  %3144 = vst [vmem:[#allocation2 + $0x158] sm:$0xff] %v3096_v0 }
 0x49a   : > { %3145 = vst [vmem:[#allocation2 + $0x160] sm:$0xff] %v3097_v3  ;;  %3146 = vst [vmem:[#allocation2 + $0x168] sm:$0xff] %v3098_v36 }
 0x49b   : > { %3147 = vst [vmem:[#allocation2 + $0x170] sm:$0xff] %v3099_v21  ;;  %3148 = vst [vmem:[#allocation2 + $0x178] sm:$0xff] %v3100_v39 }
 0x49c PF: > { %p7075_p11 = scmp.ne.s32.totalorder %s9181_s21, 2 }
 0x49d   : > { %v11595_v23 = vld [vmem:[#allocation2 + $0x70] sm:$0xff] (!%p7075_p11)  ;;  %v11597_v32 = vld [vmem:[#allocation2 + $0x78] sm:$0xff] (!%p7075_p11)  ;;  %v11599_v41 = vld [vmem:[#allocation2 + $0x60] sm:$0xff] (!%p7075_p11)  ;;  %s9126_s11 = smov (!%p7075_p11), 1   ;;  %s9128_s30 = smov (!%p7075_p11), 17   ;;  %vm6269_vm6 = vcmask (!%p7075_p11), 523264  }
 0x49e   : > { %3152 = sbr.rel (%p7075_p11) target bundleno = 2428 (0x97c), region = 75  ;;  %v11563_v50 = vld [vmem:[#allocation2] sm:$0xff] (!%p7075_p11)  ;;  %v11567_v9 = vld [vmem:[#allocation2 + $0x8] sm:$0xff] (!%p7075_p11)  ;;  %v3222_v38 = vadd.f32 (!%p7075_p11), %v11597_v32, %v11595_v23  ;;  %v11607_v45 = vld [vmem:[#allocation2 + $0x90] sm:$0xff] (!%p7075_p11)  ;;  %s9129_s6 = smov (!%p7075_p11), 16  }
 0x49f   : > { %v3201_v8 = vadd.f32 (!%p7075_p11), %v11567_v9, %v11563_v50  ;;  %v11575_v56 = vld [vmem:[#allocation2 + $0x10] sm:$0xff] (!%p7075_p11)  ;;  %v11577_v2 = vld [vmem:[#allocation2 + $0x18] sm:$0xff] (!%p7075_p11)  ;;  %v11601_v4 = vld [vmem:[#allocation2 + $0x68] sm:$0xff] (!%p7075_p11)  ;;  %s9130_s9 = smov (!%p7075_p11), 15   ;;  %s9131_s10 = smov (!%p7075_p11), 127  }
 0x4a0   : > { %v11559_v25 = vld [vmem:[#allocation2 + $0x20] sm:$0xff] (!%p7075_p11)  ;;  %v11561_v44 = vld [vmem:[#allocation2 + $0x28] sm:$0xff] (!%p7075_p11)  ;;  %v3204_v43 = vadd.f32 (!%p7075_p11), %v11577_v2, %v11575_v56  ;;  %v3219_v37 = vadd.f32 (!%p7075_p11), %v11601_v4, %v11599_v41  ;;  %v11609_v58 = vld [vmem:[#allocation2 + $0x98] sm:$0xff] (!%p7075_p11)  ;;  %s9132_s14 = smov (!%p7075_p11), 113  }
 0x4a1   : > { %v3207_v13 = vadd.f32 (!%p7075_p11), %v11561_v44, %v11559_v25  ;;  %v11569_v59 = vld [vmem:[#allocation2 + $0x30] sm:$0xff] (!%p7075_p11)  ;;  %v11571_v42 = vld [vmem:[#allocation2 + $0x38] sm:$0xff] (!%p7075_p11)  ;;  %3202 = vadd.xlane.f32.xlu0 (!%p7075_p11), %v3201_v8  ;;  %v11611_v22 = vld [vmem:[#allocation2 + $0x80] sm:$0xff] (!%p7075_p11)  ;;  %v3228_v27 = vadd.f32 (!%p7075_p11), %v11609_v58, %v11607_v45 }
 0x4a2   : > { %v3210_v29 = vadd.f32 (!%p7075_p11), %v11571_v42, %v11569_v59  ;;  %v11587_v11 = vld [vmem:[#allocation2 + $0x40] sm:$0xff] (!%p7075_p11)  ;;  %v11589_v17 = vld [vmem:[#allocation2 + $0x48] sm:$0xff] (!%p7075_p11)  ;;  %v11619_v20 = vld [vmem:[#allocation2 + $0xb0] sm:$0xff] (!%p7075_p11) }
 0x4a3   : > { %3208 = vadd.xlane.f32.xlu1 (!%p7075_p11), %v3207_v13  ;;  %v11583_v51 = vld [vmem:[#allocation2 + $0x50] sm:$0xff] (!%p7075_p11)  ;;  %v11585_v57 = vld [vmem:[#allocation2 + $0x58] sm:$0xff] (!%p7075_p11)  ;;  %v3213_v54 = vadd.f32 (!%p7075_p11), %v11589_v17, %v11587_v11  ;;  %v11613_v52 = vld [vmem:[#allocation2 + $0x88] sm:$0xff] (!%p7075_p11) }
 0x4a4   : > { %v3216_v53 = vadd.f32 (!%p7075_p11), %v11585_v57, %v11583_v51  ;;  %v3225_v47 = vadd.f32 (!%p7075_p11), %v11613_v52, %v11611_v22  ;;  %v11621_v10 = vld [vmem:[#allocation2 + $0xb8] sm:$0xff] (!%p7075_p11)  ;;  %v11623_v18 = vld [vmem:[#allocation2 + $0xa0] sm:$0xff] (!%p7075_p11)  ;;  %v11625_v55 = vld [vmem:[#allocation2 + $0xa8] sm:$0xff] (!%p7075_p11) }
 0x4a5   : > { %3205 = vadd.xlane.f32.xlu0 %v3204_v43  ;;  %v3234_v60 = vadd.f32 %v11621_v10, %v11619_v20  ;;  %v3231_v7 = vadd.f32 %v11625_v55, %v11623_v18  ;;  %v11631_v15 = vld [vmem:[#allocation2 + $0xd0] sm:$0xff]  ;;  %v11633_v26 = vld [vmem:[#allocation2 + $0xd8] sm:$0xff]  ;;  %v11635_v14 = vld [vmem:[#allocation2 + $0xc0] sm:$0xff] }
 0x4a6   : > { %v11637_v62 = vld [vmem:[#allocation2 + $0xc8] sm:$0xff]  ;;  %v3240_v12 = vadd.f32 %v11633_v26, %v11631_v15  ;;  %v11643_v30 = vld [vmem:[#allocation2 + $0xf0] sm:$0xff]  ;;  %v11645_v46 = vld [vmem:[#allocation2 + $0xf8] sm:$0xff] }
 0x4a7   : > { %3211 = vadd.xlane.f32.xlu1 %v3210_v29  ;;  %v3237_v5 = vadd.f32 %v11637_v62, %v11635_v14  ;;  %v11647_v28 = vld [vmem:[#allocation2 + $0xe0] sm:$0xff]  ;;  %v11649_v35 = vld [vmem:[#allocation2 + $0xe8] sm:$0xff]  ;;  %v3246_v48 = vadd.f32 %v11645_v46, %v11643_v30  ;;  %v11655_v33 = vld [vmem:[#allocation2 + $0x110] sm:$0xff] }
 0x4a8   : > { %v3243_v61 = vadd.f32 %v11649_v35, %v11647_v28  ;;  %v11657_v19 = vld [vmem:[#allocation2 + $0x118] sm:$0xff]  ;;  %v11659_v24 = vld [vmem:[#allocation2 + $0x100] sm:$0xff]  ;;  %v11661_v16 = vld [vmem:[#allocation2 + $0x108] sm:$0xff] }
 0x4a9   : > { %3214 = vadd.xlane.f32.xlu0 %v3213_v54  ;;  %v3252_v6 = vadd.f32 %v11657_v19, %v11655_v33  ;;  %v3249_v1 = vadd.f32 %v11661_v16, %v11659_v24  ;;  %v11667_v63 = vld [vmem:[#allocation2 + $0x130] sm:$0xff]  ;;  %v11669_v0 = vld [vmem:[#allocation2 + $0x138] sm:$0xff]  ;;  %v11671_v3 = vld [vmem:[#allocation2 + $0x120] sm:$0xff] }
 0x4aa   : > { %v11673_v31 = vld [vmem:[#allocation2 + $0x128] sm:$0xff]  ;;  %v3258_v49 = vadd.f32 %v11669_v0, %v11667_v63  ;;  %v11679_v36 = vld [vmem:[#allocation2 + $0x150] sm:$0xff]  ;;  %v11681_v21 = vld [vmem:[#allocation2 + $0x158] sm:$0xff] }
 0x4ab   : > { %3217 = vadd.xlane.f32.xlu1 %v3216_v53  ;;  %v3255_v34 = vadd.f32 %v11673_v31, %v11671_v3  ;;  %v11683_v39 = vld [vmem:[#allocation2 + $0x140] sm:$0xff]  ;;  %v11685_v13 = vld [vmem:[#allocation2 + $0x148] sm:$0xff]  ;;  %v3264_v8 = vadd.f32 %v11681_v21, %v11679_v36  ;;  %v11691_v43 = vld [vmem:[#allocation2 + $0x170] sm:$0xff] }
 0x4ac   : > { %v3261_v29 = vadd.f32 %v11685_v13, %v11683_v39  ;;  %v11693_v53 = vld [vmem:[#allocation2 + $0x178] sm:$0xff]  ;;  %v11695_v54 = vld [vmem:[#allocation2 + $0x160] sm:$0xff] }
 0x4ad   : > { %3220 = vadd.xlane.f32.xlu0 %v3219_v37  ;;  %v3270_v37 = vadd.f32 %v11693_v53, %v11691_v43 }
 0x4af   : > { %3223 = vadd.xlane.f32.xlu1 %v3222_v38  ;;  %v11697_v38 = vld [vmem:[#allocation2 + $0x168] sm:$0xff] }
 0x4b1   : > { %3226 = vadd.xlane.f32.xlu0 %v3225_v47  ;;  %v3300_v47 = vmul.f32 %v11577_v2, %v11577_v2 }
 0x4b3   : > { %3229 = vadd.xlane.f32.xlu1 %v3228_v27  ;;  %v3299_v27 = vmul.f32 %v11575_v56, %v11575_v56  ;;  %v3304_v56 = vmul.f32 %v11571_v42, %v11571_v42  ;;  %v3305_v42 = vmul.f32 %v11587_v11, %v11587_v11 }
 0x4b5   : > { %3232 = vadd.xlane.f32.xlu0 %v3231_v7  ;;  %v3297_v7 = vmul.f32 %v11563_v50, %v11563_v50 }
 0x4b7   : > { %3235 = vadd.xlane.f32.xlu1 %v3234_v60  ;;  %v3267_v60 = vadd.f32 %v11697_v38, %v11695_v54 }
 0x4b9   : > { %3238 = vadd.xlane.f32.xlu0 %v3237_v5  ;;  %v3348_v5 = vadd.f32 %v3300_v47, %v3299_v27  ;;  %v3320_v27 = vmul.f32 %v11621_v10, %v11621_v10  ;;  %v3318_v47 = vmul.f32 %v11625_v55, %v11625_v55  ;;  %v3321_v10 = vmul.f32 %v11635_v14, %v11635_v14 }
 0x4ba   : > { %v3327_v55 = vmul.f32 %v11643_v30, %v11643_v30 }
 0x4bb   : > { %3241 = vadd.xlane.f32.xlu1 %v3240_v12  ;;  %v3298_v12 = vmul.f32 %v11567_v9, %v11567_v9  ;;  %v3307_v9 = vmul.f32 %v11583_v51, %v11583_v51 }
 0x4bd   : > { %3244 = vadd.xlane.f32.xlu0 %v3243_v61  ;;  %v3345_v2 = vadd.f32 %v3298_v12, %v3297_v7  ;;  %v3301_v61 = vmul.f32 %v11559_v25, %v11559_v25  ;;  %v3322_v7 = vmul.f32 %v11637_v62, %v11637_v62  ;;  %v3328_v12 = vmul.f32 %v11645_v46, %v11645_v46 }
 0x4be   : > { %v3331_v62 = vmul.f32 %v11655_v33, %v11655_v33  ;;  %v3329_v46 = vmul.f32 %v11659_v24, %v11659_v24 }
 0x4bf   : > { %3247 = vadd.xlane.f32.xlu1 %v3246_v48  ;;  %v3303_v48 = vmul.f32 %v11569_v59, %v11569_v59  ;;  %v3390_v14 = vadd.f32 %v3328_v12, %v3327_v55 }
 0x4c1   : > { %3250 = vadd.xlane.f32.xlu0 %v3249_v1  ;;  %v3354_v50 = vadd.f32 %v3304_v56, %v3303_v48  ;;  %v3308_v1 = vmul.f32 %v11585_v57, %v11585_v57  ;;  %v3309_v57 = vmul.f32 %v11599_v41, %v11599_v41  ;;  %v3332_v48 = vmul.f32 %v11657_v19, %v11657_v19 }
 0x4c2   : > { %v3330_v56 = vmul.f32 %v11661_v16, %v11661_v16  ;;  %v3333_v19 = vmul.f32 %v11671_v3, %v11671_v3  ;;  %v3339_v16 = vmul.f32 %v11679_v36, %v11679_v36  ;;  %v9125_v3 = vmov 0  }
 0x4c3   : > { %3253 = vadd.xlane.f32.xlu1 %v3252_v6  ;;  %v3302_v6 = vmul.f32 %v11561_v44, %v11561_v44  ;;  %v3360_v25 = vadd.f32 %v3308_v1, %v3307_v9  ;;  %v3311_v44 = vmul.f32 %v11595_v23, %v11595_v23  ;;  %8037 = vset.pattern.permute.xlu0 %v9125_v3 }
 0x4c4   : > { %v3393_v33 = vadd.f32 %v3330_v56, %v3329_v46  ;;  %8038 = vset.pattern.permute.xlu1 %v9125_v3  ;;  %v3343_v9 = vmul.f32 %v11691_v43, %v11691_v43  ;;  %v3344_v36 = vmul.f32 %v11693_v53, %v11693_v53  ;;  %v3341_v1 = vmul.f32 %v11695_v54, %v11695_v54 }
 0x4c5   : > { %3256 = vadd.xlane.f32.xlu0 %v3255_v34  ;;  %v3351_v59 = vadd.f32 %v3302_v6, %v3301_v61  ;;  %v3312_v34 = vmul.f32 %v11597_v32, %v11597_v32  ;;  %v3313_v32 = vmul.f32 %v11611_v22, %v11611_v22  ;;  %v3334_v61 = vmul.f32 %v11673_v31, %v11673_v31 }
 0x4c6   : > { %v3340_v6 = vmul.f32 %v11681_v21, %v11681_v21 }
 0x4c7   : > { %3259 = vadd.xlane.f32.xlu1 %v3258_v49  ;;  %v3306_v49 = vmul.f32 %v11589_v17, %v11589_v17  ;;  %v3366_v11 = vadd.f32 %v3312_v34, %v3311_v44  ;;  %v3315_v17 = vmul.f32 %v11607_v45, %v11607_v45 }
 0x4c8   : > { %v3408_v31 = vadd.f32 %v3340_v6, %v3339_v16 }
 0x4c9   : > { %3262 = vadd.xlane.f32.xlu0 %v3261_v29  ;;  %v3357_v51 = vadd.f32 %v3306_v49, %v3305_v42  ;;  %v3316_v29 = vmul.f32 %v11609_v58, %v11609_v58  ;;  %v3317_v58 = vmul.f32 %v11623_v18, %v11623_v18 }
 0x4cb   : > { %3265 = vadd.xlane.f32.xlu1 %v3264_v8  ;;  %v3310_v8 = vmul.f32 %v11601_v4, %v11601_v4  ;;  %v3372_v41 = vadd.f32 %v3316_v29, %v3315_v17  ;;  %v3319_v4 = vmul.f32 %v11619_v20, %v11619_v20  ;;  %v3375_v20 = vadd.f32 %v3318_v47, %v3317_v58 }
 0x4cd   : > { %3268 = vadd.xlane.f32.xlu0 %v3267_v60  ;;  %v3363_v23 = vadd.f32 %v3310_v8, %v3309_v57  ;;  %v3378_v22 = vadd.f32 %v3320_v27, %v3319_v4  ;;  %v3324_v60 = vmul.f32 %v11633_v26, %v11633_v26  ;;  %v3325_v26 = vmul.f32 %v11647_v28, %v11647_v28 }
 0x4ce   : > { %v3396_v28 = vadd.f32 %v3332_v48, %v3331_v62 }
 0x4cf   : > { %3271 = vadd.xlane.f32.xlu1 %v3270_v37  ;;  %v3314_v37 = vmul.f32 %v11613_v52, %v11613_v52  ;;  %v3323_v52 = vmul.f32 %v11631_v15, %v11631_v15  ;;  %v3381_v15 = vadd.f32 %v3322_v7, %v3321_v10 }
 0x4d1   : > { %3346 = vadd.xlane.f32.xlu0 %v3345_v2  ;;  %v3369_v45 = vadd.f32 %v3314_v37, %v3313_v32  ;;  %v3384_v18 = vadd.f32 %v3324_v60, %v3323_v52  ;;  %v3336_v2 = vmul.f32 %v11669_v0, %v11669_v0  ;;  %v3337_v0 = vmul.f32 %v11683_v39, %v11683_v39 }
 0x4d2   : > { %v3342_v39 = vmul.f32 %v11697_v38, %v11697_v38 }
 0x4d3   : > { %3349 = vadd.xlane.f32.xlu1 %v3348_v5  ;;  %v3326_v5 = vmul.f32 %v11649_v35, %v11649_v35  ;;  %v3335_v35 = vmul.f32 %v11667_v63, %v11667_v63  ;;  %v3399_v63 = vadd.f32 %v3334_v61, %v3333_v19 }
 0x4d5   : > { %3352 = vadd.xlane.f32.xlu0 %v3351_v59  ;;  %v3387_v30 = vadd.f32 %v3326_v5, %v3325_v26  ;;  %v3402_v24 = vadd.f32 %v3336_v2, %v3335_v35  ;;  %v3411_v59 = vadd.f32 %v3342_v39, %v3341_v1 }
 0x4d7   : > { %3355 = vadd.xlane.f32.xlu1 %v3354_v50  ;;  %v3338_v50 = vmul.f32 %v11685_v13, %v11685_v13  ;;  %v3414_v13 = vadd.f32 %v3344_v36, %v3343_v9 }
 0x4d9   : > { %3358 = vadd.xlane.f32.xlu0 %v3357_v51  ;;  %v3405_v21 = vadd.f32 %v3338_v50, %v3337_v0 }
 0x4db   : > { %3361 = vadd.xlane.f32.xlu1 %v3360_v25 }
 0x4dd   : > { %3364 = vadd.xlane.f32.xlu0 %v3363_v23 }
 0x4df   : > { %3367 = vadd.xlane.f32.xlu1 %v3366_v11 }
 0x4e1   : > { %3370 = vadd.xlane.f32.xlu0 %v3369_v45 }
 0x4e3   : > { %3373 = vadd.xlane.f32.xlu1 %v3372_v41 }
 0x4e5   : > { %3376 = vadd.xlane.f32.xlu0 %v3375_v20 }
 0x4e7   : > { %3379 = vadd.xlane.f32.xlu1 %v3378_v22 }
 0x4e9   : > { %3382 = vadd.xlane.f32.xlu0 %v3381_v15 }
 0x4eb   : > { %3385 = vadd.xlane.f32.xlu1 %v3384_v18 }
 0x4ed   : > { %3388 = vadd.xlane.f32.xlu0 %v3387_v30 }
 0x4ef   : > { %3391 = vadd.xlane.f32.xlu1 %v3390_v14 }
 0x4f1   : > { %3394 = vadd.xlane.f32.xlu0 %v3393_v33 }
 0x4f3   : > { %3397 = vadd.xlane.f32.xlu1 %v3396_v28 }
 0x4f5   : > { %3400 = vadd.xlane.f32.xlu0 %v3399_v63 }
 0x4f7   : > { %3403 = vadd.xlane.f32.xlu1 %v3402_v24 }
 0x4f9   : > { %3406 = vadd.xlane.f32.xlu0 %v3405_v21 }
 0x4fb   : > { %3409 = vadd.xlane.f32.xlu1 %v3408_v31 }
 0x4fd   : > { %3412 = vadd.xlane.f32.xlu0 %v3411_v59 }
 0x4ff   : > { %3415 = vadd.xlane.f32.xlu1 %v3414_v13 }
 0x52e   : > { %v3203_v49 = vpop.xlane.xlu0 %3202 }
 0x52f   : > { %v11829_v52 = vmul.f32 0.0051020407, %v3203_v49 }
 0x530   : > { %v3209_v42 = vpop.xlane.xlu1 %3208 }
 0x531   : > { %v11835_v55 = vmul.f32 0.0051020407, %v3209_v42  ;;  %v3441_v12 = vmul.f32 %v11829_v52, %v11829_v52 }
 0x532   : > { %v3206_v25 = vpop.xlane.xlu0 %3205 }
 0x533   : > { %v11825_v47 = vmul.f32 0.0051020407, %v3206_v25  ;;  %v3443_v56 = vmul.f32 %v11835_v55, %v11835_v55 }
 0x534   : > { %v3212_v43 = vpop.xlane.xlu1 %3211 }
 0x535   : > { %v11831_v20 = vmul.f32 0.0051020407, %v3212_v43  ;;  %v3442_v10 = vmul.f32 %v11825_v47, %v11825_v47 }
 0x536   : > { %v3215_v53 = vpop.xlane.xlu0 %3214 }
 0x537   : > { %v3444_v62 = vmul.f32 %v11831_v20, %v11831_v20  ;;  %v11843_v28 = vmul.f32 0.0051020407, %v3215_v53  ;;  %v11864_v53 = vld [vmem:[%s14226_s3 + $0x8] sm:$0xff] }
 0x538   : > { %v3218_v44 = vpop.xlane.xlu1 %3217 }
 0x539   : > { %v11845_v33 = vmul.f32 0.0051020407, %v3218_v44  ;;  %v3445_v0 = vmul.f32 %v11843_v28, %v11843_v28 }
 0x53a   : > { %v3221_v51 = vpop.xlane.xlu0 %3220 }
 0x53b   : > { %v11849_v50 = vmul.f32 0.0051020407, %v3221_v51  ;;  %v3446_v9 = vmul.f32 %v11845_v33, %v11845_v33 }
 0x53c   : > { %v3224_v34 = vpop.xlane.xlu1 %3223 }
 0x53d   : > { %v11853_v36 = vmul.f32 0.0051020407, %v3224_v34  ;;  %v3447_v42 = vmul.f32 %v11849_v50, %v11849_v50 }
 0x53e   : > { %v3227_v8 = vpop.xlane.xlu0 %3226 }
 0x53f   : > { %v11855_v39 = vmul.f32 0.0051020407, %v3227_v8  ;;  %v3448_v34 = vmul.f32 %v11853_v36, %v11853_v36 }
 0x540   : > { %v3230_v57 = vpop.xlane.xlu1 %3229 }
 0x541   : > { %v11859_v44 = vmul.f32 0.0051020407, %v3230_v57 }
 0x542   : > { %v11801_v11 = vpop.xlane.xlu0 %3232 }
 0x543   : > { %v11869_v51 = vmul.f32 0.0051020407, %v11801_v11 }
 0x544   : > { %v11799_v54 = vpop.xlane.xlu1 %3235 }
 0x546   : > { %v11805_v17 = vpop.xlane.xlu0 %3238 }
 0x548   : > { %v11803_v38 = vpop.xlane.xlu1 %3241 }
 0x54a   : > { %v11809_v23 = vpop.xlane.xlu0 %3244 }
 0x54c   : > { %v11807_v29 = vpop.xlane.xlu1 %3247 }
 0x54e   : > { %v11813_v37 = vpop.xlane.xlu0 %3250 }
 0x550   : > { %v11811_v32 = vpop.xlane.xlu1 %3253 }
 0x552   : > { %v11817_v4 = vpop.xlane.xlu0 %3256 }
 0x554   : > { %v11815_v41 = vpop.xlane.xlu1 %3259 }
 0x556   : > { %v11821_v45 = vpop.xlane.xlu0 %3262 }
 0x558   : > { %v11819_v27 = vpop.xlane.xlu1 %3265 }
 0x55a   : > { %v11827_v22 = vpop.xlane.xlu0 %3268 }
 0x55c   : > { %v11823_v58 = vpop.xlane.xlu1 %3271 }
 0x55e   : > { %v3347_v18 = vpop.xlane.xlu0 %3346 }
 0x55f   : > { %v3417_v15 = vmul.f32 0.0051020407, %v3347_v18 }
 0x560   : > { %v3350_v60 = vpop.xlane.xlu1 %3349 }
 0x561   : > { %v3418_v7 = vmul.f32 0.0051020407, %v3350_v60  ;;  %v3465_v5 = vsub.f32 %v3417_v15, %v3441_v12 }
 0x562   : > { %v3353_v46 = vpop.xlane.xlu0 %3352 }
 0x563   : > { %v3466_v26 = vsub.f32 %v3418_v7, %v3442_v10  ;;  %v3513_v35 = vadd.f32 1e-05, %v3465_v5  ;;  %v3419_v2 = vmul.f32 0.0051020407, %v3353_v46  ;;  %v11874_v10 = vld [vmem:[%s14226_s3] sm:$0xff]  ;;  %v3449_v7 = vmul.f32 %v11855_v39, %v11855_v39 }
 0x564   : > { %v3356_v14 = vpop.xlane.xlu1 %3355 }
 0x565   : > { %v3514_v48 = vadd.f32 1e-05, %v3466_v26  ;;  %v3420_v30 = vmul.f32 0.0051020407, %v3356_v14  ;;  %v3467_v61 = vsub.f32 %v3419_v2, %v3443_v56  ;;  %v11888_v56 = vld [vmem:[%s14226_s3 + $0x18] sm:$0xff] }
 0x566   : > { %v3359_v63 = vpop.xlane.xlu0 %3358 }
 0x567   : > { %9001 = vrsqrt.f32 %v3514_v48  ;;  %v3468_v19 = vsub.f32 %v3420_v30, %v3444_v62  ;;  %v3515_v3 = vadd.f32 1e-05, %v3467_v61  ;;  %v3421_v31 = vmul.f32 0.0051020407, %v3359_v63  ;;  %v11895_v61 = vld [vmem:[%s14226_s3 + $0x10] sm:$0xff] }
 0x568   : > { %9003 = vrsqrt.f32 %v3513_v35  ;;  %v3362_v24 = vpop.xlane.xlu1 %3361  ;;  %v3450_v48 = vmul.f32 %v11859_v44, %v11859_v44  ;;  %v11882_v30 = vmul.f32 0.0051020407, %v11799_v54  ;;  %v3451_v35 = vmul.f32 %v11869_v51, %v11869_v51 }
 0x569   : > { %v3516_v16 = vadd.f32 1e-05, %v3468_v19  ;;  %v3422_v6 = vmul.f32 0.0051020407, %v3362_v24  ;;  %v3469_v21 = vsub.f32 %v3421_v31, %v3445_v0  ;;  %v11898_v24 = vmul.f32 0.0051020407, %v11805_v17 }
 0x56a   : > { %v3365_v59 = vpop.xlane.xlu0 %3364  ;;  %v11907_v17 = vmul.f32 0.0051020407, %v11803_v38 }
 0x56b   : > { %9005 = vrsqrt.f32 %v3516_v16  ;;  %v3470_v13 = vsub.f32 %v3422_v6, %v3446_v9  ;;  %v3517_v49 = vadd.f32 1e-05, %v3469_v21  ;;  %v3423_v25 = vmul.f32 0.0051020407, %v3365_v59 }
 0x56c   : > { %9007 = vrsqrt.f32 %v3515_v3  ;;  %v3368_v1 = vpop.xlane.xlu1 %3367 }
 0x56d   : > { %v3424_v43 = vmul.f32 0.0051020407, %v3368_v1  ;;  %9009 = vrsqrt.f32 %v3517_v49  ;;  %v3471_v8 = vsub.f32 %v3423_v25, %v3447_v42  ;;  %v3518_v18 = vadd.f32 1e-05, %v3470_v13  ;;  %v11912_v49 = vld [vmem:[%s14226_s3 + $0x20] sm:$0xff] }
 0x56e   : > { %v3371_v15 = vpop.xlane.xlu0 %3370  ;;  %v3452_v1 = vmul.f32 %v11882_v30, %v11882_v30  ;;  %v11917_v25 = vmul.f32 0.0051020407, %v11809_v23 }
 0x56f   : > { %v3472_v5 = vsub.f32 %v3424_v43, %v3448_v34  ;;  %v3519_v14 = vadd.f32 1e-05, %v3471_v8  ;;  %v3425_v11 = vmul.f32 0.0051020407, %v3371_v15  ;;  %v3453_v43 = vmul.f32 %v11898_v24, %v11898_v24 }
 0x570   : > { %v3374_v60 = vpop.xlane.xlu1 %3373 }
 0x571   : > { %v9002_v57 = vpop.eup %9001  ;;  %v3426_v12 = vmul.f32 0.0051020407, %v3374_v60  ;;  %9011 = vrsqrt.f32 %v3519_v14  ;;  %v3473_v2 = vsub.f32 %v3425_v11, %v3449_v7  ;;  %v3520_v3 = vadd.f32 1e-05, %v3472_v5 }
 0x572   : > { %v9004_v26 = vpop.eup %9003  ;;  %v3562_v62 = vmul.f32 %v9002_v57, %v11864_v53  ;;  %9013 = vrsqrt.f32 %v3518_v18  ;;  %v3377_v63 = vpop.xlane.xlu0 %3376  ;;  %v3454_v5 = vmul.f32 %v11907_v17, %v11907_v17  ;;  %v11931_v14 = vmul.f32 0.0051020407, %v11811_v32 }
 0x573   : > { %v3561_v46 = vmul.f32 %v9004_v26, %v11874_v10  ;;  %v3474_v16 = vsub.f32 %v3426_v12, %v3450_v48  ;;  %v3521_v31 = vadd.f32 1e-05, %v3473_v2  ;;  %v3427_v9 = vmul.f32 0.0051020407, %v3377_v63 }
 0x574   : > { %v3380_v19 = vpop.xlane.xlu1 %3379  ;;  %3736 = vperm.xlu1 %8038, %v3562_v62   ;;  %v11921_v12 = vmul.f32 0.0051020407, %v11807_v29  ;;  %v3586_v26 = vmul.f32 %v3562_v62, %v11825_v47  ;;  %v11936_v29 = vld [vmem:[%s14226_s3 + $0x30] sm:$0xff]  ;;  %v3455_v47 = vmul.f32 %v11917_v25, %v11917_v25 }
 0x575   : > { %v9006_v54 = vpop.eup %9005  ;;  %v3428_v6 = vmul.f32 0.0051020407, %v3380_v19  ;;  %3731 = vperm.xlu0 %8037, %v3561_v46   ;;  %9015 = vrsqrt.f32 %v3521_v31  ;;  %v3475_v59 = vsub.f32 %v3427_v9, %v3451_v35  ;;  %v3522_v34 = vadd.f32 1e-05, %v3474_v16 }
 0x576   : > { %v9008_v0 = vpop.eup %9007  ;;  %v11901_v21 = vmul.f32 %v9006_v54, %v11888_v56  ;;  %v3383_v38 = vpop.xlane.xlu0 %3382  ;;  %9017 = vrsqrt.f32 %v3520_v3  ;;  %v3585_v15 = vmul.f32 %v3561_v46, %v11829_v52  ;;  %v11941_v52 = vmul.f32 0.0051020407, %v11813_v37 }
 0x577   : > { %v3563_v13 = vmul.f32 %v9008_v0, %v11895_v61  ;;  %v3476_v8 = vsub.f32 %v3428_v6, %v3452_v1  ;;  %v9010_v60 = vpop.eup %9009  ;;  %v3523_v57 = vadd.f32 1e-05, %v3475_v59  ;;  %v3429_v18 = vmul.f32 0.0051020407, %v3383_v38  ;;  %v11961_v59 = vld [vmem:[%s14226_s3 + $0x28] sm:$0xff] }
 0x578   : > { %v3386_v42 = vpop.xlane.xlu1 %3385  ;;  %v11926_v23 = vmul.f32 %v9010_v60, %v11912_v49  ;;  %v3456_v6 = vmul.f32 %v11921_v12, %v11921_v12  ;;  %v3458_v3 = vmul.f32 %v11931_v14, %v11931_v14  ;;  %v11956_v31 = vmul.f32 0.0051020407, %v11815_v41 }
 0x579   : > { %3746 = vperm.xlu0 %8037, %v11901_v21   ;;  %3741 = vperm.xlu1 %8038, %v3563_v13   ;;  %v3430_v7 = vmul.f32 0.0051020407, %v3386_v42  ;;  %9019 = vrsqrt.f32 %v3523_v57  ;;  %v3477_v11 = vsub.f32 %v3429_v18, %v3453_v43  ;;  %v3524_v62 = vadd.f32 1e-05, %v3476_v8 }
 0x57a   : > { %9021 = vrsqrt.f32 %v3522_v34  ;;  %v3389_v32 = vpop.xlane.xlu0 %3388  ;;  %v3587_v37 = vmul.f32 %v3563_v13, %v11835_v55  ;;  %v3589_v63 = vmul.f32 %v11926_v23, %v11843_v28  ;;  %v11966_v55 = vld [vmem:[%s14226_s3 + $0x40] sm:$0xff]  ;;  %v3457_v28 = vmul.f32 %v11941_v52, %v11941_v52 }
 0x57b   : > { %v9012_v46 = vpop.eup %9011  ;;  %v3478_v35 = vsub.f32 %v3430_v7, %v3454_v5  ;;  %v3525_v2 = vadd.f32 1e-05, %v3477_v11  ;;  %v3431_v54 = vmul.f32 0.0051020407, %v3389_v32  ;;  %v11971_v13 = vmul.f32 0.0051020407, %v11817_v4 }
 0x57c   : > { %v3392_v48 = vpop.xlane.xlu1 %3391  ;;  %v9014_v16 = vpop.eup %9013  ;;  %v11951_v0 = vmul.f32 %v9012_v46, %v11936_v29  ;;  %v3588_v57 = vmul.f32 %v11901_v21, %v11831_v20  ;;  %v11990_v20 = vld [vmem:[%s14226_s3 + $0x38] sm:$0xff] }
 0x57d   : > { %3633 = vrot.lane.b32.xlu0 %v3585_v15, %s9126_s11  ;;  %3635 = vrot.lane.b32.xlu1 %v3586_v26, %s9126_s11  ;;  %v3432_v19 = vmul.f32 0.0051020407, %v3392_v48  ;;  %9023 = vrsqrt.f32 %v3525_v2  ;;  %v3479_v9 = vsub.f32 %v3431_v54, %v3455_v47  ;;  %v3526_v34 = vadd.f32 1e-05, %v3478_v35 }
 0x57e   : > { %9025 = vrsqrt.f32 %v3524_v62  ;;  %v3395_v42 = vpop.xlane.xlu0 %3394  ;;  %v3591_v7 = vmul.f32 %v11951_v0, %v11849_v50  ;;  %v11980_v4 = vmul.f32 %v9014_v16, %v11961_v59  ;;  %v3460_v26 = vmul.f32 %v11956_v31, %v11956_v31  ;;  %v11995_v50 = vld [vmem:[%s14226_s3 + $0x50] sm:$0xff] }
 0x57f   : > { %v9016_v43 = vpop.eup %9015  ;;  %v3480_v8 = vsub.f32 %v3432_v19, %v3456_v6  ;;  %v3527_v38 = vadd.f32 1e-05, %v3479_v9  ;;  %v3433_v60 = vmul.f32 0.0051020407, %v3395_v42  ;;  %v3459_v21 = vmul.f32 %v11971_v13, %v11971_v13 }
 0x580   : > { %v3398_v1 = vpop.xlane.xlu1 %3397  ;;  %v11983_v18 = vmul.f32 %v9016_v43, %v11966_v55  ;;  %v9018_v15 = vpop.eup %9017  ;;  %v12000_v48 = vmul.f32 0.0051020407, %v11821_v45  ;;  %v3590_v16 = vmul.f32 %v11980_v4, %v11845_v33  ;;  %v12025_v33 = vld [vmem:[%s14226_s3 + $0x60] sm:$0xff] }
 0x581   : > { %v3434_v41 = vmul.f32 0.0051020407, %v3398_v1  ;;  %3637 = vrot.lane.b32.xlu1 %v3587_v37, %s9126_s11  ;;  %3641 = vrot.lane.b32.xlu0 %v3589_v63, %s9126_s11  ;;  %9027 = vrsqrt.f32 %v3527_v38  ;;  %v3481_v5 = vsub.f32 %v3433_v60, %v3457_v28  ;;  %v3528_v35 = vadd.f32 1e-05, %v3480_v8  ;;  %v12020_v1 = vld [vmem:[%s14226_s3 + $0x48] sm:$0xff] }
 0x582   : > { %v3401_v32 = vpop.xlane.xlu0 %3400  ;;  %9029 = vrsqrt.f32 %v3526_v34  ;;  %v3593_v45 = vmul.f32 %v11983_v18, %v11855_v39  ;;  %v12009_v6 = vmul.f32 %v9018_v15, %v11990_v20  ;;  %v12015_v63 = vmul.f32 0.0051020407, %v11819_v27 }
 0x583   : > { %v3482_v47 = vsub.f32 %v3434_v41, %v3458_v3  ;;  %v9020_v46 = vpop.eup %9019  ;;  %v3529_v2 = vadd.f32 1e-05, %v3481_v5  ;;  %v3435_v19 = vmul.f32 0.0051020407, %v3401_v32  ;;  %v3461_v39 = vmul.f32 %v12000_v48, %v12000_v48 }
 0x584   : > { %v3404_v11 = vpop.xlane.xlu1 %3403  ;;  %v9022_v54 = vpop.eup %9021  ;;  %v12012_v37 = vmul.f32 %v9020_v46, %v11995_v50  ;;  %v12030_v28 = vmul.f32 0.0051020407, %v11827_v22  ;;  %v12047_v5 = vmul.f32 0.0051020407, %v11823_v58 }
 0x585   : > { %v3436_v62 = vmul.f32 0.0051020407, %v3404_v11  ;;  %3639 = vrot.lane.b32.xlu1 %v3588_v57, %s9126_s11  ;;  %3645 = vrot.lane.b32.xlu0 %v3591_v7, %s9126_s11  ;;  %9031 = vrsqrt.f32 %v3529_v2  ;;  %v3483_v3 = vsub.f32 %v3435_v19, %v3459_v21  ;;  %v3530_v27 = vadd.f32 1e-05, %v3482_v47 }
 0x586   : > { %v3407_v42 = vpop.xlane.xlu0 %3406  ;;  %9033 = vrsqrt.f32 %v3528_v35  ;;  %v3592_v57 = vmul.f32 %v12009_v6, %v11853_v36  ;;  %v3595_v22 = vmul.f32 %v12012_v37, %v11869_v51  ;;  %v12039_v7 = vmul.f32 %v9022_v54, %v12020_v1  ;;  %v12052_v36 = vld [vmem:[%s14226_s3 + $0x58] sm:$0xff]  ;;  %v12057_v51 = vld [vmem:[%s14226_s3 + $0x70] sm:$0xff] }
 0x587   : > { %v3484_v41 = vsub.f32 %v3436_v62, %v3460_v26  ;;  %v9024_v43 = vpop.eup %9023  ;;  %v3531_v34 = vadd.f32 1e-05, %v3483_v3  ;;  %v3437_v38 = vmul.f32 0.0051020407, %v3407_v42  ;;  %v3462_v26 = vmul.f32 %v12015_v63, %v12015_v63 }
 0x588   : > { %v3410_v9 = vpop.xlane.xlu1 %3409  ;;  %v9026_v60 = vpop.eup %9025  ;;  %v12042_v15 = vmul.f32 %v9024_v43, %v12025_v33  ;;  %v3463_v47 = vmul.f32 %v12030_v28, %v12030_v28  ;;  %v3594_v54 = vmul.f32 %v12039_v7, %v11859_v44  ;;  %v12083_v44 = vld [vmem:[%s14226_s3 + $0x80] sm:$0xff] }
 0x589   : > { %3643 = vrot.lane.b32.xlu1 %v3590_v16, %s9126_s11  ;;  %3649 = vrot.lane.b32.xlu0 %v3593_v45, %s9126_s11  ;;  %v3438_v8 = vmul.f32 0.0051020407, %v3410_v9  ;;  %9035 = vrsqrt.f32 %v3531_v34  ;;  %v3485_v11 = vsub.f32 %v3437_v38, %v3461_v39  ;;  %v3532_v62 = vadd.f32 1e-05, %v3484_v41  ;;  %v12078_v41 = vld [vmem:[%s14226_s3 + $0x68] sm:$0xff] }
 0x58a   : > { %9037 = vrsqrt.f32 %v3530_v27  ;;  %v3413_v58 = vpop.xlane.xlu0 %3412  ;;  %v3597_v16 = vmul.f32 %v12042_v15, %v11898_v24  ;;  %v12068_v45 = vmul.f32 %v9026_v60, %v12052_v36  ;;  %v3464_v39 = vmul.f32 %v12047_v5, %v12047_v5 }
 0x58b   : > { %v9028_v32 = vpop.eup %9027  ;;  %v3486_v46 = vsub.f32 %v3438_v8, %v3462_v26  ;;  %v3533_v35 = vadd.f32 1e-05, %v3485_v11  ;;  %v3439_v19 = vmul.f32 0.0051020407, %v3413_v58  ;;  %v12098_v26 = vld [vmem:[%s14226_s3 + $0x78] sm:$0xff]  ;;  %v12103_v11 = vld [vmem:[%s14226_s3 + $0x90] sm:$0xff] }
 0x58c   : > { %v3416_v21 = vpop.xlane.xlu1 %3415  ;;  %v12071_v3 = vmul.f32 %v9028_v32, %v12057_v51  ;;  %v9030_v9 = vpop.eup %9029  ;;  %v3596_v8 = vmul.f32 %v12068_v45, %v11882_v30 }
 0x58d   : > { %3647 = vrot.lane.b32.xlu1 %v3592_v57, %s9126_s11  ;;  %3653 = vrot.lane.b32.xlu0 %v3595_v22, %s9126_s11  ;;  %v3440_v2 = vmul.f32 0.0051020407, %v3416_v21  ;;  %9039 = vrsqrt.f32 %v3533_v35  ;;  %v3487_v27 = vsub.f32 %v3439_v19, %v3463_v47  ;;  %v3534_v42 = vadd.f32 1e-05, %v3486_v46  ;;  %v12115_v46 = vld [vmem:[%s14226_s3 + $0x88] sm:$0xff]  ;;  %v12120_v35 = vld [vmem:[%s14226_s3 + $0xa0] sm:$0xff] }
 0x58e   : > { %9041 = vrsqrt.f32 %v3532_v62  ;;  %v3599_v38 = vmul.f32 %v12071_v3, %v11917_v25  ;;  %v3574_v60 = vmul.f32 %v9030_v9, %v12078_v41  ;;  %v12131_v9 = vld [vmem:[%s14226_s3 + $0x98] sm:$0xff] }
 0x58f   : > { %v9032_v24 = vpop.eup %9031  ;;  %v3488_v43 = vsub.f32 %v3440_v2, %v3464_v39  ;;  %v3535_v34 = vadd.f32 1e-05, %v3487_v27  ;;  %v12136_v39 = vld [vmem:[%s14226_s3 + $0xb0] sm:$0xff] }
 0x590   : > { %v12093_v57 = vmul.f32 %v9032_v24, %v12083_v44  ;;  %v9034_v22 = vpop.eup %9033  ;;  %v3598_v47 = vmul.f32 %v3574_v60, %v11907_v17 }
 0x591   : > { %3651 = vrot.lane.b32.xlu1 %v3594_v54, %s9126_s11  ;;  %3657 = vrot.lane.b32.xlu0 %v3597_v16, %s9126_s11  ;;  %9043 = vrsqrt.f32 %v3535_v34  ;;  %v3536_v25 = vadd.f32 1e-05, %v3488_v43  ;;  %v3576_v58 = vmul.f32 %v9034_v22, %v12098_v26  ;;  %v12147_v34 = vld [vmem:[%s14226_s3 + $0xa8] sm:$0xff]  ;;  %v12157_v22 = vld [vmem:[%s14226_s3 + $0xb8] sm:$0xff] }
 0x592   : > { %9045 = vrsqrt.f32 %v3534_v42  ;;  %v3601_v62 = vmul.f32 %v12093_v57, %v11941_v52 }
 0x593   : > { %v9036_v30 = vpop.eup %9035  ;;  %9047 = vrsqrt.f32 %v3536_v25  ;;  %v3600_v52 = vmul.f32 %v3576_v58, %v11921_v12 }
 0x594   : > { %v9038_v21 = vpop.eup %9037  ;;  %v3579_v32 = vmul.f32 %v9036_v30, %v12103_v11 }
 0x595   : > { %3655 = vrot.lane.b32.xlu1 %v3596_v8, %s9126_s11  ;;  %3661 = vrot.lane.b32.xlu0 %v3599_v38, %s9126_s11  ;;  %v3578_v19 = vmul.f32 %v9038_v21, %v12115_v46 }
 0x596   : > { %v3603_v2 = vmul.f32 %v3579_v32, %v11971_v13 }
 0x597   : > { %v9040_v17 = vpop.eup %9039  ;;  %v3602_v13 = vmul.f32 %v3578_v19, %v11931_v14 }
 0x598   : > { %v3581_v54 = vmul.f32 %v9040_v17, %v12120_v35  ;;  %v9042_v16 = vpop.eup %9041 }
 0x599   : > { %3659 = vrot.lane.b32.xlu1 %v3598_v47, %s9126_s11  ;;  %3665 = vrot.lane.b32.xlu0 %v3601_v62, %s9126_s11  ;;  %v3580_v24 = vmul.f32 %v9042_v16, %v12131_v9 }
 0x59a   : > { %v3605_v27 = vmul.f32 %v3581_v54, %v12000_v48 }
 0x59b   : > { %v9044_v12 = vpop.eup %9043  ;;  %v3604_v8 = vmul.f32 %v3580_v24, %v11956_v31 }
 0x59c   : > { %v3583_v42 = vmul.f32 %v9044_v12, %v12136_v39  ;;  %v9046_v43 = vpop.eup %9045 }
 0x59d   : > { %3663 = vrot.lane.b32.xlu1 %v3600_v52, %s9126_s11  ;;  %3669 = vrot.lane.b32.xlu0 %v3603_v2, %s9126_s11  ;;  %v3582_v48 = vmul.f32 %v9046_v43, %v12147_v34  ;;  %v9048_v38 = vpop.eup %9047 }
 0x59e   : > { %v3607_v14 = vmul.f32 %v3583_v42, %v12030_v28  ;;  %v3584_v25 = vmul.f32 %v9048_v38, %v12157_v22 }
 0x59f   : > { %v3606_v30 = vmul.f32 %v3582_v48, %v12015_v63 }
 0x5a0   : > { %v3608_v31 = vmul.f32 %v3584_v25, %v12047_v5 }
 0x5a1   : > { %3667 = vrot.lane.b32.xlu1 %v3602_v13, %s9126_s11  ;;  %3673 = vrot.lane.b32.xlu0 %v3605_v27, %s9126_s11 }
 0x5a5   : > { %3671 = vrot.lane.b32.xlu1 %v3604_v8, %s9126_s11  ;;  %3677 = vrot.lane.b32.xlu0 %v3607_v14, %s9126_s11 }
 0x5a9   : > { %3675 = vrot.lane.b32.xlu1 %v3606_v30, %s9126_s11  ;;  %3756 = vperm.xlu0 %8037, %v11980_v4  }
 0x5ad   : > { %3679 = vrot.lane.b32.xlu1 %v3608_v31, %s9126_s11  ;;  %3766 = vperm.xlu0 %8037, %v12009_v6  }
 0x5b1   : > { %3751 = vperm.xlu1 %8038, %v11926_v23   ;;  %3776 = vperm.xlu0 %8037, %v12039_v7   ;;  %v9127_v23 = vmov 1  }
 0x5b5   : > { %3761 = vperm.xlu1 %8038, %v11951_v0   ;;  %3786 = vperm.xlu0 %8037, %v12068_v45  }
 0x5b9   : > { %3771 = vperm.xlu1 %8038, %v11983_v18   ;;  %3796 = vperm.xlu0 %8037, %v3574_v60  }
 0x5bd   : > { %3781 = vperm.xlu1 %8038, %v12012_v37   ;;  %3806 = vperm.xlu0 %8037, %v3576_v58  }
 0x5c1   : > { %3791 = vperm.xlu1 %8038, %v12042_v15   ;;  %3816 = vperm.xlu0 %8037, %v3578_v19  }
 0x5c5   : > { %3801 = vperm.xlu1 %8038, %v12071_v3   ;;  %3826 = vperm.xlu0 %8037, %v3580_v24  }
 0x5c9   : > { %3811 = vperm.xlu1 %8038, %v12093_v57   ;;  %3836 = vperm.xlu0 %8037, %v3582_v48  }
 0x5cd   : > { %3821 = vperm.xlu1 %8038, %v3579_v32   ;;  %3846 = vperm.xlu0 %8037, %v3584_v25  }
 0x5d1   : > { %3831 = vperm.xlu1 %8038, %v3581_v54   ;;  %8040 = vset.pattern.permute.xlu0 %v9127_v23 }
 0x5d5   : > { %3841 = vperm.xlu1 %8038, %v3583_v42  }
 0x5d9   : > { %8039 = vset.pattern.permute.xlu1 %v9127_v23 }
 0x5f3   : > { %v12177_v0 = vpop.permute.xlu1 %3736 }
 0x5f4   : > { %v12179_v4 = vpop.permute.xlu0 %3731 }
 0x5f8   : > { %v12181_v18 = vpop.permute.xlu1 %3741  ;;  %v12183_v6 = vpop.permute.xlu0 %3746 }
 0x5fc   : > { %v3636_v37 = vpop.permute.xlu1 %3635  ;;  %v3634_v63 = vpop.permute.xlu0 %3633 }
 0x5fd   : > { %v3706_v28 = vsub.f32 %v11864_v53, %v3636_v37  ;;  %v3705_v7 = vsub.f32 %v11874_v10, %v3634_v63 }
 0x5ff   : > { %3904 = vperm.xlu0 %8040, %v3706_v28   ;;  %3899 = vperm.xlu1 %8039, %v3705_v7  }
 0x600   : > { %v3638_v15 = vpop.permute.xlu1 %3637  ;;  %v3642_v5 = vpop.permute.xlu0 %3641 }
 0x601   : > { %v3707_v45 = vsub.f32 %v11895_v61, %v3638_v15  ;;  %v3709_v3 = vsub.f32 %v11912_v49, %v3642_v5 }
 0x603   : > { %3909 = vperm.xlu1 %8039, %v3707_v45   ;;  %3919 = vperm.xlu0 %8040, %v3709_v3   ;;  %v9049_v3 = vld [vmem:[#allocation2 + $0x10] sm:$0xff] }
 0x604   : > { %v3640_v60 = vpop.permute.xlu1 %3639  ;;  %v3646_v57 = vpop.permute.xlu0 %3645 }
 0x605   : > { %v3708_v21 = vsub.f32 %v11888_v56, %v3640_v60  ;;  %v3711_v47 = vsub.f32 %v11936_v29, %v3646_v57  ;;  %v3851_v60 = vmul.f32 %v9049_v3, %v12177_v0  ;;  %v9050_v57 = vld [vmem:[#allocation2 + $0x18] sm:$0xff] }
 0x607   : > { %3914 = vperm.xlu1 %8039, %v3708_v21   ;;  %3929 = vperm.xlu0 %8040, %v3711_v47   ;;  %v3852_v21 = vmul.f32 %v9050_v57, %v12177_v0  ;;  %v9051_v47 = vld [vmem:[#allocation2] sm:$0xff]  ;;  %v9070_v57 = vld [vmem:[#allocation2 + $0x88] sm:$0xff] }
 0x608   : > { %v3644_v53 = vpop.permute.xlu1 %3643  ;;  %v3650_v10 = vpop.permute.xlu0 %3649 }
 0x609   : > { %v3710_v62 = vsub.f32 %v11961_v59, %v3644_v53  ;;  %v3713_v58 = vsub.f32 %v11966_v55, %v3650_v10  ;;  %v3849_v53 = vmul.f32 %v9051_v47, %v12179_v4  ;;  %v9071_v47 = vld [vmem:[#allocation2 + $0xd0] sm:$0xff] }
 0x60b   : > { %3924 = vperm.xlu1 %8039, %v3710_v62   ;;  %3939 = vperm.xlu0 %8040, %v3713_v58   ;;  %v9052_v58 = vld [vmem:[#allocation2 + $0x8] sm:$0xff] }
 0x60c   : > { %v3648_v61 = vpop.permute.xlu1 %3647  ;;  %v3654_v49 = vpop.permute.xlu0 %3653 }
 0x60d   : > { %v3712_v32 = vsub.f32 %v11990_v20, %v3648_v61  ;;  %v3715_v17 = vsub.f32 %v11995_v50, %v3654_v49  ;;  %v3850_v61 = vmul.f32 %v9052_v58, %v12179_v4  ;;  %v9053_v49 = vld [vmem:[#allocation2 + $0x20] sm:$0xff]  ;;  %v9058_v4 = vld [vmem:[#allocation2 + $0x58] sm:$0xff] }
 0x60f   : > { %3934 = vperm.xlu1 %8039, %v3712_v32   ;;  %3949 = vperm.xlu0 %8040, %v3715_v17   ;;  %v12242_v32 = vmul.f32 %v9053_v49, %v12181_v18  ;;  %v9054_v17 = vld [vmem:[#allocation2 + $0x28] sm:$0xff] }
 0x610   : > { %v3652_v56 = vpop.permute.xlu1 %3651  ;;  %v3658_v29 = vpop.permute.xlu0 %3657 }
 0x611   : > { %v3714_v52 = vsub.f32 %v12020_v1, %v3652_v56  ;;  %v3717_v2 = vsub.f32 %v12025_v33, %v3658_v29  ;;  %v12245_v56 = vmul.f32 %v9054_v17, %v12181_v18  ;;  %v9055_v29 = vld [vmem:[#allocation2 + $0x30] sm:$0xff]  ;;  %v9073_v17 = vld [vmem:[#allocation2 + $0xa0] sm:$0xff] }
 0x612   : > { %v12248_v0 = vmul.f32 %v9055_v29, %v12183_v6 }
 0x613   : > { %3944 = vperm.xlu1 %8039, %v3714_v52   ;;  %3959 = vperm.xlu0 %8040, %v3717_v2   ;;  %v9056_v52 = vld [vmem:[#allocation2 + $0x38] sm:$0xff] }
 0x614   : > { %v3656_v59 = vpop.permute.xlu1 %3655  ;;  %v3662_v55 = vpop.permute.xlu0 %3661  ;;  %v12251_v2 = vmul.f32 %v9056_v52, %v12183_v6  ;;  %v9064_v6 = vld [vmem:[#allocation2 + $0x98] sm:$0xff]  ;;  %v9074_v52 = vld [vmem:[#allocation2 + $0xa8] sm:$0xff] }
 0x615   : > { %v3716_v19 = vsub.f32 %v12052_v36, %v3656_v59  ;;  %v3719_v54 = vsub.f32 %v12057_v51, %v3662_v55  ;;  %v9057_v59 = vld [vmem:[#allocation2 + $0x50] sm:$0xff] }
 0x617   : > { %3954 = vperm.xlu1 %8039, %v3716_v19   ;;  %3969 = vperm.xlu0 %8040, %v3719_v54   ;;  %v9059_v54 = vld [vmem:[#allocation2 + $0x70] sm:$0xff] }
 0x618   : > { %v3660_v20 = vpop.permute.xlu1 %3659  ;;  %v3666_v50 = vpop.permute.xlu0 %3665 }
 0x619   : > { %v3718_v16 = vsub.f32 %v12078_v41, %v3660_v20  ;;  %v3721_v12 = vsub.f32 %v12083_v44, %v3666_v50  ;;  %v9060_v50 = vld [vmem:[#allocation2 + $0x78] sm:$0xff] }
 0x61b   : > { %3964 = vperm.xlu1 %8039, %v3718_v16   ;;  %3979 = vperm.xlu0 %8040, %v3721_v12   ;;  %v9061_v16 = vld [vmem:[#allocation2 + $0x40] sm:$0xff] }
 0x61c   : > { %v3664_v1 = vpop.permute.xlu1 %3663  ;;  %v3670_v33 = vpop.permute.xlu0 %3669 }
 0x61d   : > { %v3720_v13 = vsub.f32 %v12098_v26, %v3664_v1  ;;  %v3723_v27 = vsub.f32 %v12103_v11, %v3670_v33  ;;  %v9062_v1 = vld [vmem:[#allocation2 + $0x48] sm:$0xff] }
 0x61f   : > { %3974 = vperm.xlu1 %8039, %v3720_v13   ;;  %3989 = vperm.xlu0 %8040, %v3723_v27   ;;  %v9063_v13 = vld [vmem:[#allocation2 + $0x90] sm:$0xff] }
 0x620   : > { %v3668_v36 = vpop.permute.xlu1 %3667  ;;  %v3674_v51 = vpop.permute.xlu0 %3673 }
 0x621   : > { %v3722_v24 = vsub.f32 %v12115_v46, %v3668_v36  ;;  %v3725_v42 = vsub.f32 %v12120_v35, %v3674_v51  ;;  %v9065_v51 = vld [vmem:[#allocation2 + $0x60] sm:$0xff] }
 0x623   : > { %3984 = vperm.xlu1 %8039, %v3722_v24   ;;  %3999 = vperm.xlu0 %8040, %v3725_v42   ;;  %v9066_v42 = vld [vmem:[#allocation2 + $0x68] sm:$0xff] }
 0x624   : > { %v3672_v41 = vpop.permute.xlu1 %3671  ;;  %v3678_v44 = vpop.permute.xlu0 %3677 }
 0x625   : > { %v3724_v43 = vsub.f32 %v12131_v9, %v3672_v41  ;;  %v3727_v8 = vsub.f32 %v12136_v39, %v3678_v44  ;;  %v9067_v44 = vld [vmem:[#allocation2 + $0xb0] sm:$0xff] }
 0x627   : > { %3994 = vperm.xlu1 %8039, %v3724_v43   ;;  %4009 = vperm.xlu0 %8040, %v3727_v8  }
 0x628   : > { %v3676_v26 = vpop.permute.xlu1 %3675  ;;  %v3757_v46 = vpop.permute.xlu0 %3756 }
 0x629   : > { %v3726_v11 = vsub.f32 %v12147_v34, %v3676_v26  ;;  %v12253_v55 = vmul.f32 %v9057_v59, %v3757_v46  ;;  %v12255_v19 = vmul.f32 %v9058_v4, %v3757_v46  ;;  %v9075_v59 = vld [vmem:[#allocation2 + $0xf0] sm:$0xff] }
 0x62b   : > { %4004 = vperm.xlu1 %8039, %v3726_v11  }
 0x62c   : > { %v3680_v14 = vpop.permute.xlu1 %3679  ;;  %v3767_v38 = vpop.permute.xlu0 %3766 }
 0x62d   : > { %v3728_v48 = vsub.f32 %v12157_v22, %v3680_v14  ;;  %v12257_v20 = vmul.f32 %v9059_v54, %v3767_v38  ;;  %v12259_v18 = vmul.f32 %v9060_v50, %v3767_v38 }
 0x62f   : > { %4014 = vperm.xlu1 %8039, %v3728_v48  }
 0x630   : > { %v3752_v35 = vpop.permute.xlu1 %3751  ;;  %v3777_v25 = vpop.permute.xlu0 %3776 }
 0x631   : > { %v3857_v12 = vmul.f32 %v9061_v16, %v3752_v35  ;;  %v3858_v33 = vmul.f32 %v9062_v1, %v3752_v35  ;;  %v12261_v27 = vmul.f32 %v9063_v13, %v3777_v25  ;;  %v12263_v36 = vmul.f32 %v9064_v6, %v3777_v25  ;;  %v9068_v35 = vld [vmem:[#allocation2 + $0xb8] sm:$0xff]  ;;  %v9069_v25 = vld [vmem:[#allocation2 + $0x80] sm:$0xff] }
 0x632   : > { %v14501_v1 = vld [vmem:[#allocation13_spill] sm:$0xff] }
 0x634   : > { %v3762_v30 = vpop.permute.xlu1 %3761  ;;  %v3787_v9 = vpop.permute.xlu0 %3786 }
 0x635   : > { %v12265_v24 = vmul.f32 %v9065_v51, %v3762_v30  ;;  %v12267_v41 = vmul.f32 %v9066_v42, %v3762_v30  ;;  %v12269_v43 = vmul.f32 %v9067_v44, %v3787_v9  ;;  %v12271_v38 = vmul.f32 %v9068_v35, %v3787_v9  ;;  %v9076_v51 = vld [vmem:[#allocation2 + $0xf8] sm:$0xff]  ;;  %v9077_v42 = vld [vmem:[#allocation2 + $0xc0] sm:$0xff] }
 0x638   : > { %v12209_v31 = vpop.permute.xlu1 %3771  ;;  %v12213_v39 = vpop.permute.xlu0 %3796 }
 0x639   : > { %v12274_v3 = vmul.f32 %v9069_v25, %v12209_v31  ;;  %v12277_v30 = vmul.f32 %v9070_v57, %v12209_v31  ;;  %v12280_v58 = vmul.f32 %v9071_v47, %v12213_v39  ;;  %v9080_v57 = vld [vmem:[#allocation2 + $0x118] sm:$0xff] }
 0x63c   : > { %v12211_v23 = vpop.permute.xlu1 %3781  ;;  %v12217_v34 = vpop.permute.xlu0 %3806 }
 0x63d   : > { %v12286_v29 = vmul.f32 %v9073_v17, %v12211_v23  ;;  %v12289_v31 = vmul.f32 %v9074_v52, %v12211_v23  ;;  %v12292_v4 = vmul.f32 %v9075_v59, %v12217_v34  ;;  %v12303_v23 = vmul.f32 %v9076_v51, %v12217_v34  ;;  %v9079_v34 = vld [vmem:[#allocation2 + $0x110] sm:$0xff]  ;;  %v9081_v17 = vld [vmem:[#allocation2 + $0xe0] sm:$0xff]  ;;  %v9082_v59 = vld [vmem:[#allocation2 + $0xe8] sm:$0xff] }
 0x640   : > { %v12215_v37 = vpop.permute.xlu1 %3791  ;;  %v12221_v22 = vpop.permute.xlu0 %3816 }
 0x641   : > { %v12306_v44 = vmul.f32 %v9077_v42, %v12215_v37  ;;  %v12318_v25 = vmul.f32 %v9079_v34, %v12221_v22  ;;  %v12321_v47 = vmul.f32 %v9080_v57, %v12221_v22  ;;  %v9083_v22 = vld [vmem:[#allocation2 + $0x130] sm:$0xff]  ;;  %v9086_v42 = vld [vmem:[#allocation2 + $0x108] sm:$0xff] }
 0x644   : > { %v12219_v63 = vpop.permute.xlu1 %3801  ;;  %v12225_v7 = vpop.permute.xlu0 %3826 }
 0x645   : > { %v12326_v52 = vmul.f32 %v9081_v17, %v12219_v63 }
 0x648   : > { %v12223_v28 = vpop.permute.xlu1 %3811  ;;  %v12229_v5 = vpop.permute.xlu0 %3836 }
 0x64c   : > { %v12227_v15 = vpop.permute.xlu1 %3821  ;;  %v12236_v10 = vpop.permute.xlu0 %3846 }
 0x650   : > { %v12231_v45 = vpop.permute.xlu1 %3831 }
 0x654   : > { %v12238_v62 = vpop.permute.xlu1 %3841 }
 0x67e   : > { %v3900_v8 = vpop.permute.xlu1 %3899  ;;  %v3905_v26 = vpop.permute.xlu0 %3904 }
 0x67f   : > { %v4017_v11 = vadd.f32 %v3900_v8, %v3849_v53  ;;  %v4018_v14 = vadd.f32 %v3900_v8, %v3850_v61  ;;  %v4019_v48 = vadd.f32 %v3905_v26, %v3851_v60  ;;  %v4020_v46 = vadd.f32 %v3905_v26, %v3852_v21  ;;  %v9072_v21 = vld [vmem:[#allocation2 + $0xd8] sm:$0xff] }
 0x680   : > { %v12283_v9 = vmul.f32 %v9072_v21, %v12213_v39 }
 0x681   : > { %v4065_v49 = vmax.f32 %v4017_v11, 0.0  ;;  %v4066_v53 = vmax.f32 %v4018_v14, 0.0  ;;  %v4067_v61 = vmax.f32 %v4019_v48, 0.0  ;;  %v4068_v60 = vmax.f32 %v4020_v46, 0.0  ;;  %v9078_v11 = vld [vmem:[#allocation2 + $0xc8] sm:$0xff] }
 0x682   : > { %v3910_v54 = vpop.permute.xlu1 %3909  ;;  %v3920_v50 = vpop.permute.xlu0 %3919  ;;  %v12311_v14 = vmul.f32 %v9078_v11, %v12215_v37 }
 0x683   : > { %v4113_v16 = vmul.f32 %v4065_v49, %v10937_v40  ;;  %v12296_v13 = vmul.f32 %v4066_v53, %v14501_v1  ;;  %v4115_v39 = vmul.f32 %v4067_v61, %v10937_v40  ;;  %v12300_v6 = vmul.f32 %v4068_v60, %v14501_v1 }
 0x684   : > { %v4021_v8 = vadd.f32 %v3910_v54, %v12242_v32  ;;  %v4022_v26 = vadd.f32 %v3910_v54, %v12245_v56  ;;  %v4025_v32 = vadd.f32 %v3920_v50, %v3857_v12  ;;  %v4026_v56 = vadd.f32 %v3920_v50, %v3858_v33 }
 0x685   : > { %v7374_v48 = vpack.c.bf16 %v12300_v6, %v12296_v13  ;;  %v12315_v46 = vpack.i.bf16 %v4115_v39, %v4113_v16  ;;  %v7376_v35 = vpack.c.bf16 %v4115_v39, %v4113_v16  ;;  %v12329_v54 = vmul.f32 %v9082_v59, %v12219_v63  ;;  %v9085_v63 = vld [vmem:[#allocation2 + $0x100] sm:$0xff] }
 0x686   : > { %v3915_v49 = vpop.permute.xlu1 %3914  ;;  %v3930_v53 = vpop.permute.xlu0 %3929  ;;  %v4069_v37 = vmax.f32 %v4021_v8, 0.0  ;;  %v4070_v61 = vmax.f32 %v4022_v26, 0.0  ;;  %v12332_v12 = vmul.f32 %v9083_v22, %v12225_v7  ;;  %v12342_v51 = vmul.f32 %v9085_v63, %v12223_v28 }
 0x687   : > { %v4023_v60 = vadd.f32 %v3915_v49, %v12248_v0  ;;  %v4024_v21 = vadd.f32 %v3915_v49, %v12251_v2  ;;  %7375 = vmatprep.subr.bf16.mxu0 %v7374_v48  ;;  %v4029_v33 = vadd.f32 %v3930_v53, %v12265_v24  ;;  %8042 = vrot.lane.b32.xlu0 %v12315_v46, %s9128_s30  ;;  %v9084_v0 = vld [vmem:[#allocation2 + $0x138] sm:$0xff]  ;;  %v4073_v8 = vmax.f32 %v4025_v32, 0.0 }
 0x688   : > { %v12338_v2 = vmul.f32 %v9084_v0, %v12225_v7  ;;  %v4030_v39 = vadd.f32 %v3930_v53, %v12267_v41  ;;  %7377 = vmatpush1.bf16.msra.mxu0 %v7376_v35  ;;  %v12345_v24 = vmul.f32 %v9086_v42, %v12223_v28  ;;  %v4074_v26 = vmax.f32 %v4026_v56, 0.0 }
 0x689   : > { %v4071_v50 = vmax.f32 %v4023_v60, 0.0  ;;  %v4072_v16 = vmax.f32 %v4024_v21, 0.0  ;;  %v4117_v7 = vmul.f32 %v4069_v37, %v10937_v40  ;;  %v12349_v34 = vmul.f32 %v4070_v61, %v14501_v1  ;;  %v9087_v60 = vld [vmem:[#allocation2 + $0x150] sm:$0xff] }
 0x68a   : > { %v3925_v11 = vpop.permute.xlu1 %3924  ;;  %v3940_v48 = vpop.permute.xlu0 %3939  ;;  %v4077_v57 = vmax.f32 %v4029_v33, 0.0  ;;  %v4078_v56 = vmax.f32 %v4030_v39, 0.0  ;;  %v12363_v21 = vmul.f32 %v9087_v60, %v12229_v5  ;;  %v4121_v0 = vmul.f32 %v4073_v8, %v10937_v40 }
 0x68b   : > { %v4119_v41 = vmul.f32 %v4071_v50, %v10937_v40  ;;  %v12353_v35 = vmul.f32 %v4072_v16, %v14501_v1  ;;  %v4027_v49 = vadd.f32 %v3925_v11, %v12253_v55  ;;  %v4028_v28 = vadd.f32 %v3925_v11, %v12255_v19  ;;  %v9088_v19 = vld [vmem:[#allocation2 + $0x158] sm:$0xff] }
 0x68c   : > { %v4033_v32 = vadd.f32 %v3940_v48, %v12274_v3  ;;  %v4034_v22 = vadd.f32 %v3940_v48, %v12277_v30  ;;  %v12367_v3 = vmul.f32 %v9088_v19, %v12229_v5  ;;  %v12375_v39 = vmul.f32 %v4074_v26, %v14501_v1 }
 0x68d   : > { %v12358_v53 = vpack.i.bf16 %v4119_v41, %v4117_v7  ;;  %v7378_v37 = vpack.c.bf16 %v12353_v35, %v12349_v34  ;;  %v7380_v61 = vpack.c.bf16 %v4119_v41, %v4117_v7  ;;  %v4075_v17 = vmax.f32 %v4027_v49, 0.0 }
 0x68e   : > { %v4076_v59 = vmax.f32 %v4028_v28, 0.0  ;;  %v3935_v55 = vpop.permute.xlu1 %3934  ;;  %v3950_v33 = vpop.permute.xlu0 %3949  ;;  %v4081_v42 = vmax.f32 %v4033_v32, 0.0  ;;  %v4125_v5 = vmul.f32 %v4077_v57, %v10937_v40  ;;  %v12383_v8 = vmul.f32 %v4078_v56, %v14501_v1 }
 0x68f   : > { %v4031_v50 = vadd.f32 %v3935_v55, %v12257_v20  ;;  %v4032_v16 = vadd.f32 %v3935_v55, %v12259_v18  ;;  %8047 = vrot.lane.b32.xlu1 %v12358_v53, %s9128_s30  ;;  %v4123_v30 = vmul.f32 %v4075_v17, %v10937_v40  ;;  %7379 = vmatprep.subr.bf16.mxu0 %v7378_v37  ;;  %v4082_v11 = vmax.f32 %v4034_v22, 0.0  ;;  %v9089_v37 = vld [vmem:[#allocation2 + $0x120] sm:$0xff] }
 0x690   : > { %v12379_v63 = vmul.f32 %v4076_v59, %v14501_v1  ;;  %7381 = vmatpush1.bf16.msra.mxu0 %v7380_v61  ;;  %v4037_v57 = vadd.f32 %v3950_v33, %v12286_v29  ;;  %v4038_v56 = vadd.f32 %v3950_v33, %v12289_v31  ;;  %v12396_v61 = vmul.f32 %v9089_v37, %v12227_v15 }
 0x691   : > { %v4079_v20 = vmax.f32 %v4031_v50, 0.0  ;;  %v4080_v18 = vmax.f32 %v4032_v16, 0.0  ;;  %v12387_v41 = vpack.i.bf16 %v4123_v30, %v4121_v0  ;;  %v7384_v49 = vpack.c.bf16 %v4123_v30, %v4121_v0 }
 0x692   : > { %v3945_v48 = vpop.permute.xlu1 %3944  ;;  %v3960_v7 = vpop.permute.xlu0 %3959  ;;  %v7382_v26 = vpack.c.bf16 %v12379_v63, %v12375_v39  ;;  %v4129_v60 = vmul.f32 %v4081_v42, %v10937_v40  ;;  %v12408_v55 = vmul.f32 %v4082_v11, %v14501_v1  ;;  %v4085_v50 = vmax.f32 %v4037_v57, 0.0 }
 0x693   : > { %v4127_v28 = vmul.f32 %v4079_v20, %v10937_v40  ;;  %v12391_v32 = vmul.f32 %v4080_v18, %v14501_v1  ;;  %v4035_v17 = vadd.f32 %v3945_v48, %v12261_v27  ;;  %v4036_v59 = vadd.f32 %v3945_v48, %v12263_v36  ;;  %8052 = vrot.lane.b32.xlu0 %v12387_v41, %s9128_s30 }
 0x694   : > { %7383 = vmatprep.subr.bf16.mxu0 %v7382_v26  ;;  %v4041_v27 = vadd.f32 %v3960_v7, %v12306_v44  ;;  %v4086_v16 = vmax.f32 %v4038_v56, 0.0  ;;  %v4042_v18 = vadd.f32 %v3960_v7, %v12311_v14  ;;  %v9090_v44 = vld [vmem:[#allocation2 + $0x128] sm:$0xff]  ;;  %v4133_v7 = vmul.f32 %v4085_v50, %v10937_v40 }
 0x695   : > { %7385 = vmatpush1.bf16.msra.mxu0 %v7384_v49  ;;  %v7386_v29 = vpack.c.bf16 %v12391_v32, %v12383_v8  ;;  %v12405_v22 = vpack.i.bf16 %v4127_v28, %v4125_v5  ;;  %v7388_v31 = vpack.c.bf16 %v4127_v28, %v4125_v5  ;;  %v4083_v33 = vmax.f32 %v4035_v17, 0.0 }
 0x696   : > { %v4084_v19 = vmax.f32 %v4036_v59, 0.0  ;;  %v3955_v0 = vpop.permute.xlu1 %3954  ;;  %v3970_v36 = vpop.permute.xlu0 %3969  ;;  %v3886_v48 = vmul.f32 %v9090_v44, %v12227_v15  ;;  %v4089_v49 = vmax.f32 %v4041_v27, 0.0  ;;  %v12429_v37 = vmul.f32 %v4086_v16, %v14501_v1 }
 0x697   : > { %v4039_v30 = vadd.f32 %v3955_v0, %v12269_v43  ;;  %v4040_v42 = vadd.f32 %v3955_v0, %v12271_v38  ;;  %7387 = vmatprep.subr.bf16.mxu0 %v7386_v29  ;;  %v4131_v20 = vmul.f32 %v4083_v33, %v10937_v40  ;;  %v4045_v11 = vadd.f32 %v3970_v36, %v12326_v52  ;;  %v9091_v0 = vld [vmem:[#allocation2 + $0x170] sm:$0xff] }
 0x698   : > { %v12415_v5 = vmul.f32 %v4084_v19, %v14501_v1  ;;  %8057 = vrot.lane.b32.xlu1 %v12405_v22, %s9128_s30  ;;  %v4046_v38 = vadd.f32 %v3970_v36, %v12329_v54  ;;  %v4090_v54 = vmax.f32 %v4042_v18, 0.0  ;;  %v12444_v36 = vmul.f32 %v9091_v0, %v12236_v10 }
 0x699   : > { %v4087_v26 = vmax.f32 %v4039_v30, 0.0  ;;  %v4088_v43 = vmax.f32 %v4040_v42, 0.0  ;;  %7389 = vmatpush1.bf16.msra.mxu0 %v7388_v31  ;;  %v12425_v14 = vpack.i.bf16 %v4131_v20, %v4129_v60  ;;  %v7392_v52 = vpack.c.bf16 %v4131_v20, %v4129_v60 }
 0x69a   : > { %v3965_v28 = vpop.permute.xlu1 %3964  ;;  %v3980_v57 = vpop.permute.xlu0 %3979  ;;  %v7390_v56 = vpack.c.bf16 %v12415_v5, %v12408_v55  ;;  %v4093_v59 = vmax.f32 %v4045_v11, 0.0  ;;  %v4094_v33 = vmax.f32 %v4046_v38, 0.0  ;;  %v12452_v44 = vmul.f32 %v4090_v54, %v14501_v1 }
 0x69b   : > { %v4135_v15 = vmul.f32 %v4087_v26, %v10937_v40  ;;  %v12433_v17 = vmul.f32 %v4088_v43, %v14501_v1  ;;  %v4043_v29 = vadd.f32 %v3965_v28, %v12280_v58  ;;  %v4044_v31 = vadd.f32 %v3965_v28, %v12283_v9  ;;  %8062 = vrot.lane.b32.xlu0 %v12425_v14, %s9128_s30 }
 0x69c   : > { %7391 = vmatprep.subr.bf16.mxu0 %v7390_v56  ;;  %v4137_v58 = vmul.f32 %v4089_v49, %v10937_v40  ;;  %v4049_v42 = vadd.f32 %v3980_v57, %v12342_v51  ;;  %v4050_v20 = vadd.f32 %v3980_v57, %v12345_v24  ;;  %v4141_v26 = vmul.f32 %v4093_v59, %v10937_v40 }
 0x69d   : > { %7393 = vmatpush1.bf16.msra.mxu0 %v7392_v52  ;;  %v7394_v60 = vpack.c.bf16 %v12433_v17, %v12429_v37  ;;  %v12441_v19 = vpack.i.bf16 %v4135_v15, %v4133_v7  ;;  %v7396_v27 = vpack.c.bf16 %v4135_v15, %v4133_v7  ;;  %v4091_v50 = vmax.f32 %v4043_v29, 0.0 }
 0x69e   : > { %v4092_v9 = vmax.f32 %v4044_v31, 0.0  ;;  %v3975_v16 = vpop.permute.xlu1 %3974  ;;  %v3990_v30 = vpop.permute.xlu0 %3989  ;;  %v12462_v51 = vmul.f32 %v4094_v33, %v14501_v1  ;;  %v4097_v15 = vmax.f32 %v4049_v42, 0.0  ;;  %v4098_v54 = vmax.f32 %v4050_v20, 0.0  ;;  %v9092_v31 = vld [vmem:[#allocation2 + $0x140] sm:$0xff]  ;;  %v9093_v33 = vld [vmem:[#allocation2 + $0x148] sm:$0xff] }
 0x69f   : > { %v4047_v18 = vadd.f32 %v3975_v16, %v12292_v4  ;;  %v4048_v11 = vadd.f32 %v3975_v16, %v12303_v23  ;;  %7395 = vmatprep.subr.bf16.mxu0 %v7394_v60  ;;  %v4139_v43 = vmul.f32 %v4091_v50, %v10937_v40  ;;  %8067 = vrot.lane.b32.xlu1 %v12441_v19, %s9128_s30  ;;  %v9094_v16 = vld [vmem:[#allocation2 + $0x160] sm:$0xff] }
 0x6a0   : > { %v12457_v38 = vmul.f32 %v4092_v9, %v14501_v1  ;;  %v4053_v23 = vadd.f32 %v3990_v30, %v12396_v61  ;;  %v4054_v49 = vadd.f32 %v3990_v30, %v3886_v48  ;;  %v3889_v61 = vmul.f32 %v9092_v31, %v12231_v45 }
 0x6a1   : > { %v4095_v4 = vmax.f32 %v4047_v18, 0.0  ;;  %v4096_v24 = vmax.f32 %v4048_v11, 0.0  ;;  %7397 = vmatpush1.bf16.msra.mxu0 %v7396_v27  ;;  %v12467_v52 = vpack.i.bf16 %v4139_v43, %v4137_v58  ;;  %v7400_v7 = vpack.c.bf16 %v4139_v43, %v4137_v58 }
 0x6a2   : > { %v3985_v28 = vpop.permute.xlu1 %3984  ;;  %v4000_v57 = vpop.permute.xlu0 %3999  ;;  %v7398_v56 = vpack.c.bf16 %v12457_v38, %v12452_v44  ;;  %v3890_v48 = vmul.f32 %v9093_v33, %v12231_v45  ;;  %v4101_v0 = vmax.f32 %v4053_v23, 0.0  ;;  %v3893_v30 = vmul.f32 %v9094_v16, %v12238_v62 }
 0x6a3   : > { %v4143_v59 = vmul.f32 %v4095_v4, %v10937_v40  ;;  %v12471_v29 = vmul.f32 %v4096_v24, %v14501_v1  ;;  %v4051_v60 = vadd.f32 %v3985_v28, %v12318_v25  ;;  %v4052_v27 = vadd.f32 %v3985_v28, %v12321_v47  ;;  %8072 = vrot.lane.b32.xlu0 %v12467_v52, %s9128_s30  ;;  %v9095_v28 = vld [vmem:[#allocation2 + $0x168] sm:$0xff] }
 0x6a4   : > { %7399 = vmatprep.subr.bf16.mxu0 %v7398_v56  ;;  %v4102_v45 = vmax.f32 %v4054_v49, 0.0  ;;  %v4145_v47 = vmul.f32 %v4097_v15, %v10937_v40  ;;  %v12486_v18 = vmul.f32 %v4098_v54, %v14501_v1  ;;  %v4057_v24 = vadd.f32 %v4000_v57, %v3889_v61 }
 0x6a5   : > { %7401 = vmatpush1.bf16.msra.mxu0 %v7400_v7  ;;  %v7402_v58 = vpack.c.bf16 %v12471_v29, %v12462_v51  ;;  %v12481_v50 = vpack.i.bf16 %v4143_v59, %v4141_v26  ;;  %v7404_v9 = vpack.c.bf16 %v4143_v59, %v4141_v26  ;;  %v4099_v42 = vmax.f32 %v4051_v60, 0.0 }
 0x6a6   : > { %v4100_v25 = vmax.f32 %v4052_v27, 0.0  ;;  %v3995_v20 = vpop.permute.xlu1 %3994  ;;  %v4058_v23 = vadd.f32 %v4000_v57, %v3890_v48  ;;  %v4010_v49 = vpop.permute.xlu0 %4009  ;;  %v3894_v56 = vmul.f32 %v9095_v28, %v12238_v62  ;;  %v4149_v7 = vmul.f32 %v4101_v0, %v10937_v40 }
 0x6a7   : > { %v4055_v11 = vadd.f32 %v3995_v20, %v12332_v12  ;;  %v4056_v43 = vadd.f32 %v3995_v20, %v12338_v2  ;;  %7403 = vmatprep.subr.bf16.mxu0 %v7402_v58  ;;  %v4147_v4 = vmul.f32 %v4099_v42, %v10937_v40  ;;  %8077 = vrot.lane.b32.xlu1 %v12481_v50, %s9128_s30  ;;  %v4105_v60 = vmax.f32 %v4057_v24, 0.0 }
 0x6a8   : > { %v12492_v26 = vmul.f32 %v4100_v25, %v14501_v1  ;;  %v4150_v2 = vmul.f32 %v4102_v45, %v14501_v1  ;;  %v4061_v48 = vadd.f32 %v4010_v49, %v3893_v30  ;;  %v4062_v62 = vadd.f32 %v4010_v49, %v3894_v56 }
 0x6a9   : > { %v4103_v12 = vmax.f32 %v4055_v11, 0.0  ;;  %v4104_v15 = vmax.f32 %v4056_v43, 0.0  ;;  %7405 = vmatpush1.bf16.msra.mxu0 %v7404_v9  ;;  %v12501_v31 = vpack.i.bf16 %v4147_v4, %v4145_v47  ;;  %v7408_v57 = vpack.c.bf16 %v4147_v4, %v4145_v47  ;;  %v9096_v9 = vld [vmem:[#allocation2 + $0x178] sm:$0xff] }
 0x6aa   : > { %v4005_v54 = vpop.permute.xlu1 %4004  ;;  %v7406_v59 = vpack.c.bf16 %v12492_v26, %v12486_v18  ;;  %v4106_v27 = vmax.f32 %v4058_v23, 0.0  ;;  %v3896_v16 = vmul.f32 %v9096_v9, %v12236_v10  ;;  %v4109_v11 = vmax.f32 %v4061_v48, 0.0 }
 0x6ab   : > { %v4151_v61 = vmul.f32 %v4103_v12, %v10937_v40  ;;  %v4152_v33 = vmul.f32 %v4104_v15, %v14501_v1  ;;  %v4059_v0 = vadd.f32 %v4005_v54, %v12363_v21  ;;  %v4060_v58 = vadd.f32 %v4005_v54, %v12367_v3  ;;  %8082 = vrot.lane.b32.xlu0 %v12501_v31, %s9128_s30 }
 0x6ac   : > { %7407 = vmatprep.subr.bf16.mxu0 %v7406_v59  ;;  %v4110_v43 = vmax.f32 %v4062_v62, 0.0  ;;  %v4153_v4 = vmul.f32 %v4105_v60, %v10937_v40  ;;  %v4154_v10 = vmul.f32 %v4106_v27, %v14501_v1  ;;  %v4157_v12 = vmul.f32 %v4109_v11, %v10937_v40 }
 0x6ad   : > { %7409 = vmatpush1.bf16.msra.mxu0 %v7408_v57  ;;  %v7410_v45 = vpack.c.bf16 %v4152_v33, %v4150_v2  ;;  %v12510_v42 = vpack.i.bf16 %v4151_v61, %v4149_v7  ;;  %v7412_v25 = vpack.c.bf16 %v4151_v61, %v4149_v7  ;;  %v4107_v30 = vmax.f32 %v4059_v0, 0.0 }
 0x6ae   : > { %v4108_v20 = vmax.f32 %v4060_v58, 0.0  ;;  %v4015_v47 = vpop.permute.xlu1 %4014  ;;  %v4158_v15 = vmul.f32 %v4110_v43, %v14501_v1  ;;  %v12531_v62 = vpack.i.bf16 %v12300_v6, %v12296_v13  ;;  %v12535_v60 = vpack.i.bf16 %v12415_v5, %v12408_v55  ;;  %v14502_v58 = vld [vmem:[#allocation8_spill] sm:$0xff] }
 0x6af   : > { %v4063_v21 = vadd.f32 %v4015_v47, %v12444_v36  ;;  %v4064_v3 = vadd.f32 %v4015_v47, %v3896_v16  ;;  %7411 = vmatprep.subr.bf16.mxu0 %v7410_v45  ;;  %8087 = vrot.lane.b32.xlu1 %v12510_v42, %s9128_s30  ;;  %v4155_v24 = vmul.f32 %v4107_v30, %v10937_v40  ;;  %vm4257_vm14 = vcmp.lt.s32.totalorder %v14502_v58, 17 }
 0x6b0   : > { %v4156_v23 = vmul.f32 %v4108_v20, %v14501_v1  ;;  %v12551_v13 = vpack.i.bf16 %v12492_v26, %v12486_v18  ;;  %v12555_v6 = vpack.i.bf16 %v12471_v29, %v12462_v51  ;;  %v12559_v5 = vpack.i.bf16 %v4152_v33, %v4150_v2 }
 0x6b1   : > { %v4111_v49 = vmax.f32 %v4063_v21, 0.0  ;;  %v4112_v28 = vmax.f32 %v4064_v3, 0.0  ;;  %7413 = vmatpush1.bf16.msra.mxu0 %v7412_v25  ;;  %v12519_v7 = vpack.i.bf16 %v4155_v24, %v4153_v4  ;;  %v7416_v36 = vpack.c.bf16 %v4155_v24, %v4153_v4 }
 0x6b2   : > { %v7414_v56 = vpack.c.bf16 %v4156_v23, %v4154_v10  ;;  %v12557_v55 = vpack.i.bf16 %v4156_v23, %v4154_v10  ;;  %vm4450_vm15 = vcmp.lt.s32.totalorder %v14502_v58, 16  ;;  %vm4643_vm0 = vcmp.lt.s32.totalorder %v14502_v58, 15 }
 0x6b3   : > { %v4159_v54 = vmul.f32 %v4111_v49, %v10937_v40  ;;  %v4160_v59 = vmul.f32 %v4112_v28, %v14501_v1  ;;  %8092 = vrot.lane.b32.xlu0 %v12519_v7, %s9128_s30  ;;  %v12541_v40 = vpack.i.bf16 %v12457_v38, %v12452_v44  ;;  %v12545_v1 = vpack.i.bf16 %v12433_v17, %v12429_v37 }
 0x6b4   : > { %7415 = vmatprep.subr.bf16.mxu0 %v7414_v56  ;;  %v12563_v37 = vpack.i.bf16 %v12353_v35, %v12349_v34  ;;  %v12569_v44 = vpack.i.bf16 %v12379_v63, %v12375_v39  ;;  %v12577_v38 = vpack.i.bf16 %v12391_v32, %v12383_v8  ;;  %v5754_v34 = vld [vmem:[%s14227_s4 + $0x8] sm:$0xff]  ;;  %vm5077_vm1 = vcmp.lt.s32.totalorder %v14502_v58, 127 }
 0x6b5   : > { %7417 = vmatpush1.bf16.msra.mxu0 %v7416_v36  ;;  %v7418_v57 = vpack.c.bf16 %v4160_v59, %v4158_v15  ;;  %v12527_v61 = vpack.i.bf16 %v4159_v54, %v4157_v12  ;;  %v7420_v48 = vpack.c.bf16 %v4159_v54, %v4157_v12  ;;  %v12565_v17 = vpack.i.bf16 %v4160_v59, %v4158_v15 }
 0x6b6   : > { %6352 = vmatprep.mubr.f32.mxu1 %v5754_v34  ;;  %vm5270_vm2 = vcmp.lt.s32.totalorder %v14502_v58, 113  ;;  %vm4836_vm3 = vcmp.lt.s32.totalorder %v14502_v58, 1  ;;  %vm5463_vm4 = vcmp.lt.s32.totalorder %v14502_v58, 112  ;;  %vm5656_vm5 = vcmp.lt.s32.totalorder %v14502_v58, 111  ;;  %v5822_v58 = vld [vmem:[%s14227_s4 + $0x228] sm:$0xff] }
 0x6b7   : > { %7419 = vmatprep.subr.bf16.mxu0 %v7418_v57  ;;  %8097 = vrot.lane.b32.xlu1 %v12527_v61, %s9128_s30 }
 0x6b8   : > { %8102 = vrot.lane.b32.xlu0 %v12531_v62, %s9128_s30 }
 0x6b9   : > { %7421 = vmatpush1.bf16.msra.mxu0 %v7420_v48 }
 0x6bb   : > { %8107 = vrot.lane.b32.xlu1 %v12563_v37, %s9128_s30 }
 0x6bc   : > { %8112 = vrot.lane.b32.xlu0 %v12569_v44, %s9128_s30 }
 0x6bf   : > { %8117 = vrot.lane.b32.xlu1 %v12577_v38, %s9128_s30 }
 0x6c0   : > { %8122 = vrot.lane.b32.xlu0 %v12535_v60, %s9128_s30 }
 0x6c3   : > { %8127 = vrot.lane.b32.xlu1 %v12545_v1, %s9128_s30 }
 0x6c4   : > { %8132 = vrot.lane.b32.xlu0 %v12541_v40, %s9128_s30 }
 0x6c7   : > { %8137 = vrot.lane.b32.xlu1 %v12555_v6, %s9128_s30 }
 0x6c8   : > { %8142 = vrot.lane.b32.xlu0 %v12551_v13, %s9128_s30 }
 0x6cb   : > { %8147 = vrot.lane.b32.xlu1 %v12559_v5, %s9128_s30 }
 0x6cc   : > { %8152 = vrot.lane.b32.xlu0 %v12557_v55, %s9128_s30 }
 0x6cf   : > { %8157 = vrot.lane.b32.xlu1 %v12565_v17, %s9128_s30 }
 0x6d0   : > { %8162 = vrot.lane.b32.xlu0 %v12315_v46, %s9129_s6 }
 0x6d3   : > { %8167 = vrot.lane.b32.xlu1 %v12358_v53, %s9129_s6 }
 0x6d4   : > { %8172 = vrot.lane.b32.xlu0 %v12387_v41, %s9129_s6 }
 0x6d7   : > { %8177 = vrot.lane.b32.xlu1 %v12405_v22, %s9129_s6 }
 0x6d8   : > { %8182 = vrot.lane.b32.xlu0 %v12425_v14, %s9129_s6 }
 0x6db   : > { %8187 = vrot.lane.b32.xlu1 %v12441_v19, %s9129_s6 }
 0x6dc   : > { %8192 = vrot.lane.b32.xlu0 %v12467_v52, %s9129_s6 }
 0x6df   : > { %8197 = vrot.lane.b32.xlu1 %v12481_v50, %s9129_s6 }
 0x6e0   : > { %8202 = vrot.lane.b32.xlu0 %v12501_v31, %s9129_s6 }
 0x6e3   : > { %8207 = vrot.lane.b32.xlu1 %v12510_v42, %s9129_s6 }
 0x6e4   : > { %8212 = vrot.lane.b32.xlu0 %v12519_v7, %s9129_s6 }
 0x6e7   : > { %8217 = vrot.lane.b32.xlu1 %v12527_v61, %s9129_s6 }
 0x6e8   : > { %8222 = vrot.lane.b32.xlu0 %v12531_v62, %s9129_s6 }
 0x6eb   : > { %8227 = vrot.lane.b32.xlu1 %v12563_v37, %s9129_s6 }
 0x6ec   : > { %8232 = vrot.lane.b32.xlu0 %v12569_v44, %s9129_s6 }
 0x6ef   : > { %8237 = vrot.lane.b32.xlu1 %v12577_v38, %s9129_s6 }
 0x6f0   : > { %8242 = vrot.lane.b32.xlu0 %v12535_v60, %s9129_s6 }
 0x6f3   : > { %8247 = vrot.lane.b32.xlu1 %v12545_v1, %s9129_s6 }
 0x6f4   : > { %8252 = vrot.lane.b32.xlu0 %v12541_v40, %s9129_s6 }
 0x6f7   : > { %8257 = vrot.lane.b32.xlu1 %v12555_v6, %s9129_s6 }
 0x6f8   : > { %8262 = vrot.lane.b32.xlu0 %v12551_v13, %s9129_s6 }
 0x6f9   : > { %v8043_v35 = vpop.permute.xlu0 %8042 }
 0x6fa   : > { %v8045_v9 = vunpack.i.h.bf16 %v8043_v35  ;;  %v8044_v16 = vunpack.i.l.bf16 %v8043_v35 }
 0x6fb   : > { %8267 = vrot.lane.b32.xlu1 %v12559_v5, %s9129_s6 }
 0x6fc   : > { %8272 = vrot.lane.b32.xlu0 %v12557_v55, %s9129_s6 }
 0x6ff   : > { %8277 = vrot.lane.b32.xlu1 %v12565_v17, %s9129_s6 }
 0x700   : > { %8282 = vrot.lane.b32.xlu0 %v12315_v46, %s9130_s9 }
 0x701   : > { %v8048_v39 = vpop.permute.xlu1 %8047 }
 0x702   : > { %v8050_v30 = vunpack.i.h.bf16 %v8048_v39  ;;  %v8049_v20 = vunpack.i.l.bf16 %v8048_v39 }
 0x703   : > { %8287 = vrot.lane.b32.xlu1 %v12358_v53, %s9130_s9 }
 0x704   : > { %8292 = vrot.lane.b32.xlu0 %v12387_v41, %s9130_s9 }
 0x705   : > { %v12646_v63 = vpop.permute.xlu0 %8052 }
 0x706   : > { %v8055_v28 = vunpack.i.h.bf16 %v12646_v63  ;;  %v8054_v56 = vunpack.i.l.bf16 %v12646_v63 }
 0x707   : > { %8297 = vrot.lane.b32.xlu1 %v12405_v22, %s9130_s9 }
 0x708   : > { %8302 = vrot.lane.b32.xlu0 %v12425_v14, %s9130_s9 }
 0x70a   : > { %v12652_v8 = vpop.permute.xlu1 %8057 }
 0x70b   : > { %8307 = vrot.lane.b32.xlu1 %v12441_v19, %s9130_s9 }
 0x70c   : > { %8312 = vrot.lane.b32.xlu0 %v12467_v52, %s9130_s9 }
 0x70d   : > { %v12654_v32 = vpop.permute.xlu0 %8062 }
 0x70f   : > { %8317 = vrot.lane.b32.xlu1 %v12481_v50, %s9130_s9 }
 0x710   : > { %8322 = vrot.lane.b32.xlu0 %v12501_v31, %s9130_s9 }
 0x711   : > { %v12660_v51 = vpop.permute.xlu1 %8067 }
 0x713   : > { %8327 = vrot.lane.b32.xlu1 %v12510_v42, %s9130_s9 }
 0x714   : > { %8332 = vrot.lane.b32.xlu0 %v12519_v7, %s9130_s9 }
 0x715   : > { %v12662_v29 = vpop.permute.xlu0 %8072 }
 0x717   : > { %8337 = vrot.lane.b32.xlu1 %v12527_v61, %s9130_s9 }
 0x718   : > { %8342 = vrot.lane.b32.xlu0 %v12531_v62, %s9130_s9 }
 0x719   : > { %v12668_v18 = vpop.permute.xlu1 %8077 }
 0x71b   : > { %8347 = vrot.lane.b32.xlu1 %v12563_v37, %s9130_s9 }
 0x71c   : > { %8352 = vrot.lane.b32.xlu0 %v12569_v44, %s9130_s9 }
 0x71d   : > { %v12670_v26 = vpop.permute.xlu0 %8082 }
 0x71f   : > { %8357 = vrot.lane.b32.xlu1 %v12577_v38, %s9130_s9 }
 0x720   : > { %8362 = vrot.lane.b32.xlu0 %v12535_v60, %s9130_s9 }
 0x721   : > { %v12676_v2 = vpop.permute.xlu1 %8087 }
 0x723   : > { %8367 = vrot.lane.b32.xlu1 %v12545_v1, %s9130_s9 }
 0x724   : > { %8372 = vrot.lane.b32.xlu0 %v12541_v40, %s9130_s9 }
 0x725   : > { %v12678_v33 = vpop.permute.xlu0 %8092 }
 0x727   : > { %8377 = vrot.lane.b32.xlu1 %v12555_v6, %s9130_s9 }
 0x728   : > { %8382 = vrot.lane.b32.xlu0 %v12551_v13, %s9130_s9 }
 0x729   : > { %v12684_v27 = vpop.permute.xlu1 %8097 }
 0x72a   : > { %v8103_v0 = vpop.permute.xlu0 %8102 }
 0x72b   : > { %v8105_v45 = vunpack.i.h.bf16 %v8103_v0  ;;  %v8104_v25 = vunpack.i.l.bf16 %v8103_v0  ;;  %8387 = vrot.lane.b32.xlu1 %v12559_v5, %s9130_s9 }
 0x72c   : > { %8392 = vrot.lane.b32.xlu0 %v12557_v55, %s9130_s9 }
 0x72d   : > { %v8108_v47 = vpop.permute.xlu1 %8107  ;;  %v4258_v11 = vsel %vm4257_vm14, %v8044_v16, %v8104_v25  ;;  %v4259_v43 = vsel %vm4257_vm14, %v8045_v9, %v8105_v45  ;;  %v4282_v21 = vsel %vm4257_vm14, %v8104_v25, %v8044_v16  ;;  %v4283_v3 = vsel %vm4257_vm14, %v8105_v45, %v8045_v9 }
 0x72e   : > { %v8110_v4 = vunpack.i.h.bf16 %v8108_v47  ;;  %v8109_v10 = vunpack.i.l.bf16 %v8108_v47  ;;  %v8113_v24 = vpop.permute.xlu0 %8112  ;;  %v7182_v23 = vpack.c.bf16 %v4259_v43, %v4258_v11  ;;  %v7184_v49 = vpack.c.bf16 %v4283_v3, %v4282_v21 }
 0x72f   : > { %v8115_v36 = vunpack.i.h.bf16 %v8113_v24  ;;  %v8114_v12 = vunpack.i.l.bf16 %v8113_v24  ;;  %8397 = vrot.lane.b32.xlu1 %v12565_v17, %s9130_s9  ;;  %v8060_v45 = vunpack.i.h.bf16 %v12652_v8  ;;  %v8059_v25 = vunpack.i.l.bf16 %v12652_v8 }
 0x730   : > { %8402 = vrot.lane.b32.xlu0 %v12315_v46, %s9126_s11  ;;  %7183 = vmatprep.subr.bf16.mxu1 %v7182_v23  ;;  %v4260_v15 = vsel %vm4257_vm14, %v8049_v20, %v8109_v10  ;;  %v4261_v54 = vsel %vm4257_vm14, %v8050_v30, %v8110_v4  ;;  %v4284_v59 = vsel %vm4257_vm14, %v8109_v10, %v8049_v20  ;;  %v8065_v10 = vunpack.i.h.bf16 %v12654_v32 }
 0x731   : > { %7185 = vmatpush1.bf16.msra.mxu1 %v7184_v49  ;;  %v8118_v57 = vpop.permute.xlu1 %8117  ;;  %v7186_v48 = vpack.c.bf16 %v4261_v54, %v4260_v15  ;;  %v4285_v34 = vsel %vm4257_vm14, %v8110_v4, %v8050_v30  ;;  %v4262_v35 = vsel %vm4257_vm14, %v8054_v56, %v8114_v12  ;;  %v4263_v39 = vsel %vm4257_vm14, %v8055_v28, %v8115_v36 }
 0x732   : > { %v8120_v63 = vunpack.i.h.bf16 %v8118_v57  ;;  %v8119_v0 = vunpack.i.l.bf16 %v8118_v57  ;;  %v8123_v9 = vpop.permute.xlu0 %8122  ;;  %v7188_v16 = vpack.c.bf16 %v4285_v34, %v4284_v59  ;;  %v7190_v30 = vpack.c.bf16 %v4263_v39, %v4262_v35 }
 0x733   : > { %8407 = vrot.lane.b32.xlu1 %v12315_v46, %s9131_s10  ;;  %7187 = vmatprep.subr.bf16.mxu1 %v7186_v48  ;;  %v4286_v20 = vsel %vm4257_vm14, %v8114_v12, %v8054_v56  ;;  %v4287_v47 = vsel %vm4257_vm14, %v8115_v36, %v8055_v28  ;;  %v8125_v11 = vunpack.i.h.bf16 %v8123_v9  ;;  %v8124_v43 = vunpack.i.l.bf16 %v8123_v9 }
 0x734   : > { %8412 = vrot.lane.b32.xlu0 %v12531_v62, %s9131_s10  ;;  %v4264_v8 = vsel %vm4257_vm14, %v8059_v25, %v8119_v0  ;;  %v4265_v3 = vsel %vm4257_vm14, %v8060_v45, %v8120_v63  ;;  %v8064_v24 = vunpack.i.l.bf16 %v12654_v32  ;;  %v7192_v23 = vpack.c.bf16 %v4287_v47, %v4286_v20 }
 0x735   : > { %7189 = vmatpush1.bf16.msra.mxu1 %v7188_v16  ;;  %v8128_v21 = vpop.permute.xlu1 %8127  ;;  %v7194_v49 = vpack.c.bf16 %v4265_v3, %v4264_v8  ;;  %v4288_v28 = vsel %vm4257_vm14, %v8119_v0, %v8059_v25  ;;  %v4289_v56 = vsel %vm4257_vm14, %v8120_v63, %v8060_v45  ;;  %v4267_v54 = vsel %vm4257_vm14, %v8065_v10, %v8125_v11  ;;  %v5760_v25 = vld [vmem:[%s14227_s4 + $0x38] sm:$0xff] }
 0x736   : > { %v8133_v4 = vpop.permute.xlu0 %8132  ;;  %7191 = vmatprep.subr.bf16.mxu1 %v7190_v30  ;;  %v8130_v36 = vunpack.i.h.bf16 %v8128_v21  ;;  %v8129_v12 = vunpack.i.l.bf16 %v8128_v21  ;;  %v4266_v32 = vsel %vm4257_vm14, %v8064_v24, %v8124_v43  ;;  %v8070_v57 = vunpack.i.h.bf16 %v12660_v51  ;;  %6655 = vmatprep.mubr.f32.mxu0 %v5760_v25 }
 0x737   : > { %8417 = vrot.lane.b32.xlu1 %v12358_v53, %s9131_s10  ;;  %v8069_v48 = vunpack.i.l.bf16 %v12660_v51  ;;  %v7196_v34 = vpack.c.bf16 %v4289_v56, %v4288_v28  ;;  %v7198_v35 = vpack.c.bf16 %v4267_v54, %v4266_v32  ;;  %v4290_v39 = vsel %vm4257_vm14, %v8124_v43, %v8064_v24 }
 0x738   : > { %8422 = vrot.lane.b32.xlu0 %v12563_v37, %s9131_s10  ;;  %v4291_v63 = vsel %vm4257_vm14, %v8125_v11, %v8065_v10  ;;  %v8135_v0 = vunpack.i.h.bf16 %v8133_v4  ;;  %v8134_v9 = vunpack.i.l.bf16 %v8133_v4  ;;  %v4269_v45 = vsel %vm4257_vm14, %v8070_v57, %v8130_v36 }
 0x739   : > { %7193 = vmatpush1.bf16.msra.mxu1 %v7192_v23  ;;  %v12741_v15 = vpop.permute.xlu1 %8137  ;;  %v4268_v51 = vsel %vm4257_vm14, %v8069_v48, %v8129_v12  ;;  %v8075_v20 = vunpack.i.h.bf16 %v12662_v29  ;;  %v8074_v47 = vunpack.i.l.bf16 %v12662_v29  ;;  %v7200_v11 = vpack.c.bf16 %v4291_v63, %v4290_v39 }
 0x73a   : > { %v12747_v59 = vpop.permute.xlu0 %8142  ;;  %7195 = vmatprep.subr.bf16.mxu1 %v7194_v49  ;;  %v7202_v43 = vpack.c.bf16 %v4269_v45, %v4268_v51  ;;  %v4292_v21 = vsel %vm4257_vm14, %v8129_v12, %v8069_v48  ;;  %v4293_v8 = vsel %vm4257_vm14, %v8130_v36, %v8070_v57  ;;  %v8140_v3 = vunpack.i.h.bf16 %v12741_v15 }
 0x73b   : > { %8427 = vrot.lane.b32.xlu1 %v12387_v41, %s9131_s10  ;;  %v8139_v4 = vunpack.i.l.bf16 %v12741_v15  ;;  %v4270_v10 = vsel %vm4257_vm14, %v8074_v47, %v8134_v9  ;;  %v4271_v24 = vsel %vm4257_vm14, %v8075_v20, %v8135_v0  ;;  %v8080_v49 = vunpack.i.h.bf16 %v12668_v18 }
 0x73c   : > { %8432 = vrot.lane.b32.xlu0 %v12569_v44, %s9131_s10  ;;  %v8079_v28 = vunpack.i.l.bf16 %v12668_v18  ;;  %v7204_v56 = vpack.c.bf16 %v4293_v8, %v4292_v21  ;;  %v7206_v36 = vpack.c.bf16 %v4271_v24, %v4270_v10  ;;  %v4294_v12 = vsel %vm4257_vm14, %v8134_v9, %v8074_v47 }
 0x73d   : > { %7197 = vmatpush1.bf16.msra.mxu1 %v7196_v34  ;;  %v12759_v16 = vpop.permute.xlu1 %8147  ;;  %v4295_v15 = vsel %vm4257_vm14, %v8135_v0, %v8075_v20  ;;  %v8145_v32 = vunpack.i.h.bf16 %v12747_v59  ;;  %v8144_v54 = vunpack.i.l.bf16 %v12747_v59  ;;  %v4273_v48 = vsel %vm4257_vm14, %v8080_v49, %v8140_v3 }
 0x73e   : > { %v12768_v30 = vpop.permute.xlu0 %8152  ;;  %7199 = vmatprep.subr.bf16.mxu1 %v7198_v35  ;;  %v4272_v57 = vsel %vm4257_vm14, %v8079_v28, %v8139_v4  ;;  %v8085_v35 = vunpack.i.h.bf16 %v12670_v26  ;;  %v8084_v39 = vunpack.i.l.bf16 %v12670_v26  ;;  %v7208_v59 = vpack.c.bf16 %v4295_v15, %v4294_v12 }
 0x73f   : > { %8437 = vrot.lane.b32.xlu1 %v12405_v22, %s9131_s10  ;;  %v7210_v63 = vpack.c.bf16 %v4273_v48, %v4272_v57  ;;  %v4296_v0 = vsel %vm4257_vm14, %v8139_v4, %v8079_v28  ;;  %v4297_v9 = vsel %vm4257_vm14, %v8140_v3, %v8080_v49  ;;  %v8150_v51 = vunpack.i.h.bf16 %v12759_v16 }
 0x740   : > { %8442 = vrot.lane.b32.xlu0 %v12577_v38, %s9131_s10  ;;  %v8149_v45 = vunpack.i.l.bf16 %v12759_v16  ;;  %v4274_v25 = vsel %vm4257_vm14, %v8084_v39, %v8144_v54  ;;  %v4275_v20 = vsel %vm4257_vm14, %v8085_v35, %v8145_v32  ;;  %v7212_v16 = vpack.c.bf16 %v4297_v9, %v4296_v0 }
 0x741   : > { %7201 = vmatpush1.bf16.msra.mxu1 %v7200_v11  ;;  %v12782_v29 = vpop.permute.xlu1 %8157  ;;  %v8090_v11 = vunpack.i.h.bf16 %v12676_v2  ;;  %v7214_v21 = vpack.c.bf16 %v4275_v20, %v4274_v25  ;;  %v4298_v8 = vsel %vm4257_vm14, %v8144_v54, %v8084_v39  ;;  %v4299_v3 = vsel %vm4257_vm14, %v8145_v32, %v8085_v35 }
 0x742   : > { %v12788_v23 = vpop.permute.xlu0 %8162  ;;  %7203 = vmatprep.subr.bf16.mxu1 %v7202_v43  ;;  %v8089_v43 = vunpack.i.l.bf16 %v12676_v2  ;;  %v8155_v4 = vunpack.i.h.bf16 %v12768_v30  ;;  %v8154_v10 = vunpack.i.l.bf16 %v12768_v30  ;;  %v7216_v30 = vpack.c.bf16 %v4299_v3, %v4298_v8 }
 0x743   : > { %8447 = vrot.lane.b32.xlu1 %v12425_v14, %s9131_s10  ;;  %v4277_v49 = vsel %vm4257_vm14, %v8090_v11, %v8150_v51  ;;  %v4301_v32 = vsel %vm4257_vm14, %v8150_v51, %v8090_v11  ;;  %v8160_v54 = vunpack.i.h.bf16 %v12782_v29  ;;  %v8159_v57 = vunpack.i.l.bf16 %v12782_v29 }
 0x744   : > { %8452 = vrot.lane.b32.xlu0 %v12535_v60, %s9131_s10  ;;  %v4276_v24 = vsel %vm4257_vm14, %v8089_v43, %v8149_v45  ;;  %v4300_v15 = vsel %vm4257_vm14, %v8149_v45, %v8089_v43  ;;  %v8165_v3 = vunpack.i.h.bf16 %v12788_v23 }
 0x745   : > { %7205 = vmatpush1.bf16.msra.mxu1 %v7204_v56  ;;  %v12802_v18 = vpop.permute.xlu1 %8167  ;;  %v8095_v56 = vunpack.i.h.bf16 %v12678_v33  ;;  %v7218_v12 = vpack.c.bf16 %v4277_v49, %v4276_v24  ;;  %v7220_v29 = vpack.c.bf16 %v4301_v32, %v4300_v15 }
 0x746   : > { %v12808_v34 = vpop.permute.xlu0 %8172  ;;  %7207 = vmatprep.subr.bf16.mxu1 %v7206_v36  ;;  %v8094_v36 = vunpack.i.l.bf16 %v12678_v33 }
 0x747   : > { %8457 = vrot.lane.b32.xlu1 %v12441_v19, %s9131_s10  ;;  %v4279_v35 = vsel %vm4257_vm14, %v8095_v56, %v8155_v4  ;;  %v4303_v51 = vsel %vm4257_vm14, %v8155_v4, %v8095_v56 }
 0x748   : > { %8462 = vrot.lane.b32.xlu0 %v12545_v1, %s9131_s10  ;;  %v4278_v48 = vsel %vm4257_vm14, %v8094_v36, %v8154_v10  ;;  %v4302_v9 = vsel %vm4257_vm14, %v8154_v10, %v8094_v36  ;;  %v8164_v10 = vunpack.i.l.bf16 %v12788_v23  ;;  %v8170_v36 = vunpack.i.h.bf16 %v12802_v18 }
 0x749   : > { %7209 = vmatpush1.bf16.msra.mxu1 %v7208_v59  ;;  %v12822_v26 = vpop.permute.xlu1 %8177  ;;  %v8100_v59 = vunpack.i.h.bf16 %v12684_v27  ;;  %v7222_v0 = vpack.c.bf16 %v4279_v35, %v4278_v48  ;;  %v7224_v11 = vpack.c.bf16 %v4303_v51, %v4302_v9 }
 0x74a   : > { %v12828_v47 = vpop.permute.xlu0 %8182  ;;  %7211 = vmatprep.subr.bf16.mxu1 %v7210_v63  ;;  %v8099_v63 = vunpack.i.l.bf16 %v12684_v27 }
 0x74b   : > { %8467 = vrot.lane.b32.xlu1 %v12467_v52, %s9131_s10  ;;  %v4281_v25 = vsel %vm4257_vm14, %v8100_v59, %v8160_v54 }
 0x74c   : > { %8472 = vrot.lane.b32.xlu0 %v12541_v40, %s9131_s10  ;;  %v4280_v27 = vsel %vm4257_vm14, %v8099_v63, %v8159_v57 }
 0x74d   : > { %7213 = vmatpush1.bf16.msra.mxu1 %v7212_v16  ;;  %v12842_v2 = vpop.permute.xlu1 %8187  ;;  %v7226_v43 = vpack.c.bf16 %v4281_v25, %v4280_v27  ;;  %v4304_v16 = vsel %vm4257_vm14, %v8159_v57, %v8099_v63  ;;  %v8175_v63 = vunpack.i.h.bf16 %v12808_v34 }
 0x74e   : > { %v12848_v28 = vpop.permute.xlu0 %8192  ;;  %7215 = vmatprep.subr.bf16.mxu1 %v7214_v21  ;;  %v4305_v21 = vsel %vm4257_vm14, %v8160_v54, %v8100_v59 }
 0x74f   : > { %8477 = vrot.lane.b32.xlu1 %v12481_v50, %s9131_s10  ;;  %v7228_v56 = vpack.c.bf16 %v4305_v21, %v4304_v16 }
 0x750   : > { %8482 = vrot.lane.b32.xlu0 %v12555_v6, %s9131_s10 }
 0x751   : > { %7217 = vmatpush1.bf16.msra.mxu1 %v7216_v30  ;;  %v12862_v33 = vpop.permute.xlu1 %8197  ;;  %v8169_v30 = vunpack.i.l.bf16 %v12802_v18 }
 0x752   : > { %v12868_v39 = vpop.permute.xlu0 %8202  ;;  %7219 = vmatprep.subr.bf16.mxu1 %v7218_v12 }
 0x753   : > { %8487 = vrot.lane.b32.xlu1 %v12501_v31, %s9131_s10 }
 0x754   : > { %8492 = vrot.lane.b32.xlu0 %v12551_v13, %s9131_s10 }
 0x755   : > { %7221 = vmatpush1.bf16.msra.mxu1 %v7220_v29  ;;  %v12880_v45 = vpop.permute.xlu1 %8207  ;;  %v8174_v29 = vunpack.i.l.bf16 %v12808_v34 }
 0x756   : > { %v12886_v20 = vpop.permute.xlu0 %8212  ;;  %7223 = vmatprep.subr.bf16.mxu1 %v7222_v0 }
 0x757   : > { %8497 = vrot.lane.b32.xlu1 %v12510_v42, %s9131_s10 }
 0x758   : > { %8502 = vrot.lane.b32.xlu0 %v12559_v5, %s9131_s10 }
 0x759   : > { %7225 = vmatpush1.bf16.msra.mxu1 %v7224_v11  ;;  %v12896_v8 = vpop.permute.xlu1 %8217 }
 0x75a   : > { %v8223_v4 = vpop.permute.xlu0 %8222  ;;  %7227 = vmatprep.subr.bf16.mxu1 %v7226_v43 }
 0x75b   : > { %v8225_v24 = vunpack.i.h.bf16 %v8223_v4  ;;  %v8224_v49 = vunpack.i.l.bf16 %v8223_v4  ;;  %8507 = vrot.lane.b32.xlu1 %v12519_v7, %s9131_s10 }
 0x75c   : > { %8512 = vrot.lane.b32.xlu0 %v12557_v55, %s9131_s10 }
 0x75d   : > { %7229 = vmatpush1.bf16.msra.mxu1 %v7228_v56  ;;  %v8228_v12 = vpop.permute.xlu1 %8227  ;;  %v4451_v15 = vsel %vm4450_vm15, %v8164_v10, %v8224_v49  ;;  %v4452_v23 = vsel %vm4450_vm15, %v8165_v3, %v8225_v24  ;;  %v4475_v32 = vsel %vm4450_vm15, %v8224_v49, %v8164_v10  ;;  %v4476_v54 = vsel %vm4450_vm15, %v8225_v24, %v8165_v3 }
 0x75e   : > { %v8230_v57 = vunpack.i.h.bf16 %v8228_v12  ;;  %v8229_v48 = vunpack.i.l.bf16 %v8228_v12  ;;  %v8233_v18 = vpop.permute.xlu0 %8232  ;;  %v7230_v35 = vpack.c.bf16 %v4452_v23, %v4451_v15  ;;  %v7232_v59 = vpack.c.bf16 %v4476_v54, %v4475_v32 }
 0x75f   : > { %v8235_v0 = vunpack.i.h.bf16 %v8233_v18  ;;  %v8234_v9 = vunpack.i.l.bf16 %v8233_v18  ;;  %8517 = vrot.lane.b32.xlu1 %v12527_v61, %s9131_s10  ;;  %v8180_v49 = vunpack.i.h.bf16 %v12822_v26  ;;  %v8179_v56 = vunpack.i.l.bf16 %v12822_v26 }
 0x760   : > { %8522 = vrot.lane.b32.xlu0 %v12565_v17, %s9131_s10  ;;  %7231 = vmatprep.subr.bf16.mxu1 %v7230_v35  ;;  %v4453_v51 = vsel %vm4450_vm15, %v8169_v30, %v8229_v48  ;;  %v4454_v27 = vsel %vm4450_vm15, %v8170_v36, %v8230_v57  ;;  %v4477_v25 = vsel %vm4450_vm15, %v8229_v48, %v8169_v30  ;;  %v8185_v48 = vunpack.i.h.bf16 %v12828_v47 }
 0x761   : > { %7233 = vmatpush1.bf16.msra.mxu1 %v7232_v59  ;;  %v8238_v34 = vpop.permute.xlu1 %8237  ;;  %v7234_v11 = vpack.c.bf16 %v4454_v27, %v4453_v51  ;;  %v4478_v43 = vsel %vm4450_vm15, %v8230_v57, %v8170_v36  ;;  %v4455_v16 = vsel %vm4450_vm15, %v8174_v29, %v8234_v9  ;;  %v4456_v21 = vsel %vm4450_vm15, %v8175_v63, %v8235_v0 }
 0x762   : > { %v8240_v3 = vunpack.i.h.bf16 %v8238_v34  ;;  %v8239_v4 = vunpack.i.l.bf16 %v8238_v34  ;;  %v8243_v10 = vpop.permute.xlu0 %8242  ;;  %v7236_v24 = vpack.c.bf16 %v4478_v43, %v4477_v25  ;;  %v7238_v36 = vpack.c.bf16 %v4456_v21, %v4455_v16 }
 0x763   : > { %8527 = vrot.lane.b32.xlu1 %v12315_v46, %s9132_s14  ;;  %7235 = vmatprep.subr.bf16.mxu1 %v7234_v11  ;;  %v4479_v30 = vsel %vm4450_vm15, %v8234_v9, %v8174_v29  ;;  %v4480_v12 = vsel %vm4450_vm15, %v8235_v0, %v8175_v63  ;;  %v8245_v15 = vunpack.i.h.bf16 %v8243_v10  ;;  %v8244_v23 = vunpack.i.l.bf16 %v8243_v10 }
 0x764   : > { %8532 = vrot.lane.b32.xlu0 %v12531_v62, %s9132_s14  ;;  %v4457_v26 = vsel %vm4450_vm15, %v8179_v56, %v8239_v4  ;;  %v4458_v54 = vsel %vm4450_vm15, %v8180_v49, %v8240_v3  ;;  %v8184_v18 = vunpack.i.l.bf16 %v12828_v47  ;;  %v7240_v35 = vpack.c.bf16 %v4480_v12, %v4479_v30 }
 0x765   : > { %7237 = vmatpush1.bf16.msra.mxu1 %v7236_v24  ;;  %v8248_v32 = vpop.permute.xlu1 %8247  ;;  %v7242_v59 = vpack.c.bf16 %v4458_v54, %v4457_v26  ;;  %v4481_v63 = vsel %vm4450_vm15, %v8239_v4, %v8179_v56  ;;  %v4482_v29 = vsel %vm4450_vm15, %v8240_v3, %v8180_v49  ;;  %v4460_v27 = vsel %vm4450_vm15, %v8185_v48, %v8245_v15 }
 0x766   : > { %v8253_v57 = vpop.permute.xlu0 %8252  ;;  %7239 = vmatprep.subr.bf16.mxu1 %v7238_v36  ;;  %v8250_v0 = vunpack.i.h.bf16 %v8248_v32  ;;  %v8249_v9 = vunpack.i.l.bf16 %v8248_v32  ;;  %v4459_v47 = vsel %vm4450_vm15, %v8184_v18, %v8244_v23  ;;  %v8190_v34 = vunpack.i.h.bf16 %v12842_v2 }
 0x767   : > { %8537 = vrot.lane.b32.xlu1 %v12358_v53, %s9132_s14  ;;  %v8189_v11 = vunpack.i.l.bf16 %v12842_v2  ;;  %v7244_v43 = vpack.c.bf16 %v4482_v29, %v4481_v63  ;;  %v4483_v16 = vsel %vm4450_vm15, %v8244_v23, %v8184_v18  ;;  %v4484_v21 = vsel %vm4450_vm15, %v8245_v15, %v8185_v48  ;;  %v5753_v2 = vld [vmem:[%s14227_s4] sm:$0xff]  ;;  %v5768_v23 = vld [vmem:[%s14227_s4 + $0x78] sm:$0xff] }
 0x768   : > { %8542 = vrot.lane.b32.xlu0 %v12563_v37, %s9132_s14  ;;  %v7246_v3 = vpack.c.bf16 %v4460_v27, %v4459_v47  ;;  %v8255_v4 = vunpack.i.h.bf16 %v8253_v57  ;;  %v8254_v10 = vunpack.i.l.bf16 %v8253_v57  ;;  %v4462_v56 = vsel %vm4450_vm15, %v8190_v34, %v8250_v0 }
 0x769   : > { %7241 = vmatpush1.bf16.msra.mxu1 %v7240_v35  ;;  %v12957_v51 = vpop.permute.xlu1 %8257  ;;  %v4461_v49 = vsel %vm4450_vm15, %v8189_v11, %v8249_v9  ;;  %v8195_v30 = vunpack.i.h.bf16 %v12848_v28  ;;  %v8194_v12 = vunpack.i.l.bf16 %v12848_v28  ;;  %v7248_v15 = vpack.c.bf16 %v4484_v21, %v4483_v16 }
 0x76a   : > { %v12963_v25 = vpop.permute.xlu0 %8262  ;;  %7243 = vmatprep.subr.bf16.mxu1 %v7242_v59  ;;  %v4485_v32 = vsel %vm4450_vm15, %v8249_v9, %v8189_v11  ;;  %v4486_v26 = vsel %vm4450_vm15, %v8250_v0, %v8190_v34  ;;  %v7250_v54 = vpack.c.bf16 %v4462_v56, %v4461_v49  ;;  %v8260_v28 = vunpack.i.h.bf16 %v12957_v51  ;;  %v5767_v9 = vld [vmem:[%s14227_s4 + $0x70] sm:$0xff] }
 0x76b   : > { %8547 = vrot.lane.b32.xlu1 %v12387_v41, %s9132_s14  ;;  %v8259_v57 = vunpack.i.l.bf16 %v12957_v51  ;;  %v4463_v18 = vsel %vm4450_vm15, %v8194_v12, %v8254_v10  ;;  %v4464_v35 = vsel %vm4450_vm15, %v8195_v30, %v8255_v4  ;;  %v8200_v63 = vunpack.i.h.bf16 %v12862_v33 }
 0x76c   : > { %8552 = vrot.lane.b32.xlu0 %v12569_v44, %s9132_s14  ;;  %v8199_v29 = vunpack.i.l.bf16 %v12862_v33  ;;  %v7252_v0 = vpack.c.bf16 %v4486_v26, %v4485_v32  ;;  %v4487_v51 = vsel %vm4450_vm15, %v8254_v10, %v8194_v12  ;;  %v4488_v47 = vsel %vm4450_vm15, %v8255_v4, %v8195_v30  ;;  %v5782_v33 = vld [vmem:[%s14227_s4 + $0xe8] sm:$0xff] }
 0x76d   : > { %7245 = vmatpush1.bf16.msra.mxu1 %v7244_v43  ;;  %v12975_v24 = vpop.permute.xlu1 %8267  ;;  %v7254_v27 = vpack.c.bf16 %v4464_v35, %v4463_v18  ;;  %v8265_v34 = vunpack.i.h.bf16 %v12963_v25  ;;  %v8264_v11 = vunpack.i.l.bf16 %v12963_v25  ;;  %v4466_v21 = vsel %vm4450_vm15, %v8200_v63, %v8260_v28  ;;  %v5795_v18 = vld [vmem:[%s14227_s4 + $0x150] sm:$0xff] }
 0x76e   : > { %v12984_v36 = vpop.permute.xlu0 %8272  ;;  %7247 = vmatprep.subr.bf16.mxu1 %v7246_v3  ;;  %v4465_v16 = vsel %vm4450_vm15, %v8199_v29, %v8259_v57  ;;  %v8205_v4 = vunpack.i.h.bf16 %v12868_v39  ;;  %v8204_v10 = vunpack.i.l.bf16 %v12868_v39  ;;  %v7256_v25 = vpack.c.bf16 %v4488_v47, %v4487_v51  ;;  %v5796_v39 = vld [vmem:[%s14227_s4 + $0x158] sm:$0xff] }
 0x76f   : > { %8557 = vrot.lane.b32.xlu1 %v12405_v22, %s9132_s14  ;;  %v4489_v49 = vsel %vm4450_vm15, %v8259_v57, %v8199_v29  ;;  %v4490_v56 = vsel %vm4450_vm15, %v8260_v28, %v8200_v63  ;;  %v7258_v30 = vpack.c.bf16 %v4466_v21, %v4465_v16  ;;  %v8270_v12 = vunpack.i.h.bf16 %v12975_v24  ;;  %v5809_v16 = vld [vmem:[%s14227_s4 + $0x1c0] sm:$0xff] }
 0x770   : > { %8562 = vrot.lane.b32.xlu0 %v12577_v38, %s9132_s14  ;;  %6353 = vmatmul.mubr.f32.vlgmr.msra.gmra.mrb[0].mxu1 %v5753_v2  ;;  %v5781_v2 = vld [vmem:[%s14227_s4 + $0xe0] sm:$0xff]  ;;  %v4467_v32 = vsel %vm4450_vm15, %v8204_v10, %v8264_v11  ;;  %v4468_v26 = vsel %vm4450_vm15, %v8205_v4, %v8265_v34  ;;  %v8210_v28 = vunpack.i.h.bf16 %v12880_v45  ;;  %v8209_v57 = vunpack.i.l.bf16 %v12880_v45  ;;  %v5810_v45 = vld [vmem:[%s14227_s4 + $0x1c8] sm:$0xff] }
 0x771   : > { %7249 = vmatpush1.bf16.msra.mxu1 %v7248_v15  ;;  %v13001_v48 = vpop.permute.xlu1 %8277  ;;  %6358 = vmatprep.mubr.f32.mxu1 %v5768_v23  ;;  %v8269_v15 = vunpack.i.l.bf16 %v12975_v24  ;;  %v7260_v24 = vpack.c.bf16 %v4490_v56, %v4489_v49  ;;  %v4491_v35 = vsel %vm4450_vm15, %v8264_v11, %v8204_v10  ;;  %v4492_v63 = vsel %vm4450_vm15, %v8265_v34, %v8205_v4 }
 0x772   : > { %v13007_v59 = vpop.permute.xlu0 %8282  ;;  %7251 = vmatprep.subr.bf16.mxu1 %v7250_v54  ;;  %v7262_v29 = vpack.c.bf16 %v4468_v26, %v4467_v32  ;;  %v8215_v34 = vunpack.i.h.bf16 %v12886_v20  ;;  %v8214_v11 = vunpack.i.l.bf16 %v12886_v20  ;;  %v4494_v4 = vsel %vm4450_vm15, %v8270_v12, %v8210_v28  ;;  %v5824_v20 = vld [vmem:[%s14227_s4 + $0x238] sm:$0xff]  ;;  %v5823_v32 = vld [vmem:[%s14227_s4 + $0x230] sm:$0xff] }
 0x773   : > { %8567 = vrot.lane.b32.xlu1 %v12425_v14, %s9132_s14  ;;  %v4469_v47 = vsel %vm4450_vm15, %v8209_v57, %v8269_v15  ;;  %v4493_v21 = vsel %vm4450_vm15, %v8269_v15, %v8209_v57  ;;  %v8219_v15 = vunpack.i.l.bf16 %v12896_v8 }
 0x774   : > { %8572 = vrot.lane.b32.xlu0 %v12535_v60, %s9132_s14  ;;  %6359 = vmatmul.mubr.f32.gmra.mrb[2].mxu1 %v5767_v9  ;;  %v8274_v9 = vunpack.i.l.bf16 %v12984_v36 }
 0x775   : > { %7253 = vmatpush1.bf16.msra.mxu1 %v7252_v0  ;;  %v13027_v43 = vpop.permute.xlu1 %8287  ;;  %6364 = vmatprep.mubr.f32.mxu1 %v5782_v33  ;;  %v8275_v0 = vunpack.i.h.bf16 %v12984_v36  ;;  %v7264_v36 = vpack.c.bf16 %v4492_v63, %v4491_v35 }
 0x776   : > { %v13033_v3 = vpop.permute.xlu0 %8292  ;;  %7255 = vmatprep.subr.bf16.mxu1 %v7254_v27  ;;  %v4470_v27 = vsel %vm4450_vm15, %v8210_v28, %v8270_v12  ;;  %v4471_v56 = vsel %vm4450_vm15, %v8214_v11, %v8274_v9  ;;  %v8220_v12 = vunpack.i.h.bf16 %v12896_v8  ;;  %v4495_v26 = vsel %vm4450_vm15, %v8274_v9, %v8214_v11  ;;  %v5756_v8 = vld [vmem:[%s14227_s4 + $0x18] sm:$0xff] }
 0x777   : > { %8577 = vrot.lane.b32.xlu1 %v12441_v19, %s9132_s14  ;;  %v7266_v10 = vpack.c.bf16 %v4470_v27, %v4469_v47  ;;  %v4496_v28 = vsel %vm4450_vm15, %v8275_v0, %v8215_v34  ;;  %v8285_v27 = vunpack.i.h.bf16 %v13007_v59  ;;  %v8284_v11 = vunpack.i.l.bf16 %v13007_v59 }
 0x778   : > { %8582 = vrot.lane.b32.xlu0 %v12545_v1, %s9132_s14  ;;  %6365 = vmatmul.mubr.f32.gmra.mrb[4].mxu1 %v5781_v2  ;;  %v8279_v2 = vunpack.i.l.bf16 %v13001_v48 }
 0x779   : > { %7257 = vmatpush1.bf16.msra.mxu1 %v7256_v25  ;;  %v13053_v23 = vpop.permute.xlu1 %8297  ;;  %6370 = vmatprep.mubr.f32.mxu1 %v5796_v39  ;;  %v8280_v25 = vunpack.i.h.bf16 %v13001_v48  ;;  %v7268_v48 = vpack.c.bf16 %v4494_v4, %v4493_v21  ;;  %v8290_v4 = vunpack.i.h.bf16 %v13027_v43 }
 0x77a   : > { %v13059_v54 = vpop.permute.xlu0 %8302  ;;  %7259 = vmatprep.subr.bf16.mxu1 %v7258_v30  ;;  %v4472_v30 = vsel %vm4450_vm15, %v8215_v34, %v8275_v0 }
 0x77b   : > { %8587 = vrot.lane.b32.xlu1 %v12467_v52, %s9132_s14  ;;  %v7270_v57 = vpack.c.bf16 %v4472_v30, %v4471_v56  ;;  %v4474_v35 = vsel %vm4450_vm15, %v8220_v12, %v8280_v25  ;;  %v4498_v0 = vsel %vm4450_vm15, %v8280_v25, %v8220_v12 }
 0x77c   : > { %8592 = vrot.lane.b32.xlu0 %v12541_v40, %s9132_s14  ;;  %6371 = vmatmul.mubr.f32.gmra.mrb[6].mxu1 %v5795_v18  ;;  %v4473_v18 = vsel %vm4450_vm15, %v8219_v15, %v8279_v2 }
 0x77d   : > { %7261 = vmatpush1.bf16.msra.mxu1 %v7260_v24  ;;  %v13079_v51 = vpop.permute.xlu1 %8307  ;;  %6376 = vmatprep.mubr.f32.mxu1 %v5810_v45  ;;  %v4497_v45 = vsel %vm4450_vm15, %v8279_v2, %v8219_v15  ;;  %v7274_v9 = vpack.c.bf16 %v4474_v35, %v4473_v18  ;;  %v8295_v35 = vunpack.i.h.bf16 %v13033_v3 }
 0x77e   : > { %v13085_v33 = vpop.permute.xlu0 %8312  ;;  %7263 = vmatprep.subr.bf16.mxu1 %v7262_v29  ;;  %v7272_v29 = vpack.c.bf16 %v4496_v28, %v4495_v26  ;;  %v7276_v21 = vpack.c.bf16 %v4498_v0, %v4497_v45  ;;  %v8294_v28 = vunpack.i.l.bf16 %v13033_v3 }
 0x77f   : > { %8597 = vrot.lane.b32.xlu1 %v12481_v50, %s9132_s14 }
 0x780   : > { %8602 = vrot.lane.b32.xlu0 %v12555_v6, %s9132_s14  ;;  %6377 = vmatmul.mubr.f32.gmra.mrb[8].mxu1 %v5809_v16 }
 0x781   : > { %7265 = vmatpush1.bf16.msra.mxu1 %v7264_v36  ;;  %v13105_v49 = vpop.permute.xlu1 %8317  ;;  %6382 = vmatprep.mubr.f32.mxu1 %v5824_v20 }
 0x782   : > { %v13111_v39 = vpop.permute.xlu0 %8322  ;;  %7267 = vmatprep.subr.bf16.mxu1 %v7266_v10  ;;  %v8289_v10 = vunpack.i.l.bf16 %v13027_v43 }
 0x783   : > { %8607 = vrot.lane.b32.xlu1 %v12501_v31, %s9132_s14 }
 0x784   : > { %8612 = vrot.lane.b32.xlu0 %v12551_v13, %s9132_s14  ;;  %6383 = vmatmul.mubr.f32.gmra.mrb[10].mxu1 %v5823_v32 }
 0x785   : > { %7269 = vmatpush1.bf16.msra.mxu1 %v7268_v48  ;;  %v13129_v24 = vpop.permute.xlu1 %8327  ;;  %6453 = vmatprep.mubr.f32.mxu1 %v5756_v8 }
 0x786   : > { %v13135_v63 = vpop.permute.xlu0 %8332  ;;  %7271 = vmatprep.subr.bf16.mxu1 %v7270_v57 }
 0x787   : > { %8617 = vrot.lane.b32.xlu1 %v12510_v42, %s9132_s14 }
 0x788   : > { %8622 = vrot.lane.b32.xlu0 %v12559_v5, %s9132_s14 }
 0x789   : > { %7273 = vmatpush1.bf16.msra.mxu1 %v7272_v29  ;;  %v13145_v47 = vpop.permute.xlu1 %8337 }
 0x78a   : > { %v8343_v34 = vpop.permute.xlu0 %8342  ;;  %7275 = vmatprep.subr.bf16.mxu1 %v7274_v9 }
 0x78b   : > { %v8345_v36 = vunpack.i.h.bf16 %v8343_v34  ;;  %v8344_v16 = vunpack.i.l.bf16 %v8343_v34  ;;  %8627 = vrot.lane.b32.xlu1 %v12519_v7, %s9132_s14 }
 0x78c   : > { %8632 = vrot.lane.b32.xlu0 %v12557_v55, %s9132_s14 }
 0x78d   : > { %v4668_v20 = vsel %vm4643_vm0, %v8344_v16, %v8284_v11  ;;  %v4669_v25 = vsel %vm4643_vm0, %v8345_v36, %v8285_v27  ;;  %7277 = vmatpush1.bf16.msra.mxu1 %v7276_v21  ;;  %v8348_v59 = vpop.permute.xlu1 %8347  ;;  %v4644_v2 = vsel %vm4643_vm0, %v8284_v11, %v8344_v16  ;;  %v4645_v56 = vsel %vm4643_vm0, %v8285_v27, %v8345_v36 }
 0x78e   : > { %v8350_v30 = vunpack.i.h.bf16 %v8348_v59  ;;  %v8349_v12 = vunpack.i.l.bf16 %v8348_v59  ;;  %v8353_v43 = vpop.permute.xlu0 %8352  ;;  %v7278_v15 = vpack.c.bf16 %v4645_v56, %v4644_v2  ;;  %v7280_v48 = vpack.c.bf16 %v4669_v25, %v4668_v20 }
 0x78f   : > { %v8355_v32 = vunpack.i.h.bf16 %v8353_v43  ;;  %v8354_v26 = vunpack.i.l.bf16 %v8353_v43  ;;  %8637 = vrot.lane.b32.xlu1 %v12527_v61, %s9132_s14  ;;  %v8300_v16 = vunpack.i.h.bf16 %v13053_v23  ;;  %v8299_v21 = vunpack.i.l.bf16 %v13053_v23 }
 0x790   : > { %v4670_v57 = vsel %vm4643_vm0, %v8349_v12, %v8289_v10  ;;  %v4671_v8 = vsel %vm4643_vm0, %v8350_v30, %v8290_v4  ;;  %8642 = vrot.lane.b32.xlu0 %v12565_v17, %s9132_s14  ;;  %7279 = vmatprep.subr.bf16.mxu1 %v7278_v15  ;;  %v4646_v18 = vsel %vm4643_vm0, %v8289_v10, %v8349_v12  ;;  %s9133_s14 = smov 112   ;;  %v8305_v12 = vunpack.i.h.bf16 %v13059_v54 }
 0x791   : > { %7281 = vmatpush1.bf16.msra.mxu1 %v7280_v48  ;;  %v8358_v29 = vpop.permute.xlu1 %8357  ;;  %v4647_v45 = vsel %vm4643_vm0, %v8290_v4, %v8350_v30  ;;  %v7284_v0 = vpack.c.bf16 %v4671_v8, %v4670_v57  ;;  %v4648_v36 = vsel %vm4643_vm0, %v8294_v28, %v8354_v26  ;;  %v4649_v3 = vsel %vm4643_vm0, %v8295_v35, %v8355_v32 }
 0x792   : > { %v8360_v9 = vunpack.i.h.bf16 %v8358_v29  ;;  %v8359_v27 = vunpack.i.l.bf16 %v8358_v29  ;;  %v8363_v34 = vpop.permute.xlu0 %8362  ;;  %v7282_v11 = vpack.c.bf16 %v4647_v45, %v4646_v18  ;;  %v4672_v4 = vsel %vm4643_vm0, %v8354_v26, %v8294_v28 }
 0x793   : > { %8647 = vrot.lane.b32.xlu1 %v12531_v62, %s9126_s11  ;;  %v4673_v10 = vsel %vm4643_vm0, %v8355_v32, %v8295_v35  ;;  %v7286_v20 = vpack.c.bf16 %v4649_v3, %v4648_v36  ;;  %v8365_v25 = vunpack.i.h.bf16 %v8363_v34  ;;  %v8364_v23 = vunpack.i.l.bf16 %v8363_v34 }
 0x794   : > { %8652 = vrot.lane.b32.xlu0 %v12315_v46, %s9133_s14  ;;  %7283 = vmatprep.subr.bf16.mxu1 %v7282_v11  ;;  %v4650_v2 = vsel %vm4643_vm0, %v8299_v21, %v8359_v27  ;;  %v4651_v56 = vsel %vm4643_vm0, %v8300_v16, %v8360_v9  ;;  %v8304_v43 = vunpack.i.l.bf16 %v13059_v54  ;;  %v7288_v15 = vpack.c.bf16 %v4673_v10, %v4672_v4 }
 0x795   : > { %7285 = vmatpush1.bf16.msra.mxu1 %v7284_v0  ;;  %v8368_v59 = vpop.permute.xlu1 %8367  ;;  %v4674_v48 = vsel %vm4643_vm0, %v8359_v27, %v8299_v21  ;;  %v4675_v32 = vsel %vm4643_vm0, %v8360_v9, %v8300_v16  ;;  %v7290_v26 = vpack.c.bf16 %v4651_v56, %v4650_v2  ;;  %v4653_v18 = vsel %vm4643_vm0, %v8305_v12, %v8365_v25 }
 0x796   : > { %v8373_v30 = vpop.permute.xlu0 %8372  ;;  %7287 = vmatprep.subr.bf16.mxu1 %v7286_v20  ;;  %v8370_v28 = vunpack.i.h.bf16 %v8368_v59  ;;  %v8369_v57 = vunpack.i.l.bf16 %v8368_v59  ;;  %v4652_v54 = vsel %vm4643_vm0, %v8304_v43, %v8364_v23  ;;  %v8310_v29 = vunpack.i.h.bf16 %v13079_v51 }
 0x797   : > { %8657 = vrot.lane.b32.xlu1 %v12531_v62, %s9133_s14  ;;  %v8309_v45 = vunpack.i.l.bf16 %v13079_v51  ;;  %v8315_v0 = vunpack.i.h.bf16 %v13085_v33  ;;  %v7292_v9 = vpack.c.bf16 %v4675_v32, %v4674_v48  ;;  %v8314_v27 = vunpack.i.l.bf16 %v13085_v33 }
 0x798   : > { %8662 = vrot.lane.b32.xlu0 %v12358_v53, %s9126_s11  ;;  %v4676_v34 = vsel %vm4643_vm0, %v8364_v23, %v8304_v43  ;;  %v4677_v11 = vsel %vm4643_vm0, %v8365_v25, %v8305_v12  ;;  %v7294_v36 = vpack.c.bf16 %v4653_v18, %v4652_v54  ;;  %v8375_v16 = vunpack.i.h.bf16 %v8373_v30 }
 0x799   : > { %7289 = vmatpush1.bf16.msra.mxu1 %v7288_v15  ;;  %v8378_v8 = vpop.permute.xlu1 %8377  ;;  %v8374_v51 = vunpack.i.l.bf16 %v8373_v30  ;;  %v4654_v3 = vsel %vm4643_vm0, %v8309_v45, %v8369_v57  ;;  %v4655_v33 = vsel %vm4643_vm0, %v8310_v29, %v8370_v28  ;;  %v8320_v4 = vunpack.i.h.bf16 %v13105_v49 }
 0x79a   : > { %v13210_v35 = vpop.permute.xlu0 %8382  ;;  %7291 = vmatprep.subr.bf16.mxu1 %v7290_v26  ;;  %v8319_v10 = vunpack.i.l.bf16 %v13105_v49  ;;  %v8325_v20 = vunpack.i.h.bf16 %v13111_v39  ;;  %v8324_v25 = vunpack.i.l.bf16 %v13111_v39  ;;  %v8330_v59 = vunpack.i.h.bf16 %v13129_v24 }
 0x79b   : > { %8667 = vrot.lane.b32.xlu1 %v12563_v37, %s9126_s11  ;;  %v8380_v2 = vunpack.i.h.bf16 %v8378_v8  ;;  %v8379_v56 = vunpack.i.l.bf16 %v8378_v8  ;;  %v7296_v30 = vpack.c.bf16 %v4677_v11, %v4676_v34  ;;  %v8329_v12 = vunpack.i.l.bf16 %v13129_v24 }
 0x79c   : > { %8672 = vrot.lane.b32.xlu0 %v12358_v53, %s9133_s14  ;;  %v4678_v49 = vsel %vm4643_vm0, %v8369_v57, %v8309_v45  ;;  %v4679_v39 = vsel %vm4643_vm0, %v8370_v28, %v8310_v29  ;;  %v7298_v43 = vpack.c.bf16 %v4655_v33, %v4654_v3  ;;  %v8385_v15 = vunpack.i.h.bf16 %v13210_v35 }
 0x79d   : > { %7293 = vmatpush1.bf16.msra.mxu1 %v7292_v9  ;;  %v13224_v21 = vpop.permute.xlu1 %8387  ;;  %v8384_v48 = vunpack.i.l.bf16 %v13210_v35  ;;  %v4656_v26 = vsel %vm4643_vm0, %v8314_v27, %v8374_v51  ;;  %v4657_v57 = vsel %vm4643_vm0, %v8315_v0, %v8375_v16  ;;  %v8335_v8 = vunpack.i.h.bf16 %v13135_v63 }
 0x79e   : > { %v13234_v23 = vpop.permute.xlu0 %8392  ;;  %7295 = vmatprep.subr.bf16.mxu1 %v7294_v36  ;;  %v8334_v28 = vunpack.i.l.bf16 %v13135_v63  ;;  %v4680_v54 = vsel %vm4643_vm0, %v8374_v51, %v8314_v27  ;;  %v4681_v18 = vsel %vm4643_vm0, %v8375_v16, %v8315_v0  ;;  %v4682_v29 = vsel %vm4643_vm0, %v8379_v56, %v8319_v10 }
 0x79f   : > { %8677 = vrot.lane.b32.xlu1 %v12563_v37, %s9133_s14  ;;  %v7300_v45 = vpack.c.bf16 %v4679_v39, %v4678_v49  ;;  %v4658_v9 = vsel %vm4643_vm0, %v8319_v10, %v8379_v56  ;;  %v4659_v34 = vsel %vm4643_vm0, %v8320_v4, %v8380_v2  ;;  %v4683_v27 = vsel %vm4643_vm0, %v8380_v2, %v8320_v4 }
 0x7a0   : > { %8682 = vrot.lane.b32.xlu0 %v12387_v41, %s9126_s11  ;;  %v8390_v0 = vunpack.i.h.bf16 %v13224_v21  ;;  %v8389_v11 = vunpack.i.l.bf16 %v13224_v21  ;;  %v7302_v36 = vpack.c.bf16 %v4657_v57, %v4656_v26  ;;  %v13279_v16 = vsel %vm4643_vm0, %v8384_v48, %v8324_v25 }
 0x7a1   : > { %7297 = vmatpush1.bf16.msra.mxu1 %v7296_v30  ;;  %v13249_v32 = vpop.permute.xlu1 %8397  ;;  %v7304_v3 = vpack.c.bf16 %v4681_v18, %v4680_v54  ;;  %v4660_v33 = vsel %vm4643_vm0, %v8324_v25, %v8384_v48  ;;  %v4661_v4 = vsel %vm4643_vm0, %v8325_v20, %v8385_v15  ;;  %v13287_v21 = vsel %vm4643_vm0, %v8385_v15, %v8325_v20 }
 0x7a2   : > { %v13261_v35 = vpop.permute.xlu0 %8402  ;;  %7299 = vmatprep.subr.bf16.mxu1 %v7298_v43  ;;  %v7306_v30 = vpack.c.bf16 %v4659_v34, %v4658_v9  ;;  %v8394_v49 = vunpack.i.l.bf16 %v13234_v23  ;;  %v7308_v25 = vpack.c.bf16 %v4683_v27, %v4682_v29  ;;  %v13296_v48 = vsel %vm4643_vm0, %v8389_v11, %v8329_v12 }
 0x7a3   : > { %8687 = vrot.lane.b32.xlu1 %v12569_v44, %s9126_s11  ;;  %v13302_v20 = vsel %vm4643_vm0, %v8390_v0, %v8330_v59  ;;  %v8395_v15 = vunpack.i.h.bf16 %v13234_v23  ;;  %v7310_v26 = vpack.c.bf16 %v4661_v4, %v4660_v33  ;;  %v7312_v4 = vpack.c.bf16 %v13287_v21, %v13279_v16 }
 0x7a4   : > { %8692 = vrot.lane.b32.xlu0 %v12387_v41, %s9133_s14  ;;  %v4663_v16 = vsel %vm4643_vm0, %v8330_v59, %v8390_v0  ;;  %v8340_v21 = vunpack.i.h.bf16 %v13145_v47  ;;  %v5755_v59 = vld [vmem:[%s14227_s4 + $0x10] sm:$0xff] }
 0x7a5   : > { %7301 = vmatpush1.bf16.msra.mxu1 %v7300_v45  ;;  %v8408_v51 = vpop.permute.xlu1 %8407 }
 0x7a6   : > { %v8410_v10 = vunpack.i.h.bf16 %v8408_v51  ;;  %v8409_v2 = vunpack.i.l.bf16 %v8408_v51  ;;  %v8413_v56 = vpop.permute.xlu0 %8412  ;;  %7303 = vmatprep.subr.bf16.mxu1 %v7302_v36  ;;  %v13319_v51 = vsel %vm4643_vm0, %v8394_v49, %v8334_v28 }
 0x7a7   : > { %v8415_v39 = vunpack.i.h.bf16 %v8413_v56  ;;  %v8414_v43 = vunpack.i.l.bf16 %v8413_v56  ;;  %8697 = vrot.lane.b32.xlu1 %v12569_v44, %s9133_s14 }
 0x7a8   : > { %8702 = vrot.lane.b32.xlu0 %v12405_v22, %s9126_s11 }
 0x7a9   : > { %7305 = vmatpush1.bf16.msra.mxu1 %v7304_v3  ;;  %v8418_v57 = vpop.permute.xlu1 %8417  ;;  %v5102_v54 = vsel %vm5077_vm1, %v8414_v43, %v8409_v2  ;;  %v5103_v18 = vsel %vm5077_vm1, %v8415_v39, %v8410_v10  ;;  %v5078_v29 = vsel %vm5077_vm1, %v8409_v2, %v8414_v43  ;;  %v5079_v45 = vsel %vm5077_vm1, %v8410_v10, %v8415_v39 }
 0x7aa   : > { %v8420_v9 = vunpack.i.h.bf16 %v8418_v57  ;;  %v8419_v23 = vunpack.i.l.bf16 %v8418_v57  ;;  %v8423_v34 = vpop.permute.xlu0 %8422  ;;  %7307 = vmatprep.subr.bf16.mxu1 %v7306_v30  ;;  %v7422_v27 = vpack.c.bf16 %v5103_v18, %v5102_v54  ;;  %v7424_v36 = vpack.c.bf16 %v5079_v45, %v5078_v29 }
 0x7ab   : > { %v8425_v3 = vunpack.i.h.bf16 %v8423_v34  ;;  %v8424_v33 = vunpack.i.l.bf16 %v8423_v34  ;;  %8707 = vrot.lane.b32.xlu1 %v12577_v38, %s9126_s11  ;;  %v13329_v10 = vsel %vm4643_vm0, %v8395_v15, %v8335_v8  ;;  %v4662_v2 = vsel %vm4643_vm0, %v8329_v12, %v8389_v11 }
 0x7ac   : > { %8712 = vrot.lane.b32.xlu0 %v12405_v22, %s9133_s14  ;;  %7423 = vmatprep.subr.bf16.mxu0 %v7422_v27  ;;  %v8399_v45 = vunpack.i.l.bf16 %v13249_v32  ;;  %v8339_v34 = vunpack.i.l.bf16 %v13145_v47 }
 0x7ad   : > { %7309 = vmatpush1.bf16.msra.mxu1 %v7308_v25  ;;  %7425 = vmatpush1.bf16.msra.mxu0 %v7424_v36  ;;  %v8428_v56 = vpop.permute.xlu1 %8427  ;;  %v5104_v30 = vsel %vm5077_vm1, %v8424_v33, %v8419_v23  ;;  %v5105_v39 = vsel %vm5077_vm1, %v8425_v3, %v8420_v9  ;;  %v5080_v43 = vsel %vm5077_vm1, %v8419_v23, %v8424_v33  ;;  %v8400_v25 = vunpack.i.h.bf16 %v13249_v32 }
 0x7ae   : > { %v8430_v12 = vunpack.i.h.bf16 %v8428_v56  ;;  %v8429_v11 = vunpack.i.l.bf16 %v8428_v56  ;;  %v8433_v24 = vpop.permute.xlu0 %8432  ;;  %7311 = vmatprep.subr.bf16.mxu1 %v7310_v26  ;;  %v7426_v57 = vpack.c.bf16 %v5105_v39, %v5104_v30  ;;  %v5081_v0 = vsel %vm5077_vm1, %v8420_v9, %v8425_v3 }
 0x7af   : > { %v8435_v54 = vunpack.i.h.bf16 %v8433_v24  ;;  %v8434_v18 = vunpack.i.l.bf16 %v8433_v24  ;;  %8717 = vrot.lane.b32.xlu1 %v12577_v38, %s9133_s14  ;;  %v7428_v29 = vpack.c.bf16 %v5081_v0, %v5080_v43  ;;  %v7314_v26 = vpack.c.bf16 %v4663_v16, %v4662_v2 }
 0x7b0   : > { %8722 = vrot.lane.b32.xlu0 %v12425_v14, %s9126_s11  ;;  %7427 = vmatprep.subr.bf16.mxu0 %v7426_v57  ;;  %v4664_v9 = vsel %vm4643_vm0, %v8334_v28, %v8394_v49  ;;  %v4665_v23 = vsel %vm4643_vm0, %v8335_v8, %v8395_v15  ;;  %v7316_v16 = vpack.c.bf16 %v13302_v20, %v13296_v48 }
 0x7b1   : > { %6454 = vmatmul.mubr.f32.vlgmr.msra.gmra.mrb[0].mxu1 %v5755_v59  ;;  %7429 = vmatpush1.bf16.msra.mxu0 %v7428_v29  ;;  %v8438_v32 = vpop.permute.xlu1 %8437  ;;  %v5106_v27 = vsel %vm5077_vm1, %v8434_v18, %v8429_v11  ;;  %v5107_v36 = vsel %vm5077_vm1, %v8435_v54, %v8430_v12  ;;  %v5082_v3 = vsel %vm5077_vm1, %v8429_v11, %v8434_v18 }
 0x7b2   : > { %7313 = vmatpush1.bf16.msra.mxu1 %v7312_v4  ;;  %v8440_v28 = vunpack.i.h.bf16 %v8438_v32  ;;  %v8439_v63 = vunpack.i.l.bf16 %v8438_v32  ;;  %v8443_v49 = vpop.permute.xlu0 %8442  ;;  %v7430_v33 = vpack.c.bf16 %v5107_v36, %v5106_v27  ;;  %v5083_v8 = vsel %vm5077_vm1, %v8430_v12, %v8435_v54 }
 0x7b3   : > { %v8445_v15 = vunpack.i.h.bf16 %v8443_v49  ;;  %v8444_v2 = vunpack.i.l.bf16 %v8443_v49  ;;  %7315 = vmatprep.subr.bf16.mxu1 %v7314_v26  ;;  %8727 = vrot.lane.b32.xlu1 %v12535_v60, %s9126_s11  ;;  %v7432_v56 = vpack.c.bf16 %v5083_v8, %v5082_v3  ;;  %v7318_v4 = vpack.c.bf16 %v4665_v23, %v4664_v9  ;;  %v5774_v8 = vld [vmem:[%s14227_s4 + $0xa8] sm:$0xff] }
 0x7b4   : > { %8732 = vrot.lane.b32.xlu0 %v12425_v14, %s9133_s14  ;;  %7431 = vmatprep.subr.bf16.mxu0 %v7430_v33  ;;  %v4666_v30 = vsel %vm4643_vm0, %v8339_v34, %v8399_v45  ;;  %v4667_v39 = vsel %vm4643_vm0, %v8340_v21, %v8400_v25  ;;  %v4690_v18 = vsel %vm4643_vm0, %v8399_v45, %v8339_v34 }
 0x7b5   : > { %7433 = vmatpush1.bf16.msra.mxu0 %v7432_v56  ;;  %v8448_v43 = vpop.permute.xlu1 %8447  ;;  %v5108_v12 = vsel %vm5077_vm1, %v8444_v2, %v8439_v63  ;;  %v5109_v48 = vsel %vm5077_vm1, %v8445_v15, %v8440_v28  ;;  %v5084_v20 = vsel %vm5077_vm1, %v8439_v63, %v8444_v2  ;;  %v5085_v11 = vsel %vm5077_vm1, %v8440_v28, %v8445_v15 }
 0x7b6   : > { %7317 = vmatpush1.bf16.msra.mxu1 %v7316_v16  ;;  %v8450_v24 = vunpack.i.h.bf16 %v8448_v43  ;;  %v8449_v57 = vunpack.i.l.bf16 %v8448_v43  ;;  %v8453_v59 = vpop.permute.xlu0 %8452  ;;  %v7434_v0 = vpack.c.bf16 %v5109_v48, %v5108_v12  ;;  %v7436_v54 = vpack.c.bf16 %v5085_v11, %v5084_v20  ;;  %v5773_v20 = vld [vmem:[%s14227_s4 + $0xa0] sm:$0xff] }
 0x7b7   : > { %v8455_v29 = vunpack.i.h.bf16 %v8453_v59  ;;  %v8454_v26 = vunpack.i.l.bf16 %v8453_v59  ;;  %7319 = vmatprep.subr.bf16.mxu1 %v7318_v4  ;;  %8737 = vrot.lane.b32.xlu1 %v12535_v60, %s9133_s14  ;;  %v4691_v9 = vsel %vm4643_vm0, %v8400_v25, %v8340_v21  ;;  %v7320_v23 = vpack.c.bf16 %v13329_v10, %v13319_v51  ;;  %v5759_v10 = vld [vmem:[%s14227_s4 + $0x30] sm:$0xff] }
 0x7b8   : > { %8742 = vrot.lane.b32.xlu0 %v12441_v19, %s9126_s11  ;;  %7435 = vmatprep.subr.bf16.mxu0 %v7434_v0  ;;  %v7322_v32 = vpack.c.bf16 %v4667_v39, %v4666_v30  ;;  %v7324_v33 = vpack.c.bf16 %v4691_v9, %v4690_v18 }
 0x7b9   : > { %v5087_v45 = vsel %vm5077_vm1, %v8450_v24, %v8455_v29  ;;  %v5086_v34 = vsel %vm5077_vm1, %v8449_v57, %v8454_v26  ;;  %7437 = vmatpush1.bf16.msra.mxu0 %v7436_v54  ;;  %v8458_v27 = vpop.permute.xlu1 %8457  ;;  %v5110_v47 = vsel %vm5077_vm1, %v8454_v26, %v8449_v57  ;;  %v5111_v21 = vsel %vm5077_vm1, %v8455_v29, %v8450_v24  ;;  %v5788_v57 = vld [vmem:[%s14227_s4 + $0x118] sm:$0xff] }
 0x7ba   : > { %7321 = vmatpush1.bf16.msra.mxu1 %v7320_v23  ;;  %v8460_v25 = vunpack.i.h.bf16 %v8458_v27  ;;  %v8459_v36 = vunpack.i.l.bf16 %v8458_v27  ;;  %v8463_v3 = vpop.permute.xlu0 %8462  ;;  %v7438_v51 = vpack.c.bf16 %v5111_v21, %v5110_v47  ;;  %v7440_v28 = vpack.c.bf16 %v5087_v45, %v5086_v34  ;;  %v5787_v34 = vld [vmem:[%s14227_s4 + $0x110] sm:$0xff]  ;;  %v5802_v21 = vld [vmem:[%s14227_s4 + $0x188] sm:$0xff] }
 0x7bb   : > { %v8465_v63 = vunpack.i.h.bf16 %v8463_v3  ;;  %v8464_v49 = vunpack.i.l.bf16 %v8463_v3  ;;  %7323 = vmatprep.subr.bf16.mxu1 %v7322_v32  ;;  %8747 = vrot.lane.b32.xlu1 %v12545_v1, %s9126_s11 }
 0x7bc   : > { %8752 = vrot.lane.b32.xlu0 %v12441_v19, %s9133_s14  ;;  %7439 = vmatprep.subr.bf16.mxu0 %v7438_v51 }
 0x7bd   : > { %v5089_v15 = vsel %vm5077_vm1, %v8460_v25, %v8465_v63  ;;  %v5088_v2 = vsel %vm5077_vm1, %v8459_v36, %v8464_v49  ;;  %6656 = vmatmul.mubr.f32.vlgmr.msra.gmra.mrb[0].mxu0 %v5759_v10  ;;  %v8468_v16 = vpop.permute.xlu1 %8467  ;;  %v5112_v56 = vsel %vm5077_vm1, %v8464_v49, %v8459_v36  ;;  %v5113_v4 = vsel %vm5077_vm1, %v8465_v63, %v8460_v25 }
 0x7be   : > { %7325 = vmatpush1.bf16.msra.mxu1 %v7324_v33  ;;  %7441 = vmatpush1.bf16.msra.mxu0 %v7440_v28  ;;  %v8470_v30 = vunpack.i.h.bf16 %v8468_v16  ;;  %v8469_v39 = vunpack.i.l.bf16 %v8468_v16  ;;  %v8473_v43 = vpop.permute.xlu0 %8472  ;;  %v7442_v12 = vpack.c.bf16 %v5113_v4, %v5112_v56  ;;  %v7444_v48 = vpack.c.bf16 %v5089_v15, %v5088_v2  ;;  %v5801_v15 = vld [vmem:[%s14227_s4 + $0x180] sm:$0xff]  ;;  %v5816_v56 = vld [vmem:[%s14227_s4 + $0x1f8] sm:$0xff] }
 0x7bf   : > { %v8475_v11 = vunpack.i.h.bf16 %v8473_v43  ;;  %v8474_v24 = vunpack.i.l.bf16 %v8473_v43  ;;  %8757 = vrot.lane.b32.xlu1 %v12545_v1, %s9133_s14  ;;  %6661 = vmatprep.mubr.f32.mxu0 %v5774_v8 }
 0x7c0   : > { %8762 = vrot.lane.b32.xlu0 %v12467_v52, %s9126_s11  ;;  %7443 = vmatprep.subr.bf16.mxu0 %v7442_v12 }
 0x7c1   : > { %v5091_v59 = vsel %vm5077_vm1, %v8470_v30, %v8475_v11  ;;  %v5090_v0 = vsel %vm5077_vm1, %v8469_v39, %v8474_v24  ;;  %v8478_v54 = vpop.permute.xlu1 %8477  ;;  %v5114_v18 = vsel %vm5077_vm1, %v8474_v24, %v8469_v39  ;;  %v5115_v29 = vsel %vm5077_vm1, %v8475_v11, %v8470_v30  ;;  %6662 = vmatmul.mubr.f32.gmra.mrb[2].mxu0 %v5773_v20 }
 0x7c2   : > { %7445 = vmatpush1.bf16.msra.mxu0 %v7444_v48  ;;  %v8480_v26 = vunpack.i.h.bf16 %v8478_v54  ;;  %v8479_v9 = vunpack.i.l.bf16 %v8478_v54  ;;  %v8483_v23 = vpop.permute.xlu0 %8482  ;;  %v7446_v32 = vpack.c.bf16 %v5115_v29, %v5114_v18  ;;  %v7448_v45 = vpack.c.bf16 %v5091_v59, %v5090_v0  ;;  %6667 = vmatprep.mubr.f32.mxu0 %v5788_v57  ;;  %v5815_v59 = vld [vmem:[%s14227_s4 + $0x1f0] sm:$0xff]  ;;  %v5830_v18 = vld [vmem:[%s14227_s4 + $0x268] sm:$0xff] }
 0x7c3   : > { %v8485_v27 = vunpack.i.h.bf16 %v8483_v23  ;;  %v8484_v47 = vunpack.i.l.bf16 %v8483_v23  ;;  %8767 = vrot.lane.b32.xlu1 %v12541_v40, %s9126_s11 }
 0x7c4   : > { %8772 = vrot.lane.b32.xlu0 %v12467_v52, %s9133_s14  ;;  %7447 = vmatprep.subr.bf16.mxu0 %v7446_v32 }
 0x7c5   : > { %v5093_v25 = vsel %vm5077_vm1, %v8480_v26, %v8485_v27  ;;  %v5092_v36 = vsel %vm5077_vm1, %v8479_v9, %v8484_v47  ;;  %v8488_v3 = vpop.permute.xlu1 %8487  ;;  %v5116_v51 = vsel %vm5077_vm1, %v8484_v47, %v8479_v9  ;;  %v5117_v10 = vsel %vm5077_vm1, %v8485_v27, %v8480_v26  ;;  %6668 = vmatmul.mubr.f32.gmra.mrb[4].mxu0 %v5787_v34 }
 0x7c6   : > { %7449 = vmatpush1.bf16.msra.mxu0 %v7448_v45  ;;  %v8490_v28 = vunpack.i.h.bf16 %v8488_v3  ;;  %v8489_v63 = vunpack.i.l.bf16 %v8488_v3  ;;  %v8493_v49 = vpop.permute.xlu0 %8492  ;;  %v7450_v33 = vpack.c.bf16 %v5117_v10, %v5116_v51  ;;  %v7452_v8 = vpack.c.bf16 %v5093_v25, %v5092_v36  ;;  %6673 = vmatprep.mubr.f32.mxu0 %v5802_v21  ;;  %v5829_v25 = vld [vmem:[%s14227_s4 + $0x260] sm:$0xff]  ;;  %v5762_v51 = vld [vmem:[%s14227_s4 + $0x48] sm:$0xff] }
 0x7c7   : > { %v8495_v2 = vunpack.i.h.bf16 %v8493_v49  ;;  %v8494_v16 = vunpack.i.l.bf16 %v8493_v49  ;;  %8777 = vrot.lane.b32.xlu1 %v12541_v40, %s9133_s14 }
 0x7c8   : > { %8782 = vrot.lane.b32.xlu0 %v12481_v50, %s9126_s11  ;;  %7451 = vmatprep.subr.bf16.mxu0 %v7450_v33 }
 0x7c9   : > { %v5095_v4 = vsel %vm5077_vm1, %v8490_v28, %v8495_v2  ;;  %v5094_v30 = vsel %vm5077_vm1, %v8489_v63, %v8494_v16  ;;  %v8498_v39 = vpop.permute.xlu1 %8497  ;;  %v5118_v43 = vsel %vm5077_vm1, %v8494_v16, %v8489_v63  ;;  %v5119_v12 = vsel %vm5077_vm1, %v8495_v2, %v8490_v28  ;;  %6674 = vmatmul.mubr.f32.gmra.mrb[6].mxu0 %v5801_v15 }
 0x7ca   : > { %7453 = vmatpush1.bf16.msra.mxu0 %v7452_v8  ;;  %v8500_v48 = vunpack.i.h.bf16 %v8498_v39  ;;  %v8499_v20 = vunpack.i.l.bf16 %v8498_v39  ;;  %v8503_v11 = vpop.permute.xlu0 %8502  ;;  %v7454_v24 = vpack.c.bf16 %v5119_v12, %v5118_v43  ;;  %v7456_v57 = vpack.c.bf16 %v5095_v4, %v5094_v30  ;;  %6679 = vmatprep.mubr.f32.mxu0 %v5816_v56 }
 0x7cb   : > { %v8505_v0 = vunpack.i.h.bf16 %v8503_v11  ;;  %v8504_v54 = vunpack.i.l.bf16 %v8503_v11  ;;  %8787 = vrot.lane.b32.xlu1 %v12555_v6, %s9126_s11  ;;  %v5770_v11 = vld [vmem:[%s14227_s4 + $0x88] sm:$0xff] }
 0x7cc   : > { %8792 = vrot.lane.b32.xlu0 %v12481_v50, %s9133_s14  ;;  %7455 = vmatprep.subr.bf16.mxu0 %v7454_v24  ;;  %v5769_v24 = vld [vmem:[%s14227_s4 + $0x80] sm:$0xff] }
 0x7cd   : > { %v5097_v29 = vsel %vm5077_vm1, %v8500_v48, %v8505_v0  ;;  %v5096_v26 = vsel %vm5077_vm1, %v8499_v20, %v8504_v54  ;;  %v8508_v9 = vpop.permute.xlu1 %8507  ;;  %v5120_v23 = vsel %vm5077_vm1, %v8504_v54, %v8499_v20  ;;  %v5121_v32 = vsel %vm5077_vm1, %v8505_v0, %v8500_v48  ;;  %6680 = vmatmul.mubr.f32.gmra.mrb[8].mxu0 %v5815_v59 }
 0x7ce   : > { %7457 = vmatpush1.bf16.msra.mxu0 %v7456_v57  ;;  %v8510_v45 = vunpack.i.h.bf16 %v8508_v9  ;;  %v8509_v34 = vunpack.i.l.bf16 %v8508_v9  ;;  %v8513_v27 = vpop.permute.xlu0 %8512  ;;  %v7458_v47 = vpack.c.bf16 %v5121_v32, %v5120_v23  ;;  %v7460_v21 = vpack.c.bf16 %v5097_v29, %v5096_v26  ;;  %6685 = vmatprep.mubr.f32.mxu0 %v5830_v18 }
 0x7cf   : > { %v8515_v36 = vunpack.i.h.bf16 %v8513_v27  ;;  %v8514_v3 = vunpack.i.l.bf16 %v8513_v27  ;;  %8797 = vrot.lane.b32.xlu1 %v12555_v6, %s9133_s14  ;;  %6459 = vmatprep.mubr.f32.mxu1 %v5770_v11  ;;  %v5784_v27 = vld [vmem:[%s14227_s4 + $0xf8] sm:$0xff] }
 0x7d0   : > { %8802 = vrot.lane.b32.xlu0 %v12501_v31, %s9126_s11  ;;  %7459 = vmatprep.subr.bf16.mxu0 %v7458_v47  ;;  %v5783_v47 = vld [vmem:[%s14227_s4 + $0xf0] sm:$0xff] }
 0x7d1   : > { %v5099_v10 = vsel %vm5077_vm1, %v8510_v45, %v8515_v36  ;;  %v5098_v28 = vsel %vm5077_vm1, %v8509_v34, %v8514_v3  ;;  %v8518_v63 = vpop.permute.xlu1 %8517  ;;  %v5122_v49 = vsel %vm5077_vm1, %v8514_v3, %v8509_v34  ;;  %v5123_v33 = vsel %vm5077_vm1, %v8515_v36, %v8510_v45  ;;  %6686 = vmatmul.mubr.f32.gmra.mrb[10].mxu0 %v5829_v25 }
 0x7d2   : > { %v7464_v8 = vpack.c.bf16 %v5099_v10, %v5098_v28  ;;  %7461 = vmatpush1.bf16.msra.mxu0 %v7460_v21  ;;  %v8520_v15 = vunpack.i.h.bf16 %v8518_v63  ;;  %v8519_v2 = vunpack.i.l.bf16 %v8518_v63  ;;  %v8523_v16 = vpop.permute.xlu0 %8522  ;;  %v7462_v56 = vpack.c.bf16 %v5123_v33, %v5122_v49  ;;  %6756 = vmatprep.mubr.f32.mxu0 %v5762_v51 }
 0x7d3   : > { %v8525_v4 = vunpack.i.h.bf16 %v8523_v16  ;;  %v8524_v30 = vunpack.i.l.bf16 %v8523_v16  ;;  %8807 = vrot.lane.b32.xlu1 %v12551_v13, %s9126_s11  ;;  %6460 = vmatmul.mubr.f32.gmra.mrb[2].mxu1 %v5769_v24  ;;  %v5797_v16 = vld [vmem:[%s14227_s4 + $0x160] sm:$0xff] }
 0x7d4   : > { %8812 = vrot.lane.b32.xlu0 %v12501_v31, %s9133_s14  ;;  %7463 = vmatprep.subr.bf16.mxu0 %v7462_v56 }
 0x7d5   : > { %v5101_v39 = vsel %vm5077_vm1, %v8520_v15, %v8525_v4  ;;  %v5100_v43 = vsel %vm5077_vm1, %v8519_v2, %v8524_v30  ;;  %v8528_v12 = vpop.permute.xlu1 %8527  ;;  %v5124_v48 = vsel %vm5077_vm1, %v8524_v30, %v8519_v2  ;;  %v5125_v20 = vsel %vm5077_vm1, %v8525_v4, %v8520_v15  ;;  %6465 = vmatprep.mubr.f32.mxu1 %v5784_v27  ;;  %v5798_v2 = vld [vmem:[%s14227_s4 + $0x168] sm:$0xff] }
 0x7d6   : > { %v7468_v57 = vpack.c.bf16 %v5101_v39, %v5100_v43  ;;  %7465 = vmatpush1.bf16.msra.mxu0 %v7464_v8  ;;  %v8530_v59 = vunpack.i.h.bf16 %v8528_v12  ;;  %v8529_v0 = vunpack.i.l.bf16 %v8528_v12  ;;  %v8533_v54 = vpop.permute.xlu0 %8532  ;;  %v7466_v18 = vpack.c.bf16 %v5125_v20, %v5124_v48 }
 0x7d7   : > { %v8535_v29 = vunpack.i.h.bf16 %v8533_v54  ;;  %v8534_v26 = vunpack.i.l.bf16 %v8533_v54  ;;  %8817 = vrot.lane.b32.xlu1 %v12551_v13, %s9133_s14  ;;  %6466 = vmatmul.mubr.f32.gmra.mrb[4].mxu1 %v5783_v47  ;;  %v5811_v54 = vld [vmem:[%s14227_s4 + $0x1d0] sm:$0xff] }
 0x7d8   : > { %8822 = vrot.lane.b32.xlu0 %v12510_v42, %s9126_s11  ;;  %7467 = vmatprep.subr.bf16.mxu0 %v7466_v18 }
 0x7d9   : > { %v5272_v9 = vsel %vm5270_vm2, %v8530_v59, %v8535_v29  ;;  %v5271_v23 = vsel %vm5270_vm2, %v8529_v0, %v8534_v26  ;;  %v8538_v32 = vpop.permute.xlu1 %8537  ;;  %v5295_v45 = vsel %vm5270_vm2, %v8534_v26, %v8529_v0  ;;  %v5296_v34 = vsel %vm5270_vm2, %v8535_v29, %v8530_v59  ;;  %6471 = vmatprep.mubr.f32.mxu1 %v5798_v2  ;;  %v5812_v0 = vld [vmem:[%s14227_s4 + $0x1d8] sm:$0xff] }
 0x7da   : > { %v7472_v21 = vpack.c.bf16 %v5272_v9, %v5271_v23  ;;  %7469 = vmatpush1.bf16.msra.mxu0 %v7468_v57  ;;  %v8540_v25 = vunpack.i.h.bf16 %v8538_v32  ;;  %v8539_v36 = vunpack.i.l.bf16 %v8538_v32  ;;  %v8543_v3 = vpop.permute.xlu0 %8542  ;;  %v7470_v51 = vpack.c.bf16 %v5296_v34, %v5295_v45 }
 0x7db   : > { %v8545_v10 = vunpack.i.h.bf16 %v8543_v3  ;;  %v8544_v28 = vunpack.i.l.bf16 %v8543_v3  ;;  %8827 = vrot.lane.b32.xlu1 %v12559_v5, %s9126_s11  ;;  %6472 = vmatmul.mubr.f32.gmra.mrb[6].mxu1 %v5797_v16  ;;  %v5825_v3 = vld [vmem:[%s14227_s4 + $0x240] sm:$0xff] }
 0x7dc   : > { %8832 = vrot.lane.b32.xlu0 %v12510_v42, %s9133_s14  ;;  %7471 = vmatprep.subr.bf16.mxu0 %v7470_v51 }
 0x7dd   : > { %v5274_v63 = vsel %vm5270_vm2, %v8540_v25, %v8545_v10  ;;  %v5273_v49 = vsel %vm5270_vm2, %v8539_v36, %v8544_v28  ;;  %v8548_v33 = vpop.permute.xlu1 %8547  ;;  %v5297_v8 = vsel %vm5270_vm2, %v8544_v28, %v8539_v36  ;;  %v5298_v15 = vsel %vm5270_vm2, %v8545_v10, %v8540_v25  ;;  %6477 = vmatprep.mubr.f32.mxu1 %v5812_v0  ;;  %v5826_v36 = vld [vmem:[%s14227_s4 + $0x248] sm:$0xff] }
 0x7de   : > { %v7476_v56 = vpack.c.bf16 %v5274_v63, %v5273_v49  ;;  %7473 = vmatpush1.bf16.msra.mxu0 %v7472_v21  ;;  %v8550_v4 = vunpack.i.h.bf16 %v8548_v33  ;;  %v8549_v30 = vunpack.i.l.bf16 %v8548_v33  ;;  %v8553_v39 = vpop.permute.xlu0 %8552  ;;  %v7474_v43 = vpack.c.bf16 %v5298_v15, %v5297_v8 }
 0x7df   : > { %v8555_v12 = vunpack.i.h.bf16 %v8553_v39  ;;  %v8554_v48 = vunpack.i.l.bf16 %v8553_v39  ;;  %8837 = vrot.lane.b32.xlu1 %v12559_v5, %s9133_s14  ;;  %6478 = vmatmul.mubr.f32.gmra.mrb[8].mxu1 %v5811_v54 }
 0x7e0   : > { %8842 = vrot.lane.b32.xlu0 %v12519_v7, %s9126_s11  ;;  %7475 = vmatprep.subr.bf16.mxu0 %v7474_v43 }
 0x7e1   : > { %v5276_v20 = vsel %vm5270_vm2, %v8550_v4, %v8555_v12  ;;  %v5275_v11 = vsel %vm5270_vm2, %v8549_v30, %v8554_v48  ;;  %v8558_v24 = vpop.permute.xlu1 %8557  ;;  %v5299_v57 = vsel %vm5270_vm2, %v8554_v48, %v8549_v30  ;;  %v5300_v59 = vsel %vm5270_vm2, %v8555_v12, %v8550_v4  ;;  %6483 = vmatprep.mubr.f32.mxu1 %v5826_v36  ;;  %v5758_v30 = vld [vmem:[%s14227_s4 + $0x28] sm:$0xff] }
 0x7e2   : > { %v7480_v18 = vpack.c.bf16 %v5276_v20, %v5275_v11  ;;  %7477 = vmatpush1.bf16.msra.mxu0 %v7476_v56  ;;  %v8560_v29 = vunpack.i.h.bf16 %v8558_v24  ;;  %v8559_v26 = vunpack.i.l.bf16 %v8558_v24  ;;  %v8563_v9 = vpop.permute.xlu0 %8562  ;;  %v7478_v23 = vpack.c.bf16 %v5300_v59, %v5299_v57 }
 0x7e3   : > { %v8565_v32 = vunpack.i.h.bf16 %v8563_v9  ;;  %v8564_v45 = vunpack.i.l.bf16 %v8563_v9  ;;  %8847 = vrot.lane.b32.xlu1 %v12557_v55, %s9126_s11  ;;  %6484 = vmatmul.mubr.f32.gmra.mrb[10].mxu1 %v5825_v3 }
 0x7e4   : > { %8852 = vrot.lane.b32.xlu0 %v12519_v7, %s9133_s14  ;;  %7479 = vmatprep.subr.bf16.mxu0 %v7478_v23 }
 0x7e5   : > { %v5278_v34 = vsel %vm5270_vm2, %v8560_v29, %v8565_v32  ;;  %v5277_v27 = vsel %vm5270_vm2, %v8559_v26, %v8564_v45  ;;  %v8568_v47 = vpop.permute.xlu1 %8567  ;;  %v5301_v21 = vsel %vm5270_vm2, %v8564_v45, %v8559_v26  ;;  %v5302_v25 = vsel %vm5270_vm2, %v8565_v32, %v8560_v29  ;;  %6554 = vmatprep.mubr.f32.mxu1 %v5758_v30 }
 0x7e6   : > { %v7484_v51 = vpack.c.bf16 %v5278_v34, %v5277_v27  ;;  %7481 = vmatpush1.bf16.msra.mxu0 %v7480_v18  ;;  %v8570_v10 = vunpack.i.h.bf16 %v8568_v47  ;;  %v8569_v28 = vunpack.i.l.bf16 %v8568_v47  ;;  %v8573_v63 = vpop.permute.xlu0 %8572  ;;  %v7482_v49 = vpack.c.bf16 %v5302_v25, %v5301_v21 }
 0x7e7   : > { %v8575_v33 = vunpack.i.h.bf16 %v8573_v63  ;;  %v8574_v8 = vunpack.i.l.bf16 %v8573_v63  ;;  %8857 = vrot.lane.b32.xlu1 %v12557_v55, %s9133_s14 }
 0x7e8   : > { %8862 = vrot.lane.b32.xlu0 %v12527_v61, %s9126_s11  ;;  %7483 = vmatprep.subr.bf16.mxu0 %v7482_v49 }
 0x7e9   : > { %v5280_v15 = vsel %vm5270_vm2, %v8570_v10, %v8575_v33  ;;  %v5279_v2 = vsel %vm5270_vm2, %v8569_v28, %v8574_v8  ;;  %v8578_v16 = vpop.permute.xlu1 %8577  ;;  %v5303_v56 = vsel %vm5270_vm2, %v8574_v8, %v8569_v28  ;;  %v5304_v4 = vsel %vm5270_vm2, %v8575_v33, %v8570_v10 }
 0x7ea   : > { %v7488_v39 = vpack.c.bf16 %v5280_v15, %v5279_v2  ;;  %7485 = vmatpush1.bf16.msra.mxu0 %v7484_v51  ;;  %v8580_v43 = vunpack.i.h.bf16 %v8578_v16  ;;  %v8579_v12 = vunpack.i.l.bf16 %v8578_v16  ;;  %v8583_v48 = vpop.permute.xlu0 %8582  ;;  %v7486_v20 = vpack.c.bf16 %v5304_v4, %v5303_v56 }
 0x7eb   : > { %v8585_v11 = vunpack.i.h.bf16 %v8583_v48  ;;  %v8584_v24 = vunpack.i.l.bf16 %v8583_v48  ;;  %8867 = vrot.lane.b32.xlu1 %v12565_v17, %s9126_s11  ;;  %s9134_s11 = smov 111  }
 0x7ec   : > { %8872 = vrot.lane.b32.xlu0 %v12527_v61, %s9133_s14  ;;  %7487 = vmatprep.subr.bf16.mxu0 %v7486_v20 }
 0x7ed   : > { %v5282_v57 = vsel %vm5270_vm2, %v8580_v43, %v8585_v11  ;;  %v5281_v59 = vsel %vm5270_vm2, %v8579_v12, %v8584_v24  ;;  %v8588_v0 = vpop.permute.xlu1 %8587  ;;  %v5305_v54 = vsel %vm5270_vm2, %v8584_v24, %v8579_v12  ;;  %v5306_v18 = vsel %vm5270_vm2, %v8585_v11, %v8580_v43 }
 0x7ee   : > { %v7492_v29 = vpack.c.bf16 %v5282_v57, %v5281_v59  ;;  %7489 = vmatpush1.bf16.msra.mxu0 %v7488_v39  ;;  %v8590_v26 = vunpack.i.h.bf16 %v8588_v0  ;;  %v8589_v9 = vunpack.i.l.bf16 %v8588_v0  ;;  %v8593_v23 = vpop.permute.xlu0 %8592  ;;  %v7490_v32 = vpack.c.bf16 %v5306_v18, %v5305_v54  ;;  %v5761_v54 = vld [vmem:[%s14227_s4 + $0x40] sm:$0xff] }
 0x7ef   : > { %v8595_v45 = vunpack.i.h.bf16 %v8593_v23  ;;  %v8594_v34 = vunpack.i.l.bf16 %v8593_v23  ;;  %8877 = vrot.lane.b32.xlu1 %v12565_v17, %s9133_s14 }
 0x7f0   : > { %8882 = vrot.lane.b32.xlu0 %v12315_v46, %s9134_s11  ;;  %7491 = vmatprep.subr.bf16.mxu0 %v7490_v32 }
 0x7f1   : > { %v5284_v27 = vsel %vm5270_vm2, %v8590_v26, %v8595_v45  ;;  %v5283_v47 = vsel %vm5270_vm2, %v8589_v9, %v8594_v34  ;;  %v8598_v21 = vpop.permute.xlu1 %8597  ;;  %v5307_v25 = vsel %vm5270_vm2, %v8594_v34, %v8589_v9  ;;  %v5308_v36 = vsel %vm5270_vm2, %v8595_v45, %v8590_v26  ;;  %v5776_v26 = vld [vmem:[%s14227_s4 + $0xb8] sm:$0xff] }
 0x7f2   : > { %v7496_v3 = vpack.c.bf16 %v5284_v27, %v5283_v47  ;;  %7493 = vmatpush1.bf16.msra.mxu0 %v7492_v29  ;;  %v8600_v51 = vunpack.i.h.bf16 %v8598_v21  ;;  %v8599_v10 = vunpack.i.l.bf16 %v8598_v21  ;;  %v8603_v28 = vpop.permute.xlu0 %8602  ;;  %v7494_v46 = vpack.c.bf16 %v5308_v36, %v5307_v25  ;;  %v5775_v25 = vld [vmem:[%s14227_s4 + $0xb0] sm:$0xff] }
 0x7f3   : > { %v8605_v63 = vunpack.i.h.bf16 %v8603_v28  ;;  %v8604_v49 = vunpack.i.l.bf16 %v8603_v28  ;;  %8887 = vrot.lane.b32.xlu1 %v12531_v62, %s9134_s11 }
 0x7f4   : > { %8892 = vrot.lane.b32.xlu0 %v12358_v53, %s9134_s11  ;;  %7495 = vmatprep.subr.bf16.mxu0 %v7494_v46 }
 0x7f5   : > { %v5286_v33 = vsel %vm5270_vm2, %v8600_v51, %v8605_v63  ;;  %v5285_v8 = vsel %vm5270_vm2, %v8599_v10, %v8604_v49  ;;  %v8608_v15 = vpop.permute.xlu1 %8607  ;;  %v5309_v2 = vsel %vm5270_vm2, %v8604_v49, %v8599_v10  ;;  %v5310_v16 = vsel %vm5270_vm2, %v8605_v63, %v8600_v51  ;;  %v5790_v51 = vld [vmem:[%s14227_s4 + $0x128] sm:$0xff] }
 0x7f6   : > { %v7500_v56 = vpack.c.bf16 %v5286_v33, %v5285_v8  ;;  %7497 = vmatpush1.bf16.msra.mxu0 %v7496_v3  ;;  %v8610_v62 = vunpack.i.h.bf16 %v8608_v15  ;;  %v8609_v4 = vunpack.i.l.bf16 %v8608_v15  ;;  %v8613_v30 = vpop.permute.xlu0 %8612  ;;  %v7498_v53 = vpack.c.bf16 %v5310_v16, %v5309_v2  ;;  %v5789_v2 = vld [vmem:[%s14227_s4 + $0x120] sm:$0xff] }
 0x7f7   : > { %v8615_v39 = vunpack.i.h.bf16 %v8613_v30  ;;  %v8614_v43 = vunpack.i.l.bf16 %v8613_v30  ;;  %8897 = vrot.lane.b32.xlu1 %v12563_v37, %s9134_s11  ;;  %v8404_v30 = vunpack.i.l.bf16 %v13261_v35 }
 0x7f8   : > { %8902 = vrot.lane.b32.xlu0 %v12387_v41, %s9134_s11  ;;  %7499 = vmatprep.subr.bf16.mxu0 %v7498_v53 }
 0x7f9   : > { %v5288_v12 = vsel %vm5270_vm2, %v8610_v62, %v8615_v39  ;;  %v5287_v48 = vsel %vm5270_vm2, %v8609_v4, %v8614_v43  ;;  %v8618_v20 = vpop.permute.xlu1 %8617  ;;  %v5311_v11 = vsel %vm5270_vm2, %v8614_v43, %v8609_v4  ;;  %v5312_v24 = vsel %vm5270_vm2, %v8615_v39, %v8610_v62  ;;  %v5804_v62 = vld [vmem:[%s14227_s4 + $0x198] sm:$0xff] }
 0x7fa   : > { %v7504_v57 = vpack.c.bf16 %v5288_v12, %v5287_v48  ;;  %7501 = vmatpush1.bf16.msra.mxu0 %v7500_v56  ;;  %v8620_v37 = vunpack.i.h.bf16 %v8618_v20  ;;  %v8619_v59 = vunpack.i.l.bf16 %v8618_v20  ;;  %v8623_v0 = vpop.permute.xlu0 %8622  ;;  %v7502_v41 = vpack.c.bf16 %v5312_v24, %v5311_v11  ;;  %v5803_v24 = vld [vmem:[%s14227_s4 + $0x190] sm:$0xff] }
 0x7fb   : > { %v8625_v18 = vunpack.i.h.bf16 %v8623_v0  ;;  %v8624_v29 = vunpack.i.l.bf16 %v8623_v0  ;;  %8907 = vrot.lane.b32.xlu1 %v12569_v44, %s9134_s11  ;;  %v8405_v4 = vunpack.i.h.bf16 %v13261_v35 }
 0x7fc   : > { %8912 = vrot.lane.b32.xlu0 %v12405_v22, %s9134_s11  ;;  %7503 = vmatprep.subr.bf16.mxu0 %v7502_v41 }
 0x7fd   : > { %v5290_v9 = vsel %vm5270_vm2, %v8620_v37, %v8625_v18  ;;  %v5289_v23 = vsel %vm5270_vm2, %v8619_v59, %v8624_v29  ;;  %6757 = vmatmul.mubr.f32.vlgmr.msra.gmra.mrb[0].mxu0 %v5761_v54  ;;  %v8628_v32 = vpop.permute.xlu1 %8627  ;;  %v5313_v45 = vsel %vm5270_vm2, %v8624_v29, %v8619_v59  ;;  %v5314_v44 = vsel %vm5270_vm2, %v8625_v18, %v8620_v37 }
 0x7fe   : > { %v7508_v34 = vpack.c.bf16 %v5290_v9, %v5289_v23  ;;  %7505 = vmatpush1.bf16.msra.mxu0 %v7504_v57  ;;  %v8630_v27 = vunpack.i.h.bf16 %v8628_v32  ;;  %v8629_v47 = vunpack.i.l.bf16 %v8628_v32  ;;  %v8633_v22 = vpop.permute.xlu0 %8632  ;;  %v7506_v21 = vpack.c.bf16 %v5314_v44, %v5313_v45  ;;  %6762 = vmatprep.mubr.f32.mxu0 %v5776_v26  ;;  %v5818_v57 = vld [vmem:[%s14227_s4 + $0x208] sm:$0xff]  ;;  %v5832_v45 = vld [vmem:[%s14227_s4 + $0x278] sm:$0xff] }
 0x7ff   : > { %v8635_v36 = vunpack.i.h.bf16 %v8633_v22  ;;  %v8634_v3 = vunpack.i.l.bf16 %v8633_v22  ;;  %8917 = vrot.lane.b32.xlu1 %v12577_v38, %s9134_s11 }
 0x800   : > { %8922 = vrot.lane.b32.xlu0 %v12425_v14, %s9134_s11  ;;  %7507 = vmatprep.subr.bf16.mxu0 %v7506_v21 }
 0x801   : > { %v5292_v10 = vsel %vm5270_vm2, %v8630_v27, %v8635_v36  ;;  %v5291_v28 = vsel %vm5270_vm2, %v8629_v47, %v8634_v3  ;;  %v8638_v46 = vpop.permute.xlu1 %8637  ;;  %v5315_v63 = vsel %vm5270_vm2, %v8634_v3, %v8629_v47  ;;  %v5316_v38 = vsel %vm5270_vm2, %v8635_v36, %v8630_v27  ;;  %6763 = vmatmul.mubr.f32.gmra.mrb[2].mxu0 %v5775_v25 }
 0x802   : > { %v7512_v49 = vpack.c.bf16 %v5292_v10, %v5291_v28  ;;  %7509 = vmatpush1.bf16.msra.mxu0 %v7508_v34  ;;  %v8640_v33 = vunpack.i.h.bf16 %v8638_v46  ;;  %v8639_v8 = vunpack.i.l.bf16 %v8638_v46  ;;  %v8643_v14 = vpop.permute.xlu0 %8642  ;;  %v7510_v15 = vpack.c.bf16 %v5316_v38, %v5315_v63  ;;  %6768 = vmatprep.mubr.f32.mxu0 %v5790_v51 }
 0x803   : > { %v8645_v16 = vunpack.i.h.bf16 %v8643_v14  ;;  %v8644_v56 = vunpack.i.l.bf16 %v8643_v14  ;;  %8927 = vrot.lane.b32.xlu1 %v12535_v60, %s9134_s11 }
 0x804   : > { %8932 = vrot.lane.b32.xlu0 %v12441_v19, %s9134_s11  ;;  %7511 = vmatprep.subr.bf16.mxu0 %v7510_v15 }
 0x805   : > { %v5294_v53 = vsel %vm5270_vm2, %v8640_v33, %v8645_v16  ;;  %v5293_v60 = vsel %vm5270_vm2, %v8639_v8, %v8644_v56  ;;  %v8648_v39 = vpop.permute.xlu1 %8647  ;;  %v5317_v43 = vsel %vm5270_vm2, %v8644_v56, %v8639_v8  ;;  %v5318_v12 = vsel %vm5270_vm2, %v8645_v16, %v8640_v33  ;;  %6769 = vmatmul.mubr.f32.gmra.mrb[4].mxu0 %v5789_v2 }
 0x806   : > { %v7516_v35 = vpack.c.bf16 %v5294_v53, %v5293_v60  ;;  %7513 = vmatpush1.bf16.msra.mxu0 %v7512_v49  ;;  %v8650_v19 = vunpack.i.h.bf16 %v8648_v39  ;;  %v8649_v48 = vunpack.i.l.bf16 %v8648_v39  ;;  %v8653_v20 = vpop.permute.xlu0 %8652  ;;  %v7514_v11 = vpack.c.bf16 %v5318_v12, %v5317_v43  ;;  %6774 = vmatprep.mubr.f32.mxu0 %v5804_v62 }
 0x807   : > { %8937 = vrot.lane.b32.xlu1 %v12545_v1, %s9134_s11  ;;  %v8655_v54 = vunpack.i.h.bf16 %v8653_v20  ;;  %v8654_v29 = vunpack.i.l.bf16 %v8653_v20 }
 0x808   : > { %v4861_v37 = vsel %vm4836_vm3, %v8649_v48, %v8404_v30  ;;  %v4862_v59 = vsel %vm4836_vm3, %v8650_v19, %v8405_v4  ;;  %8942 = vrot.lane.b32.xlu0 %v12467_v52, %s9134_s11  ;;  %7515 = vmatprep.subr.bf16.mxu0 %v7514_v11  ;;  %v4837_v0 = vsel %vm4836_vm3, %v8404_v30, %v8649_v48  ;;  %v5817_v52 = vld [vmem:[%s14227_s4 + $0x200] sm:$0xff] }
 0x809   : > { %v7328_v41 = vpack.c.bf16 %v4862_v59, %v4861_v37  ;;  %v8658_v1 = vpop.permute.xlu1 %8657  ;;  %v4838_v18 = vsel %vm4836_vm3, %v8405_v4, %v8650_v19  ;;  %6775 = vmatmul.mubr.f32.gmra.mrb[6].mxu0 %v5803_v24 }
 0x80a   : > { %7517 = vmatpush1.bf16.msra.mxu0 %v7516_v35  ;;  %v8660_v26 = vunpack.i.h.bf16 %v8658_v1  ;;  %v8659_v9 = vunpack.i.l.bf16 %v8658_v1  ;;  %v8663_v23 = vpop.permute.xlu0 %8662  ;;  %v7326_v32 = vpack.c.bf16 %v4838_v18, %v4837_v0  ;;  %6780 = vmatprep.mubr.f32.mxu0 %v5818_v57 }
 0x80b   : > { %8947 = vrot.lane.b32.xlu1 %v12541_v40, %s9134_s11  ;;  %v8665_v22 = vunpack.i.h.bf16 %v8663_v23  ;;  %v8664_v25 = vunpack.i.l.bf16 %v8663_v23 }
 0x80c   : > { %v5464_v44 = vsel %vm5463_vm4, %v8654_v29, %v8659_v9  ;;  %v5465_v34 = vsel %vm5463_vm4, %v8655_v54, %v8660_v26  ;;  %8952 = vrot.lane.b32.xlu0 %v12481_v50, %s9134_s11  ;;  %7327 = vmatprep.subr.bf16.mxu1 %v7326_v32  ;;  %v5488_v27 = vsel %vm5463_vm4, %v8659_v9, %v8654_v29  ;;  %v5831_v50 = vld [vmem:[%s14227_s4 + $0x270] sm:$0xff] }
 0x80d   : > { %v7520_v47 = vpack.c.bf16 %v5465_v34, %v5464_v44  ;;  %7329 = vmatpush1.bf16.msra.mxu1 %v7328_v41  ;;  %v8668_v40 = vpop.permute.xlu1 %8667  ;;  %v5489_v21 = vsel %vm5463_vm4, %v8660_v26, %v8655_v54  ;;  %6781 = vmatmul.mubr.f32.gmra.mrb[8].mxu0 %v5817_v52 }
 0x80e   : > { %v8670_v36 = vunpack.i.h.bf16 %v8668_v40  ;;  %v8669_v3 = vunpack.i.l.bf16 %v8668_v40  ;;  %v8673_v51 = vpop.permute.xlu0 %8672  ;;  %v7518_v10 = vpack.c.bf16 %v5489_v21, %v5488_v27  ;;  %6786 = vmatprep.mubr.f32.mxu0 %v5832_v45 }
 0x80f   : > { %8957 = vrot.lane.b32.xlu1 %v12555_v6, %s9134_s11  ;;  %v5764_v6 = vld [vmem:[%s14227_s4 + $0x58] sm:$0xff]  ;;  %v8675_v49 = vunpack.i.h.bf16 %v8673_v51  ;;  %v8674_v14 = vunpack.i.l.bf16 %v8673_v51 }
 0x810   : > { %v4863_v28 = vsel %vm4836_vm3, %v8669_v3, %v8664_v25  ;;  %v4864_v46 = vsel %vm4836_vm3, %v8670_v36, %v8665_v22  ;;  %8962 = vrot.lane.b32.xlu0 %v12501_v31, %s9134_s11  ;;  %7519 = vmatprep.subr.bf16.mxu0 %v7518_v10  ;;  %v4839_v63 = vsel %vm4836_vm3, %v8664_v25, %v8669_v3 }
 0x811   : > { %v7332_v38 = vpack.c.bf16 %v4864_v46, %v4863_v28  ;;  %7521 = vmatpush1.bf16.msra.mxu0 %v7520_v47  ;;  %v8678_v33 = vpop.permute.xlu1 %8677  ;;  %v4840_v8 = vsel %vm4836_vm3, %v8665_v22, %v8670_v36 }
 0x812   : > { %v8680_v15 = vunpack.i.h.bf16 %v8678_v33  ;;  %v8679_v2 = vunpack.i.l.bf16 %v8678_v33  ;;  %v8683_v16 = vpop.permute.xlu0 %8682  ;;  %v7330_v31 = vpack.c.bf16 %v4840_v8, %v4839_v63  ;;  %6787 = vmatmul.mubr.f32.gmra.mrb[10].mxu0 %v5831_v50 }
 0x813   : > { %8967 = vrot.lane.b32.xlu1 %v12551_v13, %s9134_s11  ;;  %6857 = vmatprep.mubr.f32.mxu0 %v5764_v6  ;;  %v8685_v53 = vunpack.i.h.bf16 %v8683_v16  ;;  %v8684_v39 = vunpack.i.l.bf16 %v8683_v16 }
 0x814   : > { %v5466_v56 = vsel %vm5463_vm4, %v8674_v14, %v8679_v2  ;;  %v5467_v62 = vsel %vm5463_vm4, %v8675_v49, %v8680_v15  ;;  %8972 = vrot.lane.b32.xlu0 %v12510_v42, %s9134_s11  ;;  %7331 = vmatprep.subr.bf16.mxu1 %v7330_v31  ;;  %v5490_v4 = vsel %vm5463_vm4, %v8679_v2, %v8674_v14 }
 0x815   : > { %v7524_v30 = vpack.c.bf16 %v5467_v62, %v5466_v56  ;;  %7333 = vmatpush1.bf16.msra.mxu1 %v7332_v38  ;;  %v8688_v60 = vpop.permute.xlu1 %8687  ;;  %v5491_v13 = vsel %vm5463_vm4, %v8680_v15, %v8675_v49 }
 0x816   : > { %v8690_v43 = vunpack.i.h.bf16 %v8688_v60  ;;  %v8689_v12 = vunpack.i.l.bf16 %v8688_v60  ;;  %v8693_v35 = vpop.permute.xlu0 %8692  ;;  %v7522_v19 = vpack.c.bf16 %v5491_v13, %v5490_v4 }
 0x817   : > { %8977 = vrot.lane.b32.xlu1 %v12559_v5, %s9134_s11  ;;  %v8695_v24 = vunpack.i.h.bf16 %v8693_v35  ;;  %v8694_v37 = vunpack.i.l.bf16 %v8693_v35 }
 0x818   : > { %v4865_v42 = vsel %vm4836_vm3, %v8689_v12, %v8684_v39  ;;  %v4866_v48 = vsel %vm4836_vm3, %v8690_v43, %v8685_v53  ;;  %8982 = vrot.lane.b32.xlu0 %v12519_v7, %s9134_s11  ;;  %7523 = vmatprep.subr.bf16.mxu0 %v7522_v19  ;;  %v4841_v20 = vsel %vm4836_vm3, %v8684_v39, %v8689_v12 }
 0x819   : > { %v7336_v11 = vpack.c.bf16 %v4866_v48, %v4865_v42  ;;  %7525 = vmatpush1.bf16.msra.mxu0 %v7524_v30  ;;  %v8698_v57 = vpop.permute.xlu1 %8697  ;;  %v4842_v5 = vsel %vm4836_vm3, %v8685_v53, %v8690_v43 }
 0x81a   : > { %v8700_v59 = vunpack.i.h.bf16 %v8698_v57  ;;  %v8699_v0 = vunpack.i.l.bf16 %v8698_v57  ;;  %v8703_v41 = vpop.permute.xlu0 %8702  ;;  %v7334_v54 = vpack.c.bf16 %v4842_v5, %v4841_v20 }
 0x81b   : > { %8987 = vrot.lane.b32.xlu1 %v12557_v55, %s9134_s11  ;;  %v8705_v26 = vunpack.i.h.bf16 %v8703_v41  ;;  %v8704_v23 = vunpack.i.l.bf16 %v8703_v41 }
 0x81c   : > { %v5468_v7 = vsel %vm5463_vm4, %v8694_v37, %v8699_v0  ;;  %v5469_v1 = vsel %vm5463_vm4, %v8695_v24, %v8700_v59  ;;  %8992 = vrot.lane.b32.xlu0 %v12527_v61, %s9134_s11  ;;  %7335 = vmatprep.subr.bf16.mxu1 %v7334_v54  ;;  %v5492_v18 = vsel %vm5463_vm4, %v8699_v0, %v8694_v37 }
 0x81d   : > { %v7528_v29 = vpack.c.bf16 %v5469_v1, %v5468_v7  ;;  %7337 = vmatpush1.bf16.msra.mxu1 %v7336_v11  ;;  %v8708_v9 = vpop.permute.xlu1 %8707  ;;  %v5493_v55 = vsel %vm5463_vm4, %v8700_v59, %v8695_v24 }
 0x81e   : > { %v8710_v32 = vunpack.i.h.bf16 %v8708_v9  ;;  %v8709_v52 = vunpack.i.l.bf16 %v8708_v9  ;;  %v8713_v45 = vpop.permute.xlu0 %8712  ;;  %v7526_v44 = vpack.c.bf16 %v5493_v55, %v5492_v18 }
 0x81f   : > { %8997 = vrot.lane.b32.xlu1 %v12565_v17, %s9134_s11  ;;  %v8715_v25 = vunpack.i.h.bf16 %v8713_v45  ;;  %v8714_v36 = vunpack.i.l.bf16 %v8713_v45 }
 0x820   : > { %v4867_v61 = vsel %vm4836_vm3, %v8709_v52, %v8704_v23  ;;  %v4868_v34 = vsel %vm4836_vm3, %v8710_v32, %v8705_v26  ;;  %7527 = vmatprep.subr.bf16.mxu0 %v7526_v44  ;;  %v4843_v27 = vsel %vm4836_vm3, %v8704_v23, %v8709_v52  ;;  %v4844_v47 = vsel %vm4836_vm3, %v8705_v26, %v8710_v32 }
 0x821   : > { %v7340_v22 = vpack.c.bf16 %v4868_v34, %v4867_v61  ;;  %7529 = vmatpush1.bf16.msra.mxu0 %v7528_v29  ;;  %v8718_v40 = vpop.permute.xlu1 %8717  ;;  %v7338_v21 = vpack.c.bf16 %v4844_v47, %v4843_v27 }
 0x822   : > { %v8720_v17 = vunpack.i.h.bf16 %v8718_v40  ;;  %v8719_v3 = vunpack.i.l.bf16 %v8718_v40  ;;  %v8723_v51 = vpop.permute.xlu0 %8722 }
 0x823   : > { %7339 = vmatprep.subr.bf16.mxu1 %v7338_v21  ;;  %v8725_v49 = vunpack.i.h.bf16 %v8723_v51  ;;  %v8724_v33 = vunpack.i.l.bf16 %v8723_v51 }
 0x824   : > { %v5470_v10 = vsel %vm5463_vm4, %v8714_v36, %v8719_v3  ;;  %v5471_v50 = vsel %vm5463_vm4, %v8715_v25, %v8720_v17  ;;  %7341 = vmatpush1.bf16.msra.mxu1 %v7340_v22  ;;  %v5494_v28 = vsel %vm5463_vm4, %v8719_v3, %v8714_v36  ;;  %v5495_v46 = vsel %vm5463_vm4, %v8720_v17, %v8715_v25 }
 0x825   : > { %v7532_v63 = vpack.c.bf16 %v5471_v50, %v5470_v10  ;;  %v8728_v6 = vpop.permute.xlu1 %8727  ;;  %v7530_v38 = vpack.c.bf16 %v5495_v46, %v5494_v28 }
 0x826   : > { %v8730_v8 = vunpack.i.h.bf16 %v8728_v6  ;;  %v8729_v14 = vunpack.i.l.bf16 %v8728_v6  ;;  %v8733_v15 = vpop.permute.xlu0 %8732 }
 0x827   : > { %7531 = vmatprep.subr.bf16.mxu0 %v7530_v38  ;;  %v8735_v53 = vunpack.i.h.bf16 %v8733_v15  ;;  %v8734_v60 = vunpack.i.l.bf16 %v8733_v15 }
 0x828   : > { %v4869_v2 = vsel %vm4836_vm3, %v8729_v14, %v8724_v33  ;;  %v4870_v16 = vsel %vm4836_vm3, %v8730_v8, %v8725_v49  ;;  %7533 = vmatpush1.bf16.msra.mxu0 %v7532_v63  ;;  %v4845_v31 = vsel %vm4836_vm3, %v8724_v33, %v8729_v14  ;;  %v4846_v56 = vsel %vm4836_vm3, %v8725_v49, %v8730_v8 }
 0x829   : > { %v7344_v62 = vpack.c.bf16 %v4870_v16, %v4869_v2  ;;  %v8738_v4 = vpop.permute.xlu1 %8737  ;;  %v7342_v30 = vpack.c.bf16 %v4846_v56, %v4845_v31 }
 0x82a   : > { %v8740_v13 = vunpack.i.h.bf16 %v8738_v4  ;;  %v8739_v39 = vunpack.i.l.bf16 %v8738_v4  ;;  %v8743_v43 = vpop.permute.xlu0 %8742 }
 0x82b   : > { %7343 = vmatprep.subr.bf16.mxu1 %v7342_v30  ;;  %v8745_v24 = vunpack.i.h.bf16 %v8743_v43  ;;  %v8744_v57 = vunpack.i.l.bf16 %v8743_v43 }
 0x82c   : > { %v5472_v12 = vsel %vm5463_vm4, %v8734_v60, %v8739_v39  ;;  %v5473_v35 = vsel %vm5463_vm4, %v8735_v53, %v8740_v13  ;;  %7345 = vmatpush1.bf16.msra.mxu1 %v7344_v62  ;;  %v5496_v19 = vsel %vm5463_vm4, %v8739_v39, %v8734_v60  ;;  %v5497_v42 = vsel %vm5463_vm4, %v8740_v13, %v8735_v53 }
 0x82d   : > { %v7536_v48 = vpack.c.bf16 %v5473_v35, %v5472_v12  ;;  %v8748_v20 = vpop.permute.xlu1 %8747  ;;  %v7534_v11 = vpack.c.bf16 %v5497_v42, %v5496_v19 }
 0x82e   : > { %v8750_v5 = vunpack.i.h.bf16 %v8748_v20  ;;  %v8749_v37 = vunpack.i.l.bf16 %v8748_v20  ;;  %v8753_v59 = vpop.permute.xlu0 %8752 }
 0x82f   : > { %7535 = vmatprep.subr.bf16.mxu0 %v7534_v11  ;;  %v8755_v26 = vunpack.i.h.bf16 %v8753_v59  ;;  %v8754_v9 = vunpack.i.l.bf16 %v8753_v59 }
 0x830   : > { %v4871_v0 = vsel %vm4836_vm3, %v8749_v37, %v8744_v57  ;;  %v4872_v41 = vsel %vm4836_vm3, %v8750_v5, %v8745_v24  ;;  %7537 = vmatpush1.bf16.msra.mxu0 %v7536_v48  ;;  %v4847_v54 = vsel %vm4836_vm3, %v8744_v57, %v8749_v37  ;;  %v4848_v7 = vsel %vm4836_vm3, %v8745_v24, %v8750_v5 }
 0x831   : > { %v7348_v1 = vpack.c.bf16 %v4872_v41, %v4871_v0  ;;  %v8758_v18 = vpop.permute.xlu1 %8757  ;;  %v7346_v29 = vpack.c.bf16 %v4848_v7, %v4847_v54 }
 0x832   : > { %v8760_v55 = vunpack.i.h.bf16 %v8758_v18  ;;  %v8759_v23 = vunpack.i.l.bf16 %v8758_v18  ;;  %v8763_v32 = vpop.permute.xlu0 %8762 }
 0x833   : > { %7347 = vmatprep.subr.bf16.mxu1 %v7346_v29  ;;  %v8765_v22 = vunpack.i.h.bf16 %v8763_v32  ;;  %v8764_v40 = vunpack.i.l.bf16 %v8763_v32 }
 0x834   : > { %v5474_v52 = vsel %vm5463_vm4, %v8754_v9, %v8759_v23  ;;  %v5475_v45 = vsel %vm5463_vm4, %v8755_v26, %v8760_v55  ;;  %7349 = vmatpush1.bf16.msra.mxu1 %v7348_v1  ;;  %v5498_v44 = vsel %vm5463_vm4, %v8759_v23, %v8754_v9  ;;  %v5499_v61 = vsel %vm5463_vm4, %v8760_v55, %v8755_v26 }
 0x835   : > { %v7540_v34 = vpack.c.bf16 %v5475_v45, %v5474_v52  ;;  %v8768_v27 = vpop.permute.xlu1 %8767  ;;  %v7538_v47 = vpack.c.bf16 %v5499_v61, %v5498_v44 }
 0x836   : > { %v8770_v21 = vunpack.i.h.bf16 %v8768_v27  ;;  %v8769_v25 = vunpack.i.l.bf16 %v8768_v27  ;;  %v8773_v36 = vpop.permute.xlu0 %8772 }
 0x837   : > { %7539 = vmatprep.subr.bf16.mxu0 %v7538_v47  ;;  %v8775_v63 = vunpack.i.h.bf16 %v8773_v36  ;;  %v8774_v6 = vunpack.i.l.bf16 %v8773_v36 }
 0x838   : > { %v4873_v17 = vsel %vm4836_vm3, %v8769_v25, %v8764_v40  ;;  %v4874_v3 = vsel %vm4836_vm3, %v8770_v21, %v8765_v22  ;;  %7541 = vmatpush1.bf16.msra.mxu0 %v7540_v34  ;;  %v4849_v51 = vsel %vm4836_vm3, %v8764_v40, %v8769_v25  ;;  %v4850_v10 = vsel %vm4836_vm3, %v8765_v22, %v8770_v21 }
 0x839   : > { %v7352_v50 = vpack.c.bf16 %v4874_v3, %v4873_v17  ;;  %v8778_v28 = vpop.permute.xlu1 %8777  ;;  %v7350_v46 = vpack.c.bf16 %v4850_v10, %v4849_v51 }
 0x83a   : > { %v8780_v38 = vunpack.i.h.bf16 %v8778_v28  ;;  %v8779_v49 = vunpack.i.l.bf16 %v8778_v28  ;;  %v8783_v33 = vpop.permute.xlu0 %8782 }
 0x83b   : > { %7351 = vmatprep.subr.bf16.mxu1 %v7350_v46  ;;  %v8785_v62 = vunpack.i.h.bf16 %v8783_v33  ;;  %v8784_v4 = vunpack.i.l.bf16 %v8783_v33 }
 0x83c   : > { %v5476_v8 = vsel %vm5463_vm4, %v8774_v6, %v8779_v49  ;;  %v5477_v14 = vsel %vm5463_vm4, %v8775_v63, %v8780_v38  ;;  %7353 = vmatpush1.bf16.msra.mxu1 %v7352_v50  ;;  %v5500_v15 = vsel %vm5463_vm4, %v8779_v49, %v8774_v6  ;;  %v5501_v2 = vsel %vm5463_vm4, %v8780_v38, %v8775_v63 }
 0x83d   : > { %v7544_v16 = vpack.c.bf16 %v5477_v14, %v5476_v8  ;;  %v8788_v31 = vpop.permute.xlu1 %8787  ;;  %v7542_v56 = vpack.c.bf16 %v5501_v2, %v5500_v15 }
 0x83e   : > { %v8790_v30 = vunpack.i.h.bf16 %v8788_v31  ;;  %v8789_v53 = vunpack.i.l.bf16 %v8788_v31  ;;  %v8793_v60 = vpop.permute.xlu0 %8792 }
 0x83f   : > { %7543 = vmatprep.subr.bf16.mxu0 %v7542_v56  ;;  %v8795_v48 = vunpack.i.h.bf16 %v8793_v60  ;;  %v8794_v20 = vunpack.i.l.bf16 %v8793_v60 }
 0x840   : > { %v4875_v13 = vsel %vm4836_vm3, %v8789_v53, %v8784_v4  ;;  %v4876_v39 = vsel %vm4836_vm3, %v8790_v30, %v8785_v62  ;;  %7545 = vmatpush1.bf16.msra.mxu0 %v7544_v16  ;;  %v4851_v43 = vsel %vm4836_vm3, %v8784_v4, %v8789_v53  ;;  %v4852_v12 = vsel %vm4836_vm3, %v8785_v62, %v8790_v30 }
 0x841   : > { %v7356_v35 = vpack.c.bf16 %v4876_v39, %v4875_v13  ;;  %v8798_v19 = vpop.permute.xlu1 %8797  ;;  %v7354_v42 = vpack.c.bf16 %v4852_v12, %v4851_v43 }
 0x842   : > { %v8800_v11 = vunpack.i.h.bf16 %v8798_v19  ;;  %v8799_v24 = vunpack.i.l.bf16 %v8798_v19  ;;  %v8803_v57 = vpop.permute.xlu0 %8802 }
 0x843   : > { %7355 = vmatprep.subr.bf16.mxu1 %v7354_v42  ;;  %v8805_v1 = vunpack.i.h.bf16 %v8803_v57  ;;  %v8804_v18 = vunpack.i.l.bf16 %v8803_v57 }
 0x844   : > { %v5478_v5 = vsel %vm5463_vm4, %v8794_v20, %v8799_v24  ;;  %v5479_v37 = vsel %vm5463_vm4, %v8795_v48, %v8800_v11  ;;  %7357 = vmatpush1.bf16.msra.mxu1 %v7356_v35  ;;  %v5502_v59 = vsel %vm5463_vm4, %v8799_v24, %v8794_v20  ;;  %v5503_v0 = vsel %vm5463_vm4, %v8800_v11, %v8795_v48 }
 0x845   : > { %v7548_v41 = vpack.c.bf16 %v5479_v37, %v5478_v5  ;;  %v8808_v54 = vpop.permute.xlu1 %8807  ;;  %v7546_v7 = vpack.c.bf16 %v5503_v0, %v5502_v59 }
 0x846   : > { %v8810_v29 = vunpack.i.h.bf16 %v8808_v54  ;;  %v8809_v26 = vunpack.i.l.bf16 %v8808_v54  ;;  %v8813_v9 = vpop.permute.xlu0 %8812 }
 0x847   : > { %7547 = vmatprep.subr.bf16.mxu0 %v7546_v7  ;;  %v8815_v34 = vunpack.i.h.bf16 %v8813_v9  ;;  %v8814_v27 = vunpack.i.l.bf16 %v8813_v9 }
 0x848   : > { %v4877_v55 = vsel %vm4836_vm3, %v8809_v26, %v8804_v18  ;;  %v4878_v23 = vsel %vm4836_vm3, %v8810_v29, %v8805_v1  ;;  %7549 = vmatpush1.bf16.msra.mxu0 %v7548_v41  ;;  %v4853_v32 = vsel %vm4836_vm3, %v8804_v18, %v8809_v26  ;;  %v4854_v52 = vsel %vm4836_vm3, %v8805_v1, %v8810_v29 }
 0x849   : > { %v7360_v45 = vpack.c.bf16 %v4878_v23, %v4877_v55  ;;  %v8818_v44 = vpop.permute.xlu1 %8817  ;;  %v7358_v61 = vpack.c.bf16 %v4854_v52, %v4853_v32 }
 0x84a   : > { %v8820_v47 = vunpack.i.h.bf16 %v8818_v44  ;;  %v8819_v22 = vunpack.i.l.bf16 %v8818_v44  ;;  %v8823_v40 = vpop.permute.xlu0 %8822 }
 0x84b   : > { %7359 = vmatprep.subr.bf16.mxu1 %v7358_v61  ;;  %v8825_v50 = vunpack.i.h.bf16 %v8823_v40  ;;  %v8824_v28 = vunpack.i.l.bf16 %v8823_v40 }
 0x84c   : > { %v5480_v21 = vsel %vm5463_vm4, %v8814_v27, %v8819_v22  ;;  %v5481_v25 = vsel %vm5463_vm4, %v8815_v34, %v8820_v47  ;;  %7361 = vmatpush1.bf16.msra.mxu1 %v7360_v45  ;;  %v5504_v36 = vsel %vm5463_vm4, %v8819_v22, %v8814_v27  ;;  %v5505_v17 = vsel %vm5463_vm4, %v8820_v47, %v8815_v34 }
 0x84d   : > { %v7552_v3 = vpack.c.bf16 %v5481_v25, %v5480_v21  ;;  %v8828_v51 = vpop.permute.xlu1 %8827  ;;  %v7550_v10 = vpack.c.bf16 %v5505_v17, %v5504_v36 }
 0x84e   : > { %v8830_v46 = vunpack.i.h.bf16 %v8828_v51  ;;  %v8829_v63 = vunpack.i.l.bf16 %v8828_v51  ;;  %v8833_v6 = vpop.permute.xlu0 %8832 }
 0x84f   : > { %7551 = vmatprep.subr.bf16.mxu0 %v7550_v10  ;;  %v8835_v16 = vunpack.i.h.bf16 %v8833_v6  ;;  %v8834_v31 = vunpack.i.l.bf16 %v8833_v6  ;;  %v5757_v6 = vld [vmem:[%s14227_s4 + $0x20] sm:$0xff] }
 0x850   : > { %v4879_v38 = vsel %vm4836_vm3, %v8829_v63, %v8824_v28  ;;  %v4880_v49 = vsel %vm4836_vm3, %v8830_v46, %v8825_v50  ;;  %7553 = vmatpush1.bf16.msra.mxu0 %v7552_v3  ;;  %v4855_v33 = vsel %vm4836_vm3, %v8824_v28, %v8829_v63  ;;  %v4856_v8 = vsel %vm4836_vm3, %v8825_v50, %v8830_v46 }
 0x851   : > { %v7364_v14 = vpack.c.bf16 %v4880_v49, %v4879_v38  ;;  %v8838_v15 = vpop.permute.xlu1 %8837  ;;  %v7362_v2 = vpack.c.bf16 %v4856_v8, %v4855_v33 }
 0x852   : > { %v8840_v56 = vunpack.i.h.bf16 %v8838_v15  ;;  %v8839_v62 = vunpack.i.l.bf16 %v8838_v15  ;;  %v8843_v4 = vpop.permute.xlu0 %8842  ;;  %v5772_v15 = vld [vmem:[%s14227_s4 + $0x98] sm:$0xff] }
 0x853   : > { %7363 = vmatprep.subr.bf16.mxu1 %v7362_v2  ;;  %v8845_v35 = vunpack.i.h.bf16 %v8843_v4  ;;  %v8844_v19 = vunpack.i.l.bf16 %v8843_v4 }
 0x854   : > { %v5482_v30 = vsel %vm5463_vm4, %v8834_v31, %v8839_v62  ;;  %v5483_v53 = vsel %vm5463_vm4, %v8835_v16, %v8840_v56  ;;  %7365 = vmatpush1.bf16.msra.mxu1 %v7364_v14  ;;  %v5506_v60 = vsel %vm5463_vm4, %v8839_v62, %v8834_v31  ;;  %v5507_v13 = vsel %vm5463_vm4, %v8840_v56, %v8835_v16 }
 0x855   : > { %v7556_v39 = vpack.c.bf16 %v5483_v53, %v5482_v30  ;;  %v8848_v43 = vpop.permute.xlu1 %8847  ;;  %v7554_v12 = vpack.c.bf16 %v5507_v13, %v5506_v60  ;;  %v5771_v53 = vld [vmem:[%s14227_s4 + $0x90] sm:$0xff] }
 0x856   : > { %v8850_v42 = vunpack.i.h.bf16 %v8848_v43  ;;  %v8849_v48 = vunpack.i.l.bf16 %v8848_v43  ;;  %v8853_v20 = vpop.permute.xlu0 %8852  ;;  %v5763_v60 = vld [vmem:[%s14227_s4 + $0x50] sm:$0xff] }
 0x857   : > { %7555 = vmatprep.subr.bf16.mxu0 %v7554_v12  ;;  %v8855_v41 = vunpack.i.h.bf16 %v8853_v20  ;;  %v8854_v54 = vunpack.i.l.bf16 %v8853_v20 }
 0x858   : > { %v4881_v11 = vsel %vm4836_vm3, %v8849_v48, %v8844_v19  ;;  %v4882_v24 = vsel %vm4836_vm3, %v8850_v42, %v8845_v35  ;;  %7557 = vmatpush1.bf16.msra.mxu0 %v7556_v39  ;;  %v4857_v57 = vsel %vm4836_vm3, %v8844_v19, %v8849_v48  ;;  %v4858_v5 = vsel %vm4836_vm3, %v8845_v35, %v8850_v42 }
 0x859   : > { %v7368_v37 = vpack.c.bf16 %v4882_v24, %v4881_v11  ;;  %v8858_v59 = vpop.permute.xlu1 %8857  ;;  %v7366_v0 = vpack.c.bf16 %v4858_v5, %v4857_v57  ;;  %v5786_v24 = vld [vmem:[%s14227_s4 + $0x108] sm:$0xff] }
 0x85a   : > { %v8860_v7 = vunpack.i.h.bf16 %v8858_v59  ;;  %v8859_v1 = vunpack.i.l.bf16 %v8858_v59  ;;  %v8863_v18 = vpop.permute.xlu0 %8862  ;;  %v5778_v57 = vld [vmem:[%s14227_s4 + $0xc8] sm:$0xff]  ;;  %v5785_v59 = vld [vmem:[%s14227_s4 + $0x100] sm:$0xff] }
 0x85b   : > { %7367 = vmatprep.subr.bf16.mxu1 %v7366_v0  ;;  %v8865_v45 = vunpack.i.h.bf16 %v8863_v18  ;;  %v8864_v44 = vunpack.i.l.bf16 %v8863_v18  ;;  %v5777_v0 = vld [vmem:[%s14227_s4 + $0xc0] sm:$0xff] }
 0x85c   : > { %v5484_v29 = vsel %vm5463_vm4, %v8854_v54, %v8859_v1  ;;  %v5485_v26 = vsel %vm5463_vm4, %v8855_v41, %v8860_v7  ;;  %7369 = vmatpush1.bf16.msra.mxu1 %v7368_v37  ;;  %v5508_v9 = vsel %vm5463_vm4, %v8859_v1, %v8854_v54  ;;  %v5509_v55 = vsel %vm5463_vm4, %v8860_v7, %v8855_v41 }
 0x85d   : > { %v7560_v23 = vpack.c.bf16 %v5485_v26, %v5484_v29  ;;  %v8868_v32 = vpop.permute.xlu1 %8867  ;;  %v7558_v52 = vpack.c.bf16 %v5509_v55, %v5508_v9 }
 0x85e   : > { %v8870_v61 = vunpack.i.h.bf16 %v8868_v32  ;;  %v8869_v34 = vunpack.i.l.bf16 %v8868_v32  ;;  %v8873_v27 = vpop.permute.xlu0 %8872  ;;  %v5800_v32 = vld [vmem:[%s14227_s4 + $0x178] sm:$0xff] }
 0x85f   : > { %7559 = vmatprep.subr.bf16.mxu0 %v7558_v52  ;;  %v8875_v3 = vunpack.i.h.bf16 %v8873_v27  ;;  %v8874_v51 = vunpack.i.l.bf16 %v8873_v27  ;;  %v5792_v52 = vld [vmem:[%s14227_s4 + $0x138] sm:$0xff] }
 0x860   : > { %v4883_v47 = vsel %vm4836_vm3, %v8869_v34, %v8864_v44  ;;  %v4884_v22 = vsel %vm4836_vm3, %v8870_v61, %v8865_v45  ;;  %7561 = vmatpush1.bf16.msra.mxu0 %v7560_v23  ;;  %v4859_v40 = vsel %vm4836_vm3, %v8864_v44, %v8869_v34  ;;  %v4860_v21 = vsel %vm4836_vm3, %v8865_v45, %v8870_v61  ;;  %v5799_v61 = vld [vmem:[%s14227_s4 + $0x170] sm:$0xff] }
 0x861   : > { %v7372_v25 = vpack.c.bf16 %v4884_v22, %v4883_v47  ;;  %v8878_v36 = vpop.permute.xlu1 %8877  ;;  %v7370_v17 = vpack.c.bf16 %v4860_v21, %v4859_v40  ;;  %v5791_v34 = vld [vmem:[%s14227_s4 + $0x130] sm:$0xff] }
 0x862   : > { %v8880_v10 = vunpack.i.h.bf16 %v8878_v36  ;;  %v8879_v50 = vunpack.i.l.bf16 %v8878_v36  ;;  %v8883_v28 = vpop.permute.xlu0 %8882 }
 0x863   : > { %7371 = vmatprep.subr.bf16.mxu1 %v7370_v17  ;;  %v8885_v2 = vunpack.i.h.bf16 %v8883_v28  ;;  %v8884_v16 = vunpack.i.l.bf16 %v8883_v28 }
 0x864   : > { %v5486_v46 = vsel %vm5463_vm4, %v8874_v51, %v8879_v50  ;;  %v5487_v63 = vsel %vm5463_vm4, %v8875_v3, %v8880_v10  ;;  %7373 = vmatpush1.bf16.msra.mxu1 %v7372_v25  ;;  %v5510_v38 = vsel %vm5463_vm4, %v8879_v50, %v8874_v51  ;;  %v5511_v49 = vsel %vm5463_vm4, %v8880_v10, %v8875_v3  ;;  %v5814_v10 = vld [vmem:[%s14227_s4 + $0x1e8] sm:$0xff] }
 0x865   : > { %v7564_v33 = vpack.c.bf16 %v5487_v63, %v5486_v46  ;;  %v8888_v8 = vpop.permute.xlu1 %8887  ;;  %v7562_v14 = vpack.c.bf16 %v5511_v49, %v5510_v38  ;;  %v5806_v50 = vld [vmem:[%s14227_s4 + $0x1a8] sm:$0xff]  ;;  %v5813_v63 = vld [vmem:[%s14227_s4 + $0x1e0] sm:$0xff] }
 0x866   : > { %v8890_v31 = vunpack.i.h.bf16 %v8888_v8  ;;  %v8889_v56 = vunpack.i.l.bf16 %v8888_v8  ;;  %v8893_v62 = vpop.permute.xlu0 %8892 }
 0x867   : > { %6555 = vmatmul.mubr.f32.vlgmr.msra.gmra.mrb[0].mxu1 %v5757_v6  ;;  %7563 = vmatprep.subr.bf16.mxu0 %v7562_v14  ;;  %v8895_v43 = vunpack.i.h.bf16 %v8893_v62  ;;  %v8894_v19 = vunpack.i.l.bf16 %v8893_v62  ;;  %v5805_v6 = vld [vmem:[%s14227_s4 + $0x1a0] sm:$0xff]  ;;  %v5828_v62 = vld [vmem:[%s14227_s4 + $0x258] sm:$0xff] }
 0x868   : > { %v5657_v4 = vsel %vm5656_vm5, %v8884_v16, %v8889_v56  ;;  %v5658_v30 = vsel %vm5656_vm5, %v8885_v2, %v8890_v31  ;;  %7565 = vmatpush1.bf16.msra.mxu0 %v7564_v33  ;;  %6560 = vmatprep.mubr.f32.mxu1 %v5772_v15  ;;  %v5681_v13 = vsel %vm5656_vm5, %v8889_v56, %v8884_v16 }
 0x869   : > { %v7568_v39 = vpack.c.bf16 %v5658_v30, %v5657_v4  ;;  %v8898_v12 = vpop.permute.xlu1 %8897  ;;  %v5682_v35 = vsel %vm5656_vm5, %v8890_v31, %v8885_v2  ;;  %v5820_v4 = vld [vmem:[%s14227_s4 + $0x218] sm:$0xff] }
 0x86a   : > { %v8900_v42 = vunpack.i.h.bf16 %v8898_v12  ;;  %v8899_v48 = vunpack.i.l.bf16 %v8898_v12  ;;  %v8903_v20 = vpop.permute.xlu0 %8902  ;;  %v7566_v11 = vpack.c.bf16 %v5682_v35, %v5681_v13  ;;  %v5819_v13 = vld [vmem:[%s14227_s4 + $0x210] sm:$0xff] }
 0x86b   : > { %6561 = vmatmul.mubr.f32.gmra.mrb[2].mxu1 %v5771_v53  ;;  %6858 = vmatmul.mubr.f32.vlgmr.msra.gmra.mrb[0].mxu0 %v5763_v60  ;;  %v8905_v7 = vunpack.i.h.bf16 %v8903_v20  ;;  %v8904_v29 = vunpack.i.l.bf16 %v8903_v20  ;;  %v5827_v60 = vld [vmem:[%s14227_s4 + $0x250] sm:$0xff] }
 0x86c   : > { %v5659_v5 = vsel %vm5656_vm5, %v8894_v19, %v8899_v48  ;;  %v5660_v37 = vsel %vm5656_vm5, %v8895_v43, %v8900_v42  ;;  %7567 = vmatprep.subr.bf16.mxu0 %v7566_v11  ;;  %7662 = vmatprep.subr.bf16.mxu1 %v7566_v11  ;;  %v5683_v41 = vsel %vm5656_vm5, %v8899_v48, %v8894_v19 }
 0x86d   : > { %v7572_v54 = vpack.c.bf16 %v5660_v37, %v5659_v5  ;;  %7569 = vmatpush1.bf16.msra.mxu0 %v7568_v39  ;;  %7674 = vmatpush1.bf16.msra.mxu1 %v7568_v39  ;;  %v8908_v1 = vpop.permute.xlu1 %8907  ;;  %v5684_v18 = vsel %vm5656_vm5, %v8900_v42, %v8895_v43  ;;  %v5808_v5 = vld [vmem:[%s14227_s4 + $0x1b8] sm:$0xff] }
 0x86e   : > { %v8910_v26 = vunpack.i.h.bf16 %v8908_v1  ;;  %v8909_v9 = vunpack.i.l.bf16 %v8908_v1  ;;  %v8913_v55 = vpop.permute.xlu0 %8912  ;;  %6566 = vmatprep.mubr.f32.mxu1 %v5786_v24  ;;  %6863 = vmatprep.mubr.f32.mxu0 %v5778_v57  ;;  %v7570_v23 = vpack.c.bf16 %v5684_v18, %v5683_v41  ;;  %v5834_v57 = vld [vmem:[%s14227_s4 + $0x288] sm:$0xff] }
 0x86f   : > { %6567 = vmatmul.mubr.f32.gmra.mrb[4].mxu1 %v5785_v59  ;;  %6864 = vmatmul.mubr.f32.gmra.mrb[2].mxu0 %v5777_v0  ;;  %v8915_v22 = vunpack.i.h.bf16 %v8913_v55  ;;  %v8914_v25 = vunpack.i.l.bf16 %v8913_v55  ;;  %v5833_v0 = vld [vmem:[%s14227_s4 + $0x280] sm:$0xff] }
 0x870   : > { %v5661_v45 = vsel %vm5656_vm5, %v8904_v29, %v8909_v9  ;;  %v5662_v44 = vsel %vm5656_vm5, %v8905_v7, %v8910_v26  ;;  %7571 = vmatprep.subr.bf16.mxu0 %v7570_v23  ;;  %7663 = vmatprep.subr.bf16.mxu1 %v7570_v23  ;;  %v5685_v27 = vsel %vm5656_vm5, %v8909_v9, %v8904_v29 }
 0x871   : > { %v7576_v47 = vpack.c.bf16 %v5662_v44, %v5661_v45  ;;  %7573 = vmatpush1.bf16.msra.mxu0 %v7572_v54  ;;  %7675 = vmatpush1.bf16.msra.mxu1 %v7572_v54  ;;  %v8918_v40 = vpop.permute.xlu1 %8917  ;;  %v5686_v21 = vsel %vm5656_vm5, %v8910_v26, %v8905_v7 }
 0x872   : > { %v8920_v36 = vunpack.i.h.bf16 %v8918_v40  ;;  %v8919_v17 = vunpack.i.l.bf16 %v8918_v40  ;;  %v8923_v3 = vpop.permute.xlu0 %8922  ;;  %6572 = vmatprep.mubr.f32.mxu1 %v5800_v32  ;;  %6869 = vmatprep.mubr.f32.mxu0 %v5792_v52  ;;  %v7574_v51 = vpack.c.bf16 %v5686_v21, %v5685_v27  ;;  %v5766_v32 = vld [vmem:[%s14227_s4 + $0x68] sm:$0xff] }
 0x873   : > { %6573 = vmatmul.mubr.f32.gmra.mrb[6].mxu1 %v5799_v61  ;;  %6870 = vmatmul.mubr.f32.gmra.mrb[4].mxu0 %v5791_v34  ;;  %v8925_v33 = vunpack.i.h.bf16 %v8923_v3  ;;  %v8924_v15 = vunpack.i.l.bf16 %v8923_v3 }
 0x874   : > { %v5663_v28 = vsel %vm5656_vm5, %v8914_v25, %v8919_v17  ;;  %v5664_v46 = vsel %vm5656_vm5, %v8915_v22, %v8920_v36  ;;  %7575 = vmatprep.subr.bf16.mxu0 %v7574_v51  ;;  %7664 = vmatprep.subr.bf16.mxu1 %v7574_v51  ;;  %v5687_v38 = vsel %vm5656_vm5, %v8919_v17, %v8914_v25 }
 0x875   : > { %v7580_v49 = vpack.c.bf16 %v5664_v46, %v5663_v28  ;;  %7577 = vmatpush1.bf16.msra.mxu0 %v7576_v47  ;;  %7676 = vmatpush1.bf16.msra.mxu1 %v7576_v47  ;;  %v8928_v8 = vpop.permute.xlu1 %8927  ;;  %v5688_v14 = vsel %vm5656_vm5, %v8920_v36, %v8915_v22 }
 0x876   : > { %v8930_v2 = vunpack.i.h.bf16 %v8928_v8  ;;  %v8929_v16 = vunpack.i.l.bf16 %v8928_v8  ;;  %v8933_v31 = vpop.permute.xlu0 %8932  ;;  %6578 = vmatprep.mubr.f32.mxu1 %v5814_v10  ;;  %6875 = vmatprep.mubr.f32.mxu0 %v5806_v50  ;;  %v7578_v56 = vpack.c.bf16 %v5688_v14, %v5687_v38 }
 0x877   : > { %6579 = vmatmul.mubr.f32.gmra.mrb[8].mxu1 %v5813_v63  ;;  %6876 = vmatmul.mubr.f32.gmra.mrb[6].mxu0 %v5805_v6  ;;  %v8935_v12 = vunpack.i.h.bf16 %v8933_v31  ;;  %v8934_v42 = vunpack.i.l.bf16 %v8933_v31 }
 0x878   : > { %v5665_v30 = vsel %vm5656_vm5, %v8924_v15, %v8929_v16  ;;  %v5666_v53 = vsel %vm5656_vm5, %v8925_v33, %v8930_v2  ;;  %7579 = vmatprep.subr.bf16.mxu0 %v7578_v56  ;;  %7665 = vmatprep.subr.bf16.mxu1 %v7578_v56  ;;  %v5689_v39 = vsel %vm5656_vm5, %v8929_v16, %v8924_v15 }
 0x879   : > { %v7584_v43 = vpack.c.bf16 %v5666_v53, %v5665_v30  ;;  %7581 = vmatpush1.bf16.msra.mxu0 %v7580_v49  ;;  %7677 = vmatpush1.bf16.msra.mxu1 %v7580_v49  ;;  %v8938_v35 = vpop.permute.xlu1 %8937  ;;  %v5690_v19 = vsel %vm5656_vm5, %v8930_v2, %v8925_v33 }
 0x87a   : > { %v8940_v48 = vunpack.i.h.bf16 %v8938_v35  ;;  %v8939_v20 = vunpack.i.l.bf16 %v8938_v35  ;;  %v8943_v11 = vpop.permute.xlu0 %8942  ;;  %6584 = vmatprep.mubr.f32.mxu1 %v5828_v62  ;;  %6881 = vmatprep.mubr.f32.mxu0 %v5820_v4  ;;  %v7582_v24 = vpack.c.bf16 %v5690_v19, %v5689_v39 }
 0x87b   : > { %6585 = vmatmul.mubr.f32.gmra.mrb[10].mxu1 %v5827_v60  ;;  %6882 = vmatmul.mubr.f32.gmra.mrb[8].mxu0 %v5819_v13  ;;  %v8945_v7 = vunpack.i.h.bf16 %v8943_v11  ;;  %v8944_v29 = vunpack.i.l.bf16 %v8943_v11 }
 0x87c   : > { %v5667_v37 = vsel %vm5656_vm5, %v8934_v42, %v8939_v20  ;;  %v5668_v59 = vsel %vm5656_vm5, %v8935_v12, %v8940_v48  ;;  %7583 = vmatprep.subr.bf16.mxu0 %v7582_v24  ;;  %7666 = vmatprep.subr.bf16.mxu1 %v7582_v24  ;;  %v5691_v41 = vsel %vm5656_vm5, %v8939_v20, %v8934_v42 }
 0x87d   : > { %v7588_v54 = vpack.c.bf16 %v5668_v59, %v5667_v37  ;;  %7585 = vmatpush1.bf16.msra.mxu0 %v7584_v43  ;;  %7678 = vmatpush1.bf16.msra.mxu1 %v7584_v43  ;;  %v8948_v1 = vpop.permute.xlu1 %8947  ;;  %v5692_v18 = vsel %vm5656_vm5, %v8940_v48, %v8935_v12 }
 0x87e   : > { %v8950_v26 = vunpack.i.h.bf16 %v8948_v1  ;;  %v8949_v9 = vunpack.i.l.bf16 %v8948_v1  ;;  %v8953_v55 = vpop.permute.xlu0 %8952  ;;  %6887 = vmatprep.mubr.f32.mxu0 %v5834_v57  ;;  %v7586_v23 = vpack.c.bf16 %v5692_v18, %v5691_v41  ;;  %7079 = vmatprep.mubr.msk.f32.mxu1 %vm6269_vm6, %v5808_v5 }
 0x87f   : > { %6888 = vmatmul.mubr.f32.gmra.mrb[10].mxu0 %v5833_v0  ;;  %v8955_v34 = vunpack.i.h.bf16 %v8953_v55  ;;  %v8954_v22 = vunpack.i.l.bf16 %v8953_v55 }
 0x880   : > { %v5669_v52 = vsel %vm5656_vm5, %v8944_v29, %v8949_v9  ;;  %v5670_v45 = vsel %vm5656_vm5, %v8945_v7, %v8950_v26  ;;  %7587 = vmatprep.subr.bf16.mxu0 %v7586_v23  ;;  %7667 = vmatprep.subr.bf16.mxu1 %v7586_v23  ;;  %v5693_v44 = vsel %vm5656_vm5, %v8949_v9, %v8944_v29 }
 0x881   : > { %v7592_v61 = vpack.c.bf16 %v5670_v45, %v5669_v52  ;;  %7589 = vmatpush1.bf16.msra.mxu0 %v7588_v54  ;;  %7679 = vmatpush1.bf16.msra.mxu1 %v7588_v54  ;;  %v8958_v27 = vpop.permute.xlu1 %8957  ;;  %v5694_v47 = vsel %vm5656_vm5, %v8950_v26, %v8945_v7 }
 0x882   : > { %v8960_v40 = vunpack.i.h.bf16 %v8958_v27  ;;  %v8959_v21 = vunpack.i.l.bf16 %v8958_v27  ;;  %v8963_v25 = vpop.permute.xlu0 %8962  ;;  %v7590_v36 = vpack.c.bf16 %v5694_v47, %v5693_v44  ;;  %7076 = vmatprep.mubr.msk.f32.mxu0 %vm6269_vm6, %v5766_v32  ;;  %v5765_v44 = vld [vmem:[%s14227_s4 + $0x60] sm:$0xff]  ;;  %v5779_v27 = vld [vmem:[%s14227_s4 + $0xd0] sm:$0xff] }
 0x883   : > { %v8965_v50 = vunpack.i.h.bf16 %v8963_v25  ;;  %v8964_v63 = vunpack.i.l.bf16 %v8963_v25  ;;  %v5821_v47 = vld [vmem:[%s14227_s4 + $0x220] sm:$0xff]  ;;  %v5835_v25 = vld [vmem:[%s14227_s4 + $0x290] sm:$0xff] }
 0x884   : > { %v5671_v17 = vsel %vm5656_vm5, %v8954_v22, %v8959_v21  ;;  %v5672_v3 = vsel %vm5656_vm5, %v8955_v34, %v8960_v40  ;;  %7591 = vmatprep.subr.bf16.mxu0 %v7590_v36  ;;  %7668 = vmatprep.subr.bf16.mxu1 %v7590_v36  ;;  %v5695_v51 = vsel %vm5656_vm5, %v8959_v21, %v8954_v22  ;;  %v5794_v22 = vld [vmem:[%s14227_s4 + $0x148] sm:$0xff]  ;;  %v5793_v21 = vld [vmem:[%s14227_s4 + $0x140] sm:$0xff] }
 0x885   : > { %v7596_v10 = vpack.c.bf16 %v5672_v3, %v5671_v17  ;;  %7593 = vmatpush1.bf16.msra.mxu0 %v7592_v61  ;;  %7680 = vmatpush1.bf16.msra.mxu1 %v7592_v61  ;;  %v8968_v28 = vpop.permute.xlu1 %8967  ;;  %v5696_v46 = vsel %vm5656_vm5, %v8960_v40, %v8955_v34  ;;  %v5807_v61 = vld [vmem:[%s14227_s4 + $0x1b0] sm:$0xff]  ;;  %v5780_v34 = vld [vmem:[%s14227_s4 + $0xd8] sm:$0xff] }
 0x886   : > { %v8970_v6 = vunpack.i.h.bf16 %v8968_v28  ;;  %v8969_v38 = vunpack.i.l.bf16 %v8968_v28  ;;  %v8973_v49 = vpop.permute.xlu0 %8972  ;;  %v7594_v33 = vpack.c.bf16 %v5696_v46, %v5695_v51  ;;  %v5836_v40 = vld [vmem:[%s14227_s4 + $0x298] sm:$0xff] }
 0x887   : > { %v8975_v16 = vunpack.i.h.bf16 %v8973_v49  ;;  %v8974_v62 = vunpack.i.l.bf16 %v8973_v49 }
 0x888   : > { %v5673_v8 = vsel %vm5656_vm5, %v8964_v63, %v8969_v38  ;;  %v5674_v14 = vsel %vm5656_vm5, %v8965_v50, %v8970_v6  ;;  %7595 = vmatprep.subr.bf16.mxu0 %v7594_v33  ;;  %7669 = vmatprep.subr.bf16.mxu1 %v7594_v33  ;;  %v5697_v15 = vsel %vm5656_vm5, %v8969_v38, %v8964_v63 }
 0x889   : > { %v7600_v2 = vpack.c.bf16 %v5674_v14, %v5673_v8  ;;  %7597 = vmatpush1.bf16.msra.mxu0 %v7596_v10  ;;  %7681 = vmatpush1.bf16.msra.mxu1 %v7596_v10  ;;  %v8978_v31 = vpop.permute.xlu1 %8977  ;;  %v5698_v56 = vsel %vm5656_vm5, %v8970_v6, %v8965_v50 }
 0x88a   : > { %v8980_v4 = vunpack.i.h.bf16 %v8978_v31  ;;  %v8979_v30 = vunpack.i.l.bf16 %v8978_v31  ;;  %v8983_v53 = vpop.permute.xlu0 %8982  ;;  %v7598_v60 = vpack.c.bf16 %v5698_v56, %v5697_v15 }
 0x88b   : > { %v8985_v35 = vunpack.i.h.bf16 %v8983_v53  ;;  %v8984_v48 = vunpack.i.l.bf16 %v8983_v53 }
 0x88c   : > { %v5675_v13 = vsel %vm5656_vm5, %v8974_v62, %v8979_v30  ;;  %v5676_v39 = vsel %vm5656_vm5, %v8975_v16, %v8980_v4  ;;  %7599 = vmatprep.subr.bf16.mxu0 %v7598_v60  ;;  %7670 = vmatprep.subr.bf16.mxu1 %v7598_v60  ;;  %v5699_v43 = vsel %vm5656_vm5, %v8979_v30, %v8974_v62 }
 0x88d   : > { %v7604_v12 = vpack.c.bf16 %v5676_v39, %v5675_v13  ;;  %7601 = vmatpush1.bf16.msra.mxu0 %v7600_v2  ;;  %7682 = vmatpush1.bf16.msra.mxu1 %v7600_v2  ;;  %v8988_v19 = vpop.permute.xlu1 %8987  ;;  %v5700_v42 = vsel %vm5656_vm5, %v8980_v4, %v8975_v16 }
 0x88e   : > { %v8990_v20 = vunpack.i.h.bf16 %v8988_v19  ;;  %v8989_v11 = vunpack.i.l.bf16 %v8988_v19  ;;  %v8993_v24 = vpop.permute.xlu0 %8992  ;;  %v7602_v57 = vpack.c.bf16 %v5700_v42, %v5699_v43 }
 0x88f   : > { %v8995_v41 = vunpack.i.h.bf16 %v8993_v24  ;;  %v8994_v1 = vunpack.i.l.bf16 %v8993_v24 }
 0x890   : > { %v5677_v5 = vsel %vm5656_vm5, %v8984_v48, %v8989_v11  ;;  %v5678_v37 = vsel %vm5656_vm5, %v8985_v35, %v8990_v20  ;;  %7603 = vmatprep.subr.bf16.mxu0 %v7602_v57  ;;  %7671 = vmatprep.subr.bf16.mxu1 %v7602_v57  ;;  %v5701_v59 = vsel %vm5656_vm5, %v8989_v11, %v8984_v48 }
 0x891   : > { %v7608_v0 = vpack.c.bf16 %v5678_v37, %v5677_v5  ;;  %7605 = vmatpush1.bf16.msra.mxu0 %v7604_v12  ;;  %7683 = vmatpush1.bf16.msra.mxu1 %v7604_v12  ;;  %v8998_v54 = vpop.permute.xlu1 %8997  ;;  %v5702_v7 = vsel %vm5656_vm5, %v8990_v20, %v8985_v35 }
 0x892   : > { %v9000_v18 = vunpack.i.h.bf16 %v8998_v54  ;;  %v8999_v29 = vunpack.i.l.bf16 %v8998_v54  ;;  %v7606_v26 = vpack.c.bf16 %v5702_v7, %v5701_v59 }
 0x894   : > { %v5679_v9 = vsel %vm5656_vm5, %v8994_v1, %v8999_v29  ;;  %v5680_v55 = vsel %vm5656_vm5, %v8995_v41, %v9000_v18  ;;  %7607 = vmatprep.subr.bf16.mxu0 %v7606_v26  ;;  %7672 = vmatprep.subr.bf16.mxu1 %v7606_v26  ;;  %v5703_v23 = vsel %vm5656_vm5, %v8999_v29, %v8994_v1 }
 0x895   : > { %v7612_v32 = vpack.c.bf16 %v5680_v55, %v5679_v9  ;;  %7609 = vmatpush1.bf16.msra.mxu0 %v7608_v0  ;;  %7684 = vmatpush1.bf16.msra.mxu1 %v7608_v0  ;;  %v5704_v52 = vsel %vm5656_vm5, %v9000_v18, %v8995_v41 }
 0x896   : > { %v7610_v45 = vpack.c.bf16 %v5704_v52, %v5703_v23 }
 0x898   : > { %7611 = vmatprep.subr.bf16.mxu0 %v7610_v45  ;;  %7673 = vmatprep.subr.bf16.mxu1 %v7610_v45 }
 0x899   : > { %7613 = vmatpush1.bf16.msra.mxu0 %v7612_v32  ;;  %7685 = vmatpush1.bf16.msra.mxu1 %v7612_v32 }
 0x89c   : > { %6959 = vmatmul.mubr.f32.vlgmr.msra.gmra.mrb[0].mxu0 %v5765_v44  ;;  %6977 = vmatmul.mubr.f32.vlgmr.msra.gmra.mrb[12].mxu1 %v5807_v61 }
 0x89d   : > { %7077 = vmatprep.mubr.msk.f32.mxu0 %vm6269_vm6, %v5780_v34  ;;  %7080 = vmatprep.mubr.msk.f32.mxu1 %vm6269_vm6, %v5822_v58 }
 0x8a0   : > { %6965 = vmatmul.mubr.f32.gmra.mrb[2].mxu0 %v5779_v27  ;;  %6983 = vmatmul.mubr.f32.gmra.mrb[14].mxu1 %v5821_v47 }
 0x8a1   : > { %7078 = vmatprep.mubr.msk.f32.mxu0 %vm6269_vm6, %v5794_v22  ;;  %7081 = vmatprep.mubr.msk.f32.mxu1 %vm6269_vm6, %v5836_v40 }
 0x8a4   : > { %6971 = vmatmul.mubr.f32.gmra.mrb[4].mxu0 %v5793_v21  ;;  %6989 = vmatmul.mubr.f32.gmra.mrb[16].mxu1 %v5835_v25 }
 0x93a   : > { %v6556_v36 = vpop.f32.mrb[0].mxu1 }
 0x93b   : > { %v6558_v17 = vpop.f32.mrb[1].mxu1 }
 0x93e   : > { %v6562_v3 = vpop.f32.mrb[2].mxu1 }
 0x93f   : > { %v6564_v51 = vpop.f32.mrb[3].mxu1 }
 0x942   : > { %v6568_v10 = vpop.f32.mrb[4].mxu1 }
 0x943   : > { %v6570_v50 = vpop.f32.mrb[5].mxu1 }
 0x946   : > { %v6574_v28 = vpop.f32.mrb[6].mxu1 }
 0x947   : > { %v6576_v46 = vpop.f32.mrb[7].mxu1 }
 0x94a   : > { %v6580_v63 = vpop.f32.mrb[8].mxu1  ;;  %v6877_v6 = vpop.f32.mrb[6].mxu0 }
 0x94b   : > { %v7692_v38 = vadd.f32 %v6877_v6, %v6574_v28  ;;  %v6582_v49 = vpop.f32.mrb[9].mxu1  ;;  %v6879_v33 = vpop.f32.mrb[7].mxu0 }
 0x94c   : > { %v7694_v8 = vadd.f32 %v6879_v33, %v6576_v46 }
 0x94e   : > { %v6586_v14 = vpop.f32.mrb[10].mxu1  ;;  %v6883_v15 = vpop.f32.mrb[8].mxu0 }
 0x94f   : > { %v7696_v2 = vadd.f32 %v6883_v15, %v6580_v63  ;;  %v6588_v16 = vpop.f32.mrb[11].mxu1  ;;  %v6885_v31 = vpop.f32.mrb[9].mxu0 }
 0x950   : > { %v7698_v56 = vadd.f32 %v6885_v31, %v6582_v49 }
 0x952   : > { %v6889_v62 = vpop.f32.mrb[10].mxu0 }
 0x953   : > { %v7700_v4 = vadd.f32 %v6889_v62, %v6586_v14  ;;  %v6891_v30 = vpop.f32.mrb[11].mxu0 }
 0x954   : > { %v7702_v53 = vadd.f32 %v6891_v30, %v6588_v16 }
 0x96f   : > { %v6960_v60 = vpop.f32.mrb[0].mxu0  ;;  %v6978_v13 = vpop.f32.mrb[12].mxu1 }
 0x970   : > { %v7686_v39 = vadd.f32 %v6960_v60, %v6556_v36  ;;  %v7693_v43 = vadd.f32 %v7692_v38, %v6978_v13  ;;  %v6962_v12 = vpop.f32.mrb[1].mxu0  ;;  %v6980_v35 = vpop.f32.mrb[13].mxu1 }
 0x971   : > { %v7687_v19 = vadd.f32 %v6962_v12, %v6558_v17  ;;  %v7695_v42 = vadd.f32 %v7694_v8, %v6980_v35 }
 0x972   : > { %6995 = vst [vmem:[%s14228_s5] sm:$0xff] %v7686_v39  ;;  %7001 = vst [vmem:[%s14228_s5 + $0x30] sm:$0xff] %v7693_v43 }
 0x973   : > { %6996 = vst [vmem:[%s14228_s5 + $0x8] sm:$0xff] %v7687_v19  ;;  %7002 = vst [vmem:[%s14228_s5 + $0x38] sm:$0xff] %v7695_v42  ;;  %v6966_v48 = vpop.f32.mrb[2].mxu0  ;;  %v6984_v20 = vpop.f32.mrb[14].mxu1 }
 0x974   : > { %v7688_v11 = vadd.f32 %v6966_v48, %v6562_v3  ;;  %v7697_v24 = vadd.f32 %v7696_v2, %v6984_v20  ;;  %v6968_v57 = vpop.f32.mrb[3].mxu0  ;;  %v6986_v5 = vpop.f32.mrb[15].mxu1 }
 0x975   : > { %v7689_v37 = vadd.f32 %v6968_v57, %v6564_v51  ;;  %v7699_v59 = vadd.f32 %v7698_v56, %v6986_v5 }
 0x976   : > { %6997 = vst [vmem:[%s14228_s5 + $0x10] sm:$0xff] %v7688_v11  ;;  %7003 = vst [vmem:[%s14228_s5 + $0x40] sm:$0xff] %v7697_v24 }
 0x977   : > { %6998 = vst [vmem:[%s14228_s5 + $0x18] sm:$0xff] %v7689_v37  ;;  %7004 = vst [vmem:[%s14228_s5 + $0x48] sm:$0xff] %v7699_v59  ;;  %v6972_v0 = vpop.f32.mrb[4].mxu0  ;;  %v6990_v41 = vpop.f32.mrb[16].mxu1 }
 0x978   : > { %v7690_v54 = vadd.f32 %v6972_v0, %v6568_v10  ;;  %v7701_v7 = vadd.f32 %v7700_v4, %v6990_v41  ;;  %v6974_v1 = vpop.f32.mrb[5].mxu0  ;;  %v6992_v18 = vpop.f32.mrb[17].mxu1 }
 0x979   : > { %v7691_v29 = vadd.f32 %v6974_v1, %v6570_v50  ;;  %v7703_v26 = vadd.f32 %v7702_v53, %v6992_v18 }
 0x97a   : > { %6999 = vst [vmem:[%s14228_s5 + $0x20] sm:$0xff] %v7690_v54  ;;  %7005 = vst [vmem:[%s14228_s5 + $0x50] sm:$0xff] %v7701_v7 }
 0x97b   : > { %7000 = vst [vmem:[%s14228_s5 + $0x28] sm:$0xff] %v7691_v29  ;;  %7006 = vst [vmem:[%s14228_s5 + $0x58] sm:$0xff] %v7703_v26 }
 0x97c PF: > { %p12_p12 = scmp.ge.s32.totalorder %s9184_s22, 5   ;;  %s14503_s18 = smov %s9115_s19 }
 0x97d   : > { %s14504_s19 = smov %s9193_s25  ;;  %s14505_s20 = smov %s9184_s22 }
 0x97e   :  { %14 = sbr.rel (!%p12_p12) target bundleno = 2 (0x2), region = 112 }

</bundles_post_ra>
